<compile_context>
chip_gen: v7x
topology: tpu7x:2x2x1
jax: 0.10.0
libtpu: 0.0.40
codegen_flags: <defaults>
</compile_context>

<pallas_src>
import numpy as np
import jax
import jax.numpy as jnp
from jax.experimental import pallas as pl
from jax.experimental.pallas import tpu as pltpu

_VMEM_LIMIT = 32 * 1024 * 1024   # <= physical VMEM on v5e/v6e/v7x
_ROW_BLOCK = 8                   # M-tile (rows): keeps f32 accumulators in vregs


# ----------------------------------------------------------------------------
# Kernel 1: fused branch3x3dbl head (1x1 conv + BN + ReLU, 3x3 pad=1 conv + BN + ReLU)
# ----------------------------------------------------------------------------
def _dbl_head_kernel(x_ref, wd1_ref, sd1_ref, bd1_ref,
                     wd2_ref, sd2_ref, bd2_ref, o_ref, d1p_ref):
    """x_ref: (1,H,W,Cin) bf16   wd1_ref: (Cin,64) bf16   wd2_ref: (3,3,64,96) bf16
    s*/b*: (1,Cout) f32          o_ref: (1,H,W,96) bf16
    d1p_ref: (H+2,W+2,64) bf16 VMEM scratch (zero-padded intermediate)."""
    _, H, W, Cin = x_ref.shape
    C1 = wd1_ref.shape[1]
    C2 = wd2_ref.shape[3]

    # Zero only the 1-px border of the scratch; the interior is fully
    # overwritten below.  Column borders are written as 8-wide (sublane
    # aligned) stores whose interior part is overwritten right after.
    cb = min(8, W + 2)
    zc = jnp.zeros((H + 2, cb, C1), d1p_ref.dtype)
    d1p_ref[:, pl.ds(0, cb), :] = zc
    d1p_ref[:, pl.ds(W + 2 - cb, cb), :] = zc
    zr = jnp.zeros((1, W + 2, C1), d1p_ref.dtype)
    d1p_ref[pl.ds(0, 1)] = zr
    d1p_ref[pl.ds(H + 1, 1)] = zr

    # 1x1 conv + folded BN + ReLU: one flat (H*W, Cin) x (Cin, 64) MXU matmul.
    x = x_ref[0].reshape(H * W, Cin)
    d1 = jnp.dot(x, wd1_ref[...], preferred_element_type=jnp.float32)
    d1 = jnp.maximum(d1 * sd1_ref[...] + bd1_ref[...], 0.0)
    # Single f32->bf16 cast while staging into the padded scratch (halves the
    # 9-tap read bandwidth below; no per-tap casts).
    d1p_ref[pl.ds(1, H), pl.ds(1, W), :] = d1.reshape(H, W, C1).astype(d1p_ref.dtype)

    # 3x3 / pad=1 conv + folded BN + ReLU: 9 tap-wise flat MXU matmuls,
    # M-tiled by rows; accumulator initialised from the first tap.
    for r0 in range(0, H, _ROW_BLOCK):
        rb = min(_ROW_BLOCK, H - r0)
        acc = None
        for ky in range(3):
            for kx in range(3):
                patch = d1p_ref[pl.ds(r0 + ky, rb), pl.ds(kx, W), :]
                patch = patch.reshape(rb * W, C1)
                t = jnp.dot(patch, wd2_ref[ky, kx],
                            preferred_element_type=jnp.float32)
                acc = t if acc is None else acc + t
        d2 = jnp.maximum(acc * sd2_ref[...] + bd2_ref[...], 0.0)
        o_ref[0, pl.ds(r0, rb), :, :] = d2.reshape(rb, W, C2).astype(o_ref.dtype)


# ----------------------------------------------------------------------------
# Kernel 2: fused stride-2 convs + 3x3/s2 max pool, concatenated output
# ----------------------------------------------------------------------------
def _reduce_concat_kernel(x2p_ref, w3_ref, s3_ref, b3_ref,
                          d2p_ref, wd3_ref, sd3_ref, bd3_ref, o_ref):
    """x2p_ref: (1,4,H2+1,W2+1,Cin) bf16  s2d(2)-grouped input, end-padded by 1
    w3_ref:  (3,3,Cin,384) bf16           d2p_ref: (1,4,H2+1,W2+1,96) bf16
    wd3_ref: (3,3,96,96) bf16             s*/b*: (1,Cout) f32
    o_ref:   (1,Ho,Wo,384+96+Cin) f32 with Ho = H2-1, Wo = W2-1."""
    _, Ho, Wo, _ = o_ref.shape
    H2 = x2p_ref.shape[2] - 1
    W2 = x2p_ref.shape[3] - 1
    Cin = x2p_ref.shape[4]
    C3 = w3_ref.shape[3]
    Cd = wd3_ref.shape[3]

    def s2_conv_bn_relu(src_ref, w_ref, s_ref, b_ref, r0, rb):
        # Stride-2 VALID 3x3 conv via the 9 valid taps of the s2d layout,
        # restricted to s2d-domain rows [r0, r0+rb).
        cin = src_ref.shape[4]
        cout = w_ref.shape[3]
        acc = None
        for ky in range(3):
            a, dy = divmod(ky, 2)
            for kx in range(3):
                b, dx = divmod(kx, 2)
                g = 2 * dy + dx
                patch = src_ref[0, g, pl.ds(r0 + a, rb), pl.ds(b, W2), :]
                patch = patch.reshape(rb * W2, cin)
                t = jnp.dot(patch, w_ref[ky, kx],
                            preferred_element_type=jnp.float32)
                acc = t if acc is None else acc + t
        y = jnp.maximum(acc * s_ref[...] + b_ref[...], 0.0)
        return y.reshape(rb, W2, cout)

    def s2_max_pool(src_ref, r0, rb):
        pool = None
        for ky in range(3):
            a, dy = divmod(ky, 2)
            for kx in range(3):
                b, dx = divmod(kx, 2)
                g = 2 * dy + dx
                cand = src_ref[0, g, pl.ds(r0 + a, rb), pl.ds(b, W2), :]
                pool = cand if pool is None else jnp.maximum(pool, cand)
        return pool

    # M-tiled over the s2d domain rows; end-padded / extra rows+cols only feed
    # output positions >= Ho / >= Wo, which are sliced away before storing.
    for r0 in range(0, H2, _ROW_BLOCK):
        rb = min(_ROW_BLOCK, H2 - r0)
        vr = min(r0 + rb, Ho) - r0          # valid output rows in this block
        if vr <= 0:
            continue

        # branch3x3: 3x3/s2 conv -> 384, stored at lane offset 0 (3x128 wide).
        y3 = s2_conv_bn_relu(x2p_ref, w3_ref, s3_ref, b3_ref, r0, rb)
        o_ref[0, pl.ds(r0, vr), :, pl.ds(0, C3)] = (
            y3[:vr, :Wo, :].astype(o_ref.dtype))

        # branch3x3dbl tail (3x3/s2 -> 96) + branch_pool (3x3/s2 max pool),
        # concatenated in-register and written with one lane store at channel
        # offset 384 (= 3x128, lane-aligned start).
        yd = s2_conv_bn_relu(d2p_ref, wd3_ref, sd3_ref, bd3_ref, r0, rb)
        pool = s2_max_pool(x2p_ref, r0, rb).astype(jnp.float32)
        tail = jnp.concatenate([yd, pool], axis=-1)
        o_ref[0, pl.ds(r0, vr), :, pl.ds(C3, Cd + Cin)] = (
            tail[:vr, :Wo, :].astype(o_ref.dtype))


# ----------------------------------------------------------------------------
# pallas_call wrappers
# ----------------------------------------------------------------------------
def dbl_head(x, wd1, sd1, bd1, wd2, sd2, bd2):
    """x: (N,H,W,Cin) NHWC -> (N,H,W,96) bf16 (1x1->64 then 3x3 pad=1 ->96)."""
    N, H, W, Cin = x.shape
    C1 = wd1.shape[-1]
    C2 = wd2.shape[-1]
    return pl.pallas_call(
        _dbl_head_kernel,
        out_shape=jax.ShapeDtypeStruct((N, H, W, C2), jnp.bfloat16),
        grid=(N,),
        in_specs=[
            pl.BlockSpec((1, H, W, Cin), lambda n: (n, 0, 0, 0)),
            pl.BlockSpec((Cin, C1), lambda n: (0, 0)),
            pl.BlockSpec((1, C1), lambda n: (0, 0)),
            pl.BlockSpec((1, C1), lambda n: (0, 0)),
            pl.BlockSpec((3, 3, C1, C2), lambda n: (0, 0, 0, 0)),
            pl.BlockSpec((1, C2), lambda n: (0, 0)),
            pl.BlockSpec((1, C2), lambda n: (0, 0)),
        ],
        out_specs=pl.BlockSpec((1, H, W, C2), lambda n: (n, 0, 0, 0)),
        scratch_shapes=[pltpu.VMEM((H + 2, W + 2, C1), jnp.bfloat16)],
        compiler_params=pltpu.CompilerParams(
            dimension_semantics=("parallel",),
            vmem_limit_bytes=_VMEM_LIMIT),
    )(x.astype(jnp.bfloat16),
      wd1.reshape(Cin, C1).astype(jnp.bfloat16),
      sd1.reshape(1, C1).astype(jnp.float32),
      bd1.reshape(1, C1).astype(jnp.float32),
      wd2.astype(jnp.bfloat16),
      sd2.reshape(1, C2).astype(jnp.float32),
      bd2.reshape(1, C2).astype(jnp.float32))


def reduce_concat(x2p, w3, s3, b3, d2p, wd3, sd3, bd3):
    """Fused stride-2 convs + max pool; output (N, Ho, Wo, 384+96+Cin) f32."""
    N, _, H2p, W2p, Cin = x2p.shape
    C3 = w3.shape[-1]
    Cdin = d2p.shape[-1]
    Cd = wd3.shape[-1]
    Ho, Wo = H2p - 2, W2p - 2
    Ctot = C3 + Cd + Cin
    return pl.pallas_call(
        _reduce_concat_kernel,
        out_shape=jax.ShapeDtypeStruct((N, Ho, Wo, Ctot), jnp.float32),
        grid=(N,),
        in_specs=[
            pl.BlockSpec((1, 4, H2p, W2p, Cin), lambda n: (n, 0, 0, 0, 0)),
            pl.BlockSpec((3, 3, Cin, C3), lambda n: (0, 0, 0, 0)),
            pl.BlockSpec((1, C3), lambda n: (0, 0)),
            pl.BlockSpec((1, C3), lambda n: (0, 0)),
            pl.BlockSpec((1, 4, H2p, W2p, Cdin), lambda n: (n, 0, 0, 0, 0)),
            pl.BlockSpec((3, 3, Cdin, Cd), lambda n: (0, 0, 0, 0)),
            pl.BlockSpec((1, Cd), lambda n: (0, 0)),
            pl.BlockSpec((1, Cd), lambda n: (0, 0)),
        ],
        out_specs=pl.BlockSpec((1, Ho, Wo, Ctot), lambda n: (n, 0, 0, 0)),
        compiler_params=pltpu.CompilerParams(
            dimension_semantics=("parallel",),
            vmem_limit_bytes=_VMEM_LIMIT),
    )(x2p.astype(jnp.bfloat16),
      w3.astype(jnp.bfloat16),
      s3.reshape(1, C3).astype(jnp.float32),
      b3.reshape(1, C3).astype(jnp.float32),
      d2p.astype(jnp.bfloat16),
      wd3.astype(jnp.bfloat16),
      sd3.reshape(1, Cd).astype(jnp.float32),
      bd3.reshape(1, Cd).astype(jnp.float32))


# ----------------------------------------------------------------------------
# Plain-JAX glue: layout transforms + parameter setup
# ----------------------------------------------------------------------------
def space_to_depth2_grouped(x):
    """(N,H,W,C) -> (N, 4, H/2+1, W/2+1, C); group g = 2*dy+dx on its own axis
    (no unaligned lane slicing in-kernel), spatial axes end-padded by 1 so the
    stride-2 tap shifts never read out of bounds (pad only feeds discarded
    rows/cols).  Dtype is preserved (bf16 in -> bf16 out)."""
    N, H, W, C = x.shape
    assert H % 2 == 0 and W % 2 == 0
    H2, W2 = H // 2, W // 2
    x = x.reshape(N, H2, 2, W2, 2, C)
    x = x.transpose(0, 2, 4, 1, 3, 5).reshape(N, 4, H2, W2, C)
    return jnp.pad(x, ((0, 0), (0, 0), (0, 1), (0, 1), (0, 0)))


def fold_bn(gamma, beta, mean, var, eps=1e-3):
    scale = gamma / jnp.sqrt(var + eps)
    return scale, beta - mean * scale


def init_params(key, in_channels):
    def conv_w(k, ksz, cin, cout):
        return 0.05 * jax.random.normal(k, (ksz, ksz, cin, cout), jnp.float32)

    def bn(k, c):
        k1, k2, k3, k4 = jax.random.split(k, 4)
        gamma = jax.random.uniform(k1, (c,), jnp.float32, 0.5, 1.5)
        beta = 0.1 * jax.random.normal(k2, (c,), jnp.float32)
        mean = 0.1 * jax.random.normal(k3, (c,), jnp.float32)
        var = jax.random.uniform(k4, (c,), jnp.float32, 0.5, 1.5)
        return fold_bn(gamma, beta, mean, var)

    keys = jax.random.split(key, 8)
    p = {}
    p['w_3x3'] = conv_w(keys[0], 3, in_channels, 384)
    p['s_3x3'], p['b_3x3'] = bn(keys[1], 384)
    p['w_d1'] = conv_w(keys[2], 1, in_channels, 64)
    p['s_d1'], p['b_d1'] = bn(keys[3], 64)
    p['w_d2'] = conv_w(keys[4], 3, 64, 96)
    p['s_d2'], p['b_d2'] = bn(keys[5], 96)
    p['w_d3'] = conv_w(keys[6], 3, 96, 96)
    p['s_d3'], p['b_d3'] = bn(keys[7], 96)
    return p


# ----------------------------------------------------------------------------
# InceptionB forward
# ----------------------------------------------------------------------------
def inception_b_forward(x_nchw, p):
    x = jnp.transpose(x_nchw, (0, 2, 3, 1)).astype(jnp.bfloat16)   # NHWC bf16
    # TODO(synk): fold this XLA space-to-depth pass into kernel 2 (strided DMA)
    #             to remove a full read+write of x in HBM.
    x2p = space_to_depth2_grouped(x)

    # branch3x3dbl head: 1x1 -> 64, 3x3 pad=1 -> 96 (one fused kernel, bf16 out)
    d2 = dbl_head(x, p['w_d1'], p['s_d1'], p['b_d1'],
                  p['w_d2'], p['s_d2'], p['b_d2'])
    # TODO(synk): fuse the two kernels so this 96-ch intermediate never
    #             round-trips HBM (it fits in VMEM as bf16 scratch).
    d2p = space_to_depth2_grouped(d2)

    # branch3x3 (3x3/s2 -> 384) + dbl tail (3x3/s2 -> 96) + max-pool, fused,
    # written directly into the concatenated channel layout.
    out = reduce_concat(x2p, p['w_3x3'], p['s_3x3'], p['b_3x3'],
                        d2p, p['w_d3'], p['s_d3'], p['b_d3'])
    return jnp.transpose(out, (0, 3, 1, 2))                       # back to NCHW


# ----------------------------------------------------------------------------
# Pure-JAX reference
# ----------------------------------------------------------------------------
def _ref_conv(x, w, scale, bias, stride, pad):
    y = jax.lax.conv_general_dilated(
        x, w, (stride, stride), [(pad, pad), (pad, pad)],
        dimension_numbers=('NHWC', 'HWIO', 'NHWC'),
        precision=jax.lax.Precision.HIGHEST)
    return jnp.maximum(y * scale + bias, 0.0)


def inception_b_ref(x_nchw, p):
    x = jnp.transpose(x_nchw, (0, 2, 3, 1)).astype(jnp.float32)
    b3 = _ref_conv(x, p['w_3x3'], p['s_3x3'], p['b_3x3'], 2, 0)
    d = _ref_conv(x, p['w_d1'], p['s_d1'], p['b_d1'], 1, 0)
    d = _ref_conv(d, p['w_d2'], p['s_d2'], p['b_d2'], 1, 1)
    d = _ref_conv(d, p['w_d3'], p['s_d3'], p['b_d3'], 2, 0)
    bp = jax.lax.reduce_window(x, -jnp.inf, jax.lax.max,
                               (1, 3, 3, 1), (1, 2, 2, 1), 'VALID')
    out = jnp.concatenate([b3, d, bp], axis=-1)
    return jnp.transpose(out, (0, 3, 1, 2))


# ----------------------------------------------------------------------------
if __name__ == "__main__":
    key = jax.random.PRNGKey(0)
    k_x, k_p = jax.random.split(key)

    N, C, H, W = 2, 4, 16, 16                       # small NCHW input
    x = jax.random.normal(k_x, (N, C, H, W), jnp.float32)
    params = init_params(k_p, C)

    out = jax.jit(inception_b_forward)(x, params)
    out = jax.block_until_ready(out)

    assert out.shape == (N, 384 + 96 + C, 7, 7), out.shape
    ref = inception_b_ref(x, params)
    # bf16 MXU operands / bf16 activations, f32 accumulation/BN/ReLU.
    np.testing.assert_allclose(np.asarray(out), np.asarray(ref),
                               rtol=2e-2, atol=2e-2)

    print("KERNEL_OK")
</pallas_src>

<mosaic_0001>
module attributes {stable_mosaic.version = 11 : i64} {
  func.func @_dbl_head_kernel(%arg0: i32, %arg1: memref<1x16x16x4xbf16, #tpu.memory_space<vmem>>, %arg2: memref<4x64xbf16, #tpu.memory_space<vmem>>, %arg3: memref<1x64xf32, #tpu.memory_space<vmem>>, %arg4: memref<1x64xf32, #tpu.memory_space<vmem>>, %arg5: memref<3x3x64x96xbf16, #tpu.memory_space<vmem>>, %arg6: memref<1x96xf32, #tpu.memory_space<vmem>>, %arg7: memref<1x96xf32, #tpu.memory_space<vmem>>, %arg8: memref<1x16x16x96xbf16, #tpu.memory_space<vmem>>, %arg9: memref<18x18x64xbf16, #tpu.memory_space<vmem>>) attributes {dimension_semantics = [#tpu.dimension_semantics<parallel>], iteration_bounds = array<i64: 2>, scalar_prefetch = 0 : i64, scratch_operands = 1 : i64, tpu.core_type = #tpu.core_type<tc>, window_params = [{transform_indices = @transform_0, window_bounds = array<i64: 1, 16, 16, 4>}, {pipeline_mode = #tpu.pipeline_mode<synchronous>, transform_indices = @transform_1, window_bounds = array<i64: 4, 64>}, {pipeline_mode = #tpu.pipeline_mode<synchronous>, transform_indices = @transform_2, window_bounds = array<i64: 1, 64>}, {pipeline_mode = #tpu.pipeline_mode<synchronous>, transform_indices = @transform_3, window_bounds = array<i64: 1, 64>}, {pipeline_mode = #tpu.pipeline_mode<synchronous>, transform_indices = @transform_4, window_bounds = array<i64: 3, 3, 64, 96>}, {pipeline_mode = #tpu.pipeline_mode<synchronous>, transform_indices = @transform_5, window_bounds = array<i64: 1, 96>}, {pipeline_mode = #tpu.pipeline_mode<synchronous>, transform_indices = @transform_6, window_bounds = array<i64: 1, 96>}, {transform_indices = @transform_7, window_bounds = array<i64: 1, 16, 16, 96>}]} {
    %cst = arith.constant 0.000000e+00 : bf16
    %0 = vector.broadcast %cst : bf16 to vector<18x8x64xbf16>
    %c0 = arith.constant 0 : index
    %c0_0 = arith.constant 0 : index
    %c0_1 = arith.constant 0 : index
    %1 = vector.load %arg9[%c0, %c0_0, %c0_1] : memref<18x18x64xbf16, #tpu.memory_space<vmem>>, vector<18x8x64xbf16>
    tpu.vector_store %arg9[%c0, %c0_0, %c0_1], %0 {strides = array<i32>} : memref<18x18x64xbf16, #tpu.memory_space<vmem>>, vector<18x8x64xbf16>,
    %c0_2 = arith.constant 0 : index
    %c10 = arith.constant 10 : index
    %c0_3 = arith.constant 0 : index
    %2 = vector.load %arg9[%c0_2, %c10, %c0_3] : memref<18x18x64xbf16, #tpu.memory_space<vmem>>, vector<18x8x64xbf16>
    tpu.vector_store %arg9[%c0_2, %c10, %c0_3], %0 {strides = array<i32>} : memref<18x18x64xbf16, #tpu.memory_space<vmem>>, vector<18x8x64xbf16>,
    %cst_4 = arith.constant 0.000000e+00 : bf16
    %3 = vector.broadcast %cst_4 : bf16 to vector<1x18x64xbf16>
    %c0_5 = arith.constant 0 : index
    %c0_6 = arith.constant 0 : index
    %c0_7 = arith.constant 0 : index
    %4 = vector.load %arg9[%c0_5, %c0_6, %c0_7] : memref<18x18x64xbf16, #tpu.memory_space<vmem>>, vector<1x18x64xbf16>
    tpu.vector_store %arg9[%c0_5, %c0_6, %c0_7], %3 {strides = array<i32>} : memref<18x18x64xbf16, #tpu.memory_space<vmem>>, vector<1x18x64xbf16>,
    %c17 = arith.constant 17 : index
    %c0_8 = arith.constant 0 : index
    %c0_9 = arith.constant 0 : index
    %5 = vector.load %arg9[%c17, %c0_8, %c0_9] : memref<18x18x64xbf16, #tpu.memory_space<vmem>>, vector<1x18x64xbf16>
    tpu.vector_store %arg9[%c17, %c0_8, %c0_9], %3 {strides = array<i32>} : memref<18x18x64xbf16, #tpu.memory_space<vmem>>, vector<1x18x64xbf16>,
    %c0_10 = arith.constant 0 : index
    %c0_11 = arith.constant 0 : index
    %c0_12 = arith.constant 0 : index
    %c0_13 = arith.constant 0 : index
    %6 = vector.load %arg1[%c0_10, %c0_11, %c0_12, %c0_13] : memref<1x16x16x4xbf16, #tpu.memory_space<vmem>>, vector<1x16x16x4xbf16>
    %7 = vector.shape_cast %6 : vector<1x16x16x4xbf16> to vector<16x16x4xbf16>
    %8 = vector.shape_cast %7 : vector<16x16x4xbf16> to vector<256x4xbf16>
    %c0_14 = arith.constant 0 : index
    %c0_15 = arith.constant 0 : index
    %9 = vector.load %arg2[%c0_14, %c0_15] : memref<4x64xbf16, #tpu.memory_space<vmem>>, vector<4x64xbf16>
    %cst_16 = arith.constant dense<0.000000e+00> : vector<256x64xf32>
    %10 = tpu.matmul %8, %9, %cst_16 {dimension_numbers = #tpu.dot_dimension_numbers<[1], [0], [0], [1], [0, 0, 1, 1], [], []>} : vector<256x4xbf16>, vector<4x64xbf16>, vector<256x64xf32> -> vector<256x64xf32>
    %c0_17 = arith.constant 0 : index
    %c0_18 = arith.constant 0 : index
    %11 = vector.load %arg3[%c0_17, %c0_18] : memref<1x64xf32, #tpu.memory_space<vmem>>, vector<1x64xf32>
    %12 = vector.broadcast %11 : vector<1x64xf32> to vector<256x64xf32>
    %13 = arith.mulf %10, %12 : vector<256x64xf32>
    %c0_19 = arith.constant 0 : index
    %c0_20 = arith.constant 0 : index
    %14 = vector.load %arg4[%c0_19, %c0_20] : memref<1x64xf32, #tpu.memory_space<vmem>>, vector<1x64xf32>
    %15 = vector.broadcast %14 : vector<1x64xf32> to vector<256x64xf32>
    %16 = arith.addf %13, %15 : vector<256x64xf32>
    %cst_21 = arith.constant 0.000000e+00 : f32
    %17 = vector.broadcast %cst_21 : f32 to vector<256x64xf32>
    %18 = arith.maximumf %16, %17 : vector<256x64xf32>
    %19 = vector.shape_cast %18 : vector<256x64xf32> to vector<16x16x64xf32>
    %20 = arith.truncf %19 : vector<16x16x64xf32> to vector<16x16x64xbf16>
    %c1 = arith.constant 1 : index
    %c1_22 = arith.constant 1 : index
    %c0_23 = arith.constant 0 : index
    %21 = vector.load %arg9[%c1, %c1_22, %c0_23] : memref<18x18x64xbf16, #tpu.memory_space<vmem>>, vector<16x16x64xbf16>
    tpu.vector_store %arg9[%c1, %c1_22, %c0_23], %20 {strides = array<i32>} : memref<18x18x64xbf16, #tpu.memory_space<vmem>>, vector<16x16x64xbf16>,
    %c0_24 = arith.constant 0 : index
    %c0_25 = arith.constant 0 : index
    %c0_26 = arith.constant 0 : index
    %22 = vector.load %arg9[%c0_24, %c0_25, %c0_26] : memref<18x18x64xbf16, #tpu.memory_space<vmem>>, vector<8x16x64xbf16>
    %23 = vector.shape_cast %22 : vector<8x16x64xbf16> to vector<128x64xbf16>
    %c0_27 = arith.constant 0 : index
    %c0_28 = arith.constant 0 : index
    %c0_29 = arith.constant 0 : index
    %c0_30 = arith.constant 0 : index
    %24 = vector.load %arg5[%c0_27, %c0_28, %c0_29, %c0_30] : memref<3x3x64x96xbf16, #tpu.memory_space<vmem>>, vector<1x1x64x96xbf16>
    %25 = vector.shape_cast %24 : vector<1x1x64x96xbf16> to vector<64x96xbf16>
    %cst_31 = arith.constant dense<0.000000e+00> : vector<128x96xf32>
    %26 = tpu.matmul %23, %25, %cst_31 {dimension_numbers = #tpu.dot_dimension_numbers<[1], [0], [0], [1], [0, 0, 1, 1], [], []>} : vector<128x64xbf16>, vector<64x96xbf16>, vector<128x96xf32> -> vector<128x96xf32>
    %c0_32 = arith.constant 0 : index
    %c1_33 = arith.constant 1 : index
    %c0_34 = arith.constant 0 : index
    %27 = vector.load %arg9[%c0_32, %c1_33, %c0_34] : memref<18x18x64xbf16, #tpu.memory_space<vmem>>, vector<8x16x64xbf16>
    %28 = vector.shape_cast %27 : vector<8x16x64xbf16> to vector<128x64xbf16>
    %c0_35 = arith.constant 0 : index
    %c1_36 = arith.constant 1 : index
    %c0_37 = arith.constant 0 : index
    %c0_38 = arith.constant 0 : index
    %29 = vector.load %arg5[%c0_35, %c1_36, %c0_37, %c0_38] : memref<3x3x64x96xbf16, #tpu.memory_space<vmem>>, vector<1x1x64x96xbf16>
    %30 = vector.shape_cast %29 : vector<1x1x64x96xbf16> to vector<64x96xbf16>
    %cst_39 = arith.constant dense<0.000000e+00> : vector<128x96xf32>
    %31 = tpu.matmul %28, %30, %cst_39 {dimension_numbers = #tpu.dot_dimension_numbers<[1], [0], [0], [1], [0, 0, 1, 1], [], []>} : vector<128x64xbf16>, vector<64x96xbf16>, vector<128x96xf32> -> vector<128x96xf32>
    %32 = arith.addf %26, %31 : vector<128x96xf32>
    %c0_40 = arith.constant 0 : index
    %c2 = arith.constant 2 : index
    %c0_41 = arith.constant 0 : index
    %33 = vector.load %arg9[%c0_40, %c2, %c0_41] : memref<18x18x64xbf16, #tpu.memory_space<vmem>>, vector<8x16x64xbf16>
    %34 = vector.shape_cast %33 : vector<8x16x64xbf16> to vector<128x64xbf16>
    %c0_42 = arith.constant 0 : index
    %c2_43 = arith.constant 2 : index
    %c0_44 = arith.constant 0 : index
    %c0_45 = arith.constant 0 : index
    %35 = vector.load %arg5[%c0_42, %c2_43, %c0_44, %c0_45] : memref<3x3x64x96xbf16, #tpu.memory_space<vmem>>, vector<1x1x64x96xbf16>
    %36 = vector.shape_cast %35 : vector<1x1x64x96xbf16> to vector<64x96xbf16>
    %cst_46 = arith.constant dense<0.000000e+00> : vector<128x96xf32>
    %37 = tpu.matmul %34, %36, %cst_46 {dimension_numbers = #tpu.dot_dimension_numbers<[1], [0], [0], [1], [0, 0, 1, 1], [], []>} : vector<128x64xbf16>, vector<64x96xbf16>, vector<128x96xf32> -> vector<128x96xf32>
    %38 = arith.addf %32, %37 : vector<128x96xf32>
    %c1_47 = arith.constant 1 : index
    %c0_48 = arith.constant 0 : index
    %c0_49 = arith.constant 0 : index
    %39 = vector.load %arg9[%c1_47, %c0_48, %c0_49] : memref<18x18x64xbf16, #tpu.memory_space<vmem>>, vector<8x16x64xbf16>
    %40 = vector.shape_cast %39 : vector<8x16x64xbf16> to vector<128x64xbf16>
    %c1_50 = arith.constant 1 : index
    %c0_51 = arith.constant 0 : index
    %c0_52 = arith.constant 0 : index
    %c0_53 = arith.constant 0 : index
    %41 = vector.load %arg5[%c1_50, %c0_51, %c0_52, %c0_53] : memref<3x3x64x96xbf16, #tpu.memory_space<vmem>>, vector<1x1x64x96xbf16>
    %42 = vector.shape_cast %41 : vector<1x1x64x96xbf16> to vector<64x96xbf16>
    %cst_54 = arith.constant dense<0.000000e+00> : vector<128x96xf32>
    %43 = tpu.matmul %40, %42, %cst_54 {dimension_numbers = #tpu.dot_dimension_numbers<[1], [0], [0], [1], [0, 0, 1, 1], [], []>} : vector<128x64xbf16>, vector<64x96xbf16>, vector<128x96xf32> -> vector<128x96xf32>
    %44 = arith.addf %38, %43 : vector<128x96xf32>
    %c1_55 = arith.constant 1 : index
    %c1_56 = arith.constant 1 : index
    %c0_57 = arith.constant 0 : index
    %45 = vector.load %arg9[%c1_55, %c1_56, %c0_57] : memref<18x18x64xbf16, #tpu.memory_space<vmem>>, vector<8x16x64xbf16>
    %46 = vector.shape_cast %45 : vector<8x16x64xbf16> to vector<128x64xbf16>
    %c1_58 = arith.constant 1 : index
    %c1_59 = arith.constant 1 : index
    %c0_60 = arith.constant 0 : index
    %c0_61 = arith.constant 0 : index
    %47 = vector.load %arg5[%c1_58, %c1_59, %c0_60, %c0_61] : memref<3x3x64x96xbf16, #tpu.memory_space<vmem>>, vector<1x1x64x96xbf16>
    %48 = vector.shape_cast %47 : vector<1x1x64x96xbf16> to vector<64x96xbf16>
    %cst_62 = arith.constant dense<0.000000e+00> : vector<128x96xf32>
    %49 = tpu.matmul %46, %48, %cst_62 {dimension_numbers = #tpu.dot_dimension_numbers<[1], [0], [0], [1], [0, 0, 1, 1], [], []>} : vector<128x64xbf16>, vector<64x96xbf16>, vector<128x96xf32> -> vector<128x96xf32>
    %50 = arith.addf %44, %49 : vector<128x96xf32>
    %c1_63 = arith.constant 1 : index
    %c2_64 = arith.constant 2 : index
    %c0_65 = arith.constant 0 : index
    %51 = vector.load %arg9[%c1_63, %c2_64, %c0_65] : memref<18x18x64xbf16, #tpu.memory_space<vmem>>, vector<8x16x64xbf16>
    %52 = vector.shape_cast %51 : vector<8x16x64xbf16> to vector<128x64xbf16>
    %c1_66 = arith.constant 1 : index
    %c2_67 = arith.constant 2 : index
    %c0_68 = arith.constant 0 : index
    %c0_69 = arith.constant 0 : index
    %53 = vector.load %arg5[%c1_66, %c2_67, %c0_68, %c0_69] : memref<3x3x64x96xbf16, #tpu.memory_space<vmem>>, vector<1x1x64x96xbf16>
    %54 = vector.shape_cast %53 : vector<1x1x64x96xbf16> to vector<64x96xbf16>
    %cst_70 = arith.constant dense<0.000000e+00> : vector<128x96xf32>
    %55 = tpu.matmul %52, %54, %cst_70 {dimension_numbers = #tpu.dot_dimension_numbers<[1], [0], [0], [1], [0, 0, 1, 1], [], []>} : vector<128x64xbf16>, vector<64x96xbf16>, vector<128x96xf32> -> vector<128x96xf32>
    %56 = arith.addf %50, %55 : vector<128x96xf32>
    %c2_71 = arith.constant 2 : index
    %c0_72 = arith.constant 0 : index
    %c0_73 = arith.constant 0 : index
    %57 = vector.load %arg9[%c2_71, %c0_72, %c0_73] : memref<18x18x64xbf16, #tpu.memory_space<vmem>>, vector<8x16x64xbf16>
    %58 = vector.shape_cast %57 : vector<8x16x64xbf16> to vector<128x64xbf16>
    %c2_74 = arith.constant 2 : index
    %c0_75 = arith.constant 0 : index
    %c0_76 = arith.constant 0 : index
    %c0_77 = arith.constant 0 : index
    %59 = vector.load %arg5[%c2_74, %c0_75, %c0_76, %c0_77] : memref<3x3x64x96xbf16, #tpu.memory_space<vmem>>, vector<1x1x64x96xbf16>
    %60 = vector.shape_cast %59 : vector<1x1x64x96xbf16> to vector<64x96xbf16>
    %cst_78 = arith.constant dense<0.000000e+00> : vector<128x96xf32>
    %61 = tpu.matmul %58, %60, %cst_78 {dimension_numbers = #tpu.dot_dimension_numbers<[1], [0], [0], [1], [0, 0, 1, 1], [], []>} : vector<128x64xbf16>, vector<64x96xbf16>, vector<128x96xf32> -> vector<128x96xf32>
    %62 = arith.addf %56, %61 : vector<128x96xf32>
    %c2_79 = arith.constant 2 : index
    %c1_80 = arith.constant 1 : index
    %c0_81 = arith.constant 0 : index
    %63 = vector.load %arg9[%c2_79, %c1_80, %c0_81] : memref<18x18x64xbf16, #tpu.memory_space<vmem>>, vector<8x16x64xbf16>
    %64 = vector.shape_cast %63 : vector<8x16x64xbf16> to vector<128x64xbf16>
    %c2_82 = arith.constant 2 : index
    %c1_83 = arith.constant 1 : index
    %c0_84 = arith.constant 0 : index
    %c0_85 = arith.constant 0 : index
    %65 = vector.load %arg5[%c2_82, %c1_83, %c0_84, %c0_85] : memref<3x3x64x96xbf16, #tpu.memory_space<vmem>>, vector<1x1x64x96xbf16>
    %66 = vector.shape_cast %65 : vector<1x1x64x96xbf16> to vector<64x96xbf16>
    %cst_86 = arith.constant dense<0.000000e+00> : vector<128x96xf32>
    %67 = tpu.matmul %64, %66, %cst_86 {dimension_numbers = #tpu.dot_dimension_numbers<[1], [0], [0], [1], [0, 0, 1, 1], [], []>} : vector<128x64xbf16>, vector<64x96xbf16>, vector<128x96xf32> -> vector<128x96xf32>
    %68 = arith.addf %62, %67 : vector<128x96xf32>
    %c2_87 = arith.constant 2 : index
    %c2_88 = arith.constant 2 : index
    %c0_89 = arith.constant 0 : index
    %69 = vector.load %arg9[%c2_87, %c2_88, %c0_89] : memref<18x18x64xbf16, #tpu.memory_space<vmem>>, vector<8x16x64xbf16>
    %70 = vector.shape_cast %69 : vector<8x16x64xbf16> to vector<128x64xbf16>
    %c2_90 = arith.constant 2 : index
    %c2_91 = arith.constant 2 : index
    %c0_92 = arith.constant 0 : index
    %c0_93 = arith.constant 0 : index
    %71 = vector.load %arg5[%c2_90, %c2_91, %c0_92, %c0_93] : memref<3x3x64x96xbf16, #tpu.memory_space<vmem>>, vector<1x1x64x96xbf16>
    %72 = vector.shape_cast %71 : vector<1x1x64x96xbf16> to vector<64x96xbf16>
    %cst_94 = arith.constant dense<0.000000e+00> : vector<128x96xf32>
    %73 = tpu.matmul %70, %72, %cst_94 {dimension_numbers = #tpu.dot_dimension_numbers<[1], [0], [0], [1], [0, 0, 1, 1], [], []>} : vector<128x64xbf16>, vector<64x96xbf16>, vector<128x96xf32> -> vector<128x96xf32>
    %74 = arith.addf %68, %73 : vector<128x96xf32>
    %c0_95 = arith.constant 0 : index
    %c0_96 = arith.constant 0 : index
    %75 = vector.load %arg6[%c0_95, %c0_96] : memref<1x96xf32, #tpu.memory_space<vmem>>, vector<1x96xf32>
    %76 = vector.broadcast %75 : vector<1x96xf32> to vector<128x96xf32>
    %77 = arith.mulf %74, %76 : vector<128x96xf32>
    %c0_97 = arith.constant 0 : index
    %c0_98 = arith.constant 0 : index
    %78 = vector.load %arg7[%c0_97, %c0_98] : memref<1x96xf32, #tpu.memory_space<vmem>>, vector<1x96xf32>
    %79 = vector.broadcast %78 : vector<1x96xf32> to vector<128x96xf32>
    %80 = arith.addf %77, %79 : vector<128x96xf32>
    %cst_99 = arith.constant 0.000000e+00 : f32
    %81 = vector.broadcast %cst_99 : f32 to vector<128x96xf32>
    %82 = arith.maximumf %80, %81 : vector<128x96xf32>
    %83 = vector.shape_cast %82 : vector<128x96xf32> to vector<8x16x96xf32>
    %84 = arith.truncf %83 : vector<8x16x96xf32> to vector<8x16x96xbf16>
    %c0_100 = arith.constant 0 : index
    %c0_101 = arith.constant 0 : index
    %c0_102 = arith.constant 0 : index
    %c0_103 = arith.constant 0 : index
    %85 = vector.load %arg8[%c0_100, %c0_101, %c0_102, %c0_103] : memref<1x16x16x96xbf16, #tpu.memory_space<vmem>>, vector<1x8x16x96xbf16>
    %86 = vector.shape_cast %85 : vector<1x8x16x96xbf16> to vector<8x16x96xbf16>
    %87 = vector.shape_cast %84 : vector<8x16x96xbf16> to vector<1x8x16x96xbf16>
    tpu.vector_store %arg8[%c0_100, %c0_101, %c0_102, %c0_103], %87 {strides = array<i32>} : memref<1x16x16x96xbf16, #tpu.memory_space<vmem>>, vector<1x8x16x96xbf16>,
    %c8 = arith.constant 8 : index
    %c0_104 = arith.constant 0 : index
    %c0_105 = arith.constant 0 : index
    %88 = vector.load %arg9[%c8, %c0_104, %c0_105] : memref<18x18x64xbf16, #tpu.memory_space<vmem>>, vector<8x16x64xbf16>
    %89 = vector.shape_cast %88 : vector<8x16x64xbf16> to vector<128x64xbf16>
    %c0_106 = arith.constant 0 : index
    %c0_107 = arith.constant 0 : index
    %c0_108 = arith.constant 0 : index
    %c0_109 = arith.constant 0 : index
    %90 = vector.load %arg5[%c0_106, %c0_107, %c0_108, %c0_109] : memref<3x3x64x96xbf16, #tpu.memory_space<vmem>>, vector<1x1x64x96xbf16>
    %91 = vector.shape_cast %90 : vector<1x1x64x96xbf16> to vector<64x96xbf16>
    %cst_110 = arith.constant dense<0.000000e+00> : vector<128x96xf32>
    %92 = tpu.matmul %89, %91, %cst_110 {dimension_numbers = #tpu.dot_dimension_numbers<[1], [0], [0], [1], [0, 0, 1, 1], [], []>} : vector<128x64xbf16>, vector<64x96xbf16>, vector<128x96xf32> -> vector<128x96xf32>
    %c8_111 = arith.constant 8 : index
    %c1_112 = arith.constant 1 : index
    %c0_113 = arith.constant 0 : index
    %93 = vector.load %arg9[%c8_111, %c1_112, %c0_113] : memref<18x18x64xbf16, #tpu.memory_space<vmem>>, vector<8x16x64xbf16>
    %94 = vector.shape_cast %93 : vector<8x16x64xbf16> to vector<128x64xbf16>
    %c0_114 = arith.constant 0 : index
    %c1_115 = arith.constant 1 : index
    %c0_116 = arith.constant 0 : index
    %c0_117 = arith.constant 0 : index
    %95 = vector.load %arg5[%c0_114, %c1_115, %c0_116, %c0_117] : memref<3x3x64x96xbf16, #tpu.memory_space<vmem>>, vector<1x1x64x96xbf16>
    %96 = vector.shape_cast %95 : vector<1x1x64x96xbf16> to vector<64x96xbf16>
    %cst_118 = arith.constant dense<0.000000e+00> : vector<128x96xf32>
    %97 = tpu.matmul %94, %96, %cst_118 {dimension_numbers = #tpu.dot_dimension_numbers<[1], [0], [0], [1], [0, 0, 1, 1], [], []>} : vector<128x64xbf16>, vector<64x96xbf16>, vector<128x96xf32> -> vector<128x96xf32>
    %98 = arith.addf %92, %97 : vector<128x96xf32>
    %c8_119 = arith.constant 8 : index
    %c2_120 = arith.constant 2 : index
    %c0_121 = arith.constant 0 : index
    %99 = vector.load %arg9[%c8_119, %c2_120, %c0_121] : memref<18x18x64xbf16, #tpu.memory_space<vmem>>, vector<8x16x64xbf16>
    %100 = vector.shape_cast %99 : vector<8x16x64xbf16> to vector<128x64xbf16>
    %c0_122 = arith.constant 0 : index
    %c2_123 = arith.constant 2 : index
    %c0_124 = arith.constant 0 : index
    %c0_125 = arith.constant 0 : index
    %101 = vector.load %arg5[%c0_122, %c2_123, %c0_124, %c0_125] : memref<3x3x64x96xbf16, #tpu.memory_space<vmem>>, vector<1x1x64x96xbf16>
    %102 = vector.shape_cast %101 : vector<1x1x64x96xbf16> to vector<64x96xbf16>
    %cst_126 = arith.constant dense<0.000000e+00> : vector<128x96xf32>
    %103 = tpu.matmul %100, %102, %cst_126 {dimension_numbers = #tpu.dot_dimension_numbers<[1], [0], [0], [1], [0, 0, 1, 1], [], []>} : vector<128x64xbf16>, vector<64x96xbf16>, vector<128x96xf32> -> vector<128x96xf32>
    %104 = arith.addf %98, %103 : vector<128x96xf32>
    %c9 = arith.constant 9 : index
    %c0_127 = arith.constant 0 : index
    %c0_128 = arith.constant 0 : index
    %105 = vector.load %arg9[%c9, %c0_127, %c0_128] : memref<18x18x64xbf16, #tpu.memory_space<vmem>>, vector<8x16x64xbf16>
    %106 = vector.shape_cast %105 : vector<8x16x64xbf16> to vector<128x64xbf16>
    %c1_129 = arith.constant 1 : index
    %c0_130 = arith.constant 0 : index
    %c0_131 = arith.constant 0 : index
    %c0_132 = arith.constant 0 : index
    %107 = vector.load %arg5[%c1_129, %c0_130, %c0_131, %c0_132] : memref<3x3x64x96xbf16, #tpu.memory_space<vmem>>, vector<1x1x64x96xbf16>
    %108 = vector.shape_cast %107 : vector<1x1x64x96xbf16> to vector<64x96xbf16>
    %cst_133 = arith.constant dense<0.000000e+00> : vector<128x96xf32>
    %109 = tpu.matmul %106, %108, %cst_133 {dimension_numbers = #tpu.dot_dimension_numbers<[1], [0], [0], [1], [0, 0, 1, 1], [], []>} : vector<128x64xbf16>, vector<64x96xbf16>, vector<128x96xf32> -> vector<128x96xf32>
    %110 = arith.addf %104, %109 : vector<128x96xf32>
    %c9_134 = arith.constant 9 : index
    %c1_135 = arith.constant 1 : index
    %c0_136 = arith.constant 0 : index
    %111 = vector.load %arg9[%c9_134, %c1_135, %c0_136] : memref<18x18x64xbf16, #tpu.memory_space<vmem>>, vector<8x16x64xbf16>
    %112 = vector.shape_cast %111 : vector<8x16x64xbf16> to vector<128x64xbf16>
    %c1_137 = arith.constant 1 : index
    %c1_138 = arith.constant 1 : index
    %c0_139 = arith.constant 0 : index
    %c0_140 = arith.constant 0 : index
    %113 = vector.load %arg5[%c1_137, %c1_138, %c0_139, %c0_140] : memref<3x3x64x96xbf16, #tpu.memory_space<vmem>>, vector<1x1x64x96xbf16>
    %114 = vector.shape_cast %113 : vector<1x1x64x96xbf16> to vector<64x96xbf16>
    %cst_141 = arith.constant dense<0.000000e+00> : vector<128x96xf32>
    %115 = tpu.matmul %112, %114, %cst_141 {dimension_numbers = #tpu.dot_dimension_numbers<[1], [0], [0], [1], [0, 0, 1, 1], [], []>} : vector<128x64xbf16>, vector<64x96xbf16>, vector<128x96xf32> -> vector<128x96xf32>
    %116 = arith.addf %110, %115 : vector<128x96xf32>
    %c9_142 = arith.constant 9 : index
    %c2_143 = arith.constant 2 : index
    %c0_144 = arith.constant 0 : index
    %117 = vector.load %arg9[%c9_142, %c2_143, %c0_144] : memref<18x18x64xbf16, #tpu.memory_space<vmem>>, vector<8x16x64xbf16>
    %118 = vector.shape_cast %117 : vector<8x16x64xbf16> to vector<128x64xbf16>
    %c1_145 = arith.constant 1 : index
    %c2_146 = arith.constant 2 : index
    %c0_147 = arith.constant 0 : index
    %c0_148 = arith.constant 0 : index
    %119 = vector.load %arg5[%c1_145, %c2_146, %c0_147, %c0_148] : memref<3x3x64x96xbf16, #tpu.memory_space<vmem>>, vector<1x1x64x96xbf16>
    %120 = vector.shape_cast %119 : vector<1x1x64x96xbf16> to vector<64x96xbf16>
    %cst_149 = arith.constant dense<0.000000e+00> : vector<128x96xf32>
    %121 = tpu.matmul %118, %120, %cst_149 {dimension_numbers = #tpu.dot_dimension_numbers<[1], [0], [0], [1], [0, 0, 1, 1], [], []>} : vector<128x64xbf16>, vector<64x96xbf16>, vector<128x96xf32> -> vector<128x96xf32>
    %122 = arith.addf %116, %121 : vector<128x96xf32>
    %c10_150 = arith.constant 10 : index
    %c0_151 = arith.constant 0 : index
    %c0_152 = arith.constant 0 : index
    %123 = vector.load %arg9[%c10_150, %c0_151, %c0_152] : memref<18x18x64xbf16, #tpu.memory_space<vmem>>, vector<8x16x64xbf16>
    %124 = vector.shape_cast %123 : vector<8x16x64xbf16> to vector<128x64xbf16>
    %c2_153 = arith.constant 2 : index
    %c0_154 = arith.constant 0 : index
    %c0_155 = arith.constant 0 : index
    %c0_156 = arith.constant 0 : index
    %125 = vector.load %arg5[%c2_153, %c0_154, %c0_155, %c0_156] : memref<3x3x64x96xbf16, #tpu.memory_space<vmem>>, vector<1x1x64x96xbf16>
    %126 = vector.shape_cast %125 : vector<1x1x64x96xbf16> to vector<64x96xbf16>
    %cst_157 = arith.constant dense<0.000000e+00> : vector<128x96xf32>
    %127 = tpu.matmul %124, %126, %cst_157 {dimension_numbers = #tpu.dot_dimension_numbers<[1], [0], [0], [1], [0, 0, 1, 1], [], []>} : vector<128x64xbf16>, vector<64x96xbf16>, vector<128x96xf32> -> vector<128x96xf32>
    %128 = arith.addf %122, %127 : vector<128x96xf32>
    %c10_158 = arith.constant 10 : index
    %c1_159 = arith.constant 1 : index
    %c0_160 = arith.constant 0 : index
    %129 = vector.load %arg9[%c10_158, %c1_159, %c0_160] : memref<18x18x64xbf16, #tpu.memory_space<vmem>>, vector<8x16x64xbf16>
    %130 = vector.shape_cast %129 : vector<8x16x64xbf16> to vector<128x64xbf16>
    %c2_161 = arith.constant 2 : index
    %c1_162 = arith.constant 1 : index
    %c0_163 = arith.constant 0 : index
    %c0_164 = arith.constant 0 : index
    %131 = vector.load %arg5[%c2_161, %c1_162, %c0_163, %c0_164] : memref<3x3x64x96xbf16, #tpu.memory_space<vmem>>, vector<1x1x64x96xbf16>
    %132 = vector.shape_cast %131 : vector<1x1x64x96xbf16> to vector<64x96xbf16>
    %cst_165 = arith.constant dense<0.000000e+00> : vector<128x96xf32>
    %133 = tpu.matmul %130, %132, %cst_165 {dimension_numbers = #tpu.dot_dimension_numbers<[1], [0], [0], [1], [0, 0, 1, 1], [], []>} : vector<128x64xbf16>, vector<64x96xbf16>, vector<128x96xf32> -> vector<128x96xf32>
    %134 = arith.addf %128, %133 : vector<128x96xf32>
    %c10_166 = arith.constant 10 : index
    %c2_167 = arith.constant 2 : index
    %c0_168 = arith.constant 0 : index
    %135 = vector.load %arg9[%c10_166, %c2_167, %c0_168] : memref<18x18x64xbf16, #tpu.memory_space<vmem>>, vector<8x16x64xbf16>
    %136 = vector.shape_cast %135 : vector<8x16x64xbf16> to vector<128x64xbf16>
    %c2_169 = arith.constant 2 : index
    %c2_170 = arith.constant 2 : index
    %c0_171 = arith.constant 0 : index
    %c0_172 = arith.constant 0 : index
    %137 = vector.load %arg5[%c2_169, %c2_170, %c0_171, %c0_172] : memref<3x3x64x96xbf16, #tpu.memory_space<vmem>>, vector<1x1x64x96xbf16>
    %138 = vector.shape_cast %137 : vector<1x1x64x96xbf16> to vector<64x96xbf16>
    %cst_173 = arith.constant dense<0.000000e+00> : vector<128x96xf32>
    %139 = tpu.matmul %136, %138, %cst_173 {dimension_numbers = #tpu.dot_dimension_numbers<[1], [0], [0], [1], [0, 0, 1, 1], [], []>} : vector<128x64xbf16>, vector<64x96xbf16>, vector<128x96xf32> -> vector<128x96xf32>
    %140 = arith.addf %134, %139 : vector<128x96xf32>
    %c0_174 = arith.constant 0 : index
    %c0_175 = arith.constant 0 : index
    %141 = vector.load %arg6[%c0_174, %c0_175] : memref<1x96xf32, #tpu.memory_space<vmem>>, vector<1x96xf32>
    %142 = vector.broadcast %141 : vector<1x96xf32> to vector<128x96xf32>
    %143 = arith.mulf %140, %142 : vector<128x96xf32>
    %c0_176 = arith.constant 0 : index
    %c0_177 = arith.constant 0 : index
    %144 = vector.load %arg7[%c0_176, %c0_177] : memref<1x96xf32, #tpu.memory_space<vmem>>, vector<1x96xf32>
    %145 = vector.broadcast %144 : vector<1x96xf32> to vector<128x96xf32>
    %146 = arith.addf %143, %145 : vector<128x96xf32>
    %cst_178 = arith.constant 0.000000e+00 : f32
    %147 = vector.broadcast %cst_178 : f32 to vector<128x96xf32>
    %148 = arith.maximumf %146, %147 : vector<128x96xf32>
    %149 = vector.shape_cast %148 : vector<128x96xf32> to vector<8x16x96xf32>
    %150 = arith.truncf %149 : vector<8x16x96xf32> to vector<8x16x96xbf16>
    %c0_179 = arith.constant 0 : index
    %c8_180 = arith.constant 8 : index
    %c0_181 = arith.constant 0 : index
    %c0_182 = arith.constant 0 : index
    %151 = vector.load %arg8[%c0_179, %c8_180, %c0_181, %c0_182] : memref<1x16x16x96xbf16, #tpu.memory_space<vmem>>, vector<1x8x16x96xbf16>
    %152 = vector.shape_cast %151 : vector<1x8x16x96xbf16> to vector<8x16x96xbf16>
    %153 = vector.shape_cast %150 : vector<8x16x96xbf16> to vector<1x8x16x96xbf16>
    tpu.vector_store %arg8[%c0_179, %c8_180, %c0_181, %c0_182], %153 {strides = array<i32>} : memref<1x16x16x96xbf16, #tpu.memory_space<vmem>>, vector<1x8x16x96xbf16>,
    return
  }
  func.func @transform_0(%arg0: i32) -> (i32, i32, i32, i32) {
    %c0_i32 = arith.constant 0 : i32
    %c0_i32_0 = arith.constant 0 : i32
    %c0_i32_1 = arith.constant 0 : i32
    %c0_i32_2 = arith.constant 0 : i32
    return %arg0, %c0_i32, %c0_i32_0, %c0_i32_1 : i32, i32, i32, i32
  }
  func.func @transform_1(%arg0: i32) -> (i32, i32) {
    %c0_i32 = arith.constant 0 : i32
    %c0_i32_0 = arith.constant 0 : i32
    %c0_i32_1 = arith.constant 0 : i32
    return %c0_i32, %c0_i32_0 : i32, i32
  }
  func.func @transform_2(%arg0: i32) -> (i32, i32) {
    %c0_i32 = arith.constant 0 : i32
    %c0_i32_0 = arith.constant 0 : i32
    %c0_i32_1 = arith.constant 0 : i32
    return %c0_i32, %c0_i32_0 : i32, i32
  }
  func.func @transform_3(%arg0: i32) -> (i32, i32) {
    %c0_i32 = arith.constant 0 : i32
    %c0_i32_0 = arith.constant 0 : i32
    %c0_i32_1 = arith.constant 0 : i32
    return %c0_i32, %c0_i32_0 : i32, i32
  }
  func.func @transform_4(%arg0: i32) -> (i32, i32, i32, i32) {
    %c0_i32 = arith.constant 0 : i32
    %c0_i32_0 = arith.constant 0 : i32
    %c0_i32_1 = arith.constant 0 : i32
    %c0_i32_2 = arith.constant 0 : i32
    %c0_i32_3 = arith.constant 0 : i32
    return %c0_i32, %c0_i32_0, %c0_i32_1, %c0_i32_2 : i32, i32, i32, i32
  }
  func.func @transform_5(%arg0: i32) -> (i32, i32) {
    %c0_i32 = arith.constant 0 : i32
    %c0_i32_0 = arith.constant 0 : i32
    %c0_i32_1 = arith.constant 0 : i32
    return %c0_i32, %c0_i32_0 : i32, i32
  }
  func.func @transform_6(%arg0: i32) -> (i32, i32) {
    %c0_i32 = arith.constant 0 : i32
    %c0_i32_0 = arith.constant 0 : i32
    %c0_i32_1 = arith.constant 0 : i32
    return %c0_i32, %c0_i32_0 : i32, i32
  }
  func.func @transform_7(%arg0: i32) -> (i32, i32, i32, i32) {
    %c0_i32 = arith.constant 0 : i32
    %c0_i32_0 = arith.constant 0 : i32
    %c0_i32_1 = arith.constant 0 : i32
    %c0_i32_2 = arith.constant 0 : i32
    return %arg0, %c0_i32, %c0_i32_0, %c0_i32_1 : i32, i32, i32, i32
  }
}

module attributes {stable_mosaic.version = 11 : i64} {
  func.func @_reduce_concat_kernel(%arg0: i32, %arg1: memref<1x4x9x9x4xbf16, #tpu.memory_space<vmem>>, %arg2: memref<3x3x4x384xbf16, #tpu.memory_space<vmem>>, %arg3: memref<1x384xf32, #tpu.memory_space<vmem>>, %arg4: memref<1x384xf32, #tpu.memory_space<vmem>>, %arg5: memref<1x4x9x9x96xbf16, #tpu.memory_space<vmem>>, %arg6: memref<3x3x96x96xbf16, #tpu.memory_space<vmem>>, %arg7: memref<1x96xf32, #tpu.memory_space<vmem>>, %arg8: memref<1x96xf32, #tpu.memory_space<vmem>>, %arg9: memref<1x7x7x484xf32, #tpu.memory_space<vmem>>) attributes {dimension_semantics = [#tpu.dimension_semantics<parallel>], iteration_bounds = array<i64: 2>, scalar_prefetch = 0 : i64, scratch_operands = 0 : i64, tpu.core_type = #tpu.core_type<tc>, window_params = [{transform_indices = @transform_0, window_bounds = array<i64: 1, 4, 9, 9, 4>}, {pipeline_mode = #tpu.pipeline_mode<synchronous>, transform_indices = @transform_1, window_bounds = array<i64: 3, 3, 4, 384>}, {pipeline_mode = #tpu.pipeline_mode<synchronous>, transform_indices = @transform_2, window_bounds = array<i64: 1, 384>}, {pipeline_mode = #tpu.pipeline_mode<synchronous>, transform_indices = @transform_3, window_bounds = array<i64: 1, 384>}, {transform_indices = @transform_4, window_bounds = array<i64: 1, 4, 9, 9, 96>}, {pipeline_mode = #tpu.pipeline_mode<synchronous>, transform_indices = @transform_5, window_bounds = array<i64: 3, 3, 96, 96>}, {pipeline_mode = #tpu.pipeline_mode<synchronous>, transform_indices = @transform_6, window_bounds = array<i64: 1, 96>}, {pipeline_mode = #tpu.pipeline_mode<synchronous>, transform_indices = @transform_7, window_bounds = array<i64: 1, 96>}, {transform_indices = @transform_8, window_bounds = array<i64: 1, 7, 7, 484>}]} {
    %c0 = arith.constant 0 : index
    %c0_0 = arith.constant 0 : index
    %c0_1 = arith.constant 0 : index
    %c0_2 = arith.constant 0 : index
    %c0_3 = arith.constant 0 : index
    %0 = vector.load %arg1[%c0, %c0_0, %c0_1, %c0_2, %c0_3] : memref<1x4x9x9x4xbf16, #tpu.memory_space<vmem>>, vector<1x1x8x8x4xbf16>
    %1 = vector.shape_cast %0 : vector<1x1x8x8x4xbf16> to vector<8x8x4xbf16>
    %2 = vector.shape_cast %1 : vector<8x8x4xbf16> to vector<64x4xbf16>
    %c0_4 = arith.constant 0 : index
    %c0_5 = arith.constant 0 : index
    %c0_6 = arith.constant 0 : index
    %c0_7 = arith.constant 0 : index
    %3 = vector.load %arg2[%c0_4, %c0_5, %c0_6, %c0_7] : memref<3x3x4x384xbf16, #tpu.memory_space<vmem>>, vector<1x1x4x384xbf16>
    %4 = vector.shape_cast %3 : vector<1x1x4x384xbf16> to vector<4x384xbf16>
    %cst = arith.constant dense<0.000000e+00> : vector<64x384xf32>
    %5 = tpu.matmul %2, %4, %cst {dimension_numbers = #tpu.dot_dimension_numbers<[1], [0], [0], [1], [0, 0, 1, 1], [], []>} : vector<64x4xbf16>, vector<4x384xbf16>, vector<64x384xf32> -> vector<64x384xf32>
    %c0_8 = arith.constant 0 : index
    %c1 = arith.constant 1 : index
    %c0_9 = arith.constant 0 : index
    %c0_10 = arith.constant 0 : index
    %c0_11 = arith.constant 0 : index
    %6 = vector.load %arg1[%c0_8, %c1, %c0_9, %c0_10, %c0_11] : memref<1x4x9x9x4xbf16, #tpu.memory_space<vmem>>, vector<1x1x8x8x4xbf16>
    %7 = vector.shape_cast %6 : vector<1x1x8x8x4xbf16> to vector<8x8x4xbf16>
    %8 = vector.shape_cast %7 : vector<8x8x4xbf16> to vector<64x4xbf16>
    %c0_12 = arith.constant 0 : index
    %c1_13 = arith.constant 1 : index
    %c0_14 = arith.constant 0 : index
    %c0_15 = arith.constant 0 : index
    %9 = vector.load %arg2[%c0_12, %c1_13, %c0_14, %c0_15] : memref<3x3x4x384xbf16, #tpu.memory_space<vmem>>, vector<1x1x4x384xbf16>
    %10 = vector.shape_cast %9 : vector<1x1x4x384xbf16> to vector<4x384xbf16>
    %cst_16 = arith.constant dense<0.000000e+00> : vector<64x384xf32>
    %11 = tpu.matmul %8, %10, %cst_16 {dimension_numbers = #tpu.dot_dimension_numbers<[1], [0], [0], [1], [0, 0, 1, 1], [], []>} : vector<64x4xbf16>, vector<4x384xbf16>, vector<64x384xf32> -> vector<64x384xf32>
    %12 = arith.addf %5, %11 : vector<64x384xf32>
    %c0_17 = arith.constant 0 : index
    %c0_18 = arith.constant 0 : index
    %c0_19 = arith.constant 0 : index
    %c1_20 = arith.constant 1 : index
    %c0_21 = arith.constant 0 : index
    %13 = vector.load %arg1[%c0_17, %c0_18, %c0_19, %c1_20, %c0_21] : memref<1x4x9x9x4xbf16, #tpu.memory_space<vmem>>, vector<1x1x8x8x4xbf16>
    %14 = vector.shape_cast %13 : vector<1x1x8x8x4xbf16> to vector<8x8x4xbf16>
    %15 = vector.shape_cast %14 : vector<8x8x4xbf16> to vector<64x4xbf16>
    %c0_22 = arith.constant 0 : index
    %c2 = arith.constant 2 : index
    %c0_23 = arith.constant 0 : index
    %c0_24 = arith.constant 0 : index
    %16 = vector.load %arg2[%c0_22, %c2, %c0_23, %c0_24] : memref<3x3x4x384xbf16, #tpu.memory_space<vmem>>, vector<1x1x4x384xbf16>
    %17 = vector.shape_cast %16 : vector<1x1x4x384xbf16> to vector<4x384xbf16>
    %cst_25 = arith.constant dense<0.000000e+00> : vector<64x384xf32>
    %18 = tpu.matmul %15, %17, %cst_25 {dimension_numbers = #tpu.dot_dimension_numbers<[1], [0], [0], [1], [0, 0, 1, 1], [], []>} : vector<64x4xbf16>, vector<4x384xbf16>, vector<64x384xf32> -> vector<64x384xf32>
    %19 = arith.addf %12, %18 : vector<64x384xf32>
    %c0_26 = arith.constant 0 : index
    %c2_27 = arith.constant 2 : index
    %c0_28 = arith.constant 0 : index
    %c0_29 = arith.constant 0 : index
    %c0_30 = arith.constant 0 : index
    %20 = vector.load %arg1[%c0_26, %c2_27, %c0_28, %c0_29, %c0_30] : memref<1x4x9x9x4xbf16, #tpu.memory_space<vmem>>, vector<1x1x8x8x4xbf16>
    %21 = vector.shape_cast %20 : vector<1x1x8x8x4xbf16> to vector<8x8x4xbf16>
    %22 = vector.shape_cast %21 : vector<8x8x4xbf16> to vector<64x4xbf16>
    %c1_31 = arith.constant 1 : index
    %c0_32 = arith.constant 0 : index
    %c0_33 = arith.constant 0 : index
    %c0_34 = arith.constant 0 : index
    %23 = vector.load %arg2[%c1_31, %c0_32, %c0_33, %c0_34] : memref<3x3x4x384xbf16, #tpu.memory_space<vmem>>, vector<1x1x4x384xbf16>
    %24 = vector.shape_cast %23 : vector<1x1x4x384xbf16> to vector<4x384xbf16>
    %cst_35 = arith.constant dense<0.000000e+00> : vector<64x384xf32>
    %25 = tpu.matmul %22, %24, %cst_35 {dimension_numbers = #tpu.dot_dimension_numbers<[1], [0], [0], [1], [0, 0, 1, 1], [], []>} : vector<64x4xbf16>, vector<4x384xbf16>, vector<64x384xf32> -> vector<64x384xf32>
    %26 = arith.addf %19, %25 : vector<64x384xf32>
    %c0_36 = arith.constant 0 : index
    %c3 = arith.constant 3 : index
    %c0_37 = arith.constant 0 : index
    %c0_38 = arith.constant 0 : index
    %c0_39 = arith.constant 0 : index
    %27 = vector.load %arg1[%c0_36, %c3, %c0_37, %c0_38, %c0_39] : memref<1x4x9x9x4xbf16, #tpu.memory_space<vmem>>, vector<1x1x8x8x4xbf16>
    %28 = vector.shape_cast %27 : vector<1x1x8x8x4xbf16> to vector<8x8x4xbf16>
    %29 = vector.shape_cast %28 : vector<8x8x4xbf16> to vector<64x4xbf16>
    %c1_40 = arith.constant 1 : index
    %c1_41 = arith.constant 1 : index
    %c0_42 = arith.constant 0 : index
    %c0_43 = arith.constant 0 : index
    %30 = vector.load %arg2[%c1_40, %c1_41, %c0_42, %c0_43] : memref<3x3x4x384xbf16, #tpu.memory_space<vmem>>, vector<1x1x4x384xbf16>
    %31 = vector.shape_cast %30 : vector<1x1x4x384xbf16> to vector<4x384xbf16>
    %cst_44 = arith.constant dense<0.000000e+00> : vector<64x384xf32>
    %32 = tpu.matmul %29, %31, %cst_44 {dimension_numbers = #tpu.dot_dimension_numbers<[1], [0], [0], [1], [0, 0, 1, 1], [], []>} : vector<64x4xbf16>, vector<4x384xbf16>, vector<64x384xf32> -> vector<64x384xf32>
    %33 = arith.addf %26, %32 : vector<64x384xf32>
    %c0_45 = arith.constant 0 : index
    %c2_46 = arith.constant 2 : index
    %c0_47 = arith.constant 0 : index
    %c1_48 = arith.constant 1 : index
    %c0_49 = arith.constant 0 : index
    %34 = vector.load %arg1[%c0_45, %c2_46, %c0_47, %c1_48, %c0_49] : memref<1x4x9x9x4xbf16, #tpu.memory_space<vmem>>, vector<1x1x8x8x4xbf16>
    %35 = vector.shape_cast %34 : vector<1x1x8x8x4xbf16> to vector<8x8x4xbf16>
    %36 = vector.shape_cast %35 : vector<8x8x4xbf16> to vector<64x4xbf16>
    %c1_50 = arith.constant 1 : index
    %c2_51 = arith.constant 2 : index
    %c0_52 = arith.constant 0 : index
    %c0_53 = arith.constant 0 : index
    %37 = vector.load %arg2[%c1_50, %c2_51, %c0_52, %c0_53] : memref<3x3x4x384xbf16, #tpu.memory_space<vmem>>, vector<1x1x4x384xbf16>
    %38 = vector.shape_cast %37 : vector<1x1x4x384xbf16> to vector<4x384xbf16>
    %cst_54 = arith.constant dense<0.000000e+00> : vector<64x384xf32>
    %39 = tpu.matmul %36, %38, %cst_54 {dimension_numbers = #tpu.dot_dimension_numbers<[1], [0], [0], [1], [0, 0, 1, 1], [], []>} : vector<64x4xbf16>, vector<4x384xbf16>, vector<64x384xf32> -> vector<64x384xf32>
    %40 = arith.addf %33, %39 : vector<64x384xf32>
    %c0_55 = arith.constant 0 : index
    %c0_56 = arith.constant 0 : index
    %c1_57 = arith.constant 1 : index
    %c0_58 = arith.constant 0 : index
    %c0_59 = arith.constant 0 : index
    %41 = vector.load %arg1[%c0_55, %c0_56, %c1_57, %c0_58, %c0_59] : memref<1x4x9x9x4xbf16, #tpu.memory_space<vmem>>, vector<1x1x8x8x4xbf16>
    %42 = vector.shape_cast %41 : vector<1x1x8x8x4xbf16> to vector<8x8x4xbf16>
    %43 = vector.shape_cast %42 : vector<8x8x4xbf16> to vector<64x4xbf16>
    %c2_60 = arith.constant 2 : index
    %c0_61 = arith.constant 0 : index
    %c0_62 = arith.constant 0 : index
    %c0_63 = arith.constant 0 : index
    %44 = vector.load %arg2[%c2_60, %c0_61, %c0_62, %c0_63] : memref<3x3x4x384xbf16, #tpu.memory_space<vmem>>, vector<1x1x4x384xbf16>
    %45 = vector.shape_cast %44 : vector<1x1x4x384xbf16> to vector<4x384xbf16>
    %cst_64 = arith.constant dense<0.000000e+00> : vector<64x384xf32>
    %46 = tpu.matmul %43, %45, %cst_64 {dimension_numbers = #tpu.dot_dimension_numbers<[1], [0], [0], [1], [0, 0, 1, 1], [], []>} : vector<64x4xbf16>, vector<4x384xbf16>, vector<64x384xf32> -> vector<64x384xf32>
    %47 = arith.addf %40, %46 : vector<64x384xf32>
    %c0_65 = arith.constant 0 : index
    %c1_66 = arith.constant 1 : index
    %c1_67 = arith.constant 1 : index
    %c0_68 = arith.constant 0 : index
    %c0_69 = arith.constant 0 : index
    %48 = vector.load %arg1[%c0_65, %c1_66, %c1_67, %c0_68, %c0_69] : memref<1x4x9x9x4xbf16, #tpu.memory_space<vmem>>, vector<1x1x8x8x4xbf16>
    %49 = vector.shape_cast %48 : vector<1x1x8x8x4xbf16> to vector<8x8x4xbf16>
    %50 = vector.shape_cast %49 : vector<8x8x4xbf16> to vector<64x4xbf16>
    %c2_70 = arith.constant 2 : index
    %c1_71 = arith.constant 1 : index
    %c0_72 = arith.constant 0 : index
    %c0_73 = arith.constant 0 : index
    %51 = vector.load %arg2[%c2_70, %c1_71, %c0_72, %c0_73] : memref<3x3x4x384xbf16, #tpu.memory_space<vmem>>, vector<1x1x4x384xbf16>
    %52 = vector.shape_cast %51 : vector<1x1x4x384xbf16> to vector<4x384xbf16>
    %cst_74 = arith.constant dense<0.000000e+00> : vector<64x384xf32>
    %53 = tpu.matmul %50, %52, %cst_74 {dimension_numbers = #tpu.dot_dimension_numbers<[1], [0], [0], [1], [0, 0, 1, 1], [], []>} : vector<64x4xbf16>, vector<4x384xbf16>, vector<64x384xf32> -> vector<64x384xf32>
    %54 = arith.addf %47, %53 : vector<64x384xf32>
    %c0_75 = arith.constant 0 : index
    %c0_76 = arith.constant 0 : index
    %c1_77 = arith.constant 1 : index
    %c1_78 = arith.constant 1 : index
    %c0_79 = arith.constant 0 : index
    %55 = vector.load %arg1[%c0_75, %c0_76, %c1_77, %c1_78, %c0_79] : memref<1x4x9x9x4xbf16, #tpu.memory_space<vmem>>, vector<1x1x8x8x4xbf16>
    %56 = vector.shape_cast %55 : vector<1x1x8x8x4xbf16> to vector<8x8x4xbf16>
    %57 = vector.shape_cast %56 : vector<8x8x4xbf16> to vector<64x4xbf16>
    %c2_80 = arith.constant 2 : index
    %c2_81 = arith.constant 2 : index
    %c0_82 = arith.constant 0 : index
    %c0_83 = arith.constant 0 : index
    %58 = vector.load %arg2[%c2_80, %c2_81, %c0_82, %c0_83] : memref<3x3x4x384xbf16, #tpu.memory_space<vmem>>, vector<1x1x4x384xbf16>
    %59 = vector.shape_cast %58 : vector<1x1x4x384xbf16> to vector<4x384xbf16>
    %cst_84 = arith.constant dense<0.000000e+00> : vector<64x384xf32>
    %60 = tpu.matmul %57, %59, %cst_84 {dimension_numbers = #tpu.dot_dimension_numbers<[1], [0], [0], [1], [0, 0, 1, 1], [], []>} : vector<64x4xbf16>, vector<4x384xbf16>, vector<64x384xf32> -> vector<64x384xf32>
    %61 = arith.addf %54, %60 : vector<64x384xf32>
    %c0_85 = arith.constant 0 : index
    %c0_86 = arith.constant 0 : index
    %62 = vector.load %arg3[%c0_85, %c0_86] : memref<1x384xf32, #tpu.memory_space<vmem>>, vector<1x384xf32>
    %63 = vector.broadcast %62 : vector<1x384xf32> to vector<64x384xf32>
    %64 = arith.mulf %61, %63 : vector<64x384xf32>
    %c0_87 = arith.constant 0 : index
    %c0_88 = arith.constant 0 : index
    %65 = vector.load %arg4[%c0_87, %c0_88] : memref<1x384xf32, #tpu.memory_space<vmem>>, vector<1x384xf32>
    %66 = vector.broadcast %65 : vector<1x384xf32> to vector<64x384xf32>
    %67 = arith.addf %64, %66 : vector<64x384xf32>
    %cst_89 = arith.constant 0.000000e+00 : f32
    %68 = vector.broadcast %cst_89 : f32 to vector<64x384xf32>
    %69 = arith.maximumf %67, %68 : vector<64x384xf32>
    %70 = vector.shape_cast %69 : vector<64x384xf32> to vector<8x8x384xf32>
    %71 = vector.extract_strided_slice %70 {offsets = [0, 0, 0], sizes = [7, 7, 384], strides = [1, 1, 1]} : vector<8x8x384xf32> to vector<7x7x384xf32>
    %c0_90 = arith.constant 0 : index
    %c0_91 = arith.constant 0 : index
    %c0_92 = arith.constant 0 : index
    %c0_93 = arith.constant 0 : index
    %72 = vector.load %arg9[%c0_90, %c0_91, %c0_92, %c0_93] : memref<1x7x7x484xf32, #tpu.memory_space<vmem>>, vector<1x7x7x384xf32>
    %73 = vector.shape_cast %72 : vector<1x7x7x384xf32> to vector<7x7x384xf32>
    %74 = vector.shape_cast %71 : vector<7x7x384xf32> to vector<1x7x7x384xf32>
    tpu.vector_store %arg9[%c0_90, %c0_91, %c0_92, %c0_93], %74 {strides = array<i32>} : memref<1x7x7x484xf32, #tpu.memory_space<vmem>>, vector<1x7x7x384xf32>,
    %c0_94 = arith.constant 0 : index
    %c0_95 = arith.constant 0 : index
    %c0_96 = arith.constant 0 : index
    %c0_97 = arith.constant 0 : index
    %c0_98 = arith.constant 0 : index
    %75 = vector.load %arg5[%c0_94, %c0_95, %c0_96, %c0_97, %c0_98] : memref<1x4x9x9x96xbf16, #tpu.memory_space<vmem>>, vector<1x1x8x8x96xbf16>
    %76 = vector.shape_cast %75 : vector<1x1x8x8x96xbf16> to vector<8x8x96xbf16>
    %77 = vector.shape_cast %76 : vector<8x8x96xbf16> to vector<64x96xbf16>
    %c0_99 = arith.constant 0 : index
    %c0_100 = arith.constant 0 : index
    %c0_101 = arith.constant 0 : index
    %c0_102 = arith.constant 0 : index
    %78 = vector.load %arg6[%c0_99, %c0_100, %c0_101, %c0_102] : memref<3x3x96x96xbf16, #tpu.memory_space<vmem>>, vector<1x1x96x96xbf16>
    %79 = vector.shape_cast %78 : vector<1x1x96x96xbf16> to vector<96x96xbf16>
    %cst_103 = arith.constant dense<0.000000e+00> : vector<64x96xf32>
    %80 = tpu.matmul %77, %79, %cst_103 {dimension_numbers = #tpu.dot_dimension_numbers<[1], [0], [0], [1], [0, 0, 1, 1], [], []>} : vector<64x96xbf16>, vector<96x96xbf16>, vector<64x96xf32> -> vector<64x96xf32>
    %c0_104 = arith.constant 0 : index
    %c1_105 = arith.constant 1 : index
    %c0_106 = arith.constant 0 : index
    %c0_107 = arith.constant 0 : index
    %c0_108 = arith.constant 0 : index
    %81 = vector.load %arg5[%c0_104, %c1_105, %c0_106, %c0_107, %c0_108] : memref<1x4x9x9x96xbf16, #tpu.memory_space<vmem>>, vector<1x1x8x8x96xbf16>
    %82 = vector.shape_cast %81 : vector<1x1x8x8x96xbf16> to vector<8x8x96xbf16>
    %83 = vector.shape_cast %82 : vector<8x8x96xbf16> to vector<64x96xbf16>
    %c0_109 = arith.constant 0 : index
    %c1_110 = arith.constant 1 : index
    %c0_111 = arith.constant 0 : index
    %c0_112 = arith.constant 0 : index
    %84 = vector.load %arg6[%c0_109, %c1_110, %c0_111, %c0_112] : memref<3x3x96x96xbf16, #tpu.memory_space<vmem>>, vector<1x1x96x96xbf16>
    %85 = vector.shape_cast %84 : vector<1x1x96x96xbf16> to vector<96x96xbf16>
    %cst_113 = arith.constant dense<0.000000e+00> : vector<64x96xf32>
    %86 = tpu.matmul %83, %85, %cst_113 {dimension_numbers = #tpu.dot_dimension_numbers<[1], [0], [0], [1], [0, 0, 1, 1], [], []>} : vector<64x96xbf16>, vector<96x96xbf16>, vector<64x96xf32> -> vector<64x96xf32>
    %87 = arith.addf %80, %86 : vector<64x96xf32>
    %c0_114 = arith.constant 0 : index
    %c0_115 = arith.constant 0 : index
    %c0_116 = arith.constant 0 : index
    %c1_117 = arith.constant 1 : index
    %c0_118 = arith.constant 0 : index
    %88 = vector.load %arg5[%c0_114, %c0_115, %c0_116, %c1_117, %c0_118] : memref<1x4x9x9x96xbf16, #tpu.memory_space<vmem>>, vector<1x1x8x8x96xbf16>
    %89 = vector.shape_cast %88 : vector<1x1x8x8x96xbf16> to vector<8x8x96xbf16>
    %90 = vector.shape_cast %89 : vector<8x8x96xbf16> to vector<64x96xbf16>
    %c0_119 = arith.constant 0 : index
    %c2_120 = arith.constant 2 : index
    %c0_121 = arith.constant 0 : index
    %c0_122 = arith.constant 0 : index
    %91 = vector.load %arg6[%c0_119, %c2_120, %c0_121, %c0_122] : memref<3x3x96x96xbf16, #tpu.memory_space<vmem>>, vector<1x1x96x96xbf16>
    %92 = vector.shape_cast %91 : vector<1x1x96x96xbf16> to vector<96x96xbf16>
    %cst_123 = arith.constant dense<0.000000e+00> : vector<64x96xf32>
    %93 = tpu.matmul %90, %92, %cst_123 {dimension_numbers = #tpu.dot_dimension_numbers<[1], [0], [0], [1], [0, 0, 1, 1], [], []>} : vector<64x96xbf16>, vector<96x96xbf16>, vector<64x96xf32> -> vector<64x96xf32>
    %94 = arith.addf %87, %93 : vector<64x96xf32>
    %c0_124 = arith.constant 0 : index
    %c2_125 = arith.constant 2 : index
    %c0_126 = arith.constant 0 : index
    %c0_127 = arith.constant 0 : index
    %c0_128 = arith.constant 0 : index
    %95 = vector.load %arg5[%c0_124, %c2_125, %c0_126, %c0_127, %c0_128] : memref<1x4x9x9x96xbf16, #tpu.memory_space<vmem>>, vector<1x1x8x8x96xbf16>
    %96 = vector.shape_cast %95 : vector<1x1x8x8x96xbf16> to vector<8x8x96xbf16>
    %97 = vector.shape_cast %96 : vector<8x8x96xbf16> to vector<64x96xbf16>
    %c1_129 = arith.constant 1 : index
    %c0_130 = arith.constant 0 : index
    %c0_131 = arith.constant 0 : index
    %c0_132 = arith.constant 0 : index
    %98 = vector.load %arg6[%c1_129, %c0_130, %c0_131, %c0_132] : memref<3x3x96x96xbf16, #tpu.memory_space<vmem>>, vector<1x1x96x96xbf16>
    %99 = vector.shape_cast %98 : vector<1x1x96x96xbf16> to vector<96x96xbf16>
    %cst_133 = arith.constant dense<0.000000e+00> : vector<64x96xf32>
    %100 = tpu.matmul %97, %99, %cst_133 {dimension_numbers = #tpu.dot_dimension_numbers<[1], [0], [0], [1], [0, 0, 1, 1], [], []>} : vector<64x96xbf16>, vector<96x96xbf16>, vector<64x96xf32> -> vector<64x96xf32>
    %101 = arith.addf %94, %100 : vector<64x96xf32>
    %c0_134 = arith.constant 0 : index
    %c3_135 = arith.constant 3 : index
    %c0_136 = arith.constant 0 : index
    %c0_137 = arith.constant 0 : index
    %c0_138 = arith.constant 0 : index
    %102 = vector.load %arg5[%c0_134, %c3_135, %c0_136, %c0_137, %c0_138] : memref<1x4x9x9x96xbf16, #tpu.memory_space<vmem>>, vector<1x1x8x8x96xbf16>
    %103 = vector.shape_cast %102 : vector<1x1x8x8x96xbf16> to vector<8x8x96xbf16>
    %104 = vector.shape_cast %103 : vector<8x8x96xbf16> to vector<64x96xbf16>
    %c1_139 = arith.constant 1 : index
    %c1_140 = arith.constant 1 : index
    %c0_141 = arith.constant 0 : index
    %c0_142 = arith.constant 0 : index
    %105 = vector.load %arg6[%c1_139, %c1_140, %c0_141, %c0_142] : memref<3x3x96x96xbf16, #tpu.memory_space<vmem>>, vector<1x1x96x96xbf16>
    %106 = vector.shape_cast %105 : vector<1x1x96x96xbf16> to vector<96x96xbf16>
    %cst_143 = arith.constant dense<0.000000e+00> : vector<64x96xf32>
    %107 = tpu.matmul %104, %106, %cst_143 {dimension_numbers = #tpu.dot_dimension_numbers<[1], [0], [0], [1], [0, 0, 1, 1], [], []>} : vector<64x96xbf16>, vector<96x96xbf16>, vector<64x96xf32> -> vector<64x96xf32>
    %108 = arith.addf %101, %107 : vector<64x96xf32>
    %c0_144 = arith.constant 0 : index
    %c2_145 = arith.constant 2 : index
    %c0_146 = arith.constant 0 : index
    %c1_147 = arith.constant 1 : index
    %c0_148 = arith.constant 0 : index
    %109 = vector.load %arg5[%c0_144, %c2_145, %c0_146, %c1_147, %c0_148] : memref<1x4x9x9x96xbf16, #tpu.memory_space<vmem>>, vector<1x1x8x8x96xbf16>
    %110 = vector.shape_cast %109 : vector<1x1x8x8x96xbf16> to vector<8x8x96xbf16>
    %111 = vector.shape_cast %110 : vector<8x8x96xbf16> to vector<64x96xbf16>
    %c1_149 = arith.constant 1 : index
    %c2_150 = arith.constant 2 : index
    %c0_151 = arith.constant 0 : index
    %c0_152 = arith.constant 0 : index
    %112 = vector.load %arg6[%c1_149, %c2_150, %c0_151, %c0_152] : memref<3x3x96x96xbf16, #tpu.memory_space<vmem>>, vector<1x1x96x96xbf16>
    %113 = vector.shape_cast %112 : vector<1x1x96x96xbf16> to vector<96x96xbf16>
    %cst_153 = arith.constant dense<0.000000e+00> : vector<64x96xf32>
    %114 = tpu.matmul %111, %113, %cst_153 {dimension_numbers = #tpu.dot_dimension_numbers<[1], [0], [0], [1], [0, 0, 1, 1], [], []>} : vector<64x96xbf16>, vector<96x96xbf16>, vector<64x96xf32> -> vector<64x96xf32>
    %115 = arith.addf %108, %114 : vector<64x96xf32>
    %c0_154 = arith.constant 0 : index
    %c0_155 = arith.constant 0 : index
    %c1_156 = arith.constant 1 : index
    %c0_157 = arith.constant 0 : index
    %c0_158 = arith.constant 0 : index
    %116 = vector.load %arg5[%c0_154, %c0_155, %c1_156, %c0_157, %c0_158] : memref<1x4x9x9x96xbf16, #tpu.memory_space<vmem>>, vector<1x1x8x8x96xbf16>
    %117 = vector.shape_cast %116 : vector<1x1x8x8x96xbf16> to vector<8x8x96xbf16>
    %118 = vector.shape_cast %117 : vector<8x8x96xbf16> to vector<64x96xbf16>
    %c2_159 = arith.constant 2 : index
    %c0_160 = arith.constant 0 : index
    %c0_161 = arith.constant 0 : index
    %c0_162 = arith.constant 0 : index
    %119 = vector.load %arg6[%c2_159, %c0_160, %c0_161, %c0_162] : memref<3x3x96x96xbf16, #tpu.memory_space<vmem>>, vector<1x1x96x96xbf16>
    %120 = vector.shape_cast %119 : vector<1x1x96x96xbf16> to vector<96x96xbf16>
    %cst_163 = arith.constant dense<0.000000e+00> : vector<64x96xf32>
    %121 = tpu.matmul %118, %120, %cst_163 {dimension_numbers = #tpu.dot_dimension_numbers<[1], [0], [0], [1], [0, 0, 1, 1], [], []>} : vector<64x96xbf16>, vector<96x96xbf16>, vector<64x96xf32> -> vector<64x96xf32>
    %122 = arith.addf %115, %121 : vector<64x96xf32>
    %c0_164 = arith.constant 0 : index
    %c1_165 = arith.constant 1 : index
    %c1_166 = arith.constant 1 : index
    %c0_167 = arith.constant 0 : index
    %c0_168 = arith.constant 0 : index
    %123 = vector.load %arg5[%c0_164, %c1_165, %c1_166, %c0_167, %c0_168] : memref<1x4x9x9x96xbf16, #tpu.memory_space<vmem>>, vector<1x1x8x8x96xbf16>
    %124 = vector.shape_cast %123 : vector<1x1x8x8x96xbf16> to vector<8x8x96xbf16>
    %125 = vector.shape_cast %124 : vector<8x8x96xbf16> to vector<64x96xbf16>
    %c2_169 = arith.constant 2 : index
    %c1_170 = arith.constant 1 : index
    %c0_171 = arith.constant 0 : index
    %c0_172 = arith.constant 0 : index
    %126 = vector.load %arg6[%c2_169, %c1_170, %c0_171, %c0_172] : memref<3x3x96x96xbf16, #tpu.memory_space<vmem>>, vector<1x1x96x96xbf16>
    %127 = vector.shape_cast %126 : vector<1x1x96x96xbf16> to vector<96x96xbf16>
    %cst_173 = arith.constant dense<0.000000e+00> : vector<64x96xf32>
    %128 = tpu.matmul %125, %127, %cst_173 {dimension_numbers = #tpu.dot_dimension_numbers<[1], [0], [0], [1], [0, 0, 1, 1], [], []>} : vector<64x96xbf16>, vector<96x96xbf16>, vector<64x96xf32> -> vector<64x96xf32>
    %129 = arith.addf %122, %128 : vector<64x96xf32>
    %c0_174 = arith.constant 0 : index
    %c0_175 = arith.constant 0 : index
    %c1_176 = arith.constant 1 : index
    %c1_177 = arith.constant 1 : index
    %c0_178 = arith.constant 0 : index
    %130 = vector.load %arg5[%c0_174, %c0_175, %c1_176, %c1_177, %c0_178] : memref<1x4x9x9x96xbf16, #tpu.memory_space<vmem>>, vector<1x1x8x8x96xbf16>
    %131 = vector.shape_cast %130 : vector<1x1x8x8x96xbf16> to vector<8x8x96xbf16>
    %132 = vector.shape_cast %131 : vector<8x8x96xbf16> to vector<64x96xbf16>
    %c2_179 = arith.constant 2 : index
    %c2_180 = arith.constant 2 : index
    %c0_181 = arith.constant 0 : index
    %c0_182 = arith.constant 0 : index
    %133 = vector.load %arg6[%c2_179, %c2_180, %c0_181, %c0_182] : memref<3x3x96x96xbf16, #tpu.memory_space<vmem>>, vector<1x1x96x96xbf16>
    %134 = vector.shape_cast %133 : vector<1x1x96x96xbf16> to vector<96x96xbf16>
    %cst_183 = arith.constant dense<0.000000e+00> : vector<64x96xf32>
    %135 = tpu.matmul %132, %134, %cst_183 {dimension_numbers = #tpu.dot_dimension_numbers<[1], [0], [0], [1], [0, 0, 1, 1], [], []>} : vector<64x96xbf16>, vector<96x96xbf16>, vector<64x96xf32> -> vector<64x96xf32>
    %136 = arith.addf %129, %135 : vector<64x96xf32>
    %c0_184 = arith.constant 0 : index
    %c0_185 = arith.constant 0 : index
    %137 = vector.load %arg7[%c0_184, %c0_185] : memref<1x96xf32, #tpu.memory_space<vmem>>, vector<1x96xf32>
    %138 = vector.broadcast %137 : vector<1x96xf32> to vector<64x96xf32>
    %139 = arith.mulf %136, %138 : vector<64x96xf32>
    %c0_186 = arith.constant 0 : index
    %c0_187 = arith.constant 0 : index
    %140 = vector.load %arg8[%c0_186, %c0_187] : memref<1x96xf32, #tpu.memory_space<vmem>>, vector<1x96xf32>
    %141 = vector.broadcast %140 : vector<1x96xf32> to vector<64x96xf32>
    %142 = arith.addf %139, %141 : vector<64x96xf32>
    %cst_188 = arith.constant 0.000000e+00 : f32
    %143 = vector.broadcast %cst_188 : f32 to vector<64x96xf32>
    %144 = arith.maximumf %142, %143 : vector<64x96xf32>
    %145 = vector.shape_cast %144 : vector<64x96xf32> to vector<8x8x96xf32>
    %c0_189 = arith.constant 0 : index
    %c0_190 = arith.constant 0 : index
    %c0_191 = arith.constant 0 : index
    %c0_192 = arith.constant 0 : index
    %c0_193 = arith.constant 0 : index
    %146 = vector.load %arg1[%c0_189, %c0_190, %c0_191, %c0_192, %c0_193] : memref<1x4x9x9x4xbf16, #tpu.memory_space<vmem>>, vector<1x1x8x8x4xbf16>
    %147 = vector.shape_cast %146 : vector<1x1x8x8x4xbf16> to vector<8x8x4xbf16>
    %c0_194 = arith.constant 0 : index
    %c1_195 = arith.constant 1 : index
    %c0_196 = arith.constant 0 : index
    %c0_197 = arith.constant 0 : index
    %c0_198 = arith.constant 0 : index
    %148 = vector.load %arg1[%c0_194, %c1_195, %c0_196, %c0_197, %c0_198] : memref<1x4x9x9x4xbf16, #tpu.memory_space<vmem>>, vector<1x1x8x8x4xbf16>
    %149 = vector.shape_cast %148 : vector<1x1x8x8x4xbf16> to vector<8x8x4xbf16>
    %150 = arith.maximumf %147, %149 : vector<8x8x4xbf16>
    %c0_199 = arith.constant 0 : index
    %c0_200 = arith.constant 0 : index
    %c0_201 = arith.constant 0 : index
    %c1_202 = arith.constant 1 : index
    %c0_203 = arith.constant 0 : index
    %151 = vector.load %arg1[%c0_199, %c0_200, %c0_201, %c1_202, %c0_203] : memref<1x4x9x9x4xbf16, #tpu.memory_space<vmem>>, vector<1x1x8x8x4xbf16>
    %152 = vector.shape_cast %151 : vector<1x1x8x8x4xbf16> to vector<8x8x4xbf16>
    %153 = arith.maximumf %150, %152 : vector<8x8x4xbf16>
    %c0_204 = arith.constant 0 : index
    %c2_205 = arith.constant 2 : index
    %c0_206 = arith.constant 0 : index
    %c0_207 = arith.constant 0 : index
    %c0_208 = arith.constant 0 : index
    %154 = vector.load %arg1[%c0_204, %c2_205, %c0_206, %c0_207, %c0_208] : memref<1x4x9x9x4xbf16, #tpu.memory_space<vmem>>, vector<1x1x8x8x4xbf16>
    %155 = vector.shape_cast %154 : vector<1x1x8x8x4xbf16> to vector<8x8x4xbf16>
    %156 = arith.maximumf %153, %155 : vector<8x8x4xbf16>
    %c0_209 = arith.constant 0 : index
    %c3_210 = arith.constant 3 : index
    %c0_211 = arith.constant 0 : index
    %c0_212 = arith.constant 0 : index
    %c0_213 = arith.constant 0 : index
    %157 = vector.load %arg1[%c0_209, %c3_210, %c0_211, %c0_212, %c0_213] : memref<1x4x9x9x4xbf16, #tpu.memory_space<vmem>>, vector<1x1x8x8x4xbf16>
    %158 = vector.shape_cast %157 : vector<1x1x8x8x4xbf16> to vector<8x8x4xbf16>
    %159 = arith.maximumf %156, %158 : vector<8x8x4xbf16>
    %c0_214 = arith.constant 0 : index
    %c2_215 = arith.constant 2 : index
    %c0_216 = arith.constant 0 : index
    %c1_217 = arith.constant 1 : index
    %c0_218 = arith.constant 0 : index
    %160 = vector.load %arg1[%c0_214, %c2_215, %c0_216, %c1_217, %c0_218] : memref<1x4x9x9x4xbf16, #tpu.memory_space<vmem>>, vector<1x1x8x8x4xbf16>
    %161 = vector.shape_cast %160 : vector<1x1x8x8x4xbf16> to vector<8x8x4xbf16>
    %162 = arith.maximumf %159, %161 : vector<8x8x4xbf16>
    %c0_219 = arith.constant 0 : index
    %c0_220 = arith.constant 0 : index
    %c1_221 = arith.constant 1 : index
    %c0_222 = arith.constant 0 : index
    %c0_223 = arith.constant 0 : index
    %163 = vector.load %arg1[%c0_219, %c0_220, %c1_221, %c0_222, %c0_223] : memref<1x4x9x9x4xbf16, #tpu.memory_space<vmem>>, vector<1x1x8x8x4xbf16>
    %164 = vector.shape_cast %163 : vector<1x1x8x8x4xbf16> to vector<8x8x4xbf16>
    %165 = arith.maximumf %162, %164 : vector<8x8x4xbf16>
    %c0_224 = arith.constant 0 : index
    %c1_225 = arith.constant 1 : index
    %c1_226 = arith.constant 1 : index
    %c0_227 = arith.constant 0 : index
    %c0_228 = arith.constant 0 : index
    %166 = vector.load %arg1[%c0_224, %c1_225, %c1_226, %c0_227, %c0_228] : memref<1x4x9x9x4xbf16, #tpu.memory_space<vmem>>, vector<1x1x8x8x4xbf16>
    %167 = vector.shape_cast %166 : vector<1x1x8x8x4xbf16> to vector<8x8x4xbf16>
    %168 = arith.maximumf %165, %167 : vector<8x8x4xbf16>
    %c0_229 = arith.constant 0 : index
    %c0_230 = arith.constant 0 : index
    %c1_231 = arith.constant 1 : index
    %c1_232 = arith.constant 1 : index
    %c0_233 = arith.constant 0 : index
    %169 = vector.load %arg1[%c0_229, %c0_230, %c1_231, %c1_232, %c0_233] : memref<1x4x9x9x4xbf16, #tpu.memory_space<vmem>>, vector<1x1x8x8x4xbf16>
    %170 = vector.shape_cast %169 : vector<1x1x8x8x4xbf16> to vector<8x8x4xbf16>
    %171 = arith.maximumf %168, %170 : vector<8x8x4xbf16>
    %172 = arith.extf %171 : vector<8x8x4xbf16> to vector<8x8x4xf32>
    %173 = tpu.concatenate %145, %172 in 2 : vector<8x8x96xf32>, vector<8x8x4xf32> -> vector<8x8x100xf32>
    %174 = vector.extract_strided_slice %173 {offsets = [0, 0, 0], sizes = [7, 7, 100], strides = [1, 1, 1]} : vector<8x8x100xf32> to vector<7x7x100xf32>
    %c0_234 = arith.constant 0 : index
    %c0_235 = arith.constant 0 : index
    %c0_236 = arith.constant 0 : index
    %c384 = arith.constant 384 : index
    %175 = vector.load %arg9[%c0_234, %c0_235, %c0_236, %c384] : memref<1x7x7x484xf32, #tpu.memory_space<vmem>>, vector<1x7x7x100xf32>
    %176 = vector.shape_cast %175 : vector<1x7x7x100xf32> to vector<7x7x100xf32>
    %177 = vector.shape_cast %174 : vector<7x7x100xf32> to vector<1x7x7x100xf32>
    tpu.vector_store %arg9[%c0_234, %c0_235, %c0_236, %c384], %177 {strides = array<i32>} : memref<1x7x7x484xf32, #tpu.memory_space<vmem>>, vector<1x7x7x100xf32>,
    return
  }
  func.func @transform_0(%arg0: i32) -> (i32, i32, i32, i32, i32) {
    %c0_i32 = arith.constant 0 : i32
    %c0_i32_0 = arith.constant 0 : i32
    %c0_i32_1 = arith.constant 0 : i32
    %c0_i32_2 = arith.constant 0 : i32
    %c0_i32_3 = arith.constant 0 : i32
    return %arg0, %c0_i32, %c0_i32_0, %c0_i32_1, %c0_i32_2 : i32, i32, i32, i32, i32
  }
  func.func @transform_1(%arg0: i32) -> (i32, i32, i32, i32) {
    %c0_i32 = arith.constant 0 : i32
    %c0_i32_0 = arith.constant 0 : i32
    %c0_i32_1 = arith.constant 0 : i32
    %c0_i32_2 = arith.constant 0 : i32
    %c0_i32_3 = arith.constant 0 : i32
    return %c0_i32, %c0_i32_0, %c0_i32_1, %c0_i32_2 : i32, i32, i32, i32
  }
  func.func @transform_2(%arg0: i32) -> (i32, i32) {
    %c0_i32 = arith.constant 0 : i32
    %c0_i32_0 = arith.constant 0 : i32
    %c0_i32_1 = arith.constant 0 : i32
    return %c0_i32, %c0_i32_0 : i32, i32
  }
  func.func @transform_3(%arg0: i32) -> (i32, i32) {
    %c0_i32 = arith.constant 0 : i32
    %c0_i32_0 = arith.constant 0 : i32
    %c0_i32_1 = arith.constant 0 : i32
    return %c0_i32, %c0_i32_0 : i32, i32
  }
  func.func @transform_4(%arg0: i32) -> (i32, i32, i32, i32, i32) {
    %c0_i32 = arith.constant 0 : i32
    %c0_i32_0 = arith.constant 0 : i32
    %c0_i32_1 = arith.constant 0 : i32
    %c0_i32_2 = arith.constant 0 : i32
    %c0_i32_3 = arith.constant 0 : i32
    return %arg0, %c0_i32, %c0_i32_0, %c0_i32_1, %c0_i32_2 : i32, i32, i32, i32, i32
  }
  func.func @transform_5(%arg0: i32) -> (i32, i32, i32, i32) {
    %c0_i32 = arith.constant 0 : i32
    %c0_i32_0 = arith.constant 0 : i32
    %c0_i32_1 = arith.constant 0 : i32
    %c0_i32_2 = arith.constant 0 : i32
    %c0_i32_3 = arith.constant 0 : i32
    return %c0_i32, %c0_i32_0, %c0_i32_1, %c0_i32_2 : i32, i32, i32, i32
  }
  func.func @transform_6(%arg0: i32) -> (i32, i32) {
    %c0_i32 = arith.constant 0 : i32
    %c0_i32_0 = arith.constant 0 : i32
    %c0_i32_1 = arith.constant 0 : i32
    return %c0_i32, %c0_i32_0 : i32, i32
  }
  func.func @transform_7(%arg0: i32) -> (i32, i32) {
    %c0_i32 = arith.constant 0 : i32
    %c0_i32_0 = arith.constant 0 : i32
    %c0_i32_1 = arith.constant 0 : i32
    return %c0_i32, %c0_i32_0 : i32, i32
  }
  func.func @transform_8(%arg0: i32) -> (i32, i32, i32, i32) {
    %c0_i32 = arith.constant 0 : i32
    %c0_i32_0 = arith.constant 0 : i32
    %c0_i32_1 = arith.constant 0 : i32
    %c0_i32_2 = arith.constant 0 : i32
    return %arg0, %c0_i32, %c0_i32_0, %c0_i32_1 : i32, i32, i32, i32
  }
}

</mosaic_0001>

<bundles_post_ra>
// kernel: inception_b_forward.3
= control target key start
LH: loop header
LB: loop body
LE: loop exit
PB: predicated region body
PF: predicated region fallthrough
CT: control target
= control target key end

     0   :  { %s6543_s27 = smov 0   ;;  %s7817_s0 = inlined_call_operand.vmem [shape: bf16[2,4,9,9,4], index: 0, kind: input, shape index: {}]   ;;  %s7818_s1 = inlined_call_operand.vmem [shape: bf16[3,3,4,384], index: 1, kind: input, shape index: {}]   ;;  %s7819_s2 = inlined_call_operand.vmem [shape: f32[1,384], index: 2, kind: input, shape index: {}]   ;;  %s7820_s3 = inlined_call_operand.vmem [shape: f32[1,384], index: 3, kind: input, shape index: {}]   ;;  %s7821_s4 = inlined_call_operand.vmem [shape: bf16[2,4,9,9,96], index: 4, kind: input, shape index: {}]   ;;  %s7822_s5 = inlined_call_operand.vmem [shape: bf16[3,3,96,96], index: 5, kind: input, shape index: {}]   ;;  %s7823_s6 = inlined_call_operand.vmem [shape: f32[1,96], index: 6, kind: input, shape index: {}]   ;;  %s7824_s7 = inlined_call_operand.vmem [shape: f32[1,96], index: 7, kind: input, shape index: {}]   ;;  %s7825_s8 = inlined_call_operand.vmem [shape: f32[2,7,7,484], index: 8, kind: output, shape index: {}]  }
   0x1 LB: > { %s5117_s28 = sadd.s32 4294967295, %s6493_s27   ;;  %p5121_p0 = scmp.ge.s32.totalorder %s6493_s27, 1  ;;  %s6493_s27 = sphi %s6543_s27, %s18_s27  }
   0x2   : > { %p272_p1 = scmp.lt.s32.totalorder %s6493_s27, 3 }
   0x4   : > { %p273_p2 = pnand %p5121_p0, %p272_p1 }
   0x5   : > { %v335_v0 = vld [vmem:[%s7818_s1] sm:$0x3f] (!%p273_p2)  ;;  %v372_v1 = vlaneseq (!%p273_p2)  ;;  %p311_p3 = scmp.lt.s32.totalorder (!%p273_p2), %s5117_s28, 1  ;;  %v6495_v2 = vmov (!%p273_p2), 1983009808   ;;  %v6496_v6 = vmov (!%p273_p2), 0  }
   0x6   : > { %276 = sbr.rel (%p273_p2) target bundleno = 560 (0x230), region = 52  ;;  %v370_v3 = vunpack.c.l.s4 (!%p273_p2), %v6495_v2  ;;  %v6557_v4 = vld [vmem:[%s7818_s1 + $0xc] sm:$0x3f] (!%p273_p2)  ;;  %439 = vmatprep.mubr.bf16.mxu0 (!%p273_p2), %v6496_v6  ;;  %v563_v8 = vcombine.high (!%p273_p2), %v335_v0, %v335_v0  ;;  %v5133_v9 = vld [vmem:[%s7818_s1 + $0x6] sm:$0x3f] (!%p273_p2)  ;;  %vm397_vm0 = vcmask (!%p273_p2), 1041408  }
   0x7   : > { %v6559_v5 = vshrl.u32 (!%p273_p2), %v372_v1, 7  ;;  %v881_v10 = vcombine.high (!%p273_p2), %v6557_v4, %v6557_v4  ;;  %v6573_v11 = vld [vmem:[%s7818_s1 + $0x12] sm:$0x3f] (!%p273_p2)  ;;  %v368_v13 = vcombine.high (!%p273_p2), %v5133_v9, %v5133_v9  ;;  %vm384_vm1 = vcmask (!%p273_p2), 31744   ;;  %v6595_v18 = vld [vmem:[%s7818_s1 + $0x18] sm:$0x3f] (!%p273_p2) }
   0x8   : > { %v371_v7 = vunpack.c.0.s8 (!%p273_p2), %v370_v3  ;;  %v1106_v17 = vcombine.high (!%p273_p2), %v6573_v11, %v6573_v11  ;;  %vm751_vm2 = vsmask.f32 (!%p273_p2), 3328  ;;  %vm752_vm3 = vsmask.f32 (!%p273_p2), 7440  ;;  %s6497_s14 = smov (!%p273_p2), 96  }
   0x9   : > { %v1331_v30 = vcombine.high (!%p273_p2), %v6595_v18, %v6595_v18  ;;  %vm6654_vm4 = vmor (!%p273_p2), %vm751_vm2, %vm752_vm3  ;;  %vm2862_vm5 = vcmask (!%p273_p2), 785408   ;;  %vm5042_vm6 = vcmask (!%p273_p2), 817152  }
   0xa   : > { %v6576_v12 = vsub.s32 (!%p273_p2), %v371_v7, %v6559_v5 }
   0xc   : > { %v577_v14 = vrot.slane (!%p273_p2), %v563_v8, %v6576_v12  ;;  %v375_v15 = vrot.slane (!%p273_p2), %v5133_v9, %v6576_v12  ;;  %v6598_v19 = vrot.slane (!%p273_p2), %v335_v0, %v6576_v12  ;;  %v895_v21 = vrot.slane (!%p273_p2), %v881_v10, %v6576_v12 }
   0xd   : > { %s7829_s28 = smov (!%p311_p3, %s5117_s28), 1  ;;  %v382_v25 = vrot.slane %v368_v13, %v6576_v12  ;;  %v1120_v29 = vrot.slane %v1106_v17, %v6576_v12  ;;  %v6645_v47 = vrot.slane %v1331_v30, %v6576_v12 }
   0xe   : > { %s6337_s13 = smul.u32 288, %s7829_s28  ;;  %6329 = vmatprep.subr.msk.bf16.mxu1 %vm397_vm0, %v577_v14  ;;  %v598_v22 = vsel %vm397_vm0, %v577_v14, 0  ;;  %v383_v23 = vcombine.high %v375_v15, %v375_v15  ;;  %v399_v24 = vsel %vm397_vm0, %v375_v15, 0  ;;  %v916_v27 = vsel %vm397_vm0, %v895_v21, 0 }
   0xf   : > { %5815 = vmatpush3.bf16.msra.mxu1 %v598_v22  ;;  %v405_v31 = vsel %vm397_vm0, %v382_v25, 0  ;;  %v578_v33 = vcombine.high %v6598_v19, %v6598_v19  ;;  %v1141_v17 = vsel %vm397_vm0, %v1120_v29, 0 }
  0x10   : > { %s6583_s18 = scalar_lea.vmem %s7817_s0, %s6337_s13  ;;  %5138 = vmatprep.subr.msk.bf16.mxu0 %vm397_vm0, %v383_v23  ;;  %6330 = vmatprep.subr.msk.bf16.mxu1 %vm397_vm0, %v895_v21  ;;  %s6857_s9 = scalar_lea.vmem %s7821_s4, %s6337_s13 }
  0x11   : > { %v6588_v16 = vld [vmem:[%s6583_s18] ss:$8 sps:$4 sm:$0xff]   ;;  %v6601_v20 = vld [vmem:[%s6583_s18 + $0x10] ss:$8 sps:$4 sm:$0xff]   ;;  %408 = vmatpush1.bf16.msra.mxu0 %v399_v24  ;;  %v736_v34 = vld [vmem:[%s6583_s18 + $0x4] sm:$0x1] }
  0x12   : > { %5816 = vmatprep.mubr.msk.bf16.mxu1 %vm384_vm1, %v6588_v16  ;;  %v6611_v26 = vld [vmem:[%s6583_s18 + $0x48] ss:$8 sps:$4 sm:$0xff]   ;;  %6328 = vmatprep.subr.msk.bf16.mxu0 %vm397_vm0, %v382_v25  ;;  %v735_v32 = vld [vmem:[%s6583_s18] sm:$0xf]  ;;  %v738_v36 = vld [vmem:[%s6583_s18 + $0xc] sm:$0x1] }
  0x13   : > { %v6617_v28 = vld [vmem:[%s6583_s18 + $0x20] ss:$8 sps:$4 sm:$0xff]   ;;  %5817 = vmatmul.mubr.msk.bf16.vlgmr.msra.gmra.mrb[0].mxu1 %vm384_vm1, %v6601_v20  ;;  %v6637_v37 = vld [vmem:[%s6583_s18 + $0x30] ss:$8 sps:$4 sm:$0xff]   ;;  %v755_v38 = vshrl.u32 %v735_v32, 16  ;;  %v758_v39 = vshll.u32 %v735_v32, 16 }
  0x14   : > { %5825 = vmatpush3.bf16.msra.mxu1 %v916_v27  ;;  %5820 = vmatprep.mubr.msk.bf16.mxu1 %vm384_vm1, %v6617_v28  ;;  %v737_v35 = vld [vmem:[%s6583_s18 + $0x8] sm:$0xf]  ;;  %v764_v40 = vshll.u32 %v736_v34, 16  ;;  %v739_v42 = vld [vmem:[%s6583_s18 + $0x10] sm:$0xf]  ;;  %v778_v44 = vshll.u32 %v738_v36, 16 }
  0x15   : > { %5139 = vmatmul.mubr.msk.bf16.vlgmr.msra.gmra.mrb[0].mxu0 %vm384_vm1, %v6611_v26  ;;  %v769_v41 = vshrl.u32 %v737_v35, 16  ;;  %6331 = vmatprep.subr.msk.bf16.mxu1 %vm397_vm0, %v1120_v29  ;;  %v772_v43 = vshll.u32 %v737_v35, 16  ;;  %v740_v45 = vld [vmem:[%s6583_s18 + $0x14] sm:$0x1]  ;;  %v741_v46 = vld [vmem:[%s6583_s18 + $0x18] sm:$0xf] }
  0x16   : > { %5805 = vmatpush3.bf16.msra.mxu0 %v405_v31  ;;  %449 = vmatprep.mubr.bf16.mxu0 %v6496_v6  ;;  %v6648_v48 = vld [vmem:[%s6583_s18 + $0x58] ss:$8 sps:$4 sm:$0xff]   ;;  %v757_v49 = vrot.slane %v755_v38, 4  ;;  %v760_v50 = vrot.slane %v758_v39, 5  ;;  %v766_v51 = vrot.slane %v764_v40, 5  ;;  %v780_v55 = vrot.slane %v778_v44, 5 }
  0x17   : > { %v771_v52 = vrot.slane %v769_v41, 4  ;;  %v742_v53 = vld [vmem:[%s6583_s18 + $0x1c] sm:$0x1]  ;;  %5151 = vmatprep.subr.msk.bf16.mxu0 %vm397_vm0, %v578_v33  ;;  %v774_v54 = vrot.slane %v772_v43, 5  ;;  %v783_v56 = vshrl.u32 %v739_v42, 16  ;;  %v786_v57 = vshll.u32 %v739_v42, 16 }
  0x18   : > { %v761_v58 = vor.u32 %v760_v50, %v757_v49  ;;  %v792_v59 = vshll.u32 %v740_v45, 16  ;;  %v797_v60 = vshrl.u32 %v741_v46, 16  ;;  %v800_v61 = vshll.u32 %v741_v46, 16  ;;  %v743_v10 = vld [vmem:[%s6583_s18 + $0x20] sm:$0xf] }
  0x19   : > { %v775_v63 = vor.u32 %v774_v54, %v771_v52  ;;  %v785_v0 = vrot.slane %v783_v56, 4  ;;  %v788_v1 = vrot.slane %v786_v57, 5  ;;  %v806_v2 = vshll.u32 %v742_v53, 16  ;;  %v744_v21 = vld [vmem:[%s6583_s18 + $0x24] sm:$0x1] }
  0x1a   : > { %v762_v3 = vrot.slane %v761_v58, 4  ;;  %v794_v7 = vrot.slane %v792_v59, 5  ;;  %v799_v8 = vrot.slane %v797_v60, 4  ;;  %v802_v9 = vrot.slane %v800_v61, 5  ;;  %v745_v24 = vld [vmem:[%s6583_s18 + $0x28] sm:$0xf] }
  0x1b   : > { %5821 = vmatmul.mubr.msk.bf16.gmra.mrb[4].mxu1 %vm384_vm1, %v6637_v37  ;;  %v776_v13 = vrot.slane %v775_v63, 4  ;;  %v789_v14 = vor.u32 %v788_v1, %v785_v0  ;;  %v808_v15 = vrot.slane %v806_v2, 5  ;;  %v746_v25 = vld [vmem:[%s6583_s18 + $0x2c] sm:$0x1]  ;;  %v811_v27 = vshrl.u32 %v743_v10, 16 }
  0x1c   : > { %v767_v22 = vsel %vm6654_vm4, %v762_v3, %v766_v51  ;;  %v803_v23 = vor.u32 %v802_v9, %v799_v8  ;;  %v814_v30 = vshll.u32 %v743_v10, 16  ;;  %v820_v29 = vshll.u32 %v744_v21, 16  ;;  %v747_v34 = vld [vmem:[%s6583_s18 + $0x30] sm:$0xf]  ;;  %v748_v41 = vld [vmem:[%s6583_s18 + $0x34] sm:$0x1] }
  0x1d   : > { %5140 = vmatmul.mubr.msk.bf16.gmra.mrb[4].mxu0 %vm384_vm1, %v6648_v48  ;;  %v781_v31 = vsel %vm6654_vm4, %v776_v13, %v780_v55  ;;  %v790_v32 = vrot.slane %v789_v14, 4  ;;  %v825_v33 = vshrl.u32 %v745_v24, 16  ;;  %v6676_v38 = vld [vmem:[%s6583_s18 + $0x68] ss:$8 sps:$4 sm:$0xff]   ;;  %v813_v39 = vrot.slane %v811_v27, 4 }
  0x1e   : > { %459 = vmatprep.mubr.bf16.mxu0 %v6496_v6  ;;  %v6673_v35 = vcombine.low %v767_v22, %v781_v31  ;;  %v804_v36 = vrot.slane %v803_v23, 4  ;;  %v816_v40 = vrot.slane %v814_v30, 5  ;;  %v822_v43 = vrot.slane %v820_v29, 5  ;;  %v749_v46 = vld [vmem:[%s6583_s18 + $0x38] sm:$0xf] }
  0x1f   : > { %v795_v42 = vsel %vm6654_vm4, %v790_v32, %v794_v7  ;;  %v827_v44 = vrot.slane %v825_v33, 4  ;;  %v828_v45 = vshll.u32 %v745_v24, 16  ;;  %v834_v51 = vshll.u32 %v746_v25, 16  ;;  %v750_v52 = vld [vmem:[%s6583_s18 + $0x3c] sm:$0x1] }
  0x20   : > { %5826 = vmatprep.mubr.msk.bf16.mxu1 %vm384_vm1, %v6673_v35  ;;  %v809_v49 = vsel %vm6654_vm4, %v804_v36, %v808_v15  ;;  %v817_v50 = vor.u32 %v816_v40, %v813_v39  ;;  %v839_v53 = vshrl.u32 %v747_v34, 16  ;;  %v842_v56 = vshll.u32 %v747_v34, 16  ;;  %v6376_v23 = vld [vmem:[%s6583_s18 + $0x78] ss:$8 sps:$4 sm:$0xff]   ;;  %v5218_v39 = vld [vmem:[%s6583_s18 + $0x90] sm:$0xf] }
  0x21   : > { %v6687_v54 = vcombine.low %v795_v42, %v809_v49  ;;  %v830_v55 = vrot.slane %v828_v45, 5  ;;  %v848_v57 = vshll.u32 %v748_v41, 16  ;;  %v853_v60 = vshrl.u32 %v749_v46, 16  ;;  %v6710_v30 = vld [vmem:[%s6583_s18 + $0x90] ss:$8 sps:$4 sm:$0xff]  }
  0x22   : > { %v818_v58 = vrot.slane %v817_v50, 4  ;;  %v841_v59 = vrot.slane %v839_v53, 4  ;;  %v836_v63 = vrot.slane %v834_v51, 5  ;;  %v844_v0 = vrot.slane %v842_v56, 5  ;;  %v6720_v32 = vld [vmem:[%s7818_s1 + $0x1e] sm:$0x3f] }
  0x23   : > { %5827 = vmatmul.mubr.msk.bf16.vlgmr.msra.gmra.mrb[0].mxu1 %vm384_vm1, %v6687_v54  ;;  %v831_v61 = vor.u32 %v830_v55, %v827_v44  ;;  %v856_v1 = vshll.u32 %v749_v46, 16  ;;  %v850_v2 = vrot.slane %v848_v57, 5  ;;  %v855_v3 = vrot.slane %v853_v60, 4  ;;  %v6731_v34 = vld [vmem:[%s6583_s18 + $0xa0] ss:$8 sps:$4 sm:$0xff]  }
  0x24   : > { %5835 = vmatpush3.bf16.msra.mxu1 %v1141_v17  ;;  %v862_v7 = vshll.u32 %v750_v52, 16  ;;  %v823_v8 = vsel %vm6654_vm4, %v818_v58, %v822_v43  ;;  %v845_v10 = vor.u32 %v844_v0, %v841_v59  ;;  %v888_v29 = vrot.slane %v6557_v4, %v6576_v12  ;;  %v5220_v40 = vld [vmem:[%s6583_s18 + $0x98] sm:$0xf]  ;;  %v5221_v46 = vld [vmem:[%s6583_s18 + $0x9c] sm:$0x1] }
  0x25   : > { %5141 = vmatmul.mubr.msk.bf16.gmra.mrb[8].mxu0 %vm384_vm1, %v6676_v38  ;;  %v832_v9 = vrot.slane %v831_v61, 4  ;;  %v858_v13 = vrot.slane %v856_v1, 5  ;;  %6332 = vmatprep.subr.msk.bf16.mxu1 %vm397_vm0, %v6645_v47  ;;  %v1667_v33 = vcombine.high %v6720_v32, %v6720_v32  ;;  %v6738_v41 = vld [vmem:[%s6583_s18 + $0xb0] ss:$8 sps:$4 sm:$0xff]   ;;  %v1366_v4 = vsel %vm397_vm0, %v6645_v47, 0 }
  0x26   : > { %469 = vmatprep.mubr.bf16.mxu0 %v6496_v6  ;;  %v846_v15 = vrot.slane %v845_v10, 4  ;;  %v864_v21 = vrot.slane %v862_v7, 5  ;;  %v896_v36 = vcombine.high %v888_v29, %v888_v29  ;;  %v1544_v43 = vshll.u32 %v5218_v39, 16  ;;  %v5219_v47 = vld [vmem:[%s6583_s18 + $0x94] sm:$0x1] }
  0x27   : > { %v837_v14 = vsel %vm6654_vm4, %v832_v9, %v836_v63  ;;  %v859_v17 = vor.u32 %v858_v13, %v855_v3  ;;  %v1681_v42 = vrot.slane %v1667_v33, %v6576_v12  ;;  %v1555_v44 = vshrl.u32 %v5220_v40, 16  ;;  %v5222_v49 = vld [vmem:[%s6583_s18 + $0xa0] sm:$0xf]  ;;  %v5224_v57 = vld [vmem:[%s6583_s18 + $0xa8] sm:$0xf] }
  0x28   : > { %v6700_v22 = vcombine.low %v823_v8, %v837_v14  ;;  %v851_v24 = vsel %vm6654_vm4, %v846_v15, %v850_v2  ;;  %v1558_v45 = vshll.u32 %v5220_v40, 16  ;;  %v6765_v50 = vld [vmem:[%s6583_s18 + $0xd8] ss:$8 sps:$4 sm:$0xff]   ;;  %v1546_v52 = vrot.slane %v1544_v43, 5  ;;  %v6769_v59 = vld [vmem:[%s6583_s18 + $0xa4] sm:$0x1] }
  0x29   : > { %v860_v25 = vrot.slane %v859_v17, 4  ;;  %v1557_v53 = vrot.slane %v1555_v44, 4  ;;  %v1550_v56 = vshll.u32 %v5219_v47, 16  ;;  %v1564_v58 = vshll.u32 %v5221_v46, 16  ;;  %v5226_v0 = vld [vmem:[%s6583_s18 + $0xb0] sm:$0xf] }
  0x2a   : > { %5830 = vmatprep.mubr.msk.bf16.mxu1 %vm384_vm1, %v6700_v22  ;;  %v1560_v55 = vrot.slane %v1558_v45, 5  ;;  %v1569_v60 = vshrl.u32 %v5222_v49, 16  ;;  %v1572_v61 = vshll.u32 %v5222_v49, 16  ;;  %v1583_v3 = vshrl.u32 %v5224_v57, 16  ;;  %v5228_v8 = vld [vmem:[%s6583_s18 + $0xb8] sm:$0xf] }
  0x2b   : > { %v865_v27 = vsel %vm6654_vm4, %v860_v25, %v864_v21  ;;  %v1586_v7 = vshll.u32 %v5224_v57, 16  ;;  %v910_v9 = vsel %vm397_vm0, %v888_v29, 0  ;;  %v1702_v10 = vsel %vm397_vm0, %v1681_v42, 0  ;;  %v5227_v44 = vld [vmem:[%s6583_s18 + $0xb4] sm:$0x1] }
  0x2c   : > { %v6712_v31 = vcombine.low %v851_v24, %v865_v27  ;;  %v1561_v2 = vor.u32 %v1560_v55, %v1557_v53  ;;  %v1552_v13 = vrot.slane %v1550_v56, 5  ;;  %v6783_v14 = vrot.slane %v6573_v11, %v6576_v12  ;;  %v6789_v24 = vld [vmem:[%s6583_s18 + $0xe8] ss:$8 sps:$4 sm:$0xff]   ;;  %v5229_v53 = vld [vmem:[%s6583_s18 + $0xbc] sm:$0x1] }
  0x2d   : > { %5142 = vmatmul.mubr.msk.bf16.gmra.mrb[12].mxu0 %vm384_vm1, %v6376_v23  ;;  %v1566_v15 = vrot.slane %v1564_v58, 5  ;;  %v1578_v17 = vshll.u32 %v6769_v59, 16  ;;  %v1597_v21 = vshrl.u32 %v5226_v0, 16  ;;  %v1571_v25 = vrot.slane %v1569_v60, 4 }
  0x2e   : > { %5806 = vmatprep.mubr.msk.bf16.mxu0 %vm384_vm1, %v6611_v26  ;;  %5831 = vmatmul.mubr.msk.bf16.gmra.mrb[4].mxu1 %vm384_vm1, %v6712_v31  ;;  %v592_v26 = vsel %vm397_vm0, %v6598_v19, 0  ;;  %v1541_v19 = vshrl.u32 %v5218_v39, 16  ;;  %v1574_v27 = vrot.slane %v1572_v61, 5  ;;  %v1611_v29 = vshrl.u32 %v5228_v8, 16  ;;  %v5225_v39 = vld [vmem:[%s6583_s18 + $0xac] sm:$0x1] }
  0x2f   : > { %5836 = vmatprep.mubr.msk.bf16.mxu1 %vm384_vm1, %v6710_v30  ;;  %v1614_v33 = vshll.u32 %v5228_v8, 16  ;;  %v1585_v40 = vrot.slane %v1583_v3, 4  ;;  %v1121_v43 = vcombine.high %v6783_v14, %v6783_v14  ;;  %v1599_v45 = vrot.slane %v1597_v21, 4  ;;  %v6813_v3 = vld [vmem:[%s6583_s18 + $0x108] ss:$8 sps:$4 sm:$0xff]  }
  0x30   : > { %v1543_v51 = vrot.slane %v1541_v19, 4  ;;  %v5232_v19 = vld [vmem:[%s6583_s18 + $0xc8] sm:$0xf]  ;;  %v1613_v49 = vrot.slane %v1611_v29, 4  ;;  %v1592_v57 = vshll.u32 %v5225_v39, 16 }
  0x31   : > { %v1639_v60 = vshrl.u32 %v5232_v19, 16  ;;  %v1642_v61 = vshll.u32 %v5232_v19, 16  ;;  %v5233_v21 = vld [vmem:[%s6583_s18 + $0xcc] sm:$0x1] }
  0x32   : > { %v1547_v1 = vor.u32 %v1546_v52, %v1543_v51  ;;  %v1616_v51 = vrot.slane %v1614_v33, 5  ;;  %v1575_v52 = vor.u32 %v1574_v27, %v1571_v25 }
  0x33   : > { %v1641_v27 = vrot.slane %v1639_v60, 4  ;;  %v1644_v29 = vrot.slane %v1642_v61, 5  ;;  %v6879_v60 = vrot.slane %v6595_v18, %v6576_v12 }
  0x34   : > { %v1548_v11 = vrot.slane %v1547_v1, 4  ;;  %v1617_v1 = vor.u32 %v1616_v51, %v1613_v49 }
  0x35   : > { %5807 = vmatmul.mubr.msk.bf16.vlgmr.msra.gmra.mrb[16].mxu0 %vm384_vm1, %v6648_v48  ;;  %v6756_v48 = vld [vmem:[%s7818_s1 + $0x24] sm:$0x3f]  ;;  %v1645_v19 = vor.u32 %v1644_v29, %v1641_v27 }
  0x36   : > { %601 = vmatpush1.bf16.msra.mxu0 %v592_v26  ;;  %5810 = vmatprep.mubr.msk.bf16.mxu0 %vm384_vm1, %v6676_v38  ;;  %v6759_v38 = vld [vmem:[%s6583_s18 + $0xc0] ss:$8 sps:$4 sm:$0xff]   ;;  %v1892_v63 = vcombine.high %v6756_v48, %v6756_v48  ;;  %v1553_v55 = vsel %vm6654_vm4, %v1548_v11, %v1552_v13  ;;  %v1594_v13 = vrot.slane %v1592_v57, 5  ;;  %v1618_v11 = vrot.slane %v1617_v1, 4 }
  0x37   : > { %5837 = vmatmul.mubr.msk.bf16.vlgmr.msra.gmra.mrb[0].mxu1 %vm384_vm1, %v6731_v34  ;;  %5165 = vmatprep.subr.msk.bf16.mxu0 %vm397_vm0, %v896_v36  ;;  %v6385_v26 = vld [vmem:[%s6583_s18 + $0xf8] ss:$8 sps:$4 sm:$0xff]   ;;  %v1562_v36 = vrot.slane %v1561_v2, 4  ;;  %v1620_v2 = vshll.u32 %v5229_v53, 16  ;;  %v1135_v1 = vsel %vm397_vm0, %v6783_v14, 0 }
  0x38   : > { %5845 = vmatpush3.bf16.msra.mxu1 %v1366_v4  ;;  %5840 = vmatprep.mubr.msk.bf16.mxu1 %vm384_vm1, %v6738_v41  ;;  %v1588_v4 = vrot.slane %v1586_v7, 5  ;;  %v1906_v46 = vrot.slane %v1892_v63, %v6576_v12  ;;  %v1580_v7 = vrot.slane %v1578_v17, 5  ;;  %v6825_v17 = vld [vmem:[%s7818_s1 + $0x2a] sm:$0x3f] }
  0x39   : > { %6333 = vmatprep.subr.msk.bf16.mxu1 %vm397_vm0, %v1681_v42  ;;  %v5230_v42 = vld [vmem:[%s6583_s18 + $0xc0] sm:$0xf]  ;;  %v1567_v56 = vsel %vm6654_vm4, %v1562_v36, %v1566_v15  ;;  %v5231_v15 = vld [vmem:[%s6583_s18 + $0xc4] sm:$0x1]  ;;  %v1622_v36 = vrot.slane %v1620_v2, 5 }
  0x3a   : > { %v1625_v58 = vshrl.u32 %v5230_v42, 16  ;;  %v1628_v59 = vshll.u32 %v5230_v42, 16  ;;  %v6815_v8 = vcombine.low %v1553_v55, %v1567_v56  ;;  %v1634_v39 = vshll.u32 %v5231_v15, 16  ;;  %v6391_v2 = vld [vmem:[%s6583_s18 + $0x28] ss:$8 sps:$4 sm:$0xff]  }
  0x3b   : > { %v1646_v55 = vrot.slane %v1645_v19, 4  ;;  %v1927_v56 = vsel %vm397_vm0, %v1906_v46, 0  ;;  %v5298_v15 = vld [vmem:[%s6583_s18 + $0x20] sm:$0xf]  ;;  %v5299_v19 = vld [vmem:[%s6583_s18 + $0x24] sm:$0x1] }
  0x3c   : > { %v1630_v25 = vrot.slane %v1628_v59, 5  ;;  %v1636_v49 = vrot.slane %v1634_v39, 5  ;;  %v5308_v59 = vld [vmem:[%s7818_s1 + $0x30] sm:$0x3f]  ;;  %v2369_v29 = vshrl.u32 %v5298_v15, 16 }
  0x3d   : > { %5811 = vmatmul.mubr.msk.bf16.gmra.mrb[20].mxu0 %vm384_vm1, %v6376_v23  ;;  %v1600_v23 = vshll.u32 %v5226_v0, 16  ;;  %v1606_v0 = vshll.u32 %v5227_v44, 16  ;;  %v1623_v44 = vsel %vm6654_vm4, %v1618_v11, %v1622_v36  ;;  %v2453_v61 = vcombine.high %v5308_v59, %v5308_v59  ;;  %v6392_v39 = vld [vmem:[%s6583_s18 + $0x38] ss:$8 sps:$4 sm:$0xff]  }
  0x3e   : > { %632 = vmatprep.mubr.bf16.mxu0 %v6496_v6 }
  0x3f   : > { %5841 = vmatmul.mubr.msk.bf16.gmra.mrb[4].mxu1 %vm384_vm1, %v6759_v38  ;;  %v1602_v47 = vrot.slane %v1600_v23, 5  ;;  %v1627_v23 = vrot.slane %v1625_v58, 4  ;;  %v6388_v58 = vld [vmem:[%s6583_s18 + $0x8] ss:$8 sps:$4 sm:$0xff]  }
  0x40   : > { %5846 = vmatprep.mubr.msk.bf16.mxu1 %vm384_vm1, %v6765_v50 }
  0x41   : > { %v1603_v63 = vor.u32 %v1602_v47, %v1599_v45  ;;  %v1631_v42 = vor.u32 %v1630_v25, %v1627_v23  ;;  %v2117_v45 = vcombine.high %v6825_v17, %v6825_v17 }
  0x43   : > { %v1604_v33 = vrot.slane %v1603_v63, 4  ;;  %v1632_v53 = vrot.slane %v1631_v42, 4  ;;  %v5292_v63 = vld [vmem:[%s6583_s18 + $0x8] sm:$0xf] }
  0x44   : > { %v5300_v42 = vld [vmem:[%s6583_s18 + $0x28] sm:$0xf] }
  0x45   : > { %5152 = vmatmul.mubr.msk.bf16.vlgmr.msra.gmra.mrb[0].mxu0 %vm384_vm1, %v6588_v16  ;;  %v1589_v16 = vor.u32 %v1588_v4, %v1585_v40  ;;  %v1648_v40 = vshll.u32 %v5233_v21, 16  ;;  %v2467_v21 = vrot.slane %v2453_v61, %v6576_v12 }
  0x46   : > { %919 = vmatpush1.bf16.msra.mxu0 %v910_v9  ;;  %642 = vmatprep.mubr.bf16.mxu0 %v6496_v6  ;;  %v1576_v9 = vrot.slane %v1575_v52, 4 }
  0x47   : > { %5847 = vmatmul.mubr.msk.bf16.vlgmr.msra.gmra.mrb[0].mxu1 %vm384_vm1, %v6789_v24  ;;  %5187 = vmatprep.subr.msk.bf16.mxu0 %vm397_vm0, %v1121_v43  ;;  %v1650_v51 = vrot.slane %v1648_v40, 5 }
  0x48   : > { %5855 = vmatpush3.bf16.msra.mxu1 %v1702_v10  ;;  %5850 = vmatprep.mubr.msk.bf16.mxu1 %vm384_vm1, %v6385_v26  ;;  %v1590_v10 = vrot.slane %v1589_v16, 4  ;;  %v1608_v26 = vrot.slane %v1606_v0, 5  ;;  %v2131_v16 = vrot.slane %v2117_v45, %v6576_v12  ;;  %v6389_v0 = vld [vmem:[%s6583_s18 + $0x18] ss:$8 sps:$4 sm:$0xff]   ;;  %v2371_v45 = vrot.slane %v2369_v29, 4 }
  0x49   : > { %6334 = vmatprep.subr.msk.bf16.mxu1 %vm397_vm0, %v1906_v46  ;;  %v1651_v46 = vsel %vm6654_vm4, %v1646_v55, %v1650_v51  ;;  %v6393_v51 = vld [vmem:[%s6583_s18 + $0x50] ss:$8 sps:$4 sm:$0xff]   ;;  %v2386_v55 = vshll.u32 %v5300_v42, 16 }
  0x4a   : > { %v1595_v4 = vsel %vm6654_vm4, %v1590_v10, %v1594_v13  ;;  %v1609_v43 = vsel %vm6654_vm4, %v1604_v33, %v1608_v26  ;;  %v2327_v10 = vshrl.u32 %v5292_v63, 16  ;;  %v2330_v13 = vshll.u32 %v5292_v63, 16  ;;  %v5293_v33 = vld [vmem:[%s6583_s18 + $0xc] sm:$0x1]  ;;  %v5295_v26 = vld [vmem:[%s6583_s18 + $0x14] sm:$0x1] }
  0x4b   : > { %v6843_v52 = vcombine.low %v1609_v43, %v1623_v44  ;;  %v2152_v18 = vsel %vm397_vm0, %v2131_v16, 0  ;;  %v2378_v63 = vshll.u32 %v5299_v19, 16 }
  0x4c   : > { %v2329_v11 = vrot.slane %v2327_v10, 4  ;;  %v2332_v36 = vrot.slane %v2330_v13, 5  ;;  %v2488_v10 = vsel %vm397_vm0, %v2467_v21, 0 }
  0x4d   : > { %5153 = vmatmul.mubr.msk.bf16.gmra.mrb[4].mxu0 %vm384_vm1, %v6601_v20  ;;  %v1581_v20 = vsel %vm6654_vm4, %v1576_v9, %v1580_v7  ;;  %v5296_v7 = vld [vmem:[%s6583_s18 + $0x18] sm:$0xf]  ;;  %v1346_v9 = vcombine.high %v6879_v60, %v6879_v60 }
  0x4e   : > { %652 = vmatprep.mubr.bf16.mxu0 %v6496_v6  ;;  %v6841_v47 = vcombine.low %v1581_v20, %v1595_v4  ;;  %v2355_v25 = vshrl.u32 %v5296_v7, 16  ;;  %v2358_v27 = vshll.u32 %v5296_v7, 16  ;;  %v5297_v4 = vld [vmem:[%s6583_s18 + $0x1c] sm:$0x1] }
  0x4f   : > { %5851 = vmatmul.mubr.msk.bf16.gmra.mrb[4].mxu1 %vm384_vm1, %v6813_v3  ;;  %v2364_v61 = vshll.u32 %v5297_v4, 16 }
  0x50   : > { %5856 = vmatprep.mubr.msk.bf16.mxu1 %vm384_vm1, %v6815_v8  ;;  %v2357_v43 = vrot.slane %v2355_v25, 4  ;;  %v2360_v44 = vrot.slane %v2358_v27, 5 }
  0x51   : > { %v2366_v29 = vrot.slane %v2364_v61, 5 }
  0x55   : > { %5154 = vmatmul.mubr.msk.bf16.gmra.mrb[8].mxu0 %vm384_vm1, %v6617_v28  ;;  %v1637_v28 = vsel %vm6654_vm4, %v1632_v53, %v1636_v49  ;;  %v2383_v53 = vshrl.u32 %v5300_v42, 16 }
  0x56   : > { %662 = vmatprep.mubr.bf16.mxu0 %v6496_v6  ;;  %v6866_v57 = vcombine.low %v1637_v28, %v1651_v46  ;;  %v5301_v28 = vld [vmem:[%s6583_s18 + $0x2c] sm:$0x1]  ;;  %v5302_v46 = vld [vmem:[%s6583_s18 + $0x30] sm:$0xf] }
  0x57   : > { %5857 = vmatmul.mubr.msk.bf16.vlgmr.msra.gmra.mrb[0].mxu1 %vm384_vm1, %v6841_v47  ;;  %v2397_v7 = vshrl.u32 %v5302_v46, 16 }
  0x58   : > { %5865 = vmatpush3.bf16.msra.mxu1 %v1927_v56  ;;  %5860 = vmatprep.mubr.msk.bf16.mxu1 %vm384_vm1, %v6843_v52  ;;  %v2336_v56 = vshll.u32 %v5293_v33, 16 }
  0x59   : > { %6335 = vmatprep.subr.msk.bf16.mxu1 %vm397_vm0, %v2131_v16  ;;  %v2350_v16 = vshll.u32 %v5295_v26, 16  ;;  %v2399_v4 = vrot.slane %v2397_v7, 4 }
  0x5a   : > { %v2338_v13 = vrot.slane %v2336_v56, 5 }
  0x5d   : > { %5155 = vmatmul.mubr.msk.bf16.gmra.mrb[12].mxu0 %vm384_vm1, %v6637_v37  ;;  %v5294_v37 = vld [vmem:[%s6583_s18 + $0x10] sm:$0xf] }
  0x5e   : > { %950 = vmatprep.mubr.bf16.mxu0 %v6496_v6  ;;  %v2341_v23 = vshrl.u32 %v5294_v37, 16  ;;  %v2344_v14 = vshll.u32 %v5294_v37, 16 }
  0x5f   : > { %5861 = vmatmul.mubr.msk.bf16.gmra.mrb[4].mxu1 %vm384_vm1, %v6866_v57 }
  0x60   : > { %5866 = vmatprep.mubr.msk.bf16.mxu1 %vm384_vm1, %v6388_v58  ;;  %v2343_v40 = vrot.slane %v2341_v23, 4  ;;  %v2346_v20 = vrot.slane %v2344_v14, 5  ;;  %v2333_v58 = vor.u32 %v2332_v36, %v2329_v11  ;;  %v5304_v23 = vld [vmem:[%s6583_s18 + $0x38] sm:$0xf]  ;;  %v5303_v11 = vld [vmem:[%s6583_s18 + $0x34] sm:$0x1] }
  0x61   : > { %v6396_v14 = vld [vmem:[%s6583_s18 + $0x70] ss:$8 sps:$4 sm:$0xff]   ;;  %v5305_v36 = vld [vmem:[%s6583_s18 + $0x3c] sm:$0x1]  ;;  %v2411_v42 = vshrl.u32 %v5304_v23, 16 }
  0x62   : > { %v2347_v59 = vor.u32 %v2346_v20, %v2343_v40  ;;  %v2334_v25 = vrot.slane %v2333_v58, 4  ;;  %v6398_v40 = vld [vmem:[%s7822_s5] sm:$0xff]  }
  0x63   : > { %v2413_v56 = vrot.slane %v2411_v42, 4  ;;  %v6401_v42 = vld [vmem:[%s7822_s5 + $0x18] sm:$0xff]  }
  0x64   : > { %v2348_v27 = vrot.slane %v2347_v59, 4 }
  0x65   : > { %5166 = vmatmul.mubr.msk.bf16.vlgmr.msra.gmra.mrb[0].mxu0 %vm384_vm1, %v6673_v35  ;;  %v2372_v35 = vshll.u32 %v5298_v15, 16  ;;  %v2352_v15 = vrot.slane %v2350_v16, 5  ;;  %v2420_v16 = vshll.u32 %v5305_v36, 16 }
  0x66   : > { %1144 = vmatpush1.bf16.msra.mxu0 %v1135_v1  ;;  %960 = vmatprep.mubr.bf16.mxu0 %v6496_v6  ;;  %v2388_v1 = vrot.slane %v2386_v55, 5  ;;  %v2406_v55 = vshll.u32 %v5303_v11, 16  ;;  %v6400_v11 = vld [vmem:[%s7822_s5 + $0x10] sm:$0xff]  }
  0x67   : > { %5867 = vmatmul.mubr.msk.bf16.vlgmr.msra.gmra.mrb[0].mxu1 %vm384_vm1, %v6389_v0  ;;  %5209 = vmatprep.subr.msk.bf16.mxu0 %vm397_vm0, %v1346_v9  ;;  %v2374_v49 = vrot.slane %v2372_v35, 5  ;;  %v2361_v0 = vor.u32 %v2360_v44, %v2357_v43  ;;  %v6394_v9 = vld [vmem:[%s6583_s18 + $0x60] ss:$8 sps:$4 sm:$0xff]   ;;  %v2380_v35 = vrot.slane %v2378_v63, 5  ;;  %v5307_v43 = vld [vmem:[%s6583_s18 + $0x44] sm:$0x1] }
  0x68   : > { %5875 = vmatpush3.bf16.msra.mxu1 %v2152_v18  ;;  %5870 = vmatprep.mubr.msk.bf16.mxu1 %vm384_vm1, %v6391_v2  ;;  %v2392_v2 = vshll.u32 %v5301_v28, 16  ;;  %v2400_v18 = vshll.u32 %v5302_v46, 16  ;;  %v2414_v44 = vshll.u32 %v5304_v23, 16  ;;  %v2353_v28 = vsel %vm6654_vm4, %v2348_v27, %v2352_v15 }
  0x69   : > { %6336 = vmatprep.subr.msk.bf16.mxu1 %vm397_vm0, %v2467_v21  ;;  %v2375_v37 = vor.u32 %v2374_v49, %v2371_v45  ;;  %v2362_v33 = vrot.slane %v2361_v0, 4  ;;  %v2434_v59 = vshll.u32 %v5307_v43, 16  ;;  %v3072_v43 = vld [vmem:[%s6857_s9 + $0x4] sm:$0x1] }
  0x6a   : > { %v2394_v20 = vrot.slane %v2392_v2, 5  ;;  %v2402_v19 = vrot.slane %v2400_v18, 5  ;;  %v2416_v58 = vrot.slane %v2414_v44, 5  ;;  %v3074_v44 = vld [vmem:[%s6857_s9 + $0xc] sm:$0x1] }
  0x6b   : > { %v2376_v26 = vrot.slane %v2375_v37, 4  ;;  %v2436_v15 = vrot.slane %v2434_v59, 5 }
  0x6c   : > { %v2403_v46 = vor.u32 %v2402_v19, %v2399_v4  ;;  %v2417_v2 = vor.u32 %v2416_v58, %v2413_v56  ;;  %v3075_v19 = vld [vmem:[%s6857_s9 + $0x10] sm:$0xf]  ;;  %v3078_v58 = vld [vmem:[%s6857_s9 + $0x1c] sm:$0x1] }
  0x6d   : > { %5167 = vmatmul.mubr.msk.bf16.gmra.mrb[4].mxu0 %vm384_vm1, %v6687_v54  ;;  %v2385_v54 = vrot.slane %v2383_v53, 4  ;;  %v3116_v56 = vshrl.u32 %v3075_v19, 16 }
  0x6e   : > { %970 = vmatprep.mubr.bf16.mxu0 %v6496_v6  ;;  %v2404_v37 = vrot.slane %v2403_v46, 4  ;;  %v2418_v23 = vrot.slane %v2417_v2, 4  ;;  %v6403_v2 = vld [vmem:[%s7822_s5 + $0x28] sm:$0xff]  }
  0x6f   : > { %5871 = vmatmul.mubr.msk.bf16.gmra.mrb[4].mxu1 %vm384_vm1, %v6392_v39  ;;  %v5306_v39 = vld [vmem:[%s6583_s18 + $0x40] sm:$0xf]  ;;  %v2389_v21 = vor.u32 %v2388_v1, %v2385_v54  ;;  %v2408_v54 = vrot.slane %v2406_v55, 5  ;;  %v1360_v1 = vsel %vm397_vm0, %v6879_v60, 0  ;;  %v3076_v55 = vld [vmem:[%s6857_s9 + $0x14] sm:$0x1] }
  0x70   : > { %5876 = vmatprep.mubr.msk.bf16.mxu1 %vm384_vm1, %v6393_v51  ;;  %v2425_v45 = vshrl.u32 %v5306_v39, 16  ;;  %v2428_v49 = vshll.u32 %v5306_v39, 16  ;;  %v2339_v51 = vsel %vm6654_vm4, %v2334_v25, %v2338_v13  ;;  %v2422_v13 = vrot.slane %v2420_v16, 5  ;;  %v6402_v16 = vld [vmem:[%s7822_s5 + $0x20] sm:$0xff]  }
  0x71   : > { %v2390_v53 = vrot.slane %v2389_v21, 4  ;;  %v6936_v0 = vcombine.low %v2339_v51, %v2353_v28  ;;  %v2409_v18 = vsel %vm6654_vm4, %v2404_v37, %v2408_v54  ;;  %v3118_v54 = vrot.slane %v3116_v56, 4  ;;  %v6412_v56 = vld [vmem:[%s6857_s9 + $0x30] ss:$8 sps:$4 sm:$0xff]  }
  0x72   : > { %v2427_v61 = vrot.slane %v2425_v45, 4  ;;  %v2430_v63 = vrot.slane %v2428_v49, 5  ;;  %v3077_v49 = vld [vmem:[%s6857_s9 + $0x18] sm:$0xf] }
  0x73   : > { %v2395_v60 = vsel %vm6654_vm4, %v2390_v53, %v2394_v20  ;;  %v6404_v20 = vld [vmem:[%s6857_s9] ss:$8 sps:$4 sm:$0xff]   ;;  %v3130_v28 = vshrl.u32 %v3077_v49, 16  ;;  %v3133_v46 = vshll.u32 %v3077_v49, 16 }
  0x74   : > { %v2431_v7 = vor.u32 %v2430_v63, %v2427_v61  ;;  %v6962_v27 = vcombine.low %v2395_v60, %v2409_v18  ;;  %v3097_v61 = vshll.u32 %v3072_v43, 16  ;;  %v3111_v63 = vshll.u32 %v3074_v44, 16  ;;  %v6405_v60 = vld [vmem:[%s7822_s5 + $0x60] sm:$0xff]  }
  0x75   : > { %5168 = vmatmul.mubr.msk.bf16.gmra.mrb[8].mxu0 %vm384_vm1, %v6700_v22  ;;  %v6397_v22 = vld [vmem:[%s6583_s18 + $0x80] ss:$8 sps:$4 sm:$0xff]  }
  0x76   : > { %980 = vmatprep.mubr.bf16.mxu0 %v6496_v6 }
  0x77   : > { %5877 = vmatmul.mubr.msk.bf16.vlgmr.msra.gmra.mrb[0].mxu1 %vm384_vm1, %v6394_v9  ;;  %v6946_v9 = vrot.slane %v6720_v32, %v6576_v12 }
  0x78   : > { %5885 = vmatpush3.bf16.msra.mxu1 %v2488_v10  ;;  %5880 = vmatprep.mubr.msk.bf16.mxu1 %vm384_vm1, %v6396_v14  ;;  %v2381_v10 = vsel %vm6654_vm4, %v2376_v26, %v2380_v35  ;;  %v2432_v14 = vrot.slane %v2431_v7, 4  ;;  %v3071_v35 = vld [vmem:[%s6857_s9] sm:$0xf]  ;;  %v3073_v26 = vld [vmem:[%s6857_s9 + $0x8] sm:$0xf] }
  0x79   : > { %5914 = vmatprep.subr.bf16.mxu1 %v6398_v40  ;;  %v1682_v25 = vcombine.high %v6946_v9, %v6946_v9  ;;  %v3088_v36 = vshrl.u32 %v3071_v35, 16  ;;  %v3102_v21 = vshrl.u32 %v3073_v26, 16  ;;  %v3105_v4 = vshll.u32 %v3073_v26, 16 }
  0x7b   : > { %v3090_v45 = vrot.slane %v3088_v36, 4  ;;  %v3104_v53 = vrot.slane %v3102_v21, 4  ;;  %v3081_v21 = vld [vmem:[%s6857_s9 + $0x28] sm:$0xf] }
  0x7c   : > { %v3161_v49 = vshll.u32 %v3081_v21, 16 }
  0x7d   : > { %5169 = vmatmul.mubr.msk.bf16.gmra.mrb[12].mxu0 %vm384_vm1, %v6712_v31  ;;  %v2367_v31 = vsel %vm6654_vm4, %v2362_v33, %v2366_v29  ;;  %v6399_v29 = vld [vmem:[%s7822_s5 + $0x8] sm:$0xff]   ;;  %v2437_v33 = vsel %vm6654_vm4, %v2432_v14, %v2436_v15  ;;  %v3079_v15 = vld [vmem:[%s6857_s9 + $0x20] sm:$0xf]  ;;  %v3113_v14 = vrot.slane %v3111_v63, 5  ;;  %v3085_v63 = vld [vmem:[%s6857_s9 + $0x38] sm:$0xf] }
  0x7e   : > { %1175 = vmatprep.mubr.bf16.mxu0 %v6496_v6  ;;  %v6958_v32 = vcombine.low %v2367_v31, %v2381_v10  ;;  %v3132_v31 = vrot.slane %v3130_v28, 4  ;;  %v3135_v10 = vrot.slane %v3133_v46, 5  ;;  %v3144_v36 = vshrl.u32 %v3079_v15, 16  ;;  %v6409_v28 = vld [vmem:[%s7822_s5 + $0x78] sm:$0xff]  }
  0x7f   : > { %5881 = vmatmul.mubr.msk.bf16.gmra.mrb[4].mxu1 %vm384_vm1, %v6397_v22  ;;  %v3119_v22 = vshll.u32 %v3075_v19, 16 }
  0x80   : > { %5886 = vmatprep.mubr.msk.bf16.mxu1 %vm384_vm1, %v6936_v0  ;;  %v3136_v26 = vor.u32 %v3135_v10, %v3132_v31  ;;  %v3146_v44 = vrot.slane %v3144_v36, 4 }
  0x81   : > { %v3121_v7 = vrot.slane %v3119_v22, 5 }
  0x82   : > { %v7033_v43 = vrot.slane %v3136_v26, 4  ;;  %v6414_v26 = vld [vmem:[%s7822_s5 + $0x90] sm:$0xff]  }
  0x85   : > { %5188 = vmatmul.mubr.msk.bf16.vlgmr.msra.gmra.mrb[0].mxu0 %vm384_vm1, %v6710_v30  ;;  %v2423_v30 = vsel %vm6654_vm4, %v2418_v23, %v2422_v13  ;;  %v3139_v13 = vshll.u32 %v3078_v58, 16  ;;  %v3099_v23 = vrot.slane %v3097_v61, 5  ;;  %v3083_v61 = vld [vmem:[%s6857_s9 + $0x30] sm:$0xf] }
  0x86   : > { %1369 = vmatpush1.bf16.msra.mxu0 %v1360_v1  ;;  %1185 = vmatprep.mubr.bf16.mxu0 %v6496_v6  ;;  %v6984_v39 = vcombine.low %v2423_v30, %v2437_v33  ;;  %v3125_v1 = vshll.u32 %v3076_v55, 16  ;;  %v6406_v30 = vld [vmem:[%s6857_s9 + $0x10] ss:$8 sps:$4 sm:$0xff]   ;;  %v3122_v33 = vor.u32 %v3121_v7, %v3118_v54  ;;  %v3084_v54 = vld [vmem:[%s6857_s9 + $0x34] sm:$0x1]  ;;  %v3189_v7 = vshll.u32 %v3085_v63, 16 }
  0x87   : > { %5887 = vmatmul.mubr.msk.bf16.vlgmr.msra.gmra.mrb[0].mxu1 %vm384_vm1, %v6958_v32  ;;  %5239 = vmatprep.subr.msk.bf16.mxu0 %vm397_vm0, %v1682_v25 }
  0x88   : > { %5915 = vmatpush3.bf16.msra.mxu1 %v6398_v40  ;;  %5890 = vmatprep.mubr.msk.bf16.mxu1 %vm384_vm1, %v6962_v27  ;;  %v3091_v40 = vshll.u32 %v3071_v35, 16  ;;  %v3080_v35 = vld [vmem:[%s6857_s9 + $0x24] sm:$0x1]  ;;  %v7031_v19 = vrot.slane %v3122_v33, 4 }
  0x89   : > { %5916 = vmatprep.subr.bf16.mxu1 %v6399_v29 }
  0x8a   : > { %v3093_v51 = vrot.slane %v3091_v40, 5  ;;  %v6410_v40 = vld [vmem:[%s6857_s9 + $0x20] ss:$8 sps:$4 sm:$0xff]  }
  0x8c   : > { %5917 = vmatpush3.bf16.msra.mxu1 %v6399_v29  ;;  %v3094_v59 = vor.u32 %v3093_v51, %v3090_v45  ;;  %v7017_v29 = vrot.slane %v3125_v1, 5  ;;  %v3158_v45 = vshrl.u32 %v3081_v21, 16  ;;  %v3172_v1 = vshrl.u32 %v3083_v61, 16 }
  0x8d   : > { %5918 = vmatprep.subr.bf16.mxu1 %v6400_v11  ;;  %5189 = vmatmul.mubr.msk.bf16.gmra.mrb[4].mxu0 %vm384_vm1, %v6731_v34  ;;  %v3107_v34 = vrot.slane %v3105_v4, 5  ;;  %v3147_v4 = vshll.u32 %v3079_v15, 16  ;;  %v3086_v15 = vld [vmem:[%s6857_s9 + $0x3c] sm:$0x1] }
  0x8e   : > { %1195 = vmatprep.mubr.bf16.mxu0 %v6496_v6  ;;  %v3095_v18 = vrot.slane %v3094_v59, 4  ;;  %v3160_v58 = vrot.slane %v3158_v45, 4  ;;  %v3163_v59 = vrot.slane %v3161_v49, 5  ;;  %v3128_v33 = vsel %vm6654_vm4, %v7031_v19, %v7017_v29 }
  0x8f   : > { %5891 = vmatmul.mubr.msk.bf16.gmra.mrb[4].mxu1 %vm384_vm1, %v6984_v39  ;;  %v3108_v37 = vor.u32 %v3107_v34, %v3104_v53  ;;  %v6408_v53 = vld [vmem:[%s7822_s5 + $0x70] sm:$0xff]   ;;  %v3149_v55 = vrot.slane %v3147_v4, 5  ;;  %v3195_v21 = vshll.u32 %v3086_v15, 16  ;;  %v5470_v15 = vld [vmem:[%s6857_s9 + $0xa8] sm:$0xf] }
  0x90   : > { %5919 = vmatpush3.bf16.msra.mxu1 %v6400_v11  ;;  %5926 = vmatprep.mubr.msk.bf16.mxu1 %vm2862_vm5, %v6404_v20  ;;  %v7021_v11 = vrot.slane %v3139_v13, 5  ;;  %v3082_v20 = vld [vmem:[%s6857_s9 + $0x2c] sm:$0x1]  ;;  %v3164_v10 = vor.u32 %v3163_v59, %v3160_v58  ;;  %v5466_v58 = vld [vmem:[%s6857_s9 + $0x98] sm:$0xf] }
  0x91   : > { %5920 = vmatprep.subr.bf16.mxu1 %v6401_v42  ;;  %v3109_v25 = vrot.slane %v3108_v37, 4  ;;  %v3167_v51 = vshll.u32 %v3082_v20, 16  ;;  %v6411_v37 = vld [vmem:[%s7822_s5 + $0x80] sm:$0xff]   ;;  %v3150_v31 = vor.u32 %v3149_v55, %v3146_v44  ;;  %v6413_v13 = vld [vmem:[%s7822_s5 + $0x88] sm:$0xff]   ;;  %v3197_v45 = vrot.slane %v3195_v21, 5 }
  0x92   : > { %v6428_v59 = vld [vmem:[%s6857_s9 + $0xc0] ss:$8 sps:$4 sm:$0xff]  }
  0x93   : > { %v3114_v22 = vsel %vm6654_vm4, %v3109_v25, %v3113_v14  ;;  %v3151_v14 = vrot.slane %v3150_v31, 4  ;;  %v3165_v25 = vrot.slane %v3164_v10, 4  ;;  %v5468_v31 = vld [vmem:[%s6857_s9 + $0xa0] sm:$0xf] }
  0x94   : > { %5921 = vmatpush3.bf16.msra.mxu1 %v6401_v42  ;;  %v3153_v42 = vshll.u32 %v3080_v35, 16  ;;  %v3169_v35 = vrot.slane %v3167_v51, 5 }
  0x95   : > { %5922 = vmatprep.subr.bf16.mxu1 %v6402_v16  ;;  %5190 = vmatmul.mubr.msk.bf16.gmra.mrb[8].mxu0 %vm384_vm1, %v6738_v41  ;;  %v1696_v41 = vsel %vm397_vm0, %v6946_v9, 0  ;;  %v6407_v9 = vld [vmem:[%s7822_s5 + $0x68] sm:$0xff]  }
  0x96   : > { %1205 = vmatprep.mubr.bf16.mxu0 %v6496_v6  ;;  %v3155_v34 = vrot.slane %v3153_v42, 5  ;;  %v3170_v29 = vsel %vm6654_vm4, %v3165_v25, %v3169_v35  ;;  %v3710_v35 = vshrl.u32 %v5468_v31, 16 }
  0x98   : > { %5923 = vmatpush3.bf16.msra.mxu1 %v6402_v16  ;;  %v3100_v16 = vsel %vm6654_vm4, %v3095_v18, %v3099_v23  ;;  %v3191_v23 = vrot.slane %v3189_v7, 5  ;;  %v3156_v20 = vsel %vm6654_vm4, %v3151_v14, %v3155_v34  ;;  %v6420_v34 = vld [vmem:[%s6857_s9 + $0x90] ss:$8 sps:$4 sm:$0xff]   ;;  %v6427_v14 = vld [vmem:[%s7822_s5 + $0xe0] sm:$0xff]  }
  0x99   : > { %5924 = vmatprep.subr.bf16.mxu1 %v6403_v2  ;;  %v5382_v46 = vcombine.low %v3100_v16, %v3114_v22  ;;  %v5384_v42 = vcombine.low %v3156_v20, %v3170_v29  ;;  %v2124_v16 = vrot.slane %v6825_v17, %v6576_v12  ;;  %v6421_v17 = vld [vmem:[%s7822_s5 + $0xc0] sm:$0xff]   ;;  %v6425_v7 = vld [vmem:[%s7822_s5 + $0xd8] sm:$0xff]  }
  0x9b   : > { %v7164_v25 = vsel %vm397_vm0, %v2124_v16, 0 }
  0x9c   : > { %5925 = vmatpush3.bf16.msra.mxu1 %v6403_v2  ;;  %v3175_v2 = vshll.u32 %v3083_v61, 16  ;;  %v5465_v61 = vld [vmem:[%s6857_s9 + $0x94] sm:$0x1] }
  0x9d   : > { %5934 = vmatprep.subr.bf16.mxu1 %v6405_v60  ;;  %5191 = vmatmul.mubr.msk.bf16.gmra.mrb[12].mxu0 %vm384_vm1, %v6759_v38  ;;  %v7042_v38 = vrot.slane %v6756_v48, %v6576_v12  ;;  %v6419_v12 = vld [vmem:[%s7822_s5 + $0xb8] sm:$0xff]   ;;  %v3691_v10 = vshll.u32 %v5465_v61, 16 }
  0x9e   : > { %1400 = vmatprep.mubr.bf16.mxu0 %v6496_v6 }
  0x9f   : > { %5927 = vmatmul.mubr.msk.bf16.vlgmr.msra.gmra.mrb[8].mxu1 %vm2862_vm5, %v6406_v30  ;;  %v1907_v48 = vcombine.high %v7042_v38, %v7042_v38  ;;  %v3181_v30 = vshll.u32 %v3084_v54, 16  ;;  %v1921_v22 = vsel %vm397_vm0, %v7042_v38, 0  ;;  %v6426_v38 = vld [vmem:[%s6857_s9 + $0xb0] ss:$8 sps:$4 sm:$0xff]   ;;  %v7169_v21 = vrot.slane %v3691_v10, 5 }
  0xa0   : > { %5935 = vmatpush3.bf16.msra.mxu1 %v6405_v60  ;;  %5930 = vmatprep.mubr.msk.bf16.mxu1 %vm2862_vm5, %v6410_v40  ;;  %v3174_v60 = vrot.slane %v3172_v1, 4  ;;  %v3696_v1 = vshrl.u32 %v5466_v58, 16 }
  0xa1   : > { %5936 = vmatprep.subr.bf16.mxu1 %v6407_v9  ;;  %v3183_v4 = vrot.slane %v3181_v30, 5  ;;  %v3713_v30 = vshll.u32 %v5468_v31, 16 }
  0xa4   : > { %5937 = vmatpush3.bf16.msra.mxu1 %v6407_v9 }
  0xa5   : > { %5938 = vmatprep.subr.bf16.mxu1 %v6408_v53  ;;  %5210 = vmatmul.mubr.msk.bf16.vlgmr.msra.gmra.mrb[0].mxu0 %vm384_vm1, %v6765_v50  ;;  %v3186_v50 = vshrl.u32 %v3085_v63, 16  ;;  %v5467_v63 = vld [vmem:[%s6857_s9 + $0x9c] sm:$0x1] }
  0xa6   : > { %1705 = vmatpush1.bf16.msra.mxu0 %v1696_v41  ;;  %1410 = vmatprep.mubr.bf16.mxu0 %v6496_v6  ;;  %v3177_v41 = vrot.slane %v3175_v2, 5  ;;  %v3699_v2 = vshll.u32 %v5466_v58, 16  ;;  %v5477_v58 = vld [vmem:[%s6857_s9 + $0xc4] sm:$0x1] }
  0xa7   : > { %5931 = vmatmul.mubr.msk.bf16.gmra.mrb[12].mxu1 %vm2862_vm5, %v6412_v56  ;;  %5261 = vmatprep.subr.msk.bf16.mxu0 %vm397_vm0, %v1907_v48  ;;  %v3188_v18 = vrot.slane %v3186_v50, 4  ;;  %v6417_v56 = vld [vmem:[%s7822_s5 + $0xa8] sm:$0xff]   ;;  %v6430_v50 = vld [vmem:[%s6857_s9 + $0xd8] ss:$8 sps:$4 sm:$0xff]  }
  0xa8   : > { %5939 = vmatpush3.bf16.msra.mxu1 %v6408_v53  ;;  %5946 = vmatprep.mubr.msk.bf16.mxu1 %vm2862_vm5, %v5382_v46  ;;  %v3178_v36 = vor.u32 %v3177_v41, %v3174_v60  ;;  %v6416_v53 = vld [vmem:[%s7822_s5 + $0xa0] sm:$0xff]   ;;  %v6423_v48 = vld [vmem:[%s7822_s5 + $0xc8] sm:$0xff]   ;;  %v5464_v46 = vld [vmem:[%s6857_s9 + $0x90] sm:$0xf] }
  0xa9   : > { %5940 = vmatprep.subr.bf16.mxu1 %v6409_v28  ;;  %v3192_v40 = vor.u32 %v3191_v23, %v3188_v18  ;;  %v3685_v54 = vshll.u32 %v5464_v46, 16  ;;  %v3698_v18 = vrot.slane %v3696_v1, 4  ;;  %v3701_v23 = vrot.slane %v3699_v2, 5 }
  0xaa   : > { %v3179_v19 = vrot.slane %v3178_v36, 4  ;;  %v5476_v36 = vld [vmem:[%s6857_s9 + $0xc0] sm:$0xf] }
  0xab   : > { %v3193_v44 = vrot.slane %v3192_v40, 4  ;;  %v3687_v41 = vrot.slane %v3685_v54, 5  ;;  %v5478_v40 = vld [vmem:[%s6857_s9 + $0xc8] sm:$0xf] }
  0xac   : > { %5941 = vmatpush3.bf16.msra.mxu1 %v6409_v28  ;;  %v3184_v49 = vsel %vm6654_vm4, %v3179_v19, %v3183_v4  ;;  %v2132_v28 = vcombine.high %v2124_v16, %v2124_v16  ;;  %v5469_v19 = vld [vmem:[%s6857_s9 + $0xa4] sm:$0x1] }
  0xad   : > { %5942 = vmatprep.subr.bf16.mxu1 %v6411_v37  ;;  %5211 = vmatmul.mubr.msk.bf16.gmra.mrb[4].mxu0 %vm384_vm1, %v6789_v24  ;;  %v3142_v24 = vsel %vm6654_vm4, %v7033_v43, %v7021_v11  ;;  %v6476_v11 = vld [vmem:[%s6583_s18 + $0xf8] ss:$8 sps:$4 sm:$0xff]   ;;  %v3198_v51 = vsel %vm6654_vm4, %v3193_v44, %v3197_v45  ;;  %v5471_v44 = vld [vmem:[%s6857_s9 + $0xac] sm:$0x1] }
  0xae   : > { %1420 = vmatprep.mubr.bf16.mxu0 %v6496_v6  ;;  %v5383_v9 = vcombine.low %v3128_v33, %v3142_v24  ;;  %v6415_v43 = vld [vmem:[%s7822_s5 + $0x98] sm:$0xff]   ;;  %v5385_v55 = vcombine.low %v3184_v49, %v3198_v51  ;;  %v3727_v24 = vshll.u32 %v5470_v15, 16  ;;  %v3769_v49 = vshll.u32 %v5476_v36, 16 }
  0xaf   : > { %v5474_v33 = vld [vmem:[%s6857_s9 + $0xb8] sm:$0xf]  ;;  %v3780_v51 = vshrl.u32 %v5478_v40, 16 }
  0xb0   : > { %5943 = vmatpush3.bf16.msra.mxu1 %v6411_v37  ;;  %v3682_v37 = vshrl.u32 %v5464_v46, 16  ;;  %v3752_v45 = vshrl.u32 %v5474_v33, 16 }
  0xb1   : > { %5944 = vmatprep.subr.bf16.mxu1 %v6413_v13  ;;  %v3782_v61 = vrot.slane %v3780_v51, 4 }
  0xb2   : > { %v3684_v60 = vrot.slane %v3682_v37, 4  ;;  %v6431_v37 = vld [vmem:[%s7822_s5 + $0xf0] sm:$0xff]  }
  0xb4   : > { %5945 = vmatpush3.bf16.msra.mxu1 %v6413_v13  ;;  %v3705_v13 = vshll.u32 %v5467_v63, 16  ;;  %v3688_v4 = vor.u32 %v3687_v41, %v3684_v60  ;;  %v6432_v60 = vld [vmem:[%s6857_s9 + $0xe8] ss:$8 sps:$4 sm:$0xff]   ;;  %v6436_v41 = vld [vmem:[%s6857_s9 + $0xf8] ss:$8 sps:$4 sm:$0xff]  }
  0xb5   : > { %5954 = vmatprep.subr.bf16.mxu1 %v6414_v26  ;;  %5212 = vmatmul.mubr.msk.bf16.gmra.mrb[8].mxu0 %vm384_vm1, %v6476_v11  ;;  %v3755_v11 = vshll.u32 %v5474_v33, 16 }
  0xb6   : > { %1430 = vmatprep.mubr.bf16.mxu0 %v6496_v6  ;;  %v7171_v20 = vrot.slane %v3705_v13, 5  ;;  %v3689_v54 = vrot.slane %v3688_v4, 4 }
  0xb7   : > { %5947 = vmatmul.mubr.msk.bf16.vlgmr.msra.gmra.mrb[8].mxu1 %vm2862_vm5, %v5383_v9  ;;  %v3757_v46 = vrot.slane %v3755_v11, 5 }
  0xb8   : > { %5955 = vmatpush3.bf16.msra.mxu1 %v6414_v26  ;;  %5950 = vmatprep.mubr.msk.bf16.mxu1 %vm2862_vm5, %v5384_v42  ;;  %v3724_v26 = vshrl.u32 %v5470_v15, 16  ;;  %v3702_v42 = vor.u32 %v3701_v23, %v3698_v18  ;;  %v3775_v15 = vshll.u32 %v5477_v58, 16 }
  0xb9   : > { %5956 = vmatprep.subr.bf16.mxu1 %v6415_v43 }
  0xba   : > { %v3726_v16 = vrot.slane %v3724_v26, 4  ;;  %v3703_v1 = vrot.slane %v3702_v42, 4  ;;  %v5574_v26 = vld [vmem:[%s6857_s9 + $0x8] sm:$0xf]  ;;  %v3777_v11 = vrot.slane %v3775_v15, 5 }
  0xbb   : > { %v5618_v15 = vld [vmem:[%s6583_s18 + $0x48] sm:$0xf] }
  0xbc   : > { %5957 = vmatpush3.bf16.msra.mxu1 %v6415_v43  ;;  %v3766_v43 = vshrl.u32 %v5476_v36, 16  ;;  %v6478_v36 = vld [vmem:[%s6583_s18 + $0x8] ss:$8 sps:$4 sm:$0xff]  }
  0xbd   : > { %5958 = vmatprep.subr.bf16.mxu1 %v6416_v53  ;;  %5213 = vmatmul.mubr.msk.bf16.gmra.mrb[12].mxu0 %vm384_vm1, %v6813_v3  ;;  %v6418_v3 = vld [vmem:[%s7822_s5 + $0xb0] sm:$0xff]  }
  0xbe   : > { %1736 = vmatprep.mubr.bf16.mxu0 %v6496_v6 }
  0xbf   : > { %5951 = vmatmul.mubr.msk.bf16.gmra.mrb[12].mxu1 %vm2862_vm5, %v5385_v55  ;;  %v6429_v55 = vld [vmem:[%s7822_s5 + $0xe8] sm:$0xff]  }
  0xc0   : > { %5959 = vmatpush3.bf16.msra.mxu1 %v6416_v53  ;;  %5966 = vmatprep.mubr.msk.bf16.mxu1 %vm2862_vm5, %v6420_v34  ;;  %v3783_v53 = vshll.u32 %v5478_v40, 16  ;;  %v3712_v34 = vrot.slane %v3710_v35, 4  ;;  %v6433_v40 = vld [vmem:[%s7822_s5 + $0xf8] sm:$0xff]  }
  0xc1   : > { %5960 = vmatprep.subr.bf16.mxu1 %v6417_v56 }
  0xc2   : > { %v3785_v63 = vrot.slane %v3783_v53, 5 }
  0xc4   : > { %5961 = vmatpush3.bf16.msra.mxu1 %v6417_v56  ;;  %v3715_v56 = vrot.slane %v3713_v30, 5  ;;  %v3786_v30 = vor.u32 %v3785_v63, %v3782_v61  ;;  %v6435_v61 = vld [vmem:[%s7822_s5 + $0x108] sm:$0xff]   ;;  %v7248_v63 = vld [vmem:[%s6857_s9 + $0x14] sm:$0x1] }
  0xc5   : > { %5962 = vmatprep.subr.bf16.mxu1 %v6418_v3  ;;  %5240 = vmatmul.mubr.msk.bf16.vlgmr.msra.gmra.mrb[0].mxu0 %vm384_vm1, %v6815_v8  ;;  %v6422_v8 = vld [vmem:[%s6857_s9 + $0xa0] ss:$8 sps:$4 sm:$0xff]  }
  0xc6   : > { %1930 = vmatpush1.bf16.msra.mxu0 %v1921_v22  ;;  %1746 = vmatprep.mubr.bf16.mxu0 %v6496_v6  ;;  %v3719_v22 = vshll.u32 %v5469_v19, 16  ;;  %v3716_v2 = vor.u32 %v3715_v56, %v3712_v34  ;;  %v3787_v53 = vrot.slane %v3786_v30, 4  ;;  %v6434_v34 = vld [vmem:[%s7822_s5 + $0x100] sm:$0xff]   ;;  %v6438_v56 = vld [vmem:[%s6857_s9 + $0x108] ss:$8 sps:$4 sm:$0xff]  }
  0xc7   : > { %5283 = vmatprep.subr.msk.bf16.mxu0 %vm397_vm0, %v2132_v28  ;;  %v3733_v28 = vshll.u32 %v5471_v44, 16 }
  0xc8   : > { %5963 = vmatpush3.bf16.msra.mxu1 %v6418_v3  ;;  %v3729_v3 = vrot.slane %v3727_v24, 5  ;;  %v3721_v18 = vrot.slane %v3719_v22, 5  ;;  %v5576_v24 = vld [vmem:[%s6857_s9 + $0x10] sm:$0xf]  ;;  %v3717_v4 = vrot.slane %v3716_v2, 4 }
  0xc9   : > { %5964 = vmatprep.subr.bf16.mxu1 %v6419_v12  ;;  %v3735_v23 = vrot.slane %v3733_v28, 5  ;;  %v7224_v28 = vld [vmem:[%s6857_s9 + $0xc] sm:$0x1]  ;;  %v7259_v2 = vld [vmem:[%s6583_s18] sm:$0xf] }
  0xcc   : > { %5965 = vmatpush3.bf16.msra.mxu1 %v6419_v12  ;;  %v5473_v12 = vld [vmem:[%s6857_s9 + $0xb4] sm:$0x1] }
  0xcd   : > { %5974 = vmatprep.subr.bf16.mxu1 %v6421_v17  ;;  %5241 = vmatmul.mubr.msk.bf16.gmra.mrb[4].mxu0 %vm384_vm1, %v6841_v47  ;;  %v6424_v47 = vld [vmem:[%s7822_s5 + $0xd0] sm:$0xff]   ;;  %v3747_v10 = vshll.u32 %v5473_v12, 16 }
  0xce   : > { %1756 = vmatprep.mubr.bf16.mxu0 %v6496_v6 }
  0xcf   : > { %5967 = vmatmul.mubr.msk.bf16.vlgmr.msra.gmra.mrb[8].mxu1 %vm2862_vm5, %v6422_v8  ;;  %v3749_v44 = vrot.slane %v3747_v10, 5 }
  0xd0   : > { %5975 = vmatpush3.bf16.msra.mxu1 %v6421_v17  ;;  %5970 = vmatprep.mubr.msk.bf16.mxu1 %vm2862_vm5, %v6426_v38  ;;  %v5475_v38 = vld [vmem:[%s6857_s9 + $0xbc] sm:$0x1] }
  0xd1   : > { %5976 = vmatprep.subr.bf16.mxu1 %v6423_v48  ;;  %v3761_v13 = vshll.u32 %v5475_v38, 16 }
  0xd4   : > { %5977 = vmatpush3.bf16.msra.mxu1 %v6423_v48  ;;  %v3754_v48 = vrot.slane %v3752_v45, 4  ;;  %v3763_v45 = vrot.slane %v3761_v13, 5 }
  0xd5   : > { %5978 = vmatprep.subr.bf16.mxu1 %v6424_v47  ;;  %5242 = vmatmul.mubr.msk.bf16.gmra.mrb[8].mxu0 %vm384_vm1, %v6843_v52  ;;  %v5472_v52 = vld [vmem:[%s6857_s9 + $0xb0] sm:$0xf] }
  0xd6   : > { %1766 = vmatprep.mubr.bf16.mxu0 %v6496_v6  ;;  %v3738_v29 = vshrl.u32 %v5472_v52, 16  ;;  %v3741_v9 = vshll.u32 %v5472_v52, 16 }
  0xd7   : > { %5971 = vmatmul.mubr.msk.bf16.gmra.mrb[12].mxu1 %vm2862_vm5, %v6428_v59  ;;  %v3771_v59 = vrot.slane %v3769_v49, 5  ;;  %v4290_v49 = vshrl.u32 %v5576_v24, 16 }
  0xd8   : > { %5979 = vmatpush3.bf16.msra.mxu1 %v6424_v47  ;;  %5986 = vmatprep.mubr.msk.bf16.mxu1 %vm2862_vm5, %v6430_v50  ;;  %v3740_v17 = vrot.slane %v3738_v29, 4  ;;  %v3743_v8 = vrot.slane %v3741_v9, 5  ;;  %v3768_v47 = vrot.slane %v3766_v43, 4  ;;  %v3730_v50 = vor.u32 %v3729_v3, %v3726_v16 }
  0xd9   : > { %5980 = vmatprep.subr.bf16.mxu1 %v6425_v7  ;;  %v3694_v29 = vsel %vm6654_vm4, %v3689_v54, %v7169_v21  ;;  %v3708_v9 = vsel %vm6654_vm4, %v3703_v1, %v7171_v20  ;;  %v4276_v21 = vshrl.u32 %v5574_v26, 16  ;;  %v4279_v43 = vshll.u32 %v5574_v26, 16 }
  0xda   : > { %v3744_v31 = vor.u32 %v3743_v8, %v3740_v17  ;;  %v3772_v35 = vor.u32 %v3771_v59, %v3768_v47  ;;  %v3731_v42 = vrot.slane %v3730_v50, 4  ;;  %v4293_v20 = vshll.u32 %v5576_v24, 16  ;;  %v6479_v59 = vld [vmem:[%s6583_s18 + $0x18] ss:$8 sps:$4 sm:$0xff]   ;;  %v7262_v50 = vld [vmem:[%s6583_s18 + $0x8] sm:$0xf] }
  0xdb   : > { %v5492_v16 = vcombine.low %v3694_v29, %v3708_v9  ;;  %v3722_v3 = vsel %vm6654_vm4, %v3717_v4, %v3721_v18  ;;  %v7226_v12 = vrot.slane %v4276_v21, 4  ;;  %v7228_v17 = vrot.slane %v4279_v43, 5  ;;  %v7289_v24 = vld [vmem:[%s6583_s18 + $0x98] sm:$0xf] }
  0xdc   : > { %5981 = vmatpush3.bf16.msra.mxu1 %v6425_v7  ;;  %v5479_v7 = vld [vmem:[%s6857_s9 + $0xcc] sm:$0x1]  ;;  %v3745_v19 = vrot.slane %v3744_v31, 4  ;;  %v3773_v51 = vrot.slane %v3772_v35, 4  ;;  %v3736_v22 = vsel %vm6654_vm4, %v3731_v42, %v3735_v23  ;;  %v7230_v8 = vrot.slane %v4290_v49, 4 }
  0xdd   : > { %5982 = vmatprep.subr.bf16.mxu1 %v6427_v14  ;;  %5243 = vmatmul.mubr.msk.bf16.gmra.mrb[12].mxu0 %vm384_vm1, %v6866_v57  ;;  %v7185_v57 = vld.sshfl [vmem:[%s7818_s1 + $0x30] sm:$0x3f pattern:$0x76325410]  ;;  %v3789_v33 = vshll.u32 %v5479_v7, 16  ;;  %v7232_v38 = vrot.slane %v4293_v20, 5  ;;  %v4580_v21 = vmax.bf16 %v5618_v15, %v7259_v2 }
  0xde   : > { %1961 = vmatprep.mubr.bf16.mxu0 %v6496_v6  ;;  %v2468_v52 = vcombine.high %v7185_v57, %v7185_v57  ;;  %v3778_v58 = vsel %vm6654_vm4, %v3773_v51, %v3777_v11  ;;  %v7255_v54 = vsel %vm397_vm0, %v7185_v57, 0  ;;  %v4285_v1 = vshll.u32 %v7224_v28, 16  ;;  %v6437_v7 = vld [vmem:[%s7822_s5 + $0x110] sm:$0xff]   ;;  %v5640_v20 = vld [vmem:[%s6583_s18 + $0x9c] sm:$0x1] }
  0xdf   : > { %v4282_v57 = vor.u32 %v7228_v17, %v7226_v12  ;;  %v4296_v13 = vor.u32 %v7232_v38, %v7230_v8  ;;  %v4299_v18 = vshll.u32 %v7248_v63, 16  ;;  %v4595_v23 = vshrl.u32 %v7259_v2, 16  ;;  %v7284_v35 = vld [vmem:[%s6583_s18 + $0x90] sm:$0xf]  ;;  %v5639_v49 = vld [vmem:[%s6583_s18 + $0x94] sm:$0x1] }
  0xe0   : > { %5983 = vmatpush3.bf16.msra.mxu1 %v6427_v14  ;;  %v3758_v14 = vor.u32 %v3757_v46, %v3754_v48  ;;  %v3750_v48 = vsel %vm6654_vm4, %v3745_v19, %v3749_v44  ;;  %v4609_v30 = vshrl.u32 %v7262_v50, 16  ;;  %v4745_v4 = vshll.u32 %v7284_v35, 16  ;;  %v5619_v42 = vld [vmem:[%s6583_s18 + $0x50] sm:$0xf]  ;;  %v6456_v28 = vld [vmem:[%s7822_s5 + $0x178] sm:$0xff]   ;;  %v6461_v8 = vld [vmem:[%s7822_s5 + $0x188] sm:$0xff]  }
  0xe1   : > { %5984 = vmatprep.subr.bf16.mxu1 %v6429_v55  ;;  %v4756_v51 = vshrl.u32 %v7289_v24, 16  ;;  %v4581_v12 = vmax.bf16 %v5619_v42, %v7262_v50  ;;  %v7330_v42 = vld [vmem:[%s6583_s18 + $0x10] sm:$0xf]  ;;  %v5582_v38 = vld [vmem:[%s6857_s9 + $0x28] sm:$0xf] }
  0xe2   : > { %v4611_v19 = vrot.slane %v4609_v30, 4 }
  0xe4   : > { %5985 = vmatpush3.bf16.msra.mxu1 %v6429_v55  ;;  %v3791_v55 = vrot.slane %v3789_v33, 5  ;;  %v4612_v33 = vshll.u32 %v7262_v50, 16  ;;  %v5660_v50 = vld [vmem:[%s6583_s18 + $0xc] sm:$0x1] }
  0xe5   : > { %5994 = vmatprep.subr.bf16.mxu1 %v6431_v37  ;;  %5262 = vmatmul.mubr.msk.bf16.vlgmr.msra.gmra.mrb[0].mxu0 %vm384_vm1, %v6478_v36  ;;  %v4742_v36 = vshrl.u32 %v7284_v35, 16 }
  0xe6   : > { %2155 = vmatpush1.bf16.msra.mxu0 %v7164_v25  ;;  %1971 = vmatprep.mubr.bf16.mxu0 %v6496_v6  ;;  %v3759_v25 = vrot.slane %v3758_v14, 4  ;;  %v3792_v47 = vsel %vm6654_vm4, %v3787_v53, %v3791_v55  ;;  %v4614_v44 = vrot.slane %v4612_v33, 5  ;;  %v6480_v53 = vld [vmem:[%s6583_s18 + $0x28] ss:$8 sps:$4 sm:$0xff]   ;;  %v6439_v55 = vld [vmem:[%s7822_s5 + $0x118] sm:$0xff]  }
  0xe7   : > { %5987 = vmatmul.mubr.msk.bf16.vlgmr.msra.gmra.mrb[8].mxu1 %vm2862_vm5, %v6432_v60  ;;  %5313 = vmatprep.subr.msk.bf16.mxu0 %vm397_vm0, %v2468_v52  ;;  %v7270_v10 = vcombine.low %v3778_v58, %v3792_v47  ;;  %v4587_v60 = vld [vmem:[%s6583_s18 + $0x4] sm:$0x1]  ;;  %v4598_v52 = vshll.u32 %v7259_v2, 16  ;;  %v4744_v11 = vrot.slane %v4742_v36, 4  ;;  %v7309_v58 = vrot.slane %v4282_v57, 4 }
  0xe8   : > { %5995 = vmatpush3.bf16.msra.mxu1 %v6431_v37  ;;  %5990 = vmatprep.mubr.msk.bf16.mxu1 %vm2862_vm5, %v6436_v41  ;;  %v3764_v46 = vsel %vm6654_vm4, %v3759_v25, %v3763_v45  ;;  %v7251_v37 = vcombine.low %v3722_v3, %v3736_v22  ;;  %v4588_v41 = vld [vmem:[%s6583_s18 + $0xc] sm:$0x1]  ;;  %v4604_v14 = vshll.u32 %v4587_v60, 16  ;;  %v4747_v25 = vrot.slane %v4745_v4, 5  ;;  %v7305_v22 = vld [vmem:[%s6583_s18 + $0x8] sm:$0xf] }
  0xe9   : > { %5996 = vmatprep.subr.bf16.mxu1 %v6433_v40  ;;  %v7268_v31 = vcombine.low %v3750_v48, %v3764_v46  ;;  %v4618_v26 = vshll.u32 %v4588_v41, 16  ;;  %v4600_v29 = vrot.slane %v4598_v52, 5  ;;  %v4765_v3 = vshll.u32 %v5640_v20, 16  ;;  %v7312_v2 = vld [vmem:[%s6583_s18 + $0x10] sm:$0xf]  ;;  %v6440_v57 = vld [vmem:[%s7822_s5 + $0x120] sm:$0xff]  }
  0xea   : > { %v4606_v9 = vrot.slane %v4604_v14, 5  ;;  %v4748_v48 = vor.u32 %v4747_v25, %v4744_v11  ;;  %v4758_v46 = vrot.slane %v4756_v51, 4  ;;  %v5661_v33 = vld [vmem:[%s6583_s18 + $0x14] sm:$0x1]  ;;  %v4898_v4 = vshll.u32 %v5660_v50, 16 }
  0xeb   : > { %v4620_v45 = vrot.slane %v4618_v26, 5  ;;  %v4767_v41 = vrot.slane %v4765_v3, 5  ;;  %v4892_v26 = vshll.u32 %v7305_v22, 16  ;;  %v4903_v11 = vshrl.u32 %v7312_v2, 16  ;;  %v7340_v51 = vld [vmem:[%s6583_s18 + $0x60] sm:$0xf] }
  0xec   : > { %5997 = vmatpush3.bf16.msra.mxu1 %v6433_v40  ;;  %v4597_v40 = vrot.slane %v4595_v23, 4  ;;  %v4749_v60 = vrot.slane %v4748_v48, 4  ;;  %v4889_v23 = vshrl.u32 %v7305_v22, 16  ;;  %v4906_v20 = vshll.u32 %v7312_v2, 16  ;;  %v7352_v48 = vld [vmem:[%s6583_s18 + $0x18] sm:$0xf] }
  0xed   : > { %5998 = vmatprep.subr.bf16.mxu1 %v6434_v34  ;;  %5263 = vmatmul.mubr.msk.bf16.gmra.mrb[4].mxu0 %vm384_vm1, %v6479_v59  ;;  %v4912_v25 = vshll.u32 %v5661_v33, 16  ;;  %v5653_v50 = vld [vmem:[%s6583_s18 + $0x50] sm:$0xf] }
  0xee   : > { %1981 = vmatprep.mubr.bf16.mxu0 %v6496_v6  ;;  %v4601_v43 = vor.u32 %v4600_v29, %v4597_v40  ;;  %v5633_v40 = vld [vmem:[%s6583_s18 + $0xe0] sm:$0xf] }
  0xef   : > { %5991 = vmatmul.mubr.msk.bf16.gmra.mrb[12].mxu1 %vm2862_vm5, %v6438_v56  ;;  %v4751_v56 = vshll.u32 %v5639_v49, 16  ;;  %v4900_v49 = vrot.slane %v4898_v4, 5 }
  0xf0   : > { %5999 = vmatpush3.bf16.msra.mxu1 %v6434_v34  ;;  %6006 = vmatprep.mubr.msk.bf16.mxu1 %vm2862_vm5, %v5492_v16  ;;  %v4615_v34 = vor.u32 %v4614_v44, %v4611_v19  ;;  %v4759_v16 = vshll.u32 %v7289_v24, 16  ;;  %v4602_v17 = vrot.slane %v4601_v43, 4 }
  0xf1   : > { %6000 = vmatprep.subr.bf16.mxu1 %v6435_v61  ;;  %v4753_v59 = vrot.slane %v4751_v56, 5  ;;  %v4905_v56 = vrot.slane %v4903_v11, 4  ;;  %v5641_v11 = vld [vmem:[%s6583_s18 + $0xa4] sm:$0x1] }
  0xf2   : > { %v4616_v47 = vrot.slane %v4615_v34, 4  ;;  %v4607_v15 = vsel %vm6654_vm4, %v4602_v17, %v4606_v9  ;;  %v4891_v9 = vrot.slane %v4889_v23, 4  ;;  %v4914_v17 = vrot.slane %v4912_v25, 5  ;;  %v4590_v23 = vld [vmem:[%s6583_s18 + $0x1c] sm:$0x1] }
  0xf3   : > { %v4699_v14 = vmax.bf16 %v4607_v15, %v4580_v21  ;;  %v4754_v29 = vsel %vm6654_vm4, %v4749_v60, %v4753_v59  ;;  %v7335_v21 = vld [vmem:[%s6583_s18 + $0x58] sm:$0xf]  ;;  %v4583_v15 = vmax.bf16 %v7340_v51, %v7352_v48  ;;  %v4623_v60 = vshrl.u32 %v7330_v42, 16  ;;  %v7389_v25 = vld [vmem:[%s6583_s18 + $0xa8] sm:$0xf] }
  0xf4   : > { %6001 = vmatpush3.bf16.msra.mxu1 %v6435_v61  ;;  %v4761_v61 = vrot.slane %v4759_v16, 5  ;;  %v4621_v52 = vsel %vm6654_vm4, %v4616_v47, %v4620_v45  ;;  %v4894_v45 = vrot.slane %v4892_v26, 5  ;;  %v4589_v16 = vld [vmem:[%s6583_s18 + $0x14] sm:$0x1]  ;;  %v4637_v26 = vshrl.u32 %v7352_v48, 16 }
  0xf5   : > { %6002 = vmatprep.subr.bf16.mxu1 %v6437_v7  ;;  %5264 = vmatmul.mubr.msk.bf16.gmra.mrb[8].mxu0 %vm384_vm1, %v6480_v53  ;;  %v4700_v36 = vmax.bf16 %v4621_v52, %v4581_v12  ;;  %v4713_v19 = vmax.bf16 %v7284_v35, %v4699_v14  ;;  %v6481_v53 = vld [vmem:[%s6583_s18 + $0x38] ss:$8 sps:$4 sm:$0xff]   ;;  %v6441_v35 = vld [vmem:[%s7822_s5 + $0x128] sm:$0xff]   ;;  %v4908_v12 = vrot.slane %v4906_v20, 5  ;;  %v6442_v47 = vld [vmem:[%s7822_s5 + $0x130] sm:$0xff]   ;;  %v4626_v52 = vshll.u32 %v7330_v42, 16 }
  0xf6   : > { %1991 = vmatprep.mubr.bf16.mxu0 %v6496_v6  ;;  %v4762_v30 = vor.u32 %v4761_v61, %v4758_v46  ;;  %v4582_v46 = vmax.bf16 %v7335_v21, %v7330_v42  ;;  %v4632_v14 = vshll.u32 %v4589_v16, 16 }
  0xf7   : > { %v4714_v43 = vmax.bf16 %v7289_v24, %v4700_v36  ;;  %v4895_v24 = vor.u32 %v4894_v45, %v4891_v9  ;;  %v4646_v45 = vshll.u32 %v4590_v23, 16  ;;  %v7406_v23 = vld [vmem:[%s6583_s18 + $0x18] sm:$0xf] }
  0xf8   : > { %6003 = vmatpush3.bf16.msra.mxu1 %v6437_v7  ;;  %v5632_v7 = vld [vmem:[%s6583_s18 + $0xd8] sm:$0xf]  ;;  %v4763_v44 = vrot.slane %v4762_v30, 4  ;;  %v4634_v9 = vrot.slane %v4632_v14, 5 }
  0xf9   : > { %6004 = vmatprep.subr.bf16.mxu1 %v6439_v55  ;;  %v4727_v34 = vmax.bf16 %v5632_v7, %v4713_v19  ;;  %v4728_v3 = vmax.bf16 %v5633_v40, %v4714_v43  ;;  %v4896_v61 = vrot.slane %v4895_v24, 4  ;;  %v5654_v30 = vld [vmem:[%s6583_s18 + $0x58] sm:$0xf]  ;;  %v4639_v19 = vrot.slane %v4637_v26, 4  ;;  %v6446_v43 = vld [vmem:[%s6857_s9 + $0x8] ss:$8 sps:$4 sm:$0xff]  }
  0xfa   : > { %v5634_v26 = vld [vmem:[%s6583_s18 + $0xe8] sm:$0xf] }
  0xfb   : > { %v4846_v59 = vmax.bf16 %v4754_v29, %v4727_v34  ;;  %v4901_v33 = vsel %vm6654_vm4, %v4896_v61, %v4900_v49  ;;  %v4628_v29 = vrot.slane %v4626_v52, 5  ;;  %v6482_v34 = vld [vmem:[%s6583_s18 + $0x50] ss:$8 sps:$4 sm:$0xff]   ;;  %v6444_v52 = vld [vmem:[%s7822_s5 + $0x140] sm:$0xff]  }
  0xfc   : > { %6005 = vmatpush3.bf16.msra.mxu1 %v6439_v55  ;;  %v4768_v55 = vsel %vm6654_vm4, %v4763_v44, %v4767_v41  ;;  %v4640_v44 = vshll.u32 %v7352_v48, 16 }
  0xfd   : > { %6014 = vmatprep.subr.bf16.mxu1 %v6440_v57  ;;  %5265 = vmatmul.mubr.msk.bf16.gmra.mrb[12].mxu0 %vm384_vm1, %v6481_v53  ;;  %v4847_v41 = vmax.bf16 %v4768_v55, %v4728_v3  ;;  %v4860_v7 = vmax.bf16 %v7305_v22, %v4846_v59  ;;  %v7381_v22 = vld [vmem:[%s7822_s5 + $0x30] sm:$0xff]   ;;  %v6443_v55 = vld [vmem:[%s7822_s5 + $0x138] sm:$0xff]   ;;  %v4779_v59 = vshll.u32 %v5641_v11, 16 }
  0xfe   : > { %2186 = vmatprep.mubr.bf16.mxu0 %v6496_v6  ;;  %v4642_v24 = vrot.slane %v4640_v44, 5  ;;  %v5662_v44 = vld [vmem:[%s6583_s18 + $0x1c] sm:$0x1] }
  0xff   : > { %6007 = vmatmul.mubr.msk.bf16.vlgmr.msra.gmra.mrb[8].mxu1 %vm2862_vm5, %v7251_v37  ;;  %v4909_v37 = vor.u32 %v4908_v12, %v4905_v56  ;;  %v4861_v36 = vmax.bf16 %v7312_v2, %v4847_v41  ;;  %v4874_v4 = vmax.bf16 %v5653_v50, %v4860_v7  ;;  %v4648_v56 = vrot.slane %v4646_v45, 5  ;;  %v5642_v41 = vld [vmem:[%s6583_s18 + $0xac] sm:$0x1] }
 0x100   : > { %6015 = vmatpush3.bf16.msra.mxu1 %v6440_v57  ;;  %6010 = vmatprep.mubr.msk.bf16.mxu1 %vm2862_vm5, %v7268_v31  ;;  %v4625_v57 = vrot.slane %v4623_v60, 4  ;;  %v7375_v31 = vld [vmem:[%s6583_s18 + $0xa0] sm:$0xf]  ;;  %v4643_v60 = vor.u32 %v4642_v24, %v4639_v19  ;;  %v4781_v7 = vrot.slane %v4779_v59, 5  ;;  %v4917_v45 = vshrl.u32 %v7406_v23, 16 }
 0x101   : > { %6016 = vmatprep.subr.bf16.mxu1 %v6441_v35  ;;  %v4910_v40 = vrot.slane %v4909_v37, 4  ;;  %v4875_v49 = vmax.bf16 %v5654_v30, %v4861_v36  ;;  %v4770_v53 = vshrl.u32 %v7375_v31, 16  ;;  %v4773_v16 = vshll.u32 %v7375_v31, 16  ;;  %v5635_v24 = vld [vmem:[%s6583_s18 + $0xf0] sm:$0xf] }
 0x102   : > { %v4629_v20 = vor.u32 %v4628_v29, %v4625_v57  ;;  %v4784_v37 = vshrl.u32 %v7389_v25, 16  ;;  %v4787_v30 = vshll.u32 %v7389_v25, 16 }
 0x103   : > { %v4915_v2 = vsel %vm6654_vm4, %v4910_v40, %v4914_v17  ;;  %v4772_v17 = vrot.slane %v4770_v53, 4  ;;  %v4775_v50 = vrot.slane %v4773_v16, 5 }
 0x104   : > { %6017 = vmatpush3.bf16.msra.mxu1 %v6441_v35  ;;  %v4993_v35 = vmax.bf16 %v4901_v33, %v4874_v4  ;;  %v4994_v3 = vmax.bf16 %v4915_v2, %v4875_v49  ;;  %v4630_v12 = vrot.slane %v4629_v20, 4  ;;  %v4786_v40 = vrot.slane %v4784_v37, 4 }
 0x105   : > { %6018 = vmatprep.subr.bf16.mxu1 %v6442_v47  ;;  %5284 = vmatmul.mubr.msk.bf16.vlgmr.msra.gmra.mrb[0].mxu0 %vm384_vm1, %v6482_v34  ;;  %v4776_v36 = vor.u32 %v4775_v50, %v4772_v17  ;;  %v4789_v19 = vrot.slane %v4787_v30, 5  ;;  %v4920_v49 = vshll.u32 %v7406_v23, 16  ;;  %v5663_v34 = vld [vmem:[%s6583_s18 + $0x24] sm:$0x1] }
 0x106   : > { %2491 = vmatpush1.bf16.msra.mxu0 %v7255_v54  ;;  %2196 = vmatprep.mubr.bf16.mxu0 %v6496_v6  ;;  %v5000_v61 = vunpack.c.l.bf16 %v4993_v35  ;;  %v4635_v14 = vsel %vm6654_vm4, %v4630_v12, %v4634_v9  ;;  %v4793_v9 = vshll.u32 %v5642_v41, 16  ;;  %v4919_v35 = vrot.slane %v4917_v45, 4  ;;  %v5655_v12 = vld [vmem:[%s6583_s18 + $0x60] sm:$0xf] }
 0x107   : > { %6011 = vmatmul.mubr.msk.bf16.gmra.mrb[12].mxu1 %vm2862_vm5, %v7270_v10  ;;  %5894 = vmatprep.subr.bf16.mxu0 %v7381_v22  ;;  %v5001_v10 = vunpack.c.l.bf16 %v4994_v3  ;;  %v4701_v57 = vmax.bf16 %v4635_v14, %v4582_v46  ;;  %v4777_v21 = vrot.slane %v4776_v36, 4  ;;  %v7433_v46 = vld [vmem:[%s6583_s18 + $0x20] sm:$0xf]  ;;  %v4790_v20 = vor.u32 %v4789_v19, %v4786_v40  ;;  %v7461_v14 = vld [vmem:[%s6583_s18 + $0x70] sm:$0xf] }
 0x108   : > { %6019 = vmatpush3.bf16.msra.mxu1 %v6442_v47  ;;  %v7408_v54 = vpop.f32.mrb[16].mxu0  ;;  %6026 = vmatprep.mubr.msk.bf16.mxu1 %vm2862_vm5, %v6446_v43  ;;  %v4644_v47 = vrot.slane %v4643_v60, 4  ;;  %v4795_v53 = vrot.slane %v4793_v9, 5  ;;  %v4922_v48 = vrot.slane %v4920_v49, 5  ;;  %v4931_v17 = vshrl.u32 %v7433_v46, 16  ;;  %v6447_v40 = vld [vmem:[%s7822_s5 + $0x150] sm:$0xff]  }
 0x109   : > { %6020 = vmatprep.subr.bf16.mxu1 %v6443_v55  ;;  %v7417_v33 = vpop.f32.mrb[17].mxu0  ;;  %v6350_v4 = vpack.i.bf16 %v5001_v10, %v5000_v61  ;;  %v4715_v42 = vmax.bf16 %v7375_v31, %v4701_v57  ;;  %v6483_v31 = vld [vmem:[%s6583_s18 + $0x60] ss:$8 sps:$4 sm:$0xff]   ;;  %v4782_v51 = vsel %vm6654_vm4, %v4777_v21, %v4781_v7  ;;  %v4791_v3 = vrot.slane %v4790_v20, 4 }
 0x10a   : > { %v7423_v29 = vpop.f32.mrb[18].mxu0  ;;  %v4649_v43 = vsel %vm6654_vm4, %v4644_v47, %v4648_v56  ;;  %v4934_v59 = vshll.u32 %v7433_v46, 16  ;;  %v7455_v61 = vld [vmem:[%s6583_s18 + $0x68] sm:$0xf]  ;;  %v4923_v41 = vor.u32 %v4922_v48, %v4919_v35  ;;  %v4940_v37 = vshll.u32 %v5663_v34, 16 }
 0x10b   : > { %v7427_v11 = vpop.f32.mrb[19].mxu0  ;;  %6351 = vrot.lane.b32.xlu0 %v6350_v4, %s6497_s14  ;;  %v4702_v2 = vmax.bf16 %v4649_v43, %v4583_v15  ;;  %v4729_v56 = vmax.bf16 %v5634_v26, %v4715_v42  ;;  %v4926_v15 = vshll.u32 %v5662_v44, 16  ;;  %v7458_v10 = vld [vmem:[%s6583_s18 + $0x20] sm:$0xf]  ;;  %v4796_v30 = vsel %vm6654_vm4, %v4791_v3, %v4795_v53  ;;  %v4591_v26 = vld [vmem:[%s6583_s18 + $0x24] sm:$0x1] }
 0x10c   : > { %6021 = vmatpush3.bf16.msra.mxu1 %v6443_v55  ;;  %v6445_v55 = vld [vmem:[%s7822_s5 + $0x148] sm:$0xff]   ;;  %v4933_v47 = vrot.slane %v4931_v17, 4  ;;  %v4936_v57 = vrot.slane %v4934_v59, 5  ;;  %v6448_v4 = vld [vmem:[%s6857_s9 + $0x18] ss:$8 sps:$4 sm:$0xff]   ;;  %v4924_v19 = vrot.slane %v4923_v41, 4  ;;  %v4584_v45 = vmax.bf16 %v7455_v61, %v7458_v10 }
 0x10d   : > { %6022 = vmatprep.subr.bf16.mxu1 %v6444_v52  ;;  %5285 = vmatmul.mubr.msk.bf16.gmra.mrb[4].mxu0 %vm384_vm1, %v6483_v31  ;;  %v4716_v16 = vmax.bf16 %v7389_v25, %v4702_v2  ;;  %v4848_v60 = vmax.bf16 %v4782_v51, %v4729_v56  ;;  %v4928_v50 = vrot.slane %v4926_v15, 5  ;;  %v4942_v9 = vrot.slane %v4940_v37, 5  ;;  %v7476_v44 = vld [vmem:[%s6583_s18 + $0x28] sm:$0xf]  ;;  %v4592_v31 = vld [vmem:[%s6583_s18 + $0x2c] sm:$0x1] }
 0x10e   : > { %2206 = vmatprep.mubr.bf16.mxu0 %v6496_v6  ;;  %v6452_v42 = vld [vmem:[%s6857_s9 + $0x28] ss:$8 sps:$4 sm:$0xff]   ;;  %v4937_v2 = vor.u32 %v4936_v57, %v4933_v47  ;;  %v4585_v20 = vmax.bf16 %v7461_v14, %v7476_v44  ;;  %v4651_v53 = vshrl.u32 %v7458_v10, 16  ;;  %v4660_v56 = vshll.u32 %v4591_v26, 16  ;;  %v6449_v17 = vld [vmem:[%s7822_s5 + $0x158] sm:$0xff]  }
 0x10f   : > { %v4730_v7 = vmax.bf16 %v5635_v24, %v4716_v16  ;;  %v5656_v49 = vld [vmem:[%s6583_s18 + $0x68] sm:$0xf]  ;;  %v4929_v35 = vsel %vm6654_vm4, %v4924_v19, %v4928_v50  ;;  %v4654_v24 = vshll.u32 %v7458_v10, 16  ;;  %v4665_v16 = vshrl.u32 %v7476_v44, 16  ;;  %v7494_v3 = vld [vmem:[%s6583_s18 + $0xb0] sm:$0xf] }
 0x110   : > { %6023 = vmatpush3.bf16.msra.mxu1 %v6444_v52  ;;  %v7463_v25 = vpop.f32.mrb[20].mxu0  ;;  %v4862_v52 = vmax.bf16 %v7406_v23, %v4848_v60  ;;  %v4938_v48 = vrot.slane %v4937_v2, 4  ;;  %v4653_v15 = vrot.slane %v4651_v53, 4  ;;  %v5643_v41 = vld [vmem:[%s6583_s18 + $0xb4] sm:$0x1]  ;;  %v4798_v19 = vshrl.u32 %v7494_v3, 16 }
 0x111   : > { %6024 = vmatprep.subr.bf16.mxu1 %v6445_v55  ;;  %v7468_v36 = vpop.f32.mrb[21].mxu0  ;;  %v4849_v21 = vmax.bf16 %v4796_v30, %v4730_v7  ;;  %v4656_v60 = vrot.slane %v4654_v24, 5  ;;  %v4667_v7 = vrot.slane %v4665_v16, 4  ;;  %v4674_v30 = vshll.u32 %v4592_v31, 16  ;;  %v7507_v47 = vld [vmem:[%s6583_s18 + $0xb8] sm:$0xf] }
 0x112   : > { %v5813_v43 = vpop.f32.mrb[22].mxu0  ;;  %v4876_v34 = vmax.bf16 %v5655_v12, %v4862_v52  ;;  %v6484_v12 = vld [vmem:[%s6583_s18 + $0x70] ss:$8 sps:$4 sm:$0xff]   ;;  %v4943_v37 = vsel %vm6654_vm4, %v4938_v48, %v4942_v9  ;;  %v5644_v9 = vld [vmem:[%s6583_s18 + $0xbc] sm:$0x1]  ;;  %v4807_v2 = vshll.u32 %v5643_v41, 16 }
 0x113   : > { %v7485_v23 = vpop.f32.mrb[23].mxu0  ;;  %v4863_v51 = vmax.bf16 %v7433_v46, %v4849_v21  ;;  %v4668_v46 = vshll.u32 %v7476_v44, 16  ;;  %v4657_v26 = vor.u32 %v4656_v60, %v4653_v15  ;;  %v4676_v21 = vrot.slane %v4674_v30, 5  ;;  %v6454_v53 = vld [vmem:[%s6857_s9 + $0x38] ss:$8 sps:$4 sm:$0xff]  }
 0x114   : > { %6025 = vmatpush3.bf16.msra.mxu1 %v6445_v55  ;;  %v4995_v59 = vmax.bf16 %v4929_v35, %v4876_v34  ;;  %v4662_v55 = vrot.slane %v4660_v56, 5  ;;  %v4800_v31 = vrot.slane %v4798_v19, 4  ;;  %v4809_v56 = vrot.slane %v4807_v2, 5  ;;  %v7521_v48 = vld [vmem:[%s6583_s18 + $0x28] sm:$0xf] }
 0x115   : > { %6034 = vmatprep.subr.bf16.mxu1 %v6447_v40  ;;  %5286 = vmatmul.mubr.msk.bf16.gmra.mrb[8].mxu0 %vm384_vm1, %v6484_v12  ;;  %v4877_v50 = vmax.bf16 %v5656_v49, %v4863_v51  ;;  %v4670_v52 = vrot.slane %v4668_v46, 5  ;;  %v4801_v49 = vshll.u32 %v7494_v3, 16  ;;  %v4658_v34 = vrot.slane %v4657_v26, 4  ;;  %v6457_v15 = vld [vmem:[%s6857_s9 + $0x50] ss:$8 sps:$4 sm:$0xff]  }
 0x116   : > { %2216 = vmatprep.mubr.bf16.mxu0 %v6496_v6  ;;  %v5002_v57 = vunpack.c.l.bf16 %v4995_v59  ;;  %v4815_v51 = vshll.u32 %v7507_v47, 16  ;;  %v4821_v60 = vshll.u32 %v5644_v9, 16  ;;  %v5664_v30 = vld [vmem:[%s6583_s18 + $0x2c] sm:$0x1]  ;;  %v6485_v26 = vld [vmem:[%s6583_s18 + $0x80] ss:$8 sps:$4 sm:$0xff]  }
 0x117   : > { %6027 = vmatmul.mubr.msk.bf16.vlgmr.msra.gmra.mrb[8].mxu1 %vm2862_vm5, %v6448_v4  ;;  %v4996_v43 = vmax.bf16 %v4943_v37, %v4877_v50  ;;  %v6450_v4 = vld [vmem:[%s7822_s5 + $0x160] sm:$0xff]   ;;  %v4671_v35 = vor.u32 %v4670_v52, %v4667_v7  ;;  %v4803_v24 = vrot.slane %v4801_v49, 5  ;;  %v4663_v16 = vsel %vm6654_vm4, %v4658_v34, %v4662_v55  ;;  %v7530_v7 = vld [vmem:[%s6583_s18 + $0x30] sm:$0xf]  ;;  %v5636_v61 = vld [vmem:[%s6583_s18 + $0xf8] sm:$0xf] }
 0x118   : > { %6035 = vmatpush3.bf16.msra.mxu1 %v6447_v40  ;;  %6030 = vmatprep.mubr.msk.bf16.mxu1 %vm2862_vm5, %v6452_v42  ;;  %v4812_v40 = vshrl.u32 %v7507_v47, 16  ;;  %v4703_v41 = vmax.bf16 %v4663_v16, %v4584_v45  ;;  %v4817_v37 = vrot.slane %v4815_v51, 5  ;;  %v4823_v10 = vrot.slane %v4821_v60, 5  ;;  %v5665_v49 = vld [vmem:[%s6583_s18 + $0x34] sm:$0x1] }
 0x119   : > { %6036 = vmatprep.subr.bf16.mxu1 %v6449_v17  ;;  %v5003_v42 = vunpack.c.l.bf16 %v4996_v43  ;;  %v4672_v12 = vrot.slane %v4671_v35, 4  ;;  %v4804_v50 = vor.u32 %v4803_v24, %v4800_v31  ;;  %v4945_v45 = vshrl.u32 %v7521_v48, 16  ;;  %v5637_v43 = vld [vmem:[%s6583_s18 + $0x100] sm:$0xf]  ;;  %v4593_v60 = vld [vmem:[%s6583_s18 + $0x34] sm:$0x1] }
 0x11a   : > { %v4814_v59 = vrot.slane %v4812_v40, 4  ;;  %v4717_v19 = vmax.bf16 %v7494_v3, %v4703_v41  ;;  %v4954_v35 = vshll.u32 %v5664_v30, 16  ;;  %v4959_v31 = vshrl.u32 %v7530_v7, 16  ;;  %v7558_v40 = vld [vmem:[%s6583_s18 + $0x30] sm:$0xf] }
 0x11b   : > { %v6355_v46 = vpack.i.bf16 %v5003_v42, %v5002_v57  ;;  %v4677_v55 = vsel %vm6654_vm4, %v4672_v12, %v4676_v21  ;;  %v4948_v57 = vshll.u32 %v7521_v48, 16  ;;  %v4805_v9 = vrot.slane %v4804_v50, 4  ;;  %v5657_v12 = vld [vmem:[%s6583_s18 + $0x70] sm:$0xf]  ;;  %v7577_v30 = vld [vmem:[%s6583_s18 + $0xc0] sm:$0xf] }
 0x11c   : > { %6037 = vmatpush3.bf16.msra.mxu1 %v6449_v17  ;;  %v6451_v17 = vld [vmem:[%s7822_s5 + $0x168] sm:$0xff]   ;;  %v4704_v52 = vmax.bf16 %v4677_v55, %v4585_v20  ;;  %v4818_v21 = vor.u32 %v4817_v37, %v4814_v59  ;;  %v4947_v2 = vrot.slane %v4945_v45, 4  ;;  %v4731_v44 = vmax.bf16 %v5636_v61, %v4717_v19  ;;  %v5645_v45 = vld [vmem:[%s6583_s18 + $0xc4] sm:$0x1] }
 0x11d   : > { %6038 = vmatprep.subr.bf16.mxu1 %v6450_v4  ;;  %5287 = vmatmul.mubr.msk.bf16.gmra.mrb[12].mxu0 %vm384_vm1, %v6485_v26  ;;  %v4950_v34 = vrot.slane %v4948_v57, 5  ;;  %v4810_v20 = vsel %vm6654_vm4, %v4805_v9, %v4809_v56  ;;  %v4956_v42 = vrot.slane %v4954_v35, 5  ;;  %v4961_v24 = vrot.slane %v4959_v31, 4  ;;  %v5624_v9 = vld [vmem:[%s6583_s18 + $0x78] sm:$0xf] }
 0x11e   : > { %2522 = vmatprep.mubr.bf16.mxu0 %v6496_v6  ;;  %6356 = vrot.lane.b32.xlu0 %v6355_v46, %s6497_s14  ;;  %v4718_v14 = vmax.bf16 %v7507_v47, %v4704_v52  ;;  %v4819_v3 = vrot.slane %v4818_v21, 4  ;;  %v4962_v51 = vshll.u32 %v7530_v7, 16  ;;  %v6459_v47 = vld [vmem:[%s7822_s5 + $0x38] sm:$0xff]   ;;  %v4850_v16 = vmax.bf16 %v4810_v20, %v4731_v44 }
 0x11f   : > { %6031 = vmatmul.mubr.msk.bf16.gmra.mrb[12].mxu1 %vm2862_vm5, %v6454_v53  ;;  %v6453_v53 = vld [vmem:[%s7822_s5 + $0x170] sm:$0xff]   ;;  %v4968_v59 = vshll.u32 %v5665_v49, 16  ;;  %v7573_v46 = vrot.slane %v4285_v1, 5  ;;  %v4679_v37 = vshrl.u32 %v7558_v40, 16  ;;  %v5658_v1 = vld [vmem:[%s6583_s18 + $0x78] sm:$0xf] }
 0x120   : > { %6039 = vmatpush3.bf16.msra.mxu1 %v6450_v4  ;;  %6046 = vmatprep.mubr.msk.bf16.mxu1 %vm2862_vm5, %v6457_v15  ;;  %v4951_v4 = vor.u32 %v4950_v34, %v4947_v2  ;;  %v4732_v15 = vmax.bf16 %v5637_v43, %v4718_v14  ;;  %v4824_v56 = vsel %vm6654_vm4, %v4819_v3, %v4823_v10  ;;  %v4964_v50 = vrot.slane %v4962_v51, 5  ;;  %v7596_v49 = vld [vmem:[%s6583_s18 + $0x38] sm:$0xf]  ;;  %v6462_v2 = vld [vmem:[%s7822_s5 + $0x40] sm:$0xff]  }
 0x121   : > { %6040 = vmatprep.subr.bf16.mxu1 %v6451_v17  ;;  %v4864_v55 = vmax.bf16 %v7521_v48, %v4850_v16  ;;  %v4970_v61 = vrot.slane %v4968_v59, 5  ;;  %v4682_v10 = vshll.u32 %v7558_v40, 16  ;;  %v4681_v48 = vrot.slane %v4679_v37, 4  ;;  %v6458_v3 = vld [vmem:[%s7822_s5 + $0x180] sm:$0xff]  }
 0x122   : > { %v4952_v41 = vrot.slane %v4951_v4, 4  ;;  %v4851_v26 = vmax.bf16 %v4824_v56, %v4732_v15  ;;  %v4965_v57 = vor.u32 %v4964_v50, %v4961_v24  ;;  %v4688_v52 = vshll.u32 %v4593_v60, 16  ;;  %v5578_v15 = vld [vmem:[%s6857_s9 + $0x18] sm:$0xf]  ;;  %v6464_v60 = vld [vmem:[%s7822_s5 + $0x48] sm:$0xff]  }
 0x123   : > { %v4878_v43 = vmax.bf16 %v5657_v12, %v4864_v55  ;;  %v4826_v21 = vshrl.u32 %v7577_v30, 16  ;;  %v4835_v31 = vshll.u32 %v5645_v45, 16  ;;  %v4973_v51 = vshrl.u32 %v7596_v49, 16  ;;  %v5666_v50 = vld [vmem:[%s6583_s18 + $0x3c] sm:$0x1] }
 0x124   : > { %6041 = vmatpush3.bf16.msra.mxu1 %v6451_v17  ;;  %v4957_v17 = vsel %vm6654_vm4, %v4952_v41, %v4956_v42  ;;  %v4865_v19 = vmax.bf16 %v7530_v7, %v4851_v26  ;;  %v4966_v34 = vrot.slane %v4965_v57, 4  ;;  %v4690_v35 = vrot.slane %v4688_v52, 5  ;;  %v6466_v26 = vld [vmem:[%s6857_s9 + $0x70] ss:$8 sps:$4 sm:$0xff]   ;;  %v5580_v55 = vld [vmem:[%s6857_s9 + $0x20] sm:$0xf] }
 0x125   : > { %6042 = vmatprep.subr.bf16.mxu1 %v6453_v53  ;;  %5314 = vmatmul.mubr.msk.bf16.vlgmr.msra.gmra.mrb[0].mxu0 %vm384_vm1, %v6936_v0  ;;  %v4684_v0 = vrot.slane %v4682_v10, 5  ;;  %v4997_v14 = vmax.bf16 %v4957_v17, %v4878_v43  ;;  %v4828_v20 = vrot.slane %v4826_v21, 4  ;;  %v4586_v42 = vmax.bf16 %v5624_v9, %v7558_v40  ;;  %v5638_v57 = vld [vmem:[%s6583_s18 + $0x108] sm:$0xf] }
 0x126   : > { %5895 = vmatpush3.bf16.msra.mxu0 %v7381_v22  ;;  %2532 = vmatprep.mubr.bf16.mxu0 %v6496_v6  ;;  %v4829_v22 = vshll.u32 %v7577_v30, 16  ;;  %v4879_v7 = vmax.bf16 %v5658_v1, %v4865_v19  ;;  %v4971_v4 = vsel %vm6654_vm4, %v4966_v34, %v4970_v61  ;;  %v4976_v59 = vshll.u32 %v7596_v49, 16 }
 0x127   : > { %5896 = vmatprep.subr.bf16.mxu0 %v6459_v47  ;;  %v4685_v44 = vor.u32 %v4684_v0, %v4681_v48  ;;  %v5004_v16 = vunpack.c.l.bf16 %v4997_v14  ;;  %v4297_v40 = vrot.slane %v4296_v13, 4  ;;  %v4301_v41 = vrot.slane %v4299_v18, 5 }
 0x128   : > { %6043 = vmatpush3.bf16.msra.mxu1 %v6453_v53  ;;  %v4831_v24 = vrot.slane %v4829_v22, 5  ;;  %v6460_v53 = vld [vmem:[%s6857_s9 + $0x60] ss:$8 sps:$4 sm:$0xff]   ;;  %v4998_v56 = vmax.bf16 %v4971_v4, %v4879_v7  ;;  %v4975_v37 = vrot.slane %v4973_v51, 4  ;;  %v4837_v45 = vrot.slane %v4835_v31, 5 }
 0x129   : > { %6044 = vmatprep.subr.bf16.mxu1 %v6456_v28  ;;  %v4686_v12 = vrot.slane %v4685_v44, 4  ;;  %v4978_v1 = vrot.slane %v4976_v59, 5  ;;  %v4304_v18 = vshrl.u32 %v5578_v15, 16  ;;  %v4982_v52 = vshll.u32 %v5666_v50, 16  ;;  %v6467_v22 = vld [vmem:[%s6857_s9 + $0x80] ss:$8 sps:$4 sm:$0xff]  }
 0x12a   : > { %5897 = vmatpush3.bf16.msra.mxu0 %v6459_v47  ;;  %v4832_v47 = vor.u32 %v4831_v24, %v4828_v20  ;;  %v5005_v61 = vunpack.c.l.bf16 %v4998_v56  ;;  %v4307_v19 = vshll.u32 %v5578_v15, 16  ;;  %v4318_v43 = vshrl.u32 %v5580_v55, 16  ;;  %v5579_v31 = vld [vmem:[%s6857_s9 + $0x1c] sm:$0x1]  ;;  %v5586_v15 = vld [vmem:[%s6857_s9 + $0x38] sm:$0xf] }
 0x12b   : > { %5898 = vmatprep.subr.bf16.mxu0 %v6462_v2  ;;  %v4691_v10 = vsel %vm6654_vm4, %v4686_v12, %v4690_v35  ;;  %v4979_v48 = vor.u32 %v4978_v1, %v4975_v37  ;;  %v4321_v9 = vshll.u32 %v5580_v55, 16  ;;  %v4288_v21 = vsel %vm6654_vm4, %v7309_v58, %v7573_v46  ;;  %v5581_v46 = vld [vmem:[%s6857_s9 + $0x24] sm:$0x1]  ;;  %v5583_v12 = vld [vmem:[%s6857_s9 + $0x2c] sm:$0x1] }
 0x12c   : > { %6045 = vmatpush3.bf16.msra.mxu1 %v6456_v28  ;;  %v4705_v63 = vmax.bf16 %v4691_v10, %v4586_v42  ;;  %v4833_v13 = vrot.slane %v4832_v47, 4  ;;  %v5584_v28 = vld [vmem:[%s6857_s9 + $0x30] sm:$0xf]  ;;  %v6360_v17 = vpack.i.bf16 %v5005_v61, %v5004_v16  ;;  %v4332_v34 = vshrl.u32 %v5582_v38, 16  ;;  %v6471_v42 = vld [vmem:[%s7822_s5 + $0x58] sm:$0xff]  }
 0x12d   : > { %6054 = vmatprep.subr.bf16.mxu1 %v6458_v3  ;;  %5315 = vmatmul.mubr.msk.bf16.gmra.mrb[4].mxu0 %vm384_vm1, %v6958_v32  ;;  %v6469_v32 = vld [vmem:[%s7822_s5 + $0x50] sm:$0xff]   ;;  %v4335_v7 = vshll.u32 %v5582_v38, 16  ;;  %v4346_v14 = vshrl.u32 %v5584_v28, 16  ;;  %v4349_v44 = vshll.u32 %v5584_v28, 16  ;;  %v4306_v20 = vrot.slane %v4304_v18, 4  ;;  %v6468_v18 = vld [vmem:[%s7822_s5 + $0x1a0] sm:$0xff]  }
 0x12e   : > { %5899 = vmatpush3.bf16.msra.mxu0 %v6462_v2  ;;  %2542 = vmatprep.mubr.bf16.mxu0 %v6496_v6  ;;  %v4719_v0 = vmax.bf16 %v7577_v30, %v4705_v63  ;;  %v4302_v2 = vsel %vm6654_vm4, %v4297_v40, %v4301_v41  ;;  %v4838_v35 = vsel %vm6654_vm4, %v4833_v13, %v4837_v45  ;;  %v6463_v30 = vld [vmem:[%s7822_s5 + $0x190] sm:$0xff]   ;;  %v4984_v4 = vrot.slane %v4982_v52, 5  ;;  %v6465_v40 = vld [vmem:[%s7822_s5 + $0x198] sm:$0xff]   ;;  %v5588_v37 = vld [vmem:[%s6857_s9 + $0x40] sm:$0xf] }
 0x12f   : > { %6047 = vmatmul.mubr.msk.bf16.vlgmr.msra.gmra.mrb[8].mxu1 %vm2862_vm5, %v6460_v53  ;;  %5900 = vmatprep.subr.bf16.mxu0 %v6464_v60  ;;  %v4309_v24 = vrot.slane %v4307_v19, 5  ;;  %v4320_v51 = vrot.slane %v4318_v43, 4  ;;  %v4323_v53 = vrot.slane %v4321_v9, 5  ;;  %v5602_v16 = vcombine.low %v4288_v21, %v4302_v2  ;;  %v5585_v10 = vld [vmem:[%s6857_s9 + $0x34] sm:$0x1]  ;;  %v6470_v19 = vld [vmem:[%s7822_s5 + $0x1a8] sm:$0xff]  }
 0x130   : > { %6055 = vmatpush3.bf16.msra.mxu1 %v6458_v3  ;;  %6050 = vmatprep.mubr.msk.bf16.mxu1 %vm2862_vm5, %v6466_v26  ;;  %v4733_v58 = vmax.bf16 %v5638_v57, %v4719_v0  ;;  %v4980_v3 = vrot.slane %v4979_v48, 4  ;;  %v4334_v59 = vrot.slane %v4332_v34, 4  ;;  %v4337_v41 = vrot.slane %v4335_v7, 5  ;;  %v5587_v2 = vld [vmem:[%s6857_s9 + $0x3c] sm:$0x1] }
 0x131   : > { %6056 = vmatprep.subr.bf16.mxu1 %v6461_v8  ;;  %6361 = vrot.lane.b32.xlu1 %v6360_v17, %s6497_s14  ;;  %v4348_v47 = vrot.slane %v4346_v14, 4  ;;  %v4351_v50 = vrot.slane %v4349_v44, 5  ;;  %v4313_v55 = vshll.u32 %v5579_v31, 16  ;;  %v4327_v61 = vshll.u32 %v5581_v46, 16 }
 0x132   : > { %5901 = vmatpush3.bf16.msra.mxu0 %v6464_v60  ;;  %v4852_v56 = vmax.bf16 %v4838_v35, %v4733_v58  ;;  %v5659_v60 = vld [vmem:[%s6583_s18 + $0x80] sm:$0xf]  ;;  %v4985_v45 = vsel %vm6654_vm4, %v4980_v3, %v4984_v4  ;;  %v4324_v1 = vor.u32 %v4323_v53, %v4320_v51  ;;  %v4374_v63 = vshrl.u32 %v5588_v37, 16  ;;  %v5589_v58 = vld [vmem:[%s6857_s9 + $0x44] sm:$0x1] }
 0x133   : > { %5902 = vmatprep.subr.bf16.mxu0 %v6469_v32  ;;  %v4377_v13 = vshll.u32 %v5588_v37, 16  ;;  %v4338_v28 = vor.u32 %v4337_v41, %v4334_v59  ;;  %v4352_v17 = vor.u32 %v4351_v50, %v4348_v47  ;;  %v4355_v57 = vshll.u32 %v5585_v10, 16  ;;  %v6475_v50 = vld [vmem:[%s6857_s9 + $0x78] ss:$8 sps:$4 sm:$0xff]  }
 0x134   : > { %6057 = vmatpush3.bf16.msra.mxu1 %v6461_v8  ;;  %v4866_v26 = vmax.bf16 %v7596_v49, %v4852_v56  ;;  %v4341_v8 = vshll.u32 %v5583_v12, 16  ;;  %v4360_v49 = vshrl.u32 %v5586_v15, 16  ;;  %v4315_v52 = vrot.slane %v4313_v55, 5  ;;  %v2646_v55 = vld [vmem:[%s7819_s2] sm:$0x7] }
 0x135   : > { %6058 = vmatprep.subr.bf16.mxu1 %v6463_v30  ;;  %5316 = vmatmul.mubr.msk.bf16.gmra.mrb[8].mxu0 %vm384_vm1, %v6962_v27  ;;  %v4310_v27 = vor.u32 %v4309_v24, %v4306_v20  ;;  %v4325_v9 = vrot.slane %v4324_v1, 4  ;;  %v4329_v0 = vrot.slane %v4327_v61, 5  ;;  %v4339_v31 = vrot.slane %v4338_v28, 4  ;;  %v6473_v24 = vld [vmem:[%s6857_s9 + $0x58] ss:$8 sps:$4 sm:$0xff]  }
 0x136   : > { %2552 = vmatprep.mubr.bf16.mxu0 %v6496_v6  ;;  %5903 = vmatpush3.bf16.msra.mxu0 %v6469_v32  ;;  %v4880_v38 = vmax.bf16 %v5659_v60, %v4866_v26  ;;  %v4363_v6 = vshll.u32 %v5586_v15, 16  ;;  %v6472_v32 = vld [vmem:[%s6857_s9 + $0x48] ss:$8 sps:$4 sm:$0xff]   ;;  %v4362_v34 = vrot.slane %v4360_v49, 4  ;;  %v4343_v7 = vrot.slane %v4341_v8, 5 }
 0x137   : > { %6051 = vmatmul.mubr.msk.bf16.gmra.mrb[12].mxu1 %vm2862_vm5, %v6467_v22  ;;  %5904 = vmatprep.subr.bf16.mxu0 %v6471_v42  ;;  %v4311_v43 = vrot.slane %v4310_v27, 4  ;;  %v4379_v22 = vrot.slane %v4377_v13, 5  ;;  %v4353_v14 = vrot.slane %v4352_v17, 4  ;;  %v4357_v44 = vrot.slane %v4355_v57, 5  ;;  %v6474_v15 = vld [vmem:[%s6857_s9 + $0x68] ss:$8 sps:$4 sm:$0xff]  }
 0x138   : > { %6059 = vmatpush3.bf16.msra.mxu1 %v6463_v30  ;;  %6066 = vmatprep.mubr.msk.bf16.mxu1 %vm2862_vm5, %v5602_v16  ;;  %v4999_v48 = vmax.bf16 %v4985_v45, %v4880_v38  ;;  %v4365_v35 = vrot.slane %v4363_v6, 5  ;;  %v4376_v30 = vrot.slane %v4374_v63, 4  ;;  %v4369_v20 = vshll.u32 %v5587_v2, 16  ;;  %v2684_v61 = vld [vmem:[%s7820_s3] sm:$0x7]  ;;  %s6338_s9 = smul.u32 224, %s7829_s28 }
 0x139   : > { %6060 = vmatprep.subr.bf16.mxu1 %v6465_v40  ;;  %v4316_v46 = vsel %vm6654_vm4, %v4311_v43, %v4315_v52  ;;  %v4330_v3 = vsel %vm6654_vm4, %v4325_v9, %v4329_v0  ;;  %v4344_v51 = vsel %vm6654_vm4, %v4339_v31, %v4343_v7  ;;  %v4358_v53 = vsel %vm6654_vm4, %v4353_v14, %v4357_v44 }
 0x13a   : > { %5905 = vmatpush3.bf16.msra.mxu0 %v6471_v42  ;;  %v5006_v21 = vunpack.c.l.bf16 %v4999_v48  ;;  %v4380_v4 = vor.u32 %v4379_v22, %v4376_v30  ;;  %v4383_v42 = vshll.u32 %v5589_v58, 16  ;;  %v5603_v56 = vcombine.low %v4316_v46, %v4330_v3  ;;  %s7723_s22 = scalar_lea.vmem %s7825_s8, %s6338_s9 }
 0x13b   : > { %v4371_v16 = vrot.slane %v4369_v20, 5  ;;  %v5604_v12 = vcombine.low %v4344_v51, %v4358_v53  ;;  %v2658_v26 = vsub.s32 2, %v6559_v5  ;;  %v2654_v46 = vsub.s32 1, %v6559_v5 }
 0x13c   : > { %6061 = vmatpush3.bf16.msra.mxu1 %v6465_v40  ;;  %5026 = vrot.lane.b32.xlu1 %v5006_v21, %s6497_s14  ;;  %v4381_v60 = vrot.slane %v4380_v4, 4  ;;  %v4385_v40 = vrot.slane %v4383_v42, 5 }
 0x13d   : > { %6062 = vmatprep.subr.bf16.mxu1 %v6468_v18  ;;  %5317 = vmatmul.mubr.msk.bf16.gmra.mrb[12].mxu0 %vm384_vm1, %v6984_v39  ;;  %v4366_v39 = vor.u32 %v4365_v35, %v4362_v34  ;;  %v2659_v10 = vrot.slane %v2646_v55, %v2658_v26  ;;  %v2697_v27 = vrot.slane %v2684_v61, %v2658_v26 }
 0x13e   : > { %5906 = vmatprep.mubr.msk.bf16.mxu0 %vm2862_vm5, %v6472_v32  ;;  %v4386_v47 = vsel %vm6654_vm4, %v4381_v60, %v4385_v40  ;;  %v7739_v3 = vrot.slane %v2646_v55, %v2654_v46  ;;  %v7743_v4 = vrot.slane %v2684_v61, %v2654_v46 }
 0x13f   : > { %v4367_v59 = vrot.slane %v4366_v39, 4 }
 0x140   : > { %6063 = vmatpush3.bf16.msra.mxu1 %v6468_v18 }
 0x141   : > { %6064 = vmatprep.subr.bf16.mxu1 %v6470_v19  ;;  %v4372_v41 = vsel %vm6654_vm4, %v4367_v59, %v4371_v16 }
 0x142   : > { %v5605_v37 = vcombine.low %v4372_v41, %v4386_v47 }
 0x144   : > { %6065 = vmatpush3.bf16.msra.mxu1 %v6470_v19 }
 0x145   : > { %5907 = vmatmul.mubr.msk.bf16.vlgmr.msra.gmra.mrb[24].mxu0 %vm2862_vm5, %v6473_v24 }
 0x146   : > { %5910 = vmatprep.mubr.msk.bf16.mxu0 %vm2862_vm5, %v6474_v15 }
 0x147   : > { %6067 = vmatmul.mubr.msk.bf16.vlgmr.msra.gmra.mrb[8].mxu1 %vm2862_vm5, %v5603_v56 }
 0x148   : > { %6070 = vmatprep.mubr.msk.bf16.mxu1 %vm2862_vm5, %v5604_v12 }
 0x14d   : > { %5911 = vmatmul.mubr.msk.bf16.gmra.mrb[28].mxu0 %vm2862_vm5, %v6475_v50 }
 0x14f   : > { %6071 = vmatmul.mubr.msk.bf16.gmra.mrb[12].mxu1 %vm2862_vm5, %v5605_v37 }
 0x15a   : > { %v5888_v45 = vpop.f32.mrb[0].mxu1 }
 0x15b   : > { %v6074_v62 = vadd.f32 %v5888_v45, %v7408_v54  ;;  %v2595_v1 = vpop.f32.mrb[1].mxu1 }
 0x15c   : > { %v6075_v8 = vadd.f32 %v2595_v1, %v7417_v33  ;;  %v5889_v38 = vpop.f32.mrb[2].mxu1 }
 0x15d   : > { %v2671_v49 = vmul.f32 %v6074_v62, %v2659_v10  ;;  %v6076_v6 = vadd.f32 %v5889_v38, %v7423_v29  ;;  %v2598_v63 = vpop.f32.mrb[3].mxu1 }
 0x15e   : > { %v2665_v13 = vmul.f32 %v6075_v8, %v2659_v10  ;;  %v6077_v18 = vadd.f32 %v2598_v63, %v7427_v11 }
 0x15f   : > { %v2709_v28 = vadd.f32 %v2697_v27, %v2671_v49  ;;  %v2674_v17 = vmul.f32 %v6076_v6, %v2659_v10 }
 0x160   : > { %v2703_v54 = vadd.f32 %v2697_v27, %v2665_v13  ;;  %v2668_v33 = vmul.f32 %v6077_v18, %v2659_v10 }
 0x161   : > { %v2730_v57 = vmax.f32 %v2709_v28, 0.0  ;;  %v2712_v48 = vadd.f32 %v2697_v27, %v2674_v17 }
 0x162   : > { %v2724_v29 = vmax.f32 %v2703_v54, 0.0  ;;  %v2706_v52 = vadd.f32 %v2697_v27, %v2668_v33  ;;  %v5892_v32 = vpop.f32.mrb[4].mxu1 }
 0x163   : > { %2751 = vst [vmem:[%s7723_s22 + $0x50] sm:$0x7f] %v2730_v57  ;;  %v2733_v11 = vmax.f32 %v2712_v48, 0.0  ;;  %v6078_v19 = vadd.f32 %v5892_v32, %v7463_v25  ;;  %v2611_v43 = vpop.f32.mrb[5].mxu1 }
 0x164   : > { %2745 = vst [vmem:[%s7723_s22 + $0x10] sm:$0x7f] %v2724_v29  ;;  %v2727_v9 = vmax.f32 %v2706_v52, 0.0  ;;  %v6079_v0 = vadd.f32 %v2611_v43, %v7468_v36  ;;  %v5893_v21 = vpop.f32.mrb[6].mxu1  ;;  %v2650_v36 = vsub.s32 0, %v6559_v5 }
 0x165   : > { %2754 = vst [vmem:[%s7723_s22 + $0x70] sm:$0x7f] %v2733_v11  ;;  %v2683_v2 = vmul.f32 %v6078_v19, %v2659_v10  ;;  %v2614_v34 = vpop.f32.mrb[7].mxu1 }
 0x166   : > { %2748 = vst [vmem:[%s7723_s22 + $0x30] sm:$0x7f] %v2727_v9  ;;  %v2677_v35 = vmul.f32 %v6079_v0, %v2659_v10  ;;  %v6080_v30 = vadd.f32 %v2614_v34, %v7485_v23  ;;  %v7737_v20 = vrot.slane %v2646_v55, %v2650_v36  ;;  %v7741_v39 = vrot.slane %v2684_v61, %v2650_v36 }
 0x167   : > { %v2721_v22 = vadd.f32 %v2697_v27, %v2683_v2 }
 0x168   : > { %v2715_v31 = vadd.f32 %v2697_v27, %v2677_v35  ;;  %v2680_v7 = vmul.f32 %v6080_v30, %v2659_v10 }
 0x169   : > { %v2742_v25 = vmax.f32 %v2721_v22, 0.0 }
 0x16a   : > { %v2736_v14 = vmax.f32 %v2715_v31, 0.0  ;;  %v2718_v44 = vadd.f32 %v2697_v27, %v2680_v7 }
 0x16b   : > { %2763 = vst [vmem:[%s7723_s22 + $0xd0] sm:$0x7f] %v2742_v25 }
 0x16c   : > { %2757 = vst [vmem:[%s7723_s22 + $0x90] sm:$0x7f] %v2736_v14  ;;  %v2739_v58 = vmax.f32 %v2718_v44, 0.0 }
 0x16e   : > { %2760 = vst [vmem:[%s7723_s22 + $0xb0] sm:$0x7f] %v2739_v58 }
 0x17d   : > { %v6352_v36 = vpop.permute.xlu0 %6351 }
 0x1f8   : > { %v2524_v23 = vpop.f32.mrb[0].mxu0 }
 0x1f9   : > { %v2663_v42 = vmul.f32 %v7737_v20, %v2524_v23  ;;  %v2526_v24 = vpop.f32.mrb[1].mxu0 }
 0x1fa   : > { %v2664_v51 = vmul.f32 %v7739_v3, %v2526_v24  ;;  %v2528_v53 = vpop.f32.mrb[2].mxu0 }
 0x1fb   : > { %v2701_v5 = vadd.f32 %v7741_v39, %v2663_v42  ;;  %v2666_v15 = vmul.f32 %v7737_v20, %v2528_v53  ;;  %v2530_v56 = vpop.f32.mrb[3].mxu0 }
 0x1fc   : > { %v2702_v16 = vadd.f32 %v7743_v4, %v2664_v51  ;;  %v2667_v12 = vmul.f32 %v7739_v3, %v2530_v56 }
 0x1fd   : > { %v2722_v59 = vmax.f32 %v2701_v5, 0.0  ;;  %v2704_v60 = vadd.f32 %v7741_v39, %v2666_v15  ;;  %v6357_v15 = vpop.permute.xlu0 %6356 }
 0x1fe   : > { %v2723_v40 = vmax.f32 %v2702_v16, 0.0  ;;  %v2705_v41 = vadd.f32 %v7743_v4, %v2667_v12 }
 0x1ff   : > { %2743 = vst [vmem:[%s7723_s22] sm:$0x7f] %v2722_v59  ;;  %v2725_v47 = vmax.f32 %v2704_v60, 0.0 }
 0x200   : > { %2744 = vst [vmem:[%s7723_s22 + $0x8] sm:$0x7f] %v2723_v40  ;;  %v2726_v50 = vmax.f32 %v2705_v41, 0.0  ;;  %v2534_v37 = vpop.f32.mrb[4].mxu0 }
 0x201   : > { %2746 = vst [vmem:[%s7723_s22 + $0x20] sm:$0x7f] %v2725_v47  ;;  %v2669_v26 = vmul.f32 %v7737_v20, %v2534_v37  ;;  %v2536_v55 = vpop.f32.mrb[5].mxu0  ;;  %v6358_v47 = vunpack.i.l.bf16 %v6357_v15  ;;  %v6353_v37 = vunpack.i.l.bf16 %v6352_v36 }
 0x202   : > { %2747 = vst [vmem:[%s7723_s22 + $0x28] sm:$0x7f] %v2726_v50  ;;  %v2670_v61 = vmul.f32 %v7739_v3, %v2536_v55  ;;  %v2538_v10 = vpop.f32.mrb[6].mxu0 }
 0x203   : > { %v2707_v45 = vadd.f32 %v7741_v39, %v2669_v26  ;;  %v2672_v62 = vmul.f32 %v7737_v20, %v2538_v10  ;;  %v2540_v27 = vpop.f32.mrb[7].mxu0 }
 0x204   : > { %v2708_v1 = vadd.f32 %v7743_v4, %v2670_v61  ;;  %v2673_v8 = vmul.f32 %v7739_v3, %v2540_v27  ;;  %v6362_v27 = vpop.permute.xlu1 %6361 }
 0x205   : > { %v2728_v38 = vmax.f32 %v2707_v45, 0.0  ;;  %v2710_v49 = vadd.f32 %v7741_v39, %v2672_v62  ;;  %v6359_v45 = vunpack.i.h.bf16 %v6357_v15 }
 0x206   : > { %v2729_v6 = vmax.f32 %v2708_v1, 0.0  ;;  %v2711_v63 = vadd.f32 %v7743_v4, %v2673_v8  ;;  %v6354_v8 = vunpack.i.h.bf16 %v6352_v36 }
 0x207   : > { %2749 = vst [vmem:[%s7723_s22 + $0x40] sm:$0x7f] %v2728_v38  ;;  %v2731_v13 = vmax.f32 %v2710_v49, 0.0 }
 0x208   : > { %2750 = vst [vmem:[%s7723_s22 + $0x48] sm:$0x7f] %v2729_v6  ;;  %v2732_v18 = vmax.f32 %v2711_v63, 0.0  ;;  %v2544_v28 = vpop.f32.mrb[8].mxu0 }
 0x209   : > { %2752 = vst [vmem:[%s7723_s22 + $0x60] sm:$0x7f] %v2731_v13  ;;  %v2675_v17 = vmul.f32 %v7737_v20, %v2544_v28  ;;  %v2546_v54 = vpop.f32.mrb[9].mxu0 }
 0x20a   : > { %2753 = vst [vmem:[%s7723_s22 + $0x68] sm:$0x7f] %v2732_v18  ;;  %v2676_v33 = vmul.f32 %v7739_v3, %v2546_v54  ;;  %v2548_v57 = vpop.f32.mrb[10].mxu0 }
 0x20b   : > { %v2713_v48 = vadd.f32 %v7741_v39, %v2675_v17  ;;  %v2678_v29 = vmul.f32 %v7737_v20, %v2548_v57  ;;  %v2550_v52 = vpop.f32.mrb[11].mxu0 }
 0x20c   : > { %v2714_v32 = vadd.f32 %v7743_v4, %v2676_v33  ;;  %v2679_v11 = vmul.f32 %v7739_v3, %v2550_v52 }
 0x20d   : > { %v2734_v19 = vmax.f32 %v2713_v48, 0.0  ;;  %v2716_v43 = vadd.f32 %v7741_v39, %v2678_v29 }
 0x20e   : > { %v2735_v9 = vmax.f32 %v2714_v32, 0.0  ;;  %v2717_v0 = vadd.f32 %v7743_v4, %v2679_v11 }
 0x20f   : > { %2755 = vst [vmem:[%s7723_s22 + $0x80] sm:$0x7f] %v2734_v19  ;;  %v2737_v21 = vmax.f32 %v2716_v43, 0.0 }
 0x210   : > { %2756 = vst [vmem:[%s7723_s22 + $0x88] sm:$0x7f] %v2735_v9  ;;  %v2738_v2 = vmax.f32 %v2717_v0, 0.0  ;;  %v2554_v34 = vpop.f32.mrb[12].mxu0 }
 0x211   : > { %2758 = vst [vmem:[%s7723_s22 + $0xa0] sm:$0x7f] %v2737_v21  ;;  %v2681_v35 = vmul.f32 %v7737_v20, %v2554_v34  ;;  %v2556_v30 = vpop.f32.mrb[13].mxu0  ;;  %v5616_v20 = vld [vmem:[%s7823_s6] ss:$0 sm:$0xff]  ;;  %v5027_v34 = vpop.permute.xlu1 %5026 }
 0x212   : > { %2759 = vst [vmem:[%s7723_s22 + $0xa8] sm:$0x7f] %v2738_v2  ;;  %v2682_v22 = vmul.f32 %v7739_v3, %v2556_v30  ;;  %v2558_v31 = vpop.f32.mrb[14].mxu0  ;;  %v6363_v2 = vunpack.i.l.bf16 %v6362_v27 }
 0x213   : > { %v2719_v7 = vadd.f32 %v7741_v39, %v2681_v35  ;;  %v2559_v25 = vpop.f32.mrb[15].mxu0 }
 0x214   : > { %v2720_v14 = vadd.f32 %v7743_v4, %v2682_v22  ;;  %v5617_v4 = vld [vmem:[%s7824_s7] ss:$0 sm:$0xff]  ;;  %v6364_v25 = vunpack.i.h.bf16 %v6362_v27 }
 0x215   : > { %v2740_v44 = vmax.f32 %v2719_v7, 0.0 }
 0x216   : > { %v2741_v58 = vmax.f32 %v2720_v14, 0.0 }
 0x217   : > { %2761 = vst [vmem:[%s7723_s22 + $0xc0] sm:$0x7f] %v2740_v44 }
 0x218   : > { %2762 = vst [vmem:[%s7723_s22 + $0xc8] sm:$0x7f] %v2741_v58  ;;  %v5908_v46 = vpop.f32.mrb[24].mxu0 }
 0x219   : > { %v2909_v23 = vpop.f32.mrb[25].mxu0 }
 0x21a   : > { %v6068_v42 = vpop.f32.mrb[8].mxu1  ;;  %v5909_v24 = vpop.f32.mrb[26].mxu0 }
 0x21b   : > { %v4494_v3 = vpop.f32.mrb[9].mxu1  ;;  %v6081_v51 = vadd.f32 %v6068_v42, %v5908_v46  ;;  %v2912_v53 = vpop.f32.mrb[27].mxu0 }
 0x21c   : > { %v6069_v39 = vpop.f32.mrb[10].mxu1  ;;  %v6082_v5 = vadd.f32 %v4494_v3, %v2909_v23 }
 0x21d   : > { %v4540_v56 = vmul.f32 %v6081_v51, %v5616_v20  ;;  %v4497_v16 = vpop.f32.mrb[11].mxu1  ;;  %v6083_v12 = vadd.f32 %v6069_v39, %v5909_v24 }
 0x21e   : > { %v4538_v59 = vmul.f32 %v6082_v5, %v5616_v20  ;;  %v6084_v60 = vadd.f32 %v4497_v16, %v2912_v53 }
 0x21f   : > { %v4554_v40 = vadd.f32 %v5617_v4, %v4540_v56  ;;  %v4541_v41 = vmul.f32 %v6083_v12, %v5616_v20 }
 0x220   : > { %v4552_v50 = vadd.f32 %v5617_v4, %v4538_v59  ;;  %v4539_v26 = vmul.f32 %v6084_v60, %v5616_v20  ;;  %v5912_v55 = vpop.f32.mrb[28].mxu0 }
 0x221   : > { %v4561_v61 = vmax.f32 %v4554_v40, 0.0  ;;  %v4555_v10 = vadd.f32 %v5617_v4, %v4541_v41  ;;  %v2925_v62 = vpop.f32.mrb[29].mxu0 }
 0x222   : > { %v4559_v1 = vmax.f32 %v4552_v50, 0.0  ;;  %v4553_v38 = vadd.f32 %v5617_v4, %v4539_v26  ;;  %v6072_v49 = vpop.f32.mrb[12].mxu1  ;;  %v5913_v6 = vpop.f32.mrb[30].mxu0 }
 0x223   : > { %v4562_v63 = vmax.f32 %v4555_v10, 0.0  ;;  %v5037_v13 = vsel %vm2862_vm5, %v4561_v61, %v6358_v47  ;;  %v4510_v18 = vpop.f32.mrb[13].mxu1  ;;  %v6085_v28 = vadd.f32 %v6072_v49, %v5912_v55  ;;  %v2928_v17 = vpop.f32.mrb[31].mxu0 }
 0x224   : > { %v5035_v54 = vsel %vm2862_vm5, %v4559_v1, %v6353_v37  ;;  %v4560_v33 = vmax.f32 %v4553_v38, 0.0  ;;  %5045 = vst.msk [vmem:[%s7723_s22 + $0x58] sm:$0x7f] %vm5042_vm6, %v5037_v13  ;;  %v6073_v57 = vpop.f32.mrb[14].mxu1  ;;  %v6086_v48 = vadd.f32 %v4510_v18, %v2925_v62 }
 0x225   : > { %5043 = vst.msk [vmem:[%s7723_s22 + $0x18] sm:$0x7f] %vm5042_vm6, %v5035_v54  ;;  %v5038_v29 = vsel %vm2862_vm5, %v4562_v63, %v6359_v45  ;;  %v4544_v52 = vmul.f32 %v6085_v28, %v5616_v20  ;;  %v4513_v32 = vpop.f32.mrb[15].mxu1 }
 0x226   : > { %v5036_v11 = vsel %vm2862_vm5, %v4560_v33, %v6354_v8  ;;  %5046 = vst.msk [vmem:[%s7723_s22 + $0x78] sm:$0x7f] %vm5042_vm6, %v5038_v29  ;;  %v4542_v19 = vmul.f32 %v6086_v48, %v5616_v20  ;;  %v6087_v43 = vadd.f32 %v4513_v32, %v2928_v17 }
 0x227   : > { %5044 = vst.msk [vmem:[%s7723_s22 + $0x38] sm:$0x7f] %vm5042_vm6, %v5036_v11  ;;  %v4558_v9 = vadd.f32 %v5617_v4, %v4544_v52 }
 0x228   : > { %v4556_v0 = vadd.f32 %v5617_v4, %v4542_v19  ;;  %v4543_v21 = vmul.f32 %v6087_v43, %v5616_v20 }
 0x229   : > { %v4565_v35 = vmax.f32 %v4558_v9, 0.0 }
 0x22a   : > { %v4563_v30 = vmax.f32 %v4556_v0, 0.0  ;;  %v4557_v22 = vadd.f32 %v5617_v4, %v4543_v21 }
 0x22b   : > { %v5041_v31 = vsel %vm2862_vm5, %v4565_v35, %v5027_v34 }
 0x22c   : > { %v4564_v7 = vmax.f32 %v4557_v22, 0.0  ;;  %v5039_v14 = vsel %vm2862_vm5, %v4563_v30, %v6363_v2  ;;  %5049 = vst.msk [vmem:[%s7723_s22 + $0xd8] sm:$0x7f] %vm5042_vm6, %v5041_v31 }
 0x22d   : > { %5047 = vst.msk [vmem:[%s7723_s22 + $0x98] sm:$0x7f] %vm5042_vm6, %v5039_v14 }
 0x22e   : > { %v5040_v44 = vsel %vm2862_vm5, %v4564_v7, %v6364_v25 }
 0x22f   : > { %5048 = vst.msk [vmem:[%s7723_s22 + $0xb8] sm:$0x7f] %vm5042_vm6, %v5040_v44 }
 0x230 PF: > { %s18_s27 = sadd.s32 1, %s6493_s27  }
 0x231   : > { %p15_p4 = scmp.ge.s32.totalorder %s18_s27, 4  }
 0x233   :  { %17 = sbr.rel (!%p15_p4) target bundleno = 1 (0x1), region = 111 }

// kernel: inception_b_forward.2
= control target key start
LH: loop header
LB: loop body
LE: loop exit
PB: predicated region body
PF: predicated region fallthrough
CT: control target
= control target key end

     0   :  { %s8941_s24 = smov 0   ;;  %s11370_s0 = inlined_call_operand.vmem [shape: bf16[2,16,16,4], index: 0, kind: input, shape index: {}]   ;;  %s11371_s1 = inlined_call_operand.vmem [shape: bf16[4,64], index: 1, kind: input, shape index: {}]   ;;  %s11372_s2 = inlined_call_operand.vmem [shape: f32[1,64], index: 2, kind: input, shape index: {}]   ;;  %s11373_s3 = inlined_call_operand.vmem [shape: f32[1,64], index: 3, kind: input, shape index: {}]   ;;  %s11374_s4 = inlined_call_operand.vmem [shape: bf16[3,3,64,96], index: 4, kind: input, shape index: {}]   ;;  %s11375_s5 = inlined_call_operand.vmem [shape: f32[1,96], index: 5, kind: input, shape index: {}]   ;;  %s11376_s6 = inlined_call_operand.vmem [shape: f32[1,96], index: 6, kind: input, shape index: {}]   ;;  %s11377_s7 = inlined_call_operand.vmem [shape: bf16[2,16,16,96], index: 7, kind: output, shape index: {}]  }
   0x1 LB: > { %s7056_s25 = sadd.s32 4294967295, %s8898_s24   ;;  %p7060_p0 = scmp.ge.s32.totalorder %s8898_s24, 1  ;;  %s8898_s24 = sphi %s8941_s24, %s17_s24  }
   0x2   : > { %p237_p1 = scmp.lt.s32.totalorder %s8898_s24, 3 }
   0x4   : > { %p238_p2 = pnand %p7060_p0, %p237_p1 }
   0x6   : > { %241 = sbr.rel (%p238_p2) target bundleno = 872 (0x368), region = 48 }
   0xd   : > { %v376_v0 = vld [vmem:[%s11371_s1] sm:$0x3]  ;;  %vm506_vm0 = vcmask 1041408   ;;  %p269_p3 = scmp.lt.s32.totalorder %s7056_s25, 1  ;;  %vm280_vm1 = vcmask 519168   ;;  %v8900_v2 = vmov 0  }
   0xe   : > { %8744 = vmatprep.subr.msk.bf16.mxu0 %vm506_vm0, %v376_v0  ;;  %v508_v1 = vsel %vm506_vm0, %v376_v0, 0  ;;  %8745 = vmatprep.subr.msk.bf16.mxu1 %vm506_vm0, %v376_v0  ;;  %283 = vst.msk [vmem:[#allocation2 + $0x18] sm:$0xf] %vm280_vm1, %v8900_v2  ;;  %281 = vst.msk [vmem:[#allocation2] sm:$0xf] %vm280_vm1, %v8900_v2  ;;  %vm457_vm2 = vcmask 31744  }
   0xf   : > { %8021 = vmatpush3.bf16.msra.mxu0 %v508_v1  ;;  %s11406_s25 = smov (!%p269_p3, %s7056_s25), 1  ;;  %8487 = vmatpush3.bf16.msra.mxu1 %v508_v1  ;;  %282 = vst.msk [vmem:[#allocation2 + $0xc] sm:$0xf] %vm280_vm1, %v8900_v2  ;;  %284 = vst.msk [vmem:[#allocation2 + $0x24] sm:$0xf] %vm280_vm1, %v8900_v2  ;;  %vm301_vm3 = vcmask 516096  }
  0x10   : > { %285 = vst.msk [vmem:[#allocation2 + $0x30] sm:$0xf] %vm280_vm1, %v8900_v2  ;;  %286 = vst.msk [vmem:[#allocation2 + $0x3c] sm:$0xf] %vm280_vm1, %v8900_v2  ;;  %s7721_s28 = sshll.u32 %s11406_s25, 7  ;;  %vm299_vm4 = vcmask 519169  }
  0x11   : > { %287 = vst.msk [vmem:[#allocation2 + $0x48] sm:$0xf] %vm280_vm1, %v8900_v2  ;;  %288 = vst.msk [vmem:[#allocation2 + $0x54] sm:$0xf] %vm280_vm1, %v8900_v2  ;;  %s273_s8 = scalar_lea.vmem %s11370_s0, %s7721_s28  ;;  %v8771_v19 = vld [vmem:[%s11374_s4 + $0x20] sm:$0xff]   ;;  %v8772_v20 = vld [vmem:[%s11374_s4 + $0x28] sm:$0xff]   ;;  %s11244_s27 = scalar_lea.vmem %s11377_s7, %s7721_s28 }
  0x12   : > { %289 = vst.msk [vmem:[#allocation2 + $0x60] sm:$0xf] %vm280_vm1, %v8900_v2  ;;  %290 = vst.msk [vmem:[#allocation2 + $0x6c] sm:$0xf] %vm280_vm1, %v8900_v2  ;;  %v8755_v3 = vld [vmem:[%s273_s8] sm:$0xff]   ;;  %v8756_v4 = vld [vmem:[%s273_s8 + $0x8] sm:$0xff]   ;;  %8054 = vmatprep.subr.bf16.mxu1 %v8771_v19 }
  0x13   : > { %291 = vst.msk [vmem:[#allocation2 + $0x78] sm:$0xf] %vm280_vm1, %v8900_v2  ;;  %292 = vst.msk [vmem:[#allocation2 + $0x84] sm:$0xf] %vm280_vm1, %v8900_v2  ;;  %8022 = vmatprep.mubr.msk.bf16.mxu0 %vm457_vm2, %v8755_v3  ;;  %v8757_v5 = vld [vmem:[%s273_s8 + $0x10] sm:$0xff]   ;;  %v8759_v6 = vld [vmem:[%s273_s8 + $0x40] sm:$0xff]  }
  0x14   : > { %293 = vst.msk [vmem:[#allocation2 + $0x90] sm:$0xf] %vm280_vm1, %v8900_v2  ;;  %294 = vst.msk [vmem:[#allocation2 + $0x9c] sm:$0xf] %vm280_vm1, %v8900_v2  ;;  %8023 = vmatmul.mubr.msk.bf16.vlgmr.msra.gmra.mrb[0].mxu0 %vm457_vm2, %v8756_v4  ;;  %v8758_v7 = vld [vmem:[%s273_s8 + $0x18] sm:$0xff]   ;;  %8038 = vmatprep.mubr.msk.bf16.mxu1 %vm457_vm2, %v8759_v6  ;;  %v8761_v8 = vld [vmem:[%s273_s8 + $0x48] sm:$0xff]  }
  0x15   : > { %295 = vst.msk [vmem:[#allocation2 + $0xa8] sm:$0xf] %vm280_vm1, %v8900_v2  ;;  %296 = vst.msk [vmem:[#allocation2 + $0xb4] sm:$0xf] %vm280_vm1, %v8900_v2  ;;  %8026 = vmatprep.mubr.msk.bf16.mxu0 %vm457_vm2, %v8757_v5  ;;  %v8760_v9 = vld [vmem:[%s273_s8 + $0x20] sm:$0xff]   ;;  %8039 = vmatmul.mubr.msk.bf16.vlgmr.msra.gmra.mrb[0].mxu1 %vm457_vm2, %v8761_v8  ;;  %v8763_v10 = vld [vmem:[%s273_s8 + $0x50] sm:$0xff]  }
  0x16   : > { %297 = vst.msk [vmem:[#allocation2 + $0xc0] sm:$0xf] %vm280_vm1, %v8900_v2  ;;  %298 = vst.msk [vmem:[#allocation2 + $0xcc] sm:$0xf] %vm280_vm1, %v8900_v2  ;;  %8042 = vmatprep.mubr.msk.bf16.mxu1 %vm457_vm2, %v8763_v10  ;;  %v8765_v11 = vld [vmem:[%s273_s8 + $0x58] sm:$0xff]   ;;  %v8767_v12 = vld [vmem:[%s273_s8 + $0x60] sm:$0xff]   ;;  %8055 = vmatpush3.bf16.msra.mxu1 %v8771_v19 }
  0x17   : > { %337 = vst.msk [vmem:[#allocation2] sm:$0xf] %vm280_vm1, %v8900_v2  ;;  %341 = vst.msk [vmem:[#allocation2 + $0xcc] sm:$0xf] %vm280_vm1, %v8900_v2  ;;  %v8762_v13 = vld [vmem:[%s273_s8 + $0x28] sm:$0xff]   ;;  %v8764_v14 = vld [vmem:[%s273_s8 + $0x30] sm:$0xff]   ;;  %8056 = vmatprep.subr.bf16.mxu1 %v8772_v20 }
  0x18   : > { %v8768_v15 = vld [vmem:[%s273_s8 + $0x68] sm:$0xff]   ;;  %v8769_v16 = vld [vmem:[%s273_s8 + $0x70] sm:$0xff]   ;;  %v8766_v17 = vld [vmem:[%s273_s8 + $0x38] sm:$0xff]   ;;  %306 = vst.msk [vmem:[#allocation2 + $0x20] sm:$0x1] %vm301_vm3, %v8900_v2  ;;  %vm1602_vm8 = vcmask 523264  }
  0x19   : > { %v8770_v18 = vld [vmem:[%s273_s8 + $0x78] sm:$0xff]   ;;  %302 = vst.msk [vmem:[#allocation2 + $0x8] sm:$0x1] %vm301_vm3, %v8900_v2  ;;  %304 = vst.msk [vmem:[#allocation2 + $0x14] sm:$0x1] %vm301_vm3, %v8900_v2  ;;  %v8774_v21 = vld [vmem:[%s11374_s4 + $0x30] sm:$0xff]  }
  0x1a   : > { %308 = vst.msk [vmem:[#allocation2 + $0x2c] sm:$0x1] %vm301_vm3, %v8900_v2  ;;  %310 = vst.msk [vmem:[#allocation2 + $0x38] sm:$0x1] %vm301_vm3, %v8900_v2  ;;  %8057 = vmatpush3.bf16.msra.mxu1 %v8772_v20  ;;  %vm1350_vm5 = vsmask.f32 3328 }
  0x1b   : > { %312 = vst.msk [vmem:[#allocation2 + $0x44] sm:$0x1] %vm301_vm3, %v8900_v2  ;;  %314 = vst.msk [vmem:[#allocation2 + $0x50] sm:$0x1] %vm301_vm3, %v8900_v2  ;;  %8058 = vmatprep.subr.bf16.mxu1 %v8774_v21  ;;  %vm1351_vm6 = vsmask.f32 7440 }
  0x1c   : > { %8027 = vmatmul.mubr.msk.bf16.gmra.mrb[4].mxu0 %vm457_vm2, %v8758_v7  ;;  %316 = vst.msk [vmem:[#allocation2 + $0x5c] sm:$0x1] %vm301_vm3, %v8900_v2  ;;  %318 = vst.msk [vmem:[#allocation2 + $0x68] sm:$0x1] %vm301_vm3, %v8900_v2  ;;  %v8775_v36 = vld [vmem:[%s11374_s4 + $0x38] sm:$0xff]   ;;  %v8773_v44 = vld [vmem:[%s11374_s4 + $0x20] sm:$0xff]  }
  0x1d   : > { %8030 = vmatprep.mubr.msk.bf16.mxu0 %vm457_vm2, %v8760_v9  ;;  %8043 = vmatmul.mubr.msk.bf16.gmra.mrb[4].mxu1 %vm457_vm2, %v8765_v11  ;;  %320 = vst.msk [vmem:[#allocation2 + $0x74] sm:$0x1] %vm301_vm3, %v8900_v2  ;;  %322 = vst.msk [vmem:[#allocation2 + $0x80] sm:$0x1] %vm301_vm3, %v8900_v2  ;;  %v8776_v45 = vld [vmem:[%s11374_s4 + $0x28] sm:$0xff]   ;;  %v8777_v46 = vld [vmem:[%s11374_s4 + $0x30] sm:$0xff]  }
  0x1e   : > { %8046 = vmatprep.mubr.msk.bf16.mxu1 %vm457_vm2, %v8767_v12  ;;  %324 = vst.msk [vmem:[#allocation2 + $0x8c] sm:$0x1] %vm301_vm3, %v8900_v2  ;;  %326 = vst.msk [vmem:[#allocation2 + $0x98] sm:$0x1] %vm301_vm3, %v8900_v2  ;;  %8059 = vmatpush3.bf16.msra.mxu1 %v8774_v21  ;;  %v1318_v22 = vld [vmem:[#allocation2] sm:$0xf] }
  0x1f   : > { %328 = vst.msk [vmem:[#allocation2 + $0xa4] sm:$0x1] %vm301_vm3, %v8900_v2  ;;  %330 = vst.msk [vmem:[#allocation2 + $0xb0] sm:$0x1] %vm301_vm3, %v8900_v2  ;;  %v1354_v24 = vshrl.u32 %v1318_v22, 16  ;;  %v1357_v25 = vshll.u32 %v1318_v22, 16  ;;  %8060 = vmatprep.subr.bf16.mxu1 %v8775_v36  ;;  %8270 = vmatprep.subr.bf16.mxu0 %v8773_v44 }
  0x20   : > { %332 = vst.msk [vmem:[#allocation2 + $0xbc] sm:$0x1] %vm301_vm3, %v8900_v2  ;;  %334 = vst.msk [vmem:[#allocation2 + $0xc8] sm:$0x1] %vm301_vm3, %v8900_v2  ;;  %8271 = vmatpush3.bf16.msra.mxu0 %v8773_v44  ;;  %v8778_v47 = vld [vmem:[%s11374_s4 + $0x38] sm:$0xff]   ;;  %v9132_v48 = vld [vmem:[%s11374_s4] sm:$0xff]  }
  0x21   : > { %336 = vst.msk [vmem:[#allocation2 + $0xd4] sm:$0x1] %vm301_vm3, %v8900_v2  ;;  %339 = vst.msk [vmem:[#allocation2 + $0x8] sm:$0x1] %vm301_vm3, %v8900_v2  ;;  %v1356_v28 = vrot.slane %v1354_v24, 4  ;;  %v1359_v29 = vrot.slane %v1357_v25, 5  ;;  %8272 = vmatprep.subr.bf16.mxu0 %v8776_v45 }
  0x22   : > { %343 = vst.msk [vmem:[#allocation2 + $0xd4] sm:$0x1] %vm301_vm3, %v8900_v2  ;;  %vm9108_vm7 = vmor %vm1350_vm5, %vm1351_vm6  ;;  %8061 = vmatpush3.bf16.msra.mxu1 %v8775_v36  ;;  %v8781_v49 = vld [vmem:[%s11374_s4] sm:$0xff]   ;;  %vm1202_vm9 = vsmask.f32 7938  ;;  %vm1933_vm15 = vcmask 1042432  }
  0x23   : > { %305 = vst.msk [vmem:[#allocation2 + $0x1c] sm:$0xe] %vm299_vm4, %v8900_v2  ;;  %300 = vst.msk [vmem:[#allocation2 + $0x4] sm:$0xe] %vm299_vm4, %v8900_v2  ;;  %v1360_v33 = vor.u32 %v1359_v29, %v1356_v28  ;;  %8078 = vmatprep.subr.bf16.mxu1 %v9132_v48  ;;  %v9141_v50 = vld [vmem:[%s11372_s2] ss:$0 sm:$0xff] }
  0x24   : > { %8031 = vmatmul.mubr.msk.bf16.gmra.mrb[8].mxu0 %vm457_vm2, %v8762_v13  ;;  %303 = vst.msk [vmem:[#allocation2 + $0x10] sm:$0xe] %vm299_vm4, %v8900_v2  ;;  %307 = vst.msk [vmem:[#allocation2 + $0x28] sm:$0xe] %vm299_vm4, %v8900_v2  ;;  %v9146_v52 = vld [vmem:[%s11373_s3] ss:$0 sm:$0xff] }
  0x25   : > { %8034 = vmatprep.mubr.msk.bf16.mxu0 %vm457_vm2, %v8764_v14  ;;  %8047 = vmatmul.mubr.msk.bf16.gmra.mrb[8].mxu1 %vm457_vm2, %v8768_v15  ;;  %309 = vst.msk [vmem:[#allocation2 + $0x34] sm:$0xe] %vm299_vm4, %v8900_v2  ;;  %311 = vst.msk [vmem:[#allocation2 + $0x40] sm:$0xe] %vm299_vm4, %v8900_v2  ;;  %v1361_v37 = vrot.slane %v1360_v33, 4  ;;  %vm1934_vm0 = vcmask 1046532  }
  0x26   : > { %8050 = vmatprep.mubr.msk.bf16.mxu1 %vm457_vm2, %v8769_v16  ;;  %313 = vst.msk [vmem:[#allocation2 + $0x4c] sm:$0xe] %vm299_vm4, %v8900_v2  ;;  %315 = vst.msk [vmem:[#allocation2 + $0x58] sm:$0xe] %vm299_vm4, %v8900_v2  ;;  %8273 = vmatpush3.bf16.msra.mxu0 %v8776_v45  ;;  %vm877_vm10 = vsmask.f32 256 }
  0x27   : > { %317 = vst.msk [vmem:[#allocation2 + $0x64] sm:$0xe] %vm299_vm4, %v8900_v2  ;;  %319 = vst.msk [vmem:[#allocation2 + $0x70] sm:$0xe] %vm299_vm4, %v8900_v2  ;;  %8274 = vmatprep.subr.bf16.mxu0 %v8777_v46  ;;  %vm878_vm11 = vsmask.f32 4368 }
  0x28   : > { %321 = vst.msk [vmem:[#allocation2 + $0x7c] sm:$0xe] %vm299_vm4, %v8900_v2  ;;  %323 = vst.msk [vmem:[#allocation2 + $0x88] sm:$0xe] %vm299_vm4, %v8900_v2  ;;  %v1342_v32 = vld [vmem:[#allocation2 + $0x8] sm:$0x1] }
  0x29   : > { %325 = vst.msk [vmem:[#allocation2 + $0x94] sm:$0xe] %vm299_vm4, %v8900_v2  ;;  %327 = vst.msk [vmem:[#allocation2 + $0xa0] sm:$0xe] %vm299_vm4, %v8900_v2  ;;  %v1373_v35 = vshll.u32 %v1342_v32, 16 }
  0x2a   : > { %329 = vst.msk [vmem:[#allocation2 + $0xac] sm:$0xe] %vm299_vm4, %v8900_v2  ;;  %331 = vst.msk [vmem:[#allocation2 + $0xb8] sm:$0xe] %vm299_vm4, %v8900_v2  ;;  %8275 = vmatpush3.bf16.msra.mxu0 %v8777_v46 }
  0x2b   : > { %333 = vst.msk [vmem:[#allocation2 + $0xc4] sm:$0xe] %vm299_vm4, %v8900_v2  ;;  %335 = vst.msk [vmem:[#allocation2 + $0xd0] sm:$0xe] %vm299_vm4, %v8900_v2  ;;  %v1375_v40 = vrot.slane %v1373_v35, 5  ;;  %8276 = vmatprep.subr.bf16.mxu0 %v8778_v47 }
  0x2c   : > { %8035 = vmatmul.mubr.msk.bf16.gmra.mrb[12].mxu0 %vm457_vm2, %v8766_v17  ;;  %338 = vst.msk [vmem:[#allocation2 + $0x4] sm:$0xf] %vm280_vm1, %v8900_v2  ;;  %342 = vst.msk [vmem:[#allocation2 + $0xd0] sm:$0xf] %vm280_vm1, %v8900_v2 }
  0x2d   : > { %8051 = vmatmul.mubr.msk.bf16.gmra.mrb[12].mxu1 %vm457_vm2, %v8770_v18  ;;  %vm9173_vm12 = vmand %vm280_vm1, %vm1202_vm9  ;;  %vm4149_vm2 = vcmask 781312  }
  0x2e   : > { %8277 = vmatpush3.bf16.msra.mxu0 %v8778_v47  ;;  %vm9180_vm13 = vmor %vm877_vm10, %vm878_vm11  ;;  %v1217_v47 = vld [vmem:[#allocation2 + $0x20] sm:$0x1] }
  0x2f   : > { %8294 = vmatprep.subr.bf16.mxu0 %v8781_v49  ;;  %vm9188_vm14 = vmand %vm301_vm3, %vm877_vm10 }
  0x33   : > { %v1319_v23 = vld [vmem:[#allocation2 + $0x4] sm:$0xf] }
  0x34   : > { %v1363_v26 = vshll.u32 %v1319_v23, 16  ;;  %v1367_v27 = vshrl.u32 %v1319_v23, 16 }
  0x36   : > { %v1365_v30 = vrot.slane %v1363_v26, 5  ;;  %v1369_v31 = vrot.slane %v1367_v27, 4 }
  0x38   : > { %v1370_v34 = vor.u32 %v1369_v31, %v1365_v30  ;;  %v1366_v41 = vsel %vm9108_vm7, %v1361_v37, %v1365_v30  ;;  %v1213_v31 = vld [vmem:[#allocation2 + $0x18] sm:$0xf] }
  0x3a   : > { %v1371_v38 = vrot.slane %v1370_v34, 4 }
  0x3c   : > { %v1376_v42 = vsel %vm9108_vm7, %v1371_v38, %v1375_v40  ;;  %v1204_v38 = vld [vmem:[#allocation2 + $0xc] sm:$0xf] }
  0x3d   : > { %v7139_v43 = vcombine.low %v1366_v41, %v1376_v42 }
  0x3f   : > { %8062 = vmatprep.mubr.msk.bf16.mxu1 %vm1602_vm8, %v7139_v43 }
  0xe7   : > { %v8024_v51 = vpop.f32.mrb[0].mxu0 }
  0xe8   : > { %v680_v53 = vmul.f32 %v8024_v51, %v9141_v50  ;;  %v544_v54 = vpop.f32.mrb[1].mxu0  ;;  %v8040_v0 = vpop.f32.mrb[0].mxu1 }
  0xe9   : > { %v678_v55 = vmul.f32 %v9141_v50, %v544_v54  ;;  %v8025_v56 = vpop.f32.mrb[2].mxu0  ;;  %v696_v3 = vmul.f32 %v8040_v0, %v9141_v50  ;;  %v608_v4 = vpop.f32.mrb[1].mxu1 }
  0xea   : > { %v719_v57 = vadd.f32 %v9146_v52, %v680_v53  ;;  %v681_v58 = vmul.f32 %v8025_v56, %v9141_v50  ;;  %v547_v59 = vpop.f32.mrb[3].mxu0  ;;  %v9158_v7 = vmul.f32 %v9141_v50, %v608_v4  ;;  %v8041_v8 = vpop.f32.mrb[2].mxu1 }
  0xeb   : > { %v717_v60 = vadd.f32 %v9146_v52, %v678_v55  ;;  %v679_v61 = vmul.f32 %v9141_v50, %v547_v59  ;;  %v9161_v12 = vadd.f32 %v9146_v52, %v696_v3  ;;  %v9164_v13 = vmul.f32 %v8041_v8, %v9141_v50  ;;  %v9166_v14 = vpop.f32.mrb[3].mxu1 }
  0xec   : > { %v751_v62 = vmax.f32 %v719_v57, 0.0  ;;  %v720_v63 = vadd.f32 %v9146_v52, %v681_v58  ;;  %v1210_v57 = vld [vmem:[#allocation2 + $0x14] sm:$0x1] }
  0xed   : > { %v749_v1 = vmax.f32 %v717_v60, 0.0  ;;  %v718_v2 = vadd.f32 %v9146_v52, %v679_v61 }
  0xee   : > { %v7725_v5 = vpack.c.bf16 %v751_v62, %v751_v62  ;;  %v752_v6 = vmax.f32 %v720_v63, 0.0 }
  0xef   : > { %v7723_v9 = vpack.c.bf16 %v749_v1, %v749_v1  ;;  %v750_v10 = vmax.f32 %v718_v2, 0.0  ;;  %v8028_v11 = vpop.f32.mrb[4].mxu0 }
  0xf0   : > { %v898_v15 = vshrl.u32 %v7725_v5, 16  ;;  %v901_v16 = vshll.u32 %v7725_v5, 16  ;;  %v7726_v17 = vpack.c.bf16 %v752_v6, %v752_v6  ;;  %v684_v18 = vmul.f32 %v8028_v11, %v9141_v50  ;;  %v560_v19 = vpop.f32.mrb[5].mxu0  ;;  %v9184_v43 = vpop.f32.mrb[4].mxu1 }
  0xf1   : > { %v881_v20 = vshrl.u32 %v7723_v9, 16  ;;  %v884_v21 = vshll.u32 %v7723_v9, 16  ;;  %v7724_v22 = vpack.c.bf16 %v750_v10, %v750_v10  ;;  %v682_v23 = vmul.f32 %v9141_v50, %v560_v19  ;;  %v8029_v24 = vpop.f32.mrb[6].mxu0  ;;  %v9192_v53 = vpop.f32.mrb[5].mxu1 }
  0xf2   : > { %v900_v25 = vrot.slane %v898_v15, 7  ;;  %v906_v26 = vshrl.u32 %v7726_v17, 16  ;;  %v909_v27 = vshll.u32 %v7726_v17, 16  ;;  %v723_v28 = vadd.f32 %v9146_v52, %v684_v18  ;;  %v563_v29 = vpop.f32.mrb[7].mxu0  ;;  %v9196_v59 = vpop.f32.mrb[6].mxu1 }
  0xf3   : > { %v883_v32 = vrot.slane %v881_v20, 7  ;;  %v889_v33 = vshrl.u32 %v7724_v22, 16  ;;  %v892_v34 = vshll.u32 %v7724_v22, 16  ;;  %v721_v35 = vadd.f32 %v9146_v52, %v682_v23  ;;  %v9200_v1 = vpop.f32.mrb[7].mxu1 }
  0xf4   : > { %v903_v36 = vor.u32 %v901_v16, %v900_v25  ;;  %v904_v37 = vrot.slane %v900_v25, 4  ;;  %v908_v41 = vrot.slane %v906_v26, 7  ;;  %v755_v42 = vmax.f32 %v723_v28, 0.0  ;;  %v1220_v28 = vld [vmem:[#allocation2 + $0x24] sm:$0xf] }
  0xf5   : > { %v886_v44 = vor.u32 %v884_v21, %v883_v32  ;;  %v887_v45 = vrot.slane %v883_v32, 4  ;;  %v891_v49 = vrot.slane %v889_v33, 7  ;;  %v753_v51 = vmax.f32 %v721_v35, 0.0  ;;  %v1227_v21 = vld [vmem:[#allocation2 + $0x30] sm:$0xf] }
  0xf6   : > { %v1214_v54 = vsel %vm9173_vm12, %v903_v36, %v1213_v31  ;;  %v911_v55 = vor.u32 %v909_v27, %v908_v41  ;;  %v913_v56 = vrot.slane %v908_v41, 4  ;;  %v7729_v58 = vpack.c.bf16 %v755_v42, %v755_v42 }
  0xf7   : > { %1215 = vst [vmem:[#allocation2 + $0x18] sm:$0xf] %v1214_v54  ;;  %v1205_v60 = vsel %vm9173_vm12, %v886_v44, %v1204_v38  ;;  %v894_v61 = vor.u32 %v892_v34, %v891_v49  ;;  %v896_v62 = vrot.slane %v891_v49, 4  ;;  %v7727_v63 = vpack.c.bf16 %v753_v51, %v753_v51  ;;  %v8032_v0 = vpop.f32.mrb[8].mxu0 }
  0xf8   : > { %1206 = vst [vmem:[#allocation2 + $0xc] sm:$0xf] %v1205_v60  ;;  %v912_v2 = vsel %vm9180_vm13, %v904_v37, %v911_v55  ;;  %v1218_v3 = vsel %vm9188_vm14, %v913_v56, %v1217_v47  ;;  %v932_v4 = vshrl.u32 %v7729_v58, 16  ;;  %v935_v5 = vshll.u32 %v7729_v58, 16  ;;  %v576_v6 = vpop.f32.mrb[9].mxu0  ;;  %v9229_v31 = vpop.f32.mrb[8].mxu1 }
  0xf9   : > { %1216 = vst.msk [vmem:[#allocation2 + $0x1c] sm:$0xf] %vm280_vm1, %v912_v2  ;;  %1219 = vst [vmem:[#allocation2 + $0x20] sm:$0x1] %v1218_v3  ;;  %v895_v8 = vsel %vm9180_vm13, %v887_v45, %v894_v61  ;;  %v1211_v9 = vsel %vm9188_vm14, %v896_v62, %v1210_v57  ;;  %v915_v10 = vshrl.u32 %v7727_v63, 16  ;;  %v918_v11 = vshll.u32 %v7727_v63, 16 }
  0xfa   : > { %v8033_v15 = vpop.f32.mrb[10].mxu0  ;;  %1207 = vst.msk [vmem:[#allocation2 + $0x10] sm:$0xf] %vm280_vm1, %v895_v8  ;;  %1212 = vst [vmem:[#allocation2 + $0x14] sm:$0x1] %v1211_v9  ;;  %v9212_v16 = vrot.slane %v932_v4, 7  ;;  %v685_v17 = vmul.f32 %v8029_v24, %v9141_v50  ;;  %v683_v18 = vmul.f32 %v9141_v50, %v563_v29  ;;  %v688_v23 = vmul.f32 %v8032_v0, %v9141_v50 }
  0xfb   : > { %v767_v19 = vmax.f32 %v9161_v12, 0.0  ;;  %v9217_v20 = vpop.f32.mrb[11].mxu0  ;;  %v9219_v22 = vrot.slane %v915_v10, 7  ;;  %v733_v25 = vadd.f32 %v9146_v52, %v9158_v7  ;;  %v686_v26 = vmul.f32 %v9141_v50, %v576_v6  ;;  %v9234_v35 = vpop.f32.mrb[9].mxu1  ;;  %v1269_v62 = vld [vmem:[#allocation2 + $0x78] sm:$0xf] }
  0xfc   : > { %v937_v27 = vor.u32 %v935_v5, %v9212_v16  ;;  %v938_v24 = vrot.slane %v9212_v16, 4  ;;  %v724_v29 = vadd.f32 %v9146_v52, %v685_v17  ;;  %v722_v12 = vadd.f32 %v9146_v52, %v683_v18  ;;  %v9238_v42 = vpop.f32.mrb[10].mxu1  ;;  %v1231_v10 = vld [vmem:[#allocation2 + $0x38] sm:$0x1] }
  0xfd   : > { %v920_v32 = vor.u32 %v918_v11, %v9219_v22  ;;  %v921_v33 = vrot.slane %v9219_v22, 4  ;;  %v7741_v34 = vpack.c.bf16 %v767_v19, %v767_v19  ;;  %v727_v7 = vadd.f32 %v9146_v52, %v688_v23  ;;  %v9244_v54 = vpop.f32.mrb[11].mxu1 }
  0xfe   : > { %v1228_v36 = vsel %vm9173_vm12, %v937_v27, %v1227_v21  ;;  %v756_v37 = vmax.f32 %v724_v29, 0.0  ;;  %v754_v38 = vmax.f32 %v722_v12, 0.0  ;;  %v765_v41 = vmax.f32 %v733_v25, 0.0 }
  0xff   : > { %1229 = vst [vmem:[#allocation2 + $0x30] sm:$0xf] %v1228_v36  ;;  %v1221_v44 = vsel %vm9173_vm12, %v920_v32, %v1220_v28  ;;  %v1034_v45 = vshrl.u32 %v7741_v34, 16  ;;  %v1037_v47 = vshll.u32 %v7741_v34, 16  ;;  %v759_v49 = vmax.f32 %v727_v7, 0.0  ;;  %v9242_v51 = vpop.f32.mrb[12].mxu0 }
 0x100   : > { %1222 = vst [vmem:[#allocation2 + $0x24] sm:$0xf] %v1221_v44  ;;  %v7730_v55 = vpack.c.bf16 %v756_v37, %v756_v37  ;;  %v7728_v56 = vpack.c.bf16 %v754_v38, %v754_v38  ;;  %v7739_v57 = vpack.c.bf16 %v765_v41, %v765_v41  ;;  %v725_v58 = vadd.f32 %v9146_v52, %v686_v26  ;;  %v9247_v60 = vpop.f32.mrb[13].mxu0  ;;  %v1224_v26 = vld [vmem:[#allocation2 + $0x2c] sm:$0x1] }
 0x101   : > { %v9249_v61 = vrot.slane %v1034_v45, 7  ;;  %v7733_v63 = vpack.c.bf16 %v759_v49, %v759_v49  ;;  %v736_v0 = vadd.f32 %v9146_v52, %v9164_v13  ;;  %v689_v2 = vmul.f32 %v8033_v15, %v9141_v50  ;;  %v9254_v3 = vpop.f32.mrb[14].mxu0  ;;  %v9260_v15 = vpop.f32.mrb[12].mxu1  ;;  %v1241_v38 = vld [vmem:[#allocation2 + $0x48] sm:$0xf] }
 0x102   : > { %v940_v4 = vshrl.u32 %v7730_v55, 16  ;;  %v943_v5 = vshll.u32 %v7730_v55, 16  ;;  %v923_v6 = vshrl.u32 %v7728_v56, 16  ;;  %v926_v8 = vshll.u32 %v7728_v56, 16  ;;  %v9256_v9 = vpop.f32.mrb[15].mxu0  ;;  %v9266_v32 = vpop.f32.mrb[13].mxu1 }
 0x103   : > { %v1039_v11 = vor.u32 %v1037_v47, %v9249_v61  ;;  %v1040_v17 = vrot.slane %v9249_v61, 4  ;;  %v966_v18 = vshrl.u32 %v7733_v63, 16  ;;  %v969_v19 = vshll.u32 %v7733_v63, 16  ;;  %v9268_v41 = vpop.f32.mrb[14].mxu1  ;;  %v1262_v63 = vld [vmem:[#allocation2 + $0x6c] sm:$0xf] }
 0x104   : > { %v942_v21 = vrot.slane %v940_v4, 7  ;;  %v925_v23 = vrot.slane %v923_v6, 7  ;;  %v1017_v13 = vshrl.u32 %v7739_v57, 16  ;;  %v1020_v25 = vshll.u32 %v7739_v57, 16  ;;  %v9274_v55 = vpop.f32.mrb[15].mxu1 }
 0x105   : > { %v1270_v27 = vsel %vm9173_vm12, %v1039_v11, %v1269_v62  ;;  %v9264_v28 = vrot.slane %v966_v18, 7  ;;  %v757_v29 = vmax.f32 %v725_v58, 0.0  ;;  %v768_v12 = vmax.f32 %v736_v0, 0.0  ;;  %v1234_v11 = vld [vmem:[#allocation2 + $0x3c] sm:$0xf] }
 0x106   : > { %v945_v34 = vor.u32 %v943_v5, %v942_v21  ;;  %v947_v7 = vrot.slane %v942_v21, 4  ;;  %v928_v36 = vor.u32 %v926_v8, %v925_v23  ;;  %v930_v37 = vrot.slane %v925_v23, 4  ;;  %1271 = vst [vmem:[#allocation2 + $0x78] sm:$0xf] %v1270_v27  ;;  %v1266_v61 = vld [vmem:[#allocation2 + $0x74] sm:$0x1] }
 0x107   : > { %v971_v44 = vor.u32 %v969_v19, %v9264_v28  ;;  %v972_v45 = vrot.slane %v9264_v28, 4  ;;  %v9272_v47 = vrot.slane %v1017_v13, 7  ;;  %v7731_v49 = vpack.c.bf16 %v757_v29, %v757_v29 }
 0x108   : > { %v946_v56 = vsel %vm9180_vm13, %v938_v24, %v945_v34  ;;  %v1232_v57 = vsel %vm9188_vm14, %v947_v7, %v1231_v10  ;;  %v929_v58 = vsel %vm9180_vm13, %v921_v33, %v928_v36  ;;  %v1225_v62 = vsel %vm9188_vm14, %v930_v37, %v1224_v26  ;;  %v1273_v7 = vld [vmem:[#allocation2 + $0x80] sm:$0x1] }
 0x109   : > { %1230 = vst.msk [vmem:[#allocation2 + $0x34] sm:$0xf] %vm280_vm1, %v946_v56  ;;  %1233 = vst [vmem:[#allocation2 + $0x38] sm:$0x1] %v1232_v57  ;;  %v1242_v16 = vsel %vm9173_vm12, %v971_v44, %v1241_v38  ;;  %v1022_v24 = vor.u32 %v1020_v25, %v9272_v47  ;;  %v1023_v22 = vrot.slane %v9272_v47, 4  ;;  %v949_v0 = vshrl.u32 %v7731_v49, 16 }
 0x10a   : > { %1223 = vst.msk [vmem:[#allocation2 + $0x28] sm:$0xf] %vm280_vm1, %v929_v58  ;;  %1226 = vst [vmem:[#allocation2 + $0x2c] sm:$0x1] %v1225_v62  ;;  %v952_v33 = vshll.u32 %v7731_v49, 16  ;;  %v7742_v4 = vpack.c.bf16 %v768_v12, %v768_v12  ;;  %v728_v5 = vadd.f32 %v9146_v52, %v689_v2  ;;  %v695_v6 = vmul.f32 %v9141_v50, %v9166_v14 }
 0x10b   : > { %1243 = vst [vmem:[#allocation2 + $0x48] sm:$0xf] %v1242_v16  ;;  %v1263_v8 = vsel %vm9173_vm12, %v1022_v24, %v1262_v63  ;;  %v9299_v10 = vrot.slane %v949_v0, 7  ;;  %v687_v18 = vmul.f32 %v9141_v50, %v9217_v20  ;;  %v700_v19 = vmul.f32 %v9184_v43, %v9141_v50 }
 0x10c   : > { %1264 = vst [vmem:[#allocation2 + $0x6c] sm:$0xf] %v1263_v8  ;;  %v1042_v21 = vshrl.u32 %v7742_v4, 16  ;;  %v1045_v23 = vshll.u32 %v7742_v4, 16  ;;  %v760_v13 = vmax.f32 %v728_v5, 0.0  ;;  %v734_v2 = vadd.f32 %v9146_v52, %v695_v6 }
 0x10d   : > { %v954_v14 = vor.u32 %v952_v33, %v9299_v10  ;;  %v955_v25 = vrot.slane %v9299_v10, 4  ;;  %v726_v26 = vadd.f32 %v9146_v52, %v687_v18  ;;  %v739_v27 = vadd.f32 %v9146_v52, %v700_v19  ;;  %v1245_v33 = vld [vmem:[#allocation2 + $0x50] sm:$0x1]  ;;  %v1238_v18 = vld [vmem:[#allocation2 + $0x44] sm:$0x1] }
 0x10e   : > { %v1044_v29 = vrot.slane %v1042_v21, 7  ;;  %v7734_v12 = vpack.c.bf16 %v760_v13, %v760_v13  ;;  %v766_v20 = vmax.f32 %v734_v2, 0.0  ;;  %v692_v43 = vmul.f32 %v9242_v51, %v9141_v50 }
 0x10f   : > { %v1235_v34 = vsel %vm9173_vm12, %v954_v14, %v1234_v11  ;;  %v758_v36 = vmax.f32 %v726_v26, 0.0  ;;  %v771_v37 = vmax.f32 %v739_v27, 0.0  ;;  %v698_v38 = vmul.f32 %v9141_v50, %v9192_v53 }
 0x110   : > { %1236 = vst [vmem:[#allocation2 + $0x3c] sm:$0xf] %v1235_v34  ;;  %v1047_v44 = vor.u32 %v1045_v23, %v1044_v29  ;;  %v1049_v49 = vrot.slane %v1044_v29, 4  ;;  %v974_v56 = vshrl.u32 %v7734_v12, 16  ;;  %v977_v57 = vshll.u32 %v7734_v12, 16 }
 0x111   : > { %v7740_v58 = vpack.c.bf16 %v766_v20, %v766_v20  ;;  %v7732_v62 = vpack.c.bf16 %v758_v36, %v758_v36  ;;  %v7745_v63 = vpack.c.bf16 %v771_v37, %v771_v37  ;;  %v731_v16 = vadd.f32 %v9146_v52, %v692_v43 }
 0x112   : > { %v1048_v51 = vsel %vm9180_vm13, %v1040_v17, %v1047_v44  ;;  %v1274_v24 = vsel %vm9188_vm14, %v1049_v49, %v1273_v7  ;;  %v976_v0 = vrot.slane %v974_v56, 7  ;;  %v737_v53 = vadd.f32 %v9146_v52, %v698_v38  ;;  %v1283_v7 = vld [vmem:[#allocation2 + $0x90] sm:$0xf] }
 0x113   : > { %1272 = vst.msk [vmem:[#allocation2 + $0x7c] sm:$0xf] %vm280_vm1, %v1048_v51  ;;  %1275 = vst [vmem:[#allocation2 + $0x80] sm:$0x1] %v1274_v24  ;;  %v1025_v4 = vshrl.u32 %v7740_v58, 16  ;;  %v1028_v5 = vshll.u32 %v7740_v58, 16  ;;  %v690_v29 = vmul.f32 %v9141_v50, %v9247_v60 }
 0x114   : > { %v957_v6 = vshrl.u32 %v7732_v62, 16  ;;  %v960_v8 = vshll.u32 %v7732_v62, 16  ;;  %v979_v10 = vor.u32 %v977_v57, %v976_v0  ;;  %v981_v11 = vrot.slane %v976_v0, 4  ;;  %v1255_v58 = vld [vmem:[#allocation2 + $0x60] sm:$0xf] }
 0x115   : > { %v1068_v19 = vshrl.u32 %v7745_v63, 16  ;;  %v1071_v17 = vshll.u32 %v7745_v63, 16  ;;  %v1027_v21 = vrot.slane %v1025_v4, 7  ;;  %v763_v13 = vmax.f32 %v731_v16, 0.0  ;;  %v1276_v0 = vld [vmem:[#allocation2 + $0x84] sm:$0xf] }
 0x116   : > { %v959_v23 = vrot.slane %v957_v6, 7  ;;  %v769_v2 = vmax.f32 %v737_v53, 0.0  ;;  %v980_v14 = vsel %vm9180_vm13, %v972_v45, %v979_v10  ;;  %v1246_v26 = vsel %vm9188_vm14, %v981_v11, %v1245_v33 }
 0x117   : > { %v9331_v27 = vrot.slane %v1068_v19, 7  ;;  %1244 = vst.msk [vmem:[#allocation2 + $0x4c] sm:$0xf] %vm280_vm1, %v980_v14  ;;  %1247 = vst [vmem:[#allocation2 + $0x50] sm:$0x1] %v1246_v26  ;;  %v1030_v12 = vor.u32 %v1028_v5, %v1027_v21  ;;  %v1032_v20 = vrot.slane %v1027_v21, 4  ;;  %v7737_v36 = vpack.c.bf16 %v763_v13, %v763_v13 }
 0x118   : > { %v962_v43 = vor.u32 %v960_v8, %v959_v23  ;;  %v964_v34 = vrot.slane %v959_v23, 4  ;;  %v7743_v37 = vpack.c.bf16 %v769_v2, %v769_v2  ;;  %v701_v63 = vmul.f32 %v9196_v59, %v9141_v50 }
 0x119   : > { %v1073_v28 = vor.u32 %v1071_v17, %v9331_v27  ;;  %v1074_v45 = vrot.slane %v9331_v27, 4  ;;  %v1031_v38 = vsel %vm9180_vm13, %v1023_v22, %v1030_v12  ;;  %v1267_v60 = vsel %vm9188_vm14, %v1032_v20, %v1266_v61 }
 0x11a   : > { %v963_v44 = vsel %vm9180_vm13, %v955_v25, %v962_v43  ;;  %v1239_v49 = vsel %vm9188_vm14, %v964_v34, %v1238_v18  ;;  %1265 = vst.msk [vmem:[#allocation2 + $0x70] sm:$0xf] %vm280_vm1, %v1031_v38  ;;  %1268 = vst [vmem:[#allocation2 + $0x74] sm:$0x1] %v1267_v60  ;;  %v1000_v56 = vshrl.u32 %v7737_v36, 16  ;;  %v1003_v22 = vshll.u32 %v7737_v36, 16 }
 0x11b   : > { %1237 = vst.msk [vmem:[#allocation2 + $0x40] sm:$0xf] %vm280_vm1, %v963_v44  ;;  %1240 = vst [vmem:[#allocation2 + $0x44] sm:$0x1] %v1239_v49  ;;  %v1284_v47 = vsel %vm9173_vm12, %v1073_v28, %v1283_v7  ;;  %v1051_v57 = vshrl.u32 %v7743_v37, 16  ;;  %v1054_v62 = vshll.u32 %v7743_v37, 16  ;;  %v729_v25 = vadd.f32 %v9146_v52, %v690_v29 }
 0x11c   : > { %1285 = vst [vmem:[#allocation2 + $0x90] sm:$0xf] %v1284_v47  ;;  %v693_v16 = vmul.f32 %v9254_v3, %v9141_v50  ;;  %v9357_v51 = vrot.slane %v1000_v56, 7  ;;  %v699_v53 = vmul.f32 %v9141_v50, %v9200_v1  ;;  %v691_v33 = vmul.f32 %v9141_v50, %v9256_v9  ;;  %v1248_v36 = vld [vmem:[#allocation2 + $0x54] sm:$0xf] }
 0x11d   : > { %v9359_v24 = vrot.slane %v1051_v57, 7  ;;  %v761_v4 = vmax.f32 %v729_v25, 0.0  ;;  %v740_v5 = vadd.f32 %v9146_v52, %v701_v63  ;;  %v704_v59 = vmul.f32 %v9229_v31, %v9141_v50  ;;  %v1287_v37 = vld [vmem:[#allocation2 + $0x98] sm:$0x1] }
 0x11e   : > { %v732_v6 = vadd.f32 %v9146_v52, %v693_v16  ;;  %v1005_v3 = vor.u32 %v1003_v22, %v9357_v51  ;;  %v1006_v8 = vrot.slane %v9357_v51, 4  ;;  %v738_v9 = vadd.f32 %v9146_v52, %v699_v53  ;;  %v1259_v53 = vld [vmem:[#allocation2 + $0x68] sm:$0x1] }
 0x11f   : > { %v1056_v10 = vor.u32 %v1054_v62, %v9359_v24  ;;  %v1057_v11 = vrot.slane %v9359_v24, 4  ;;  %v7735_v1 = vpack.c.bf16 %v761_v4, %v761_v4  ;;  %v772_v61 = vmax.f32 %v740_v5, 0.0 }
 0x120   : > { %v764_v18 = vmax.f32 %v732_v6, 0.0  ;;  %v1256_v19 = vsel %vm9173_vm12, %v1005_v3, %v1255_v58  ;;  %v730_v31 = vadd.f32 %v9146_v52, %v691_v33  ;;  %v743_v21 = vadd.f32 %v9146_v52, %v704_v59 }
 0x121   : > { %v1277_v17 = vsel %vm9173_vm12, %v1056_v10, %v1276_v0  ;;  %1257 = vst [vmem:[#allocation2 + $0x60] sm:$0xf] %v1256_v19  ;;  %v983_v23 = vshrl.u32 %v7735_v1, 16  ;;  %v986_v13 = vshll.u32 %v7735_v1, 16  ;;  %v7746_v2 = vpack.c.bf16 %v772_v61, %v772_v61  ;;  %v1280_v1 = vld [vmem:[#allocation2 + $0x8c] sm:$0x1] }
 0x122   : > { %1278 = vst [vmem:[#allocation2 + $0x84] sm:$0xf] %v1277_v17  ;;  %v7738_v14 = vpack.c.bf16 %v764_v18, %v764_v18  ;;  %v770_v26 = vmax.f32 %v738_v9, 0.0  ;;  %v762_v29 = vmax.f32 %v730_v31, 0.0  ;;  %v775_v12 = vmax.f32 %v743_v21, 0.0 }
 0x123   : > { %v702_v20 = vmul.f32 %v9141_v50, %v9234_v35  ;;  %v985_v43 = vrot.slane %v983_v23, 7  ;;  %v1076_v34 = vshrl.u32 %v7746_v2, 16  ;;  %v1079_v7 = vshll.u32 %v7746_v2, 16  ;;  %v9396_v17 = vld [vmem:[#allocation2 + $0xc] sm:$0xf] }
 0x124   : > { %v1008_v28 = vshrl.u32 %v7738_v14, 16  ;;  %v1011_v38 = vshll.u32 %v7738_v14, 16  ;;  %v7744_v60 = vpack.c.bf16 %v770_v26, %v770_v26  ;;  %v7736_v44 = vpack.c.bf16 %v762_v29, %v762_v29  ;;  %v1297_v26 = vld [vmem:[#allocation2 + $0xa8] sm:$0xf] }
 0x125   : > { %v7749_v49 = vpack.c.bf16 %v775_v12, %v775_v12  ;;  %v988_v47 = vor.u32 %v986_v13, %v985_v43  ;;  %v989_v56 = vrot.slane %v985_v43, 4  ;;  %v1078_v22 = vrot.slane %v1076_v34, 7  ;;  %v9413_v12 = vld [vmem:[#allocation2 + $0x10] sm:$0xf] }
 0x126   : > { %v1010_v57 = vrot.slane %v1008_v28, 7  ;;  %v1059_v58 = vshrl.u32 %v7744_v60, 16  ;;  %v1062_v62 = vshll.u32 %v7744_v60, 16  ;;  %v991_v25 = vshrl.u32 %v7736_v44, 16 }
 0x127   : > { %v994_v63 = vshll.u32 %v7736_v44, 16  ;;  %v1249_v35 = vsel %vm9173_vm12, %v988_v47, %v1248_v36  ;;  %v1081_v16 = vor.u32 %v1079_v7, %v1078_v22  ;;  %v1083_v51 = vrot.slane %v1078_v22, 4  ;;  %v9431_v22 = vld [vmem:[#allocation2 + $0x18] sm:$0xf] }
 0x128   : > { %v1013_v0 = vor.u32 %v1011_v38, %v1010_v57  ;;  %1250 = vst [vmem:[#allocation2 + $0x54] sm:$0xf] %v1249_v35  ;;  %v1015_v33 = vrot.slane %v1010_v57, 4  ;;  %v1061_v4 = vrot.slane %v1059_v58, 7  ;;  %v993_v5 = vrot.slane %v991_v25, 7 }
 0x129   : > { %v1102_v6 = vshrl.u32 %v7749_v49, 16  ;;  %v1082_v59 = vsel %vm9180_vm13, %v1074_v45, %v1081_v16  ;;  %v1288_v3 = vsel %vm9188_vm14, %v1083_v51, %v1287_v37  ;;  %v1105_v61 = vshll.u32 %v7749_v49, 16  ;;  %v1252_v45 = vld [vmem:[#allocation2 + $0x5c] sm:$0x1]  ;;  %v9427_v37 = vld [vmem:[#allocation2 + $0x14] sm:$0x1] }
 0x12a   : > { %v1014_v10 = vsel %vm9180_vm13, %v1006_v8, %v1013_v0  ;;  %1286 = vst.msk [vmem:[#allocation2 + $0x94] sm:$0xf] %vm280_vm1, %v1082_v59  ;;  %1289 = vst [vmem:[#allocation2 + $0x98] sm:$0x1] %v1288_v3  ;;  %v1260_v18 = vsel %vm9188_vm14, %v1015_v33, %v1259_v53  ;;  %v1064_v27 = vor.u32 %v1062_v62, %v1061_v4  ;;  %v1066_v9 = vrot.slane %v1061_v4, 4 }
 0x12b   : > { %1258 = vst.msk [vmem:[#allocation2 + $0x64] sm:$0xf] %vm280_vm1, %v1014_v10  ;;  %v996_v19 = vor.u32 %v994_v63, %v993_v5  ;;  %1261 = vst [vmem:[#allocation2 + $0x68] sm:$0x1] %v1260_v18  ;;  %v998_v31 = vrot.slane %v993_v5, 4  ;;  %v9398_v21 = vrot.slane %v1102_v6, 7  ;;  %v741_v8 = vadd.f32 %v9146_v52, %v702_v20 }
 0x12c   : > { %v705_v23 = vmul.f32 %v9238_v42, %v9141_v50  ;;  %v1065_v13 = vsel %vm9180_vm13, %v1057_v11, %v1064_v27  ;;  %v1281_v2 = vsel %vm9188_vm14, %v1066_v9, %v1280_v1  ;;  %v703_v29 = vmul.f32 %v9141_v50, %v9244_v54  ;;  %v1290_v5 = vld [vmem:[#allocation2 + $0x9c] sm:$0xf] }
 0x12d   : > { %v997_v14 = vsel %vm9180_vm13, %v989_v56, %v996_v19  ;;  %1279 = vst.msk [vmem:[#allocation2 + $0x88] sm:$0xf] %vm280_vm1, %v1065_v13  ;;  %1282 = vst [vmem:[#allocation2 + $0x8c] sm:$0x1] %v1281_v2  ;;  %v1253_v42 = vsel %vm9188_vm14, %v998_v31, %v1252_v45  ;;  %v1107_v24 = vor.u32 %v1105_v61, %v9398_v21  ;;  %v1108_v11 = vrot.slane %v9398_v21, 4 }
 0x12e   : > { %1251 = vst.msk [vmem:[#allocation2 + $0x58] sm:$0xf] %vm280_vm1, %v997_v14  ;;  %v773_v20 = vmax.f32 %v741_v8, 0.0  ;;  %1254 = vst [vmem:[#allocation2 + $0x5c] sm:$0x1] %v1253_v42  ;;  %v744_v43 = vadd.f32 %v9146_v52, %v705_v23  ;;  %v742_v54 = vadd.f32 %v9146_v52, %v703_v29  ;;  %v1378_v34 = vshrl.u32 %v9396_v17, 16 }
 0x12f   : > { %v1381_v7 = vshll.u32 %v9396_v17, 16  ;;  %v1298_v28 = vsel %vm9173_vm12, %v1107_v24, %v1297_v26  ;;  %v1387_v38 = vshll.u32 %v9413_v12, 16  ;;  %v1391_v60 = vshrl.u32 %v9413_v12, 16  ;;  %v9438_v21 = vld [vmem:[#allocation2 + $0x1c] sm:$0xf] }
 0x130   : > { %v7747_v36 = vpack.c.bf16 %v773_v20, %v773_v20  ;;  %1299 = vst [vmem:[#allocation2 + $0xa8] sm:$0xf] %v1298_v28  ;;  %v776_v44 = vmax.f32 %v744_v43, 0.0  ;;  %v774_v49 = vmax.f32 %v742_v54, 0.0  ;;  %v1380_v47 = vrot.slane %v1378_v34, 4 }
 0x131   : > { %v1383_v56 = vrot.slane %v1381_v7, 5  ;;  %v1389_v62 = vrot.slane %v1387_v38, 5  ;;  %v1393_v25 = vrot.slane %v1391_v60, 4  ;;  %v1397_v51 = vshll.u32 %v9427_v37, 16  ;;  %v1301_v8 = vld [vmem:[#allocation2 + $0xb0] sm:$0x1] }
 0x132   : > { %v1085_v57 = vshrl.u32 %v7747_v36, 16  ;;  %v1088_v58 = vshll.u32 %v7747_v36, 16  ;;  %v7750_v63 = vpack.c.bf16 %v776_v44, %v776_v44  ;;  %v7748_v35 = vpack.c.bf16 %v774_v49, %v774_v49  ;;  %v1294_v23 = vld [vmem:[#allocation2 + $0xa4] sm:$0x1]  ;;  %v9445_v20 = vld [vmem:[#allocation2 + $0x20] sm:$0x1] }
 0x133   : > { %v1384_v16 = vor.u32 %v1383_v56, %v1380_v47  ;;  %v1394_v53 = vor.u32 %v1393_v25, %v1389_v62  ;;  %v708_v33 = vmul.f32 %v9260_v15, %v9141_v50  ;;  %v1402_v4 = vshrl.u32 %v9431_v22, 16 }
 0x134   : > { %v1087_v0 = vrot.slane %v1085_v57, 7  ;;  %v1110_v6 = vshrl.u32 %v7750_v63, 16  ;;  %v1113_v59 = vshll.u32 %v7750_v63, 16  ;;  %v1093_v3 = vshrl.u32 %v7748_v35, 16  ;;  %v9469_v63 = vld [vmem:[#allocation2 + $0x24] sm:$0xf] }
 0x135   : > { %v1096_v10 = vshll.u32 %v7748_v35, 16  ;;  %v1385_v18 = vrot.slane %v1384_v16, 4  ;;  %v1395_v27 = vrot.slane %v1394_v53, 4  ;;  %v1399_v45 = vrot.slane %v1397_v51, 5 }
 0x136   : > { %v1090_v1 = vor.u32 %v1088_v58, %v1087_v0  ;;  %v1091_v61 = vrot.slane %v1087_v0, 4  ;;  %v1112_v9 = vrot.slane %v1110_v6, 7  ;;  %v1095_v19 = vrot.slane %v1093_v3, 7 }
 0x137   : > { %v747_v31 = vadd.f32 %v9146_v52, %v708_v33  ;;  %v1390_v13 = vsel %vm9108_vm7, %v1385_v18, %v1389_v62  ;;  %v1404_v2 = vrot.slane %v1402_v4, 4  ;;  %v1405_v14 = vshll.u32 %v9431_v22, 16 }
 0x138   : > { %v1291_v15 = vsel %vm9173_vm12, %v1090_v1, %v1290_v5  ;;  %v1115_v26 = vor.u32 %v1113_v59, %v1112_v9  ;;  %v1117_v29 = vrot.slane %v1112_v9, 4  ;;  %v1098_v42 = vor.u32 %v1096_v10, %v1095_v19 }
 0x139   : > { %1292 = vst [vmem:[#allocation2 + $0x9c] sm:$0xf] %v1291_v15  ;;  %v1100_v24 = vrot.slane %v1095_v19, 4  ;;  %v1400_v43 = vsel %vm9108_vm7, %v1395_v27, %v1399_v45  ;;  %v779_v54 = vmax.f32 %v747_v31, 0.0  ;;  %v1407_v34 = vrot.slane %v1405_v14, 5 }
 0x13a   : > { %v1411_v7 = vshll.u32 %v9438_v21, 16  ;;  %v1116_v28 = vsel %vm9180_vm13, %v1108_v11, %v1115_v26  ;;  %v1302_v36 = vsel %vm9188_vm14, %v1117_v29, %v1301_v8  ;;  %v1099_v38 = vsel %vm9180_vm13, %v1091_v61, %v1098_v42  ;;  %v8780_v11 = vld [vmem:[%s11374_s4 + $0x8] sm:$0xff]   ;;  %v8783_v8 = vld [vmem:[%s11374_s4 + $0x18] sm:$0xff]   ;;  %v9500_v29 = vld [vmem:[#allocation2 + $0x30] sm:$0xf] }
 0x13b   : > { %v1295_v60 = vsel %vm9188_vm14, %v1100_v24, %v1294_v23  ;;  %1300 = vst.msk [vmem:[#allocation2 + $0xac] sm:$0xf] %vm280_vm1, %v1116_v28  ;;  %1303 = vst [vmem:[#allocation2 + $0xb0] sm:$0x1] %v1302_v36  ;;  %v7140_v44 = vcombine.low %v1390_v13, %v1400_v43  ;;  %v7753_v49 = vpack.c.bf16 %v779_v54, %v779_v54  ;;  %v1415_v57 = vshrl.u32 %v9438_v21, 16 }
 0x13c   : > { %1293 = vst.msk [vmem:[#allocation2 + $0xa0] sm:$0xf] %vm280_vm1, %v1099_v38  ;;  %1296 = vst [vmem:[#allocation2 + $0xa4] sm:$0x1] %v1295_v60  ;;  %v1408_v47 = vor.u32 %v1407_v34, %v1404_v2  ;;  %v1413_v56 = vrot.slane %v1411_v7, 5  ;;  %v1421_v58 = vshll.u32 %v9445_v20, 16  ;;  %v706_v62 = vmul.f32 %v9141_v50, %v9266_v32 }
 0x13d   : > { %v709_v25 = vmul.f32 %v9268_v41, %v9141_v50  ;;  %8063 = vmatmul.mubr.msk.bf16.vlgmr.msra.gmra.mrb[16].mxu1 %vm1602_vm8, %v7140_v44  ;;  %v1136_v35 = vshrl.u32 %v7753_v49, 16  ;;  %v1139_v16 = vshll.u32 %v7753_v49, 16  ;;  %v707_v0 = vmul.f32 %v9141_v50, %v9274_v55  ;;  %v1311_v41 = vld [vmem:[#allocation2 + $0xc0] sm:$0xf]  ;;  %v8782_v50 = vld [vmem:[%s11374_s4 + $0x10] sm:$0xff]  }
 0x13e   : > { %v1409_v51 = vrot.slane %v1408_v47, 4  ;;  %v1417_v53 = vrot.slane %v1415_v57, 4  ;;  %v1423_v33 = vrot.slane %v1421_v58, 5  ;;  %v745_v4 = vadd.f32 %v9146_v52, %v706_v62  ;;  %8079 = vmatpush3.bf16.msra.mxu1 %v9132_v48  ;;  %v9486_v61 = vld [vmem:[#allocation2 + $0x28] sm:$0xf] }
 0x13f   : > { %v748_v5 = vadd.f32 %v9146_v52, %v709_v25  ;;  %v9477_v32 = vrot.slane %v1136_v35, 7  ;;  %v746_v59 = vadd.f32 %v9146_v52, %v707_v0  ;;  %v1426_v3 = vshrl.u32 %v9469_v63, 16  ;;  %8080 = vmatprep.subr.bf16.mxu1 %v8780_v11  ;;  %v9496_v2 = vld [vmem:[#allocation2 + $0x2c] sm:$0x1]  ;;  %v1304_v7 = vld [vmem:[#allocation2 + $0xb4] sm:$0xf] }
 0x140   : > { %v1414_v6 = vsel %vm9108_vm7, %v1409_v51, %v1413_v56  ;;  %v1418_v55 = vor.u32 %v1417_v53, %v1413_v56  ;;  %v777_v10 = vmax.f32 %v745_v4, 0.0  ;;  %v1429_v48 = vshll.u32 %v9469_v63, 16  ;;  %v1315_v49 = vld [vmem:[#allocation2 + $0xc8] sm:$0x1]  ;;  %v9510_v25 = vld [vmem:[%s11374_s4 + $0x40] sm:$0xff]  }
 0x141   : > { %v780_v1 = vmax.f32 %v748_v5, 0.0  ;;  %v1141_v18 = vor.u32 %v1139_v16, %v9477_v32  ;;  %v1142_v27 = vrot.slane %v9477_v32, 4  ;;  %v778_v9 = vmax.f32 %v746_v59, 0.0  ;;  %v1308_v53 = vld [vmem:[#allocation2 + $0xbc] sm:$0x1] }
 0x142   : > { %v1428_v52 = vrot.slane %v1426_v3, 4  ;;  %v1419_v19 = vrot.slane %v1418_v55, 4  ;;  %v7751_v45 = vpack.c.bf16 %v777_v10, %v777_v10  ;;  %v1431_v15 = vrot.slane %v1429_v48, 5  ;;  %8081 = vmatpush3.bf16.msra.mxu1 %v8780_v11  ;;  %v9520_v55 = vld [vmem:[#allocation2 + $0x38] sm:$0x1] }
 0x143   : > { %v7754_v31 = vpack.c.bf16 %v780_v1, %v780_v1  ;;  %v1312_v23 = vsel %vm9173_vm12, %v1141_v18, %v1311_v41  ;;  %v7752_v13 = vpack.c.bf16 %v778_v9, %v778_v9  ;;  %v1435_v14 = vshll.u32 %v9486_v61, 16  ;;  %8082 = vmatprep.subr.bf16.mxu1 %v8782_v50  ;;  %v9512_v41 = vld [vmem:[#allocation2 + $0x34] sm:$0xf]  ;;  %v9522_v10 = vld [vmem:[#allocation2 + $0x3c] sm:$0xf] }
 0x144   : > { %v1439_v26 = vshrl.u32 %v9486_v61, 16  ;;  %1313 = vst [vmem:[#allocation2 + $0xc0] sm:$0xf] %v1312_v23  ;;  %v1424_v42 = vsel %vm9108_vm7, %v1419_v19, %v1423_v33  ;;  %v1119_v24 = vshrl.u32 %v7751_v45, 16  ;;  %v1122_v43 = vshll.u32 %v7751_v45, 16 }
 0x145   : > { %v1144_v54 = vshrl.u32 %v7754_v31, 16  ;;  %v7141_v34 = vcombine.low %v1414_v6, %v1424_v42  ;;  %v1147_v28 = vshll.u32 %v7754_v31, 16  ;;  %v1127_v36 = vshrl.u32 %v7752_v13, 16  ;;  %v9536_v19 = vld [vmem:[#allocation2 + $0x40] sm:$0xf] }
 0x146   : > { %v1130_v38 = vshll.u32 %v7752_v13, 16  ;;  %v1121_v60 = vrot.slane %v1119_v24, 7  ;;  %v1432_v47 = vor.u32 %v1431_v15, %v1428_v52  ;;  %v1437_v56 = vrot.slane %v1435_v14, 5  ;;  %8083 = vmatpush3.bf16.msra.mxu1 %v8782_v50  ;;  %v9541_v31 = vld [vmem:[#allocation2 + $0x44] sm:$0x1] }
 0x147   : > { %v1146_v44 = vrot.slane %v1144_v54, 7  ;;  %8066 = vmatprep.mubr.msk.bf16.mxu1 %vm1602_vm8, %v7141_v34  ;;  %v1129_v11 = vrot.slane %v1127_v36, 7  ;;  %v1441_v57 = vrot.slane %v1439_v26, 4  ;;  %v1445_v58 = vshll.u32 %v9496_v2, 16  ;;  %8084 = vmatprep.subr.bf16.mxu1 %v8783_v8  ;;  %v9545_v42 = vld [vmem:[#allocation2 + $0x48] sm:$0xf] }
 0x148   : > { %v1450_v62 = vshrl.u32 %v9500_v29, 16  ;;  %v1124_v35 = vor.u32 %v1122_v43, %v1121_v60  ;;  %v1125_v16 = vrot.slane %v1121_v60, 4  ;;  %v1433_v5 = vrot.slane %v1432_v47, 4  ;;  %v9551_v60 = vld [vmem:[#allocation2 + $0x4c] sm:$0xf] }
 0x149   : > { %v1149_v51 = vor.u32 %v1147_v28, %v1146_v44  ;;  %v1151_v0 = vrot.slane %v1146_v44, 4  ;;  %v1132_v33 = vor.u32 %v1130_v38, %v1129_v11  ;;  %v1134_v4 = vrot.slane %v1129_v11, 4 }
 0x14a   : > { %v1442_v32 = vor.u32 %v1441_v57, %v1437_v56  ;;  %v1305_v6 = vsel %vm9173_vm12, %v1124_v35, %v1304_v7  ;;  %v1447_v50 = vrot.slane %v1445_v58, 5  ;;  %8085 = vmatpush3.bf16.msra.mxu1 %v8783_v8  ;;  %v1438_v48 = vsel %vm9108_vm7, %v1433_v5, %v1437_v56  ;;  %v9555_v35 = vld [vmem:[#allocation2 + $0x50] sm:$0x1] }
 0x14b   : > { %v1150_v59 = vsel %vm9180_vm13, %v1142_v27, %v1149_v51  ;;  %v1316_v3 = vsel %vm9188_vm14, %v1151_v0, %v1315_v49  ;;  %1306 = vst [vmem:[#allocation2 + $0xb4] sm:$0xf] %v1305_v6  ;;  %v1133_v30 = vsel %vm9180_vm13, %v1125_v16, %v1132_v33  ;;  %v1309_v1 = vsel %vm9188_vm14, %v1134_v4, %v1308_v53  ;;  %v9558_v33 = vld [vmem:[#allocation2 + $0x60] sm:$0xf] }
 0x14c   : > { %1314 = vst.msk [vmem:[#allocation2 + $0xc4] sm:$0xf] %vm280_vm1, %v1150_v59  ;;  %1317 = vst [vmem:[#allocation2 + $0xc8] sm:$0x1] %v1316_v3  ;;  %v1443_v18 = vrot.slane %v1442_v32, 4  ;;  %8102 = vmatprep.subr.bf16.mxu1 %v9510_v25  ;;  %v1452_v27 = vrot.slane %v1450_v62, 4 }
 0x14d   : > { %1307 = vst.msk [vmem:[#allocation2 + $0xb8] sm:$0xf] %vm280_vm1, %v1133_v30  ;;  %1310 = vst [vmem:[#allocation2 + $0xbc] sm:$0x1] %v1309_v1  ;;  %v1453_v9 = vshll.u32 %v9500_v29, 16  ;;  %v1459_v52 = vshll.u32 %v9512_v41, 16 }
 0x14e   : > { %v1463_v40 = vshrl.u32 %v9512_v41, 16  ;;  %v1448_v46 = vsel %vm9108_vm7, %v1443_v18, %v1447_v50  ;;  %v1469_v45 = vshll.u32 %v9520_v55, 16  ;;  %v1474_v15 = vshrl.u32 %v9522_v10, 16  ;;  %v9565_v59 = vld [vmem:[#allocation2 + $0x64] sm:$0xf]  ;;  %vm9781_vm1 = vmor %vm1933_vm15, %vm1934_vm0 }
 0x14f   : > { %v1477_v8 = vshll.u32 %v9522_v10, 16  ;;  %v7142_v23 = vcombine.low %v1438_v48, %v1448_v46  ;;  %v1455_v13 = vrot.slane %v1453_v9, 5  ;;  %v1461_v14 = vrot.slane %v1459_v52, 5  ;;  %v9569_v48 = vld [vmem:[#allocation2 + $0x54] sm:$0xf] }
 0x150   : > { %v1465_v26 = vrot.slane %v1463_v40, 4  ;;  %v1471_v24 = vrot.slane %v1469_v45, 5  ;;  %v1476_v43 = vrot.slane %v1474_v15, 4  ;;  %v1483_v34 = vshll.u32 %v9536_v19, 16  ;;  %v9574_v46 = vld [vmem:[#allocation2 + $0x68] sm:$0x1] }
 0x151   : > { %v1479_v54 = vrot.slane %v1477_v8, 5  ;;  %8067 = vmatmul.mubr.msk.bf16.gmra.mrb[20].mxu1 %vm1602_vm8, %v7142_v23  ;;  %v1456_v7 = vor.u32 %v1455_v13, %v1452_v27  ;;  %v1487_v36 = vshrl.u32 %v9536_v19, 16  ;;  %v1493_v38 = vshll.u32 %v9541_v31, 16 }
 0x152   : > { %v1466_v28 = vor.u32 %v1465_v26, %v1461_v14  ;;  %v1485_v49 = vrot.slane %v1483_v34, 5  ;;  %v1498_v47 = vshrl.u32 %v9545_v42, 16  ;;  %v1501_v56 = vshll.u32 %v9545_v42, 16 }
 0x153   : > { %v1480_v44 = vor.u32 %v1479_v54, %v1476_v43  ;;  %v1457_v11 = vrot.slane %v1456_v7, 4  ;;  %v1489_v58 = vrot.slane %v1487_v36, 4  ;;  %v1495_v62 = vrot.slane %v1493_v38, 5 }
 0x154   : > { %v1467_v57 = vrot.slane %v1466_v28, 4  ;;  %v1500_v51 = vrot.slane %v1498_v47, 4  ;;  %v1503_v0 = vrot.slane %v1501_v56, 5  ;;  %v1507_v53 = vshll.u32 %v9551_v60, 16  ;;  %v9585_v28 = vld [vmem:[#allocation2 + $0x6c] sm:$0xf] }
 0x155   : > { %v1481_v16 = vrot.slane %v1480_v44, 4  ;;  %v1462_v4 = vsel %vm9108_vm7, %v1457_v11, %v1461_v14  ;;  %v1490_v32 = vor.u32 %v1489_v58, %v1485_v49  ;;  %v1511_v6 = vshrl.u32 %v9551_v60, 16  ;;  %v9589_v47 = vld [vmem:[#allocation2 + $0x70] sm:$0xf]  ;;  %v9592_v11 = vld [vmem:[#allocation2 + $0x5c] sm:$0x1] }
 0x156   : > { %v1472_v5 = vsel %vm9108_vm7, %v1467_v57, %v1471_v24  ;;  %v1504_v30 = vor.u32 %v1503_v0, %v1500_v51  ;;  %v1509_v1 = vrot.slane %v1507_v53, 5  ;;  %v1517_v9 = vshll.u32 %v9555_v35, 16  ;;  %v9581_v24 = vld [vmem:[#allocation2 + $0x58] sm:$0xf] }
 0x157   : > { %v7143_v3 = vcombine.low %v1462_v4, %v1472_v5  ;;  %v1486_v50 = vsel %vm9108_vm7, %v1481_v16, %v1485_v49  ;;  %v1491_v18 = vrot.slane %v1490_v32, 4  ;;  %v1513_v27 = vrot.slane %v1511_v6, 4 }
 0x158   : > { %v4200_v52 = vshrl.u32 %v9558_v33, 16  ;;  %v1505_v40 = vrot.slane %v1504_v30, 4  ;;  %v4203_v45 = vshll.u32 %v9558_v33, 16  ;;  %v4209_v15 = vshll.u32 %v9565_v59, 16 }
 0x159   : > { %8070 = vmatprep.mubr.msk.bf16.mxu1 %vm1602_vm8, %v7143_v3  ;;  %v4213_v8 = vshrl.u32 %v9565_v59, 16  ;;  %v1496_v23 = vsel %vm9108_vm7, %v1491_v18, %v1495_v62  ;;  %v1514_v13 = vor.u32 %v1513_v27, %v1509_v1  ;;  %v1519_v14 = vrot.slane %v1517_v9, 5  ;;  %v9604_v9 = vld [vmem:[#allocation2 + $0x74] sm:$0x1] }
 0x15a   : > { %v4202_v26 = vrot.slane %v4200_v52, 4  ;;  %v7144_v43 = vcombine.low %v1486_v50, %v1496_v23  ;;  %v1510_v54 = vsel %vm9108_vm7, %v1505_v40, %v1509_v1  ;;  %v4205_v34 = vrot.slane %v4203_v45, 5  ;;  %v9608_v45 = vld [vmem:[#allocation2 + $0x78] sm:$0xf] }
 0x15b   : > { %v4211_v7 = vrot.slane %v4209_v15, 5  ;;  %v1515_v36 = vrot.slane %v1514_v13, 4  ;;  %v4215_v38 = vrot.slane %v4213_v8, 4  ;;  %v4219_v44 = vshll.u32 %v9574_v46, 16 }
 0x15c   : > { %v1522_v49 = vshrl.u32 %v9569_v48, 16  ;;  %8071 = vmatmul.mubr.msk.bf16.gmra.mrb[24].mxu1 %vm1602_vm8, %v7144_v43  ;;  %v4206_v56 = vor.u32 %v4205_v34, %v4202_v26  ;;  %v1525_v57 = vshll.u32 %v9569_v48, 16  ;;  %v1531_v58 = vshll.u32 %v9581_v24, 16 }
 0x15d   : > { %v1535_v62 = vshrl.u32 %v9581_v24, 16  ;;  %v1520_v16 = vsel %vm9108_vm7, %v1515_v36, %v1519_v14  ;;  %v4216_v51 = vor.u32 %v4215_v38, %v4211_v7  ;;  %v4221_v0 = vrot.slane %v4219_v44, 5  ;;  %v9612_v14 = vld [vmem:[#allocation2 + $0x7c] sm:$0xf]  ;;  %v9616_v44 = vld [vmem:[#allocation2 + $0x80] sm:$0x1] }
 0x15e   : > { %v1524_v53 = vrot.slane %v1522_v49, 4  ;;  %v7145_v4 = vcombine.low %v1510_v54, %v1520_v16  ;;  %v4207_v5 = vrot.slane %v4206_v56, 4  ;;  %v1527_v32 = vrot.slane %v1525_v57, 5  ;;  %v9624_v16 = vld [vmem:[#allocation2 + $0x84] sm:$0xf] }
 0x15f   : > { %v1533_v6 = vrot.slane %v1531_v58, 5  ;;  %v4217_v3 = vrot.slane %v4216_v51, 4  ;;  %v1537_v50 = vrot.slane %v1535_v62, 4  ;;  %v1541_v30 = vshll.u32 %v9592_v11, 16 }
 0x160   : > { %v4224_v1 = vshrl.u32 %v9585_v28, 16  ;;  %8074 = vmatprep.mubr.msk.bf16.mxu1 %vm1602_vm8, %v7145_v4  ;;  %v4212_v18 = vsel %vm9108_vm7, %v4207_v5, %v4211_v7  ;;  %v1528_v27 = vor.u32 %v1527_v32, %v1524_v53  ;;  %v4227_v52 = vshll.u32 %v9585_v28, 16  ;;  %v9628_v5 = vld [vmem:[#allocation2 + $0x88] sm:$0xf] }
 0x161   : > { %v4233_v40 = vshll.u32 %v9589_v47, 16  ;;  %v4222_v15 = vsel %vm9108_vm7, %v4217_v3, %v4221_v0  ;;  %v1538_v8 = vor.u32 %v1537_v50, %v1533_v6  ;;  %v1543_v23 = vrot.slane %v1541_v30, 5 }
 0x162   : > { %v4226_v13 = vrot.slane %v4224_v1, 4  ;;  %v7425_v26 = vcombine.low %v4212_v18, %v4222_v15  ;;  %v1529_v43 = vrot.slane %v1528_v27, 4  ;;  %v4229_v54 = vrot.slane %v4227_v52, 5  ;;  %v8888_v27 = vld [vmem:[#allocation2] sm:$0xf] }
 0x163   : > { %v4235_v34 = vrot.slane %v4233_v40, 5  ;;  %v1539_v7 = vrot.slane %v1538_v8, 4  ;;  %v4237_v36 = vshrl.u32 %v9589_v47, 16  ;;  %v4243_v38 = vshll.u32 %v9604_v9, 16  ;;  %v9632_v52 = vld [vmem:[#allocation2 + $0x4] sm:$0xf] }
 0x164   : > { %v4248_v49 = vshrl.u32 %v9608_v45, 16  ;;  %8278 = vmatprep.mubr.msk.bf16.mxu0 %vm1602_vm8, %v7425_v26  ;;  %v1534_v56 = vsel %vm9108_vm7, %v1529_v43, %v1533_v6  ;;  %v4230_v57 = vor.u32 %v4229_v54, %v4226_v13  ;;  %v4251_v58 = vshll.u32 %v9608_v45, 16  ;;  %v9640_v13 = vld [vmem:[#allocation2 + $0x8c] sm:$0x1] }
 0x165   : > { %v4257_v62 = vshll.u32 %v9612_v14, 16  ;;  %v1544_v51 = vsel %vm9108_vm7, %v1539_v7, %v1543_v23  ;;  %v4239_v0 = vrot.slane %v4237_v36, 4  ;;  %v4245_v53 = vrot.slane %v4243_v38, 5  ;;  %v9645_v38 = vld [vmem:[#allocation2 + $0x90] sm:$0xf] }
 0x166   : > { %v4250_v4 = vrot.slane %v4248_v49, 4  ;;  %v7146_v32 = vcombine.low %v1534_v56, %v1544_v51  ;;  %v4231_v3 = vrot.slane %v4230_v57, 4  ;;  %v4253_v50 = vrot.slane %v4251_v58, 5 }
 0x167   : > { %v4259_v30 = vrot.slane %v4257_v62, 5  ;;  %v4240_v6 = vor.u32 %v4239_v0, %v4235_v34  ;;  %v4261_v1 = vshrl.u32 %v9612_v14, 16  ;;  %v4267_v18 = vshll.u32 %v9616_v44, 16 }
 0x168   : > { %v7159_v40 = vcombine.low %v8888_v27, %v9632_v52  ;;  %8075 = vmatmul.mubr.msk.bf16.gmra.mrb[28].mxu1 %vm1602_vm8, %v7146_v32  ;;  %v4236_v15 = vsel %vm9108_vm7, %v4231_v3, %v4235_v34  ;;  %v4254_v8 = vor.u32 %v4253_v50, %v4250_v4  ;;  %v7160_v23 = vcombine.low %v9396_v17, %v9413_v12  ;;  %v9649_v17 = vld [vmem:[#allocation2 + $0x94] sm:$0xf]  ;;  %v8784_v3 = vld [vmem:[%s11374_s4 + $0x8] sm:$0xff]  }
 0x169   : > { %v4272_v26 = vshrl.u32 %v9624_v16, 16  ;;  %v4241_v43 = vrot.slane %v4240_v6, 4  ;;  %v4263_v54 = vrot.slane %v4261_v1, 4  ;;  %v4269_v7 = vrot.slane %v4267_v18, 5  ;;  %v9659_v1 = vld [vmem:[#allocation2 + $0x98] sm:$0x1] }
 0x16a   : > { %8086 = vmatprep.mubr.msk.bf16.mxu1 %vm1602_vm8, %v7159_v40  ;;  %v4275_v36 = vshll.u32 %v9624_v16, 16  ;;  %v4255_v49 = vrot.slane %v4254_v8, 4  ;;  %v4281_v34 = vshll.u32 %v9628_v5, 16  ;;  %v4285_v57 = vshrl.u32 %v9628_v5, 16 }
 0x16b   : > { %v4274_v56 = vrot.slane %v4272_v26, 4  ;;  %v4246_v58 = vsel %vm9108_vm7, %v4241_v43, %v4245_v53  ;;  %v4264_v62 = vor.u32 %v4263_v54, %v4259_v30  ;;  %v4291_v0 = vshll.u32 %v9640_v13, 16  ;;  %v8793_v43 = vld [vmem:[%s11374_s4 + $0x48] sm:$0xff]   ;;  %v8890_v54 = vld [vmem:[%s11374_s4] sm:$0xff]  }
 0x16c   : > { %v4277_v51 = vrot.slane %v4275_v36, 5  ;;  %v7426_v4 = vcombine.low %v4236_v15, %v4246_v58  ;;  %v4260_v32 = vsel %vm9108_vm7, %v4255_v49, %v4259_v30  ;;  %v4283_v50 = vrot.slane %v4281_v34, 5  ;;  %v9677_v34 = vld [vmem:[#allocation2 + $0x9c] sm:$0xf] }
 0x16d   : > { %v4287_v6 = vrot.slane %v4285_v57, 4  ;;  %v4265_v18 = vrot.slane %v4264_v62, 4  ;;  %v4293_v40 = vrot.slane %v4291_v0, 5  ;;  %v7161_v53 = vcombine.low %v9431_v22, %v9438_v21  ;;  %11392 = vst [vmem:[#allocation3_spill] sm:$0xff] %v9677_v34  ;;  %v8785_v0 = vld [vmem:[%s11374_s4 + $0x10] sm:$0xff]  }
 0x16e   : > { %v4278_v27 = vor.u32 %v4277_v51, %v4274_v56  ;;  %8279 = vmatmul.mubr.msk.bf16.vlgmr.msra.gmra.mrb[16].mxu0 %vm1602_vm8, %v7426_v4  ;;  %v4296_v8 = vshrl.u32 %v9645_v38, 16  ;;  %v4299_v30 = vshll.u32 %v9645_v38, 16  ;;  %v4305_v26 = vshll.u32 %v9649_v17, 16  ;;  %v9683_v4 = vld [vmem:[#allocation2 + $0xa0] sm:$0xf] }
 0x16f   : > { %v4288_v15 = vor.u32 %v4287_v6, %v4283_v50  ;;  %8295 = vmatpush3.bf16.msra.mxu0 %v8890_v54  ;;  %v4270_v22 = vsel %vm9108_vm7, %v4265_v18, %v4269_v7  ;;  %v4309_v49 = vshrl.u32 %v9649_v17, 16  ;;  %v4315_v56 = vshll.u32 %v9659_v1, 16 }
 0x170   : > { %v4279_v36 = vrot.slane %v4278_v27, 4  ;;  %v7427_v57 = vcombine.low %v4260_v32, %v4270_v22  ;;  %8296 = vmatprep.subr.bf16.mxu0 %v8784_v3  ;;  %8087 = vmatmul.mubr.msk.bf16.vlgmr.msra.gmra.mrb[16].mxu1 %vm1602_vm8, %v7160_v23  ;;  %v4298_v62 = vrot.slane %v4296_v8, 4  ;;  %v4301_v51 = vrot.slane %v4299_v30, 5  ;;  %v9688_v27 = vld [vmem:[#allocation2 + $0xa4] sm:$0x1] }
 0x171   : > { %v4289_v58 = vrot.slane %v4288_v15, 4  ;;  %8090 = vmatprep.mubr.msk.bf16.mxu1 %vm1602_vm8, %v7161_v53  ;;  %v4307_v6 = vrot.slane %v4305_v26, 5  ;;  %v4311_v18 = vrot.slane %v4309_v49, 4  ;;  %v4317_v32 = vrot.slane %v4315_v56, 5  ;;  %8103 = vmatpush3.bf16.msra.mxu1 %v9510_v25  ;;  %v8788_v53 = vld [vmem:[%s11374_s4 + $0x18] sm:$0xff]   ;;  %v8796_v25 = vld [vmem:[%s11374_s4 + $0x50] sm:$0xff]  }
 0x172   : > { %v4284_v7 = vsel %vm9108_vm7, %v4279_v36, %v4283_v50  ;;  %8282 = vmatprep.mubr.msk.bf16.mxu0 %vm1602_vm8, %v7427_v57  ;;  %v4302_v15 = vor.u32 %v4301_v51, %v4298_v62  ;;  %v7162_v8 = vcombine.low %v9469_v63, %v9486_v61  ;;  %v4320_v50 = vshrl.u32 %v9677_v34, 16  ;;  %8104 = vmatprep.subr.bf16.mxu1 %v8793_v43  ;;  %v9705_v22 = vld [vmem:[#allocation2 + $0xa8] sm:$0xf]  ;;  %v9709_v57 = vld [vmem:[#allocation2 + $0xac] sm:$0xf] }
 0x173   : > { %v4294_v23 = vsel %vm9108_vm7, %v4289_v58, %v4293_v40  ;;  %8297 = vmatpush3.bf16.msra.mxu0 %v8784_v3  ;;  %v4312_v26 = vor.u32 %v4311_v18, %v4307_v6  ;;  %v4323_v40 = vshll.u32 %v9677_v34, 16  ;;  %v4329_v54 = vshll.u32 %v9683_v4, 16  ;;  %11393 = vst [vmem:[#allocation4_spill] sm:$0xff] %v9705_v22  ;;  %11394 = vst [vmem:[#allocation5_spill] sm:$0xff] %v9709_v57 }
 0x174   : > { %v7428_v30 = vcombine.low %v4284_v7, %v4294_v23  ;;  %v4303_v63 = vrot.slane %v4302_v15, 4  ;;  %8298 = vmatprep.subr.bf16.mxu0 %v8785_v0  ;;  %v4322_v36 = vrot.slane %v4320_v50, 4  ;;  %v4333_v49 = vshrl.u32 %v9683_v4, 16  ;;  %v9716_v15 = vld [vmem:[#allocation2 + $0xb0] sm:$0x1] }
 0x175   : > { %v4339_v56 = vshll.u32 %v9688_v27, 16  ;;  %v4313_v58 = vrot.slane %v4312_v26, 4  ;;  %v4325_v62 = vrot.slane %v4323_v40, 5  ;;  %v4331_v51 = vrot.slane %v4329_v54, 5  ;;  %8105 = vmatpush3.bf16.msra.mxu1 %v8793_v43  ;;  %11395 = vst [vmem:[#allocation6_spill] sm:$0xff] %v9716_v15  ;;  %v8799_v26 = vld [vmem:[%s11374_s4 + $0x58] sm:$0xff]  }
 0x176   : > { %v7163_v3 = vcombine.low %v9500_v29, %v9512_v41  ;;  %8283 = vmatmul.mubr.msk.bf16.gmra.mrb[20].mxu0 %vm1602_vm8, %v7428_v30  ;;  %v4308_v7 = vsel %vm9108_vm7, %v4303_v63, %v4307_v6  ;;  %v4335_v18 = vrot.slane %v4333_v49, 4  ;;  %v4344_v50 = vshrl.u32 %v9705_v22, 16  ;;  %8106 = vmatprep.subr.bf16.mxu1 %v8796_v25  ;;  %v9726_v40 = vld [vmem:[#allocation2 + $0xb4] sm:$0xf] }
 0x177   : > { %v4341_v23 = vrot.slane %v4339_v56, 5  ;;  %v4318_v29 = vsel %vm9108_vm7, %v4313_v58, %v4317_v32  ;;  %v4326_v43 = vor.u32 %v4325_v62, %v4322_v36  ;;  %8299 = vmatpush3.bf16.msra.mxu0 %v8785_v0  ;;  %v4347_v30 = vshll.u32 %v9705_v22, 16  ;;  %v9733_v32 = vld [vmem:[%s11374_s4 + $0x40] sm:$0xff]  }
 0x178   : > { %v4353_v6 = vshll.u32 %v9709_v57, 16  ;;  %v7429_v54 = vcombine.low %v4308_v7, %v4318_v29  ;;  %8091 = vmatmul.mubr.msk.bf16.gmra.mrb[20].mxu1 %vm1602_vm8, %v7162_v8  ;;  %v4336_v63 = vor.u32 %v4335_v18, %v4331_v51  ;;  %v4346_v49 = vrot.slane %v4344_v50, 4  ;;  %8300 = vmatprep.subr.bf16.mxu0 %v8788_v53  ;;  %v9737_v7 = vld [vmem:[#allocation2 + $0xb8] sm:$0xf]  ;;  %v9744_v29 = vld [vmem:[%s11374_s4 + $0x60] sm:$0xff]  }
 0x179   : > { %v4357_v56 = vshrl.u32 %v9709_v57, 16  ;;  %v4327_v0 = vrot.slane %v4326_v43, 4  ;;  %8094 = vmatprep.mubr.msk.bf16.mxu1 %vm1602_vm8, %v7163_v3  ;;  %v4349_v36 = vrot.slane %v4347_v30, 5  ;;  %v4363_v62 = vshll.u32 %v9716_v15, 16  ;;  %8107 = vmatpush3.bf16.msra.mxu1 %v8796_v25 }
 0x17a   : > { %v4355_v58 = vrot.slane %v4353_v6, 5  ;;  %8286 = vmatprep.mubr.msk.bf16.mxu0 %vm1602_vm8, %v7429_v54  ;;  %v4337_v8 = vrot.slane %v4336_v63, 4  ;;  %v4368_v50 = vshrl.u32 %v9726_v40, 16  ;;  %8108 = vmatprep.subr.bf16.mxu1 %v8799_v26  ;;  %v9748_v6 = vld [vmem:[#allocation2 + $0xbc] sm:$0x1]  ;;  %v4371_v25 = vshll.u32 %v9726_v40, 16 }
 0x17b   : > { %v4359_v18 = vrot.slane %v4357_v56, 4  ;;  %v4332_v3 = vsel %vm9108_vm7, %v4327_v0, %v4331_v51  ;;  %v4350_v43 = vor.u32 %v4349_v36, %v4346_v49  ;;  %v4365_v30 = vrot.slane %v4363_v62, 5  ;;  %8301 = vmatpush3.bf16.msra.mxu0 %v8788_v53 }
 0x17c   : > { %v4342_v54 = vsel %vm9108_vm7, %v4337_v8, %v4341_v23  ;;  %v4370_v56 = vrot.slane %v4368_v50, 4  ;;  %v4377_v22 = vshll.u32 %v9737_v7, 16  ;;  %8318 = vmatprep.subr.bf16.mxu0 %v9733_v32  ;;  %v4373_v57 = vrot.slane %v4371_v25, 5  ;;  %v1909_v23 = vld [vmem:[#allocation2] sm:$0xe] }
 0x17d   : > { %v4360_v63 = vor.u32 %v4359_v18, %v4355_v58  ;;  %v7430_v34 = vcombine.low %v4332_v3, %v4342_v54  ;;  %v4351_v15 = vrot.slane %v4350_v43, 4  ;;  %v4381_v51 = vshrl.u32 %v9737_v7, 16  ;;  %8109 = vmatpush3.bf16.msra.mxu1 %v8799_v26 }
 0x17e   : > { %v7164_v0 = vcombine.low %v9522_v10, %v9536_v19  ;;  %v4379_v53 = vrot.slane %v4377_v22, 5  ;;  %v4387_v36 = vshll.u32 %v9748_v6, 16  ;;  %8126 = vmatprep.subr.bf16.mxu1 %v9744_v29  ;;  %v4374_v8 = vor.u32 %v4373_v57, %v4370_v56  ;;  %v1910_v57 = vld [vmem:[#allocation2 + $0xc] sm:$0xe] }
 0x17f   : > { %v4361_v49 = vrot.slane %v4360_v63, 4  ;;  %8287 = vmatmul.mubr.msk.bf16.gmra.mrb[24].mxu0 %vm1602_vm8, %v7430_v34  ;;  %v4356_v62 = vsel %vm9108_vm7, %v4351_v15, %v4355_v58  ;;  %v4383_v18 = vrot.slane %v4381_v51, 4  ;;  %v7165_v26 = vcombine.low %v9545_v42, %v9551_v60 }
 0x180   : > { %8095 = vmatmul.mubr.msk.bf16.gmra.mrb[24].mxu1 %vm1602_vm8, %v7164_v0  ;;  %v7445_v10 = vcombine.low %v9558_v33, %v9565_v59  ;;  %v4375_v34 = vrot.slane %v4374_v8, 4  ;;  %v4389_v43 = vrot.slane %v4387_v36, 5  ;;  %v7166_v42 = vcombine.low %v9569_v48, %v9581_v24  ;;  %v1913_v36 = vld [vmem:[#allocation2 + $0x30] sm:$0xe] }
 0x181   : > { %v4366_v50 = vsel %vm9108_vm7, %v4361_v49, %v4365_v30  ;;  %v4384_v3 = vor.u32 %v4383_v18, %v4379_v53  ;;  %8098 = vmatprep.mubr.msk.bf16.mxu1 %vm1602_vm8, %v7165_v26  ;;  %v7179_v15 = vrot.slane %v1909_v23, 9  ;;  %v1938_v58 = vrot.slane %v9632_v52, 5  ;;  %v8891_v30 = vld [vmem:[#allocation2 + $0x8] sm:$0x1]  ;;  %v1911_v52 = vld [vmem:[#allocation2 + $0x18] sm:$0xe] }
 0x182   : > { %v7431_v22 = vcombine.low %v4356_v62, %v4366_v50  ;;  %v1941_v25 = vrot.slane %v8891_v30, 5  ;;  %v4380_v33 = vsel %vm9108_vm7, %v4375_v34, %v4379_v53  ;;  %v7446_v63 = vcombine.low %v9585_v28, %v9589_v47  ;;  %v1912_v34 = vld [vmem:[#allocation2 + $0x24] sm:$0xe] }
 0x183   : > { %v4385_v54 = vrot.slane %v4384_v3, 4  ;;  %v1945_v48 = vrot.slane %v9413_v12, 5  ;;  %v1939_v51 = vsel %vm9781_vm1, %v7179_v15, %v1938_v58  ;;  %v1940_v49 = vrot.slane %v1938_v58, 4 }
 0x184   : > { %8290 = vmatprep.mubr.msk.bf16.mxu0 %vm1602_vm8, %v7431_v22  ;;  %v7180_v0 = vrot.slane %v1910_v57, 9  ;;  %v1948_v53 = vrot.slane %v9427_v37, 5  ;;  %v7447_v62 = vcombine.low %v9608_v45, %v9612_v14  ;;  %v1952_v18 = vrot.slane %v9438_v21, 5 }
 0x185   : > { %v4390_v23 = vsel %vm9108_vm7, %v4385_v54, %v4389_v43  ;;  %v1947_v8 = vrot.slane %v1945_v48, 4  ;;  %v1942_v12 = vsel %vm9781_vm1, %v1940_v49, %v1941_v25  ;;  %v7448_v50 = vcombine.low %v9624_v16, %v9628_v5  ;;  %v1915_v49 = vld [vmem:[#allocation2 + $0x48] sm:$0xe] }
 0x186   : > { %v7432_v26 = vcombine.low %v4380_v33, %v4390_v23  ;;  %v7181_v22 = vrot.slane %v1911_v52, 9  ;;  %v7195_v37 = vcombine.low %v1939_v51, %v1942_v12  ;;  %v1954_v43 = vrot.slane %v1952_v18, 4  ;;  %v1914_v33 = vld [vmem:[#allocation2 + $0x3c] sm:$0xe]  ;;  %v4759_v16 = vld [vmem:[#allocation2 + $0xa8] sm:$0xe] }
 0x187   : > { %v1949_v3 = vsel %vm9781_vm1, %v1947_v8, %v1948_v53  ;;  %v1955_v57 = vrot.slane %v9445_v20, 5  ;;  %v1946_v21 = vsel %vm9781_vm1, %v7180_v0, %v1945_v48  ;;  %v7449_v15 = vcombine.low %v9645_v38, %v9649_v17  ;;  %v4753_v8 = vld [vmem:[#allocation2 + $0x60] sm:$0xe] }
 0x188   : > { %8291 = vmatmul.mubr.msk.bf16.gmra.mrb[28].mxu0 %vm1602_vm8, %v7432_v26  ;;  %8099 = vmatmul.mubr.msk.bf16.gmra.mrb[28].mxu1 %vm1602_vm8, %v7166_v42  ;;  %v1953_v45 = vsel %vm9781_vm1, %v7181_v22, %v1952_v18  ;;  %v1959_v58 = vrot.slane %v9486_v61, 5  ;;  %v7182_v30 = vrot.slane %v1912_v34, 9  ;;  %v7183_v42 = vrot.slane %v1913_v36, 9  ;;  %v1916_v22 = vld [vmem:[#allocation2 + $0x54] sm:$0xe]  ;;  %v8800_v34 = vld [vmem:[%s11374_s4 + $0x48] sm:$0xff]  }
 0x189   : > { %8302 = vmatprep.mubr.msk.bf16.mxu0 %vm1602_vm8, %v7445_v10  ;;  %8110 = vmatprep.mubr.msk.bf16.mxu1 %vm1602_vm8, %v7195_v37  ;;  %v1956_v20 = vsel %vm9781_vm1, %v1954_v43, %v1955_v57  ;;  %v1966_v25 = vrot.slane %v9512_v41, 5  ;;  %v7196_v54 = vcombine.low %v1946_v21, %v1949_v3  ;;  %v1962_v51 = vrot.slane %v9496_v2, 5  ;;  %v9967_v38 = vld [vmem:[%s11374_s4 + $0x60] sm:$0xff]  }
 0x18a   : > { %v7197_v48 = vcombine.low %v1953_v45, %v1956_v20  ;;  %v1961_v52 = vrot.slane %v1959_v58, 4  ;;  %v9818_v61 = vsel %vm9781_vm1, %v7182_v30, %v1959_v58  ;;  %v1969_v53 = vrot.slane %v9520_v55, 5  ;;  %v8809_v58 = vld [vmem:[%s11374_s4 + $0x68] sm:$0xff]  }
 0x18b   : > { %v9822_v10 = vsel %vm9781_vm1, %v7183_v42, %v1966_v25  ;;  %v1968_v0 = vrot.slane %v1966_v25, 4  ;;  %v7184_v36 = vrot.slane %v1914_v33, 9  ;;  %v1973_v23 = vrot.slane %v9536_v19, 5  ;;  %v4754_v30 = vld [vmem:[#allocation2 + $0x6c] sm:$0xe] }
 0x18c   : > { %v9827_v41 = vsel %vm9781_vm1, %v1961_v52, %v1962_v51  ;;  %v1976_v2 = vrot.slane %v9541_v31, 5  ;;  %v7185_v12 = vrot.slane %v1915_v49, 9  ;;  %v1980_v55 = vrot.slane %v9551_v60, 5  ;;  %v4755_v25 = vld [vmem:[#allocation2 + $0x78] sm:$0xe] }
 0x18d   : > { %v7198_v18 = vcombine.low %v9818_v61, %v9827_v41  ;;  %v9835_v26 = vsel %vm9781_vm1, %v1968_v0, %v1969_v53  ;;  %v9845_v31 = vsel %vm9781_vm1, %v7184_v36, %v1973_v23  ;;  %v1975_v37 = vrot.slane %v1973_v23, 4  ;;  %v4756_v0 = vld [vmem:[#allocation2 + $0x84] sm:$0xe]  ;;  %v4757_v23 = vld [vmem:[#allocation2 + $0x90] sm:$0xe] }
 0x18e   : > { %v7199_v19 = vcombine.low %v9822_v10, %v9835_v26  ;;  %v1983_v3 = vrot.slane %v9555_v35, 5  ;;  %v9850_v43 = vsel %vm9781_vm1, %v7185_v12, %v1980_v55  ;;  %v1982_v60 = vrot.slane %v1980_v55, 4  ;;  %v8806_v12 = vld [vmem:[%s11374_s4 + $0x58] sm:$0xff]  }
 0x18f   : > { %v7465_v57 = vrot.slane %v4753_v8, 9  ;;  %v4779_v21 = vrot.slane %v9565_v59, 5  ;;  %v9860_v45 = vsel %vm9781_vm1, %v1975_v37, %v1976_v2  ;;  %v4782_v35 = vrot.slane %v9574_v46, 5  ;;  %v8811_v37 = vld [vmem:[%s11374_s4 + $0x70] sm:$0xff]  }
 0x190   : > { %8303 = vmatmul.mubr.msk.bf16.vlgmr.msra.gmra.mrb[16].mxu0 %vm1602_vm8, %v7446_v63  ;;  %8111 = vmatmul.mubr.msk.bf16.vlgmr.msra.gmra.mrb[16].mxu1 %vm1602_vm8, %v7196_v54  ;;  %v7186_v20 = vrot.slane %v1916_v22, 9  ;;  %v1987_v59 = vrot.slane %v9581_v24, 5  ;;  %v7200_v28 = vcombine.low %v9845_v31, %v9860_v45  ;;  %v9873_v63 = vsel %vm9781_vm1, %v1982_v60, %v1983_v3  ;;  %v8803_v24 = vld [vmem:[%s11374_s4 + $0x50] sm:$0xff]   ;;  %v2412_v45 = vld [vmem:[#allocation2 + $0xc] sm:$0xf] }
 0x191   : > { %8319 = vmatpush3.bf16.msra.mxu0 %v9733_v32  ;;  %8306 = vmatprep.mubr.msk.bf16.mxu0 %vm1602_vm8, %v7447_v62  ;;  %v9877_v46 = vsel %vm9781_vm1, %v7465_v57, %v4779_v21  ;;  %v4781_v42 = vrot.slane %v4779_v21, 4  ;;  %v7201_v32 = vcombine.low %v9850_v43, %v9873_v63  ;;  %v1990_v54 = vrot.slane %v9592_v11, 5  ;;  %v4758_v21 = vld [vmem:[#allocation2 + $0x9c] sm:$0xe]  ;;  %v2415_v43 = vld [vmem:[#allocation2 + $0x18] sm:$0xf] }
 0x192   : > { %8320 = vmatprep.subr.bf16.mxu0 %v8800_v34  ;;  %8114 = vmatprep.mubr.msk.bf16.mxu1 %vm1602_vm8, %v7197_v48  ;;  %v9887_v62 = vsel %vm9781_vm1, %v7186_v20, %v1987_v59  ;;  %v1989_v33 = vrot.slane %v1987_v59, 4  ;;  %v7466_v48 = vrot.slane %v4754_v30, 9  ;;  %v4786_v51 = vrot.slane %v9589_v47, 5  ;;  %v4760_v30 = vld [vmem:[#allocation2 + $0xb4] sm:$0xe] }
 0x193   : > { %8127 = vmatpush3.bf16.msra.mxu1 %v9744_v29  ;;  %v9893_v52 = vsel %vm9781_vm1, %v4781_v42, %v4782_v35  ;;  %v4789_v49 = vrot.slane %v9604_v9, 5  ;;  %v7467_v11 = vrot.slane %v4755_v25, 9  ;;  %v4793_v29 = vrot.slane %v9612_v14, 5  ;;  %v11398_v42 = vld [vmem:[#allocation5_spill] sm:$0xff] }
 0x194   : > { %v7481_v53 = vcombine.low %v9877_v46, %v9893_v52  ;;  %8128 = vmatprep.subr.bf16.mxu1 %v8809_v58  ;;  %v9901_v36 = vsel %vm9781_vm1, %v1989_v33, %v1990_v54  ;;  %v9908_v47 = vsel %vm9781_vm1, %v7466_v48, %v4786_v51  ;;  %v4788_v9 = vrot.slane %v4786_v51, 4  ;;  %v11399_v54 = vld [vmem:[#allocation6_spill] sm:$0xff] }
 0x195   : > { %8321 = vmatpush3.bf16.msra.mxu0 %v8800_v34  ;;  %v7202_v2 = vcombine.low %v9887_v62, %v9901_v36  ;;  %v4796_v8 = vrot.slane %v9616_v44, 5  ;;  %v9916_v14 = vsel %vm9781_vm1, %v7467_v11, %v4793_v29  ;;  %v4795_v55 = vrot.slane %v4793_v29, 4  ;;  %v11400_v29 = vld [vmem:[#allocation3_spill] sm:$0xff] }
 0x196   : > { %8322 = vmatprep.subr.bf16.mxu0 %v8803_v24  ;;  %v7468_v22 = vrot.slane %v4756_v0, 9  ;;  %v4800_v34 = vrot.slane %v9628_v5, 5  ;;  %v9924_v44 = vsel %vm9781_vm1, %v4788_v9, %v4789_v49  ;;  %v4803_v3 = vrot.slane %v9640_v13, 5  ;;  %v11401_v9 = vld [vmem:[#allocation4_spill] sm:$0xff] }
 0x197   : > { %8129 = vmatpush3.bf16.msra.mxu1 %v8809_v58  ;;  %v7469_v60 = vrot.slane %v4757_v23, 9  ;;  %v4807_v57 = vrot.slane %v9649_v17, 5  ;;  %v7482_v35 = vcombine.low %v9908_v47, %v9924_v44  ;;  %v9940_v13 = vsel %vm9781_vm1, %v4795_v55, %v4796_v8 }
 0x198   : > { %8307 = vmatmul.mubr.msk.bf16.gmra.mrb[20].mxu0 %vm1602_vm8, %v7448_v50  ;;  %8115 = vmatmul.mubr.msk.bf16.gmra.mrb[20].mxu1 %vm1602_vm8, %v7198_v18  ;;  %v9944_v58 = vsel %vm9781_vm1, %v7468_v22, %v4800_v34  ;;  %v4802_v20 = vrot.slane %v4800_v34, 4  ;;  %v7483_v5 = vcombine.low %v9916_v14, %v9940_v13  ;;  %v8813_v50 = vld [vmem:[%s11374_s4 + $0x78] sm:$0xff]   ;;  %v4810_v18 = vrot.slane %v9659_v1, 5  ;;  %v10095_v13 = vld [vmem:[#allocation2 + $0x2c] sm:$0x1] }
 0x199   : > { %8310 = vmatprep.mubr.msk.bf16.mxu0 %vm1602_vm8, %v7449_v15  ;;  %8323 = vmatpush3.bf16.msra.mxu0 %v8803_v24  ;;  %v9957_v61 = vsel %vm9781_vm1, %v7469_v60, %v4807_v57  ;;  %v4809_v41 = vrot.slane %v4807_v57, 4  ;;  %v7470_v15 = vrot.slane %v4758_v21, 9  ;;  %v4814_v59 = vrot.slane %v9683_v4, 5  ;;  %v10035_v57 = vld [vmem:[#allocation2 + $0x10] sm:$0xf] }
 0x19a   : > { %8118 = vmatprep.mubr.msk.bf16.mxu1 %vm1602_vm8, %v7199_v19  ;;  %8324 = vmatprep.subr.bf16.mxu0 %v8806_v12  ;;  %v9971_v17 = vsel %vm9781_vm1, %v4802_v20, %v4803_v3  ;;  %v4817_v1 = vrot.slane %v9688_v27, 5  ;;  %v7471_v19 = vrot.slane %v4759_v16, 9  ;;  %v4821_v25 = vrot.slane %v11398_v42, 5  ;;  %v8812_v16 = vld [vmem:[#allocation2 + $0xc] sm:$0xff]  }
 0x19b   : > { %8130 = vmatprep.subr.bf16.mxu1 %v8811_v37  ;;  %v7484_v10 = vcombine.low %v9944_v58, %v9971_v17  ;;  %v9979_v26 = vsel %vm9781_vm1, %v4809_v41, %v4810_v18  ;;  %v9986_v33 = vsel %vm9781_vm1, %v7470_v15, %v4814_v59  ;;  %v4816_v27 = vrot.slane %v4814_v59, 4  ;;  %v10056_v59 = vld [vmem:[#allocation2 + $0x1c] sm:$0xf] }
 0x19c   : > { %8131 = vmatpush3.bf16.msra.mxu1 %v8811_v37  ;;  %v7485_v24 = vcombine.low %v9957_v61, %v9979_v26  ;;  %v4824_v48 = vrot.slane %v11399_v54, 5  ;;  %v9991_v51 = vsel %vm9781_vm1, %v7471_v19, %v4821_v25  ;;  %v4823_v49 = vrot.slane %v4821_v25, 4  ;;  %v8814_v25 = vld [vmem:[%s11374_s4 + $0x68] sm:$0xff]   ;;  %v8831_v58 = vld [vmem:[%s11374_s4 + $0x98] sm:$0xff]   ;;  %v10159_v61 = vld [vmem:[%s11374_s4 + $0x80] sm:$0xff]  }
 0x19d   : > { %8325 = vmatpush3.bf16.msra.mxu0 %v8806_v12  ;;  %8132 = vmatprep.subr.bf16.mxu1 %v8813_v50  ;;  %v7472_v0 = vrot.slane %v4760_v30, 9  ;;  %v4828_v11 = vrot.slane %v9737_v7, 5  ;;  %v7450_v23 = vcombine.low %v11400_v29, %v9683_v4  ;;  %v7451_v8 = vcombine.low %v11401_v9, %v11398_v42  ;;  %v10013_v4 = vld [vmem:[%s11374_s4 + $0x80] sm:$0xff]   ;;  %v10058_v30 = vld [vmem:[#allocation2 + $0x14] sm:$0x1]  ;;  %v8825_v29 = vld [vmem:[%s11374_s4 + $0x88] sm:$0xff]  }
 0x19e   : > { %8342 = vmatprep.subr.bf16.mxu0 %v9967_v38  ;;  %v10001_v12 = vsel %vm9781_vm1, %v4816_v27, %v4817_v1  ;;  %v4831_v55 = vrot.slane %v9748_v6, 5  ;;  %v10008_v34 = vsel %vm9781_vm1, %v4823_v49, %v4824_v48  ;;  %v2450_v21 = vshrl.u32 %v10035_v57, 16  ;;  %v2418_v1 = vld [vmem:[#allocation2 + $0x24] sm:$0xf]  ;;  %v8815_v27 = vld [vmem:[#allocation2 + $0x18] sm:$0xff]  }
 0x19f   : > { %v7486_v22 = vcombine.low %v9986_v33, %v10001_v12  ;;  %v10017_v37 = vsel %vm9781_vm1, %v7472_v0, %v4828_v11  ;;  %v4830_v3 = vrot.slane %v4828_v11, 4  ;;  %v7487_v6 = vcombine.low %v9991_v51, %v10008_v34  ;;  %v10067_v48 = vld [vmem:[#allocation2 + $0x20] sm:$0x1]  ;;  %v10069_v0 = vld [vmem:[#allocation2 + $0x28] sm:$0xf] }
 0x1a0   : > { %8311 = vmatmul.mubr.msk.bf16.gmra.mrb[24].mxu0 %vm1602_vm8, %v7450_v23  ;;  %8119 = vmatmul.mubr.msk.bf16.gmra.mrb[24].mxu1 %vm1602_vm8, %v7200_v28  ;;  %v2446_v28 = vshll.u32 %v10035_v57, 16  ;;  %v2437_v63 = vshrl.u32 %v2412_v45, 16  ;;  %v7452_v20 = vcombine.low %v9726_v40, %v9737_v7  ;;  %v2461_v41 = vshrl.u32 %v2415_v43, 16  ;;  %v8816_v11 = vld [vmem:[#allocation2 + $0x24] sm:$0xff]  }
 0x1a1   : > { %8314 = vmatprep.mubr.msk.bf16.mxu0 %vm1602_vm8, %v7451_v8  ;;  %8122 = vmatprep.mubr.msk.bf16.mxu1 %vm1602_vm8, %v7201_v32  ;;  %v10033_v60 = vsel %vm9781_vm1, %v4830_v3, %v4831_v55  ;;  %v2440_v32 = vshll.u32 %v2412_v45, 16  ;;  %v2464_v18 = vshll.u32 %v2415_v43, 16  ;;  %v2452_v15 = vrot.slane %v2450_v21, 4  ;;  %v8817_v55 = vld [vmem:[%s11374_s4 + $0x70] sm:$0xff]  }
 0x1a2   : > { %8133 = vmatpush3.bf16.msra.mxu1 %v8813_v50  ;;  %v7488_v31 = vcombine.low %v10017_v37, %v10033_v60  ;;  %v10049_v50 = vrot.slane %v2446_v28, 5  ;;  %v2439_v40 = vrot.slane %v2437_v63, 4  ;;  %v2463_v62 = vrot.slane %v2461_v41, 4  ;;  %v8818_v28 = vld [vmem:[#allocation2 + $0x30] sm:$0xff]   ;;  %v2424_v41 = vld [vmem:[#allocation2 + $0x3c] sm:$0xf] }
 0x1a3   : > { %8150 = vmatprep.subr.bf16.mxu1 %v10013_v4  ;;  %v2442_v7 = vrot.slane %v2440_v32, 5  ;;  %v2466_v36 = vrot.slane %v2464_v18, 5  ;;  %v2470_v19 = vshll.u32 %v10056_v59, 16  ;;  %v2474_v42 = vshrl.u32 %v10056_v59, 16  ;;  %v10103_v32 = vld [vmem:[#allocation2 + $0x34] sm:$0xf] }
 0x1a4   : > { %v2485_v52 = vshrl.u32 %v2418_v1, 16  ;;  %v2456_v54 = vshll.u32 %v10058_v30, 16  ;;  %v2480_v45 = vshll.u32 %v10067_v48, 16  ;;  %v2498_v63 = vshrl.u32 %v10069_v0, 16  ;;  %v10111_v18 = vld [vmem:[#allocation2 + $0x40] sm:$0xf] }
 0x1a5   : > { %v2443_v46 = vor.u32 %v2442_v7, %v2439_v40  ;;  %v2467_v49 = vor.u32 %v2466_v36, %v2463_v62  ;;  %v10079_v9 = vrot.slane %v2470_v19, 5  ;;  %v2476_v8 = vrot.slane %v2474_v42, 4  ;;  %v10119_v62 = vld [vmem:[#allocation2 + $0x4c] sm:$0xf]  ;;  %v8819_v36 = vld [vmem:[#allocation2 + $0x3c] sm:$0xff]  }
 0x1a6   : > { %v2487_v44 = vrot.slane %v2485_v52, 4  ;;  %v2458_v3 = vrot.slane %v2456_v54, 5  ;;  %v2504_v7 = vshll.u32 %v10095_v13, 16  ;;  %v2518_v42 = vshll.u32 %v10103_v32, 16  ;;  %v2427_v52 = vld [vmem:[#allocation2 + $0x48] sm:$0xf] }
 0x1a7   : > { %v2444_v47 = vrot.slane %v2443_v46, 4  ;;  %v10093_v14 = vrot.slane %v2467_v49, 4  ;;  %v2477_v43 = vor.u32 %v2476_v8, %v10079_v9  ;;  %v2522_v46 = vshrl.u32 %v10103_v32, 16  ;;  %v2430_v49 = vld [vmem:[#allocation2 + $0x54] sm:$0xf] }
 0x1a8   : > { %8315 = vmatmul.mubr.msk.bf16.gmra.mrb[28].mxu0 %vm1602_vm8, %v7452_v20  ;;  %8123 = vmatmul.mubr.msk.bf16.gmra.mrb[28].mxu1 %vm1602_vm8, %v7202_v2  ;;  %v2453_v2 = vor.u32 %v2452_v15, %v10049_v50  ;;  %v10113_v15 = vrot.slane %v2480_v45, 5  ;;  %v2546_v54 = vshrl.u32 %v10111_v18, 16  ;;  %v10161_v26 = vrot.slane %v2504_v7, 5  ;;  %v10248_v60 = vld [vmem:[#allocation2 + $0x74] sm:$0x1] }
 0x1a9   : > { %8326 = vmatprep.mubr.msk.bf16.mxu0 %vm1602_vm8, %v7481_v53  ;;  %8134 = vmatprep.mubr.msk.bf16.mxu1 %vm1602_vm8, %v8812_v16  ;;  %v2488_v53 = vshll.u32 %v2418_v1, 16  ;;  %v2449_v20 = vsel %vm9108_vm7, %v2444_v47, %v10049_v50  ;;  %v8828_v50 = vld [vmem:[%s11374_s4 + $0x90] sm:$0xff]   ;;  %v2473_v19 = vsel %vm9108_vm7, %v10093_v14, %v10079_v9  ;;  %v2536_v8 = vshll.u32 %v2424_v41, 16 }
 0x1aa   : > { %v2454_v23 = vrot.slane %v2453_v2, 4  ;;  %v10165_v47 = vrot.slane %v2518_v42, 5  ;;  %v8823_v42 = vld [vmem:[#allocation2 + $0x54] sm:$0xff]  }
 0x1ac   : > { %v2459_v21 = vsel %vm9108_vm7, %v2454_v23, %v2458_v3  ;;  %v2533_v23 = vshrl.u32 %v2424_v41, 16  ;;  %v10167_v3 = vld [vmem:[#allocation2 + $0x58] sm:$0xf] }
 0x1ad   : > { %v10124_v2 = vcombine.low %v2449_v20, %v2459_v21  ;;  %v8821_v21 = vld [vmem:[#allocation2 + $0x48] sm:$0xff]  }
 0x1ae   : > { %v2535_v7 = vrot.slane %v2533_v23, 4 }
 0x1b0   : > { %8327 = vmatmul.mubr.msk.bf16.vlgmr.msra.gmra.mrb[16].mxu0 %vm1602_vm8, %v7482_v35  ;;  %8135 = vmatmul.mubr.msk.bf16.vlgmr.msra.gmra.mrb[16].mxu1 %vm1602_vm8, %v8815_v27  ;;  %v2490_v35 = vrot.slane %v2488_v53, 5  ;;  %v10137_v53 = vrot.slane %v2477_v43, 4  ;;  %v2542_v27 = vshll.u32 %v10111_v18, 16 }
 0x1b1   : > { %8343 = vmatpush3.bf16.msra.mxu0 %v9967_v38  ;;  %8330 = vmatprep.mubr.msk.bf16.mxu0 %vm1602_vm8, %v7483_v5  ;;  %v2494_v38 = vshll.u32 %v10069_v0, 16  ;;  %v10097_v5 = vld [vmem:[#allocation2 + $0x30] sm:$0xf] }
 0x1b2   : > { %8344 = vmatprep.subr.bf16.mxu0 %v8814_v25  ;;  %8138 = vmatprep.mubr.msk.bf16.mxu1 %vm1602_vm8, %v8816_v11  ;;  %v2491_v16 = vor.u32 %v2490_v35, %v2487_v44  ;;  %v2509_v1 = vshrl.u32 %v10097_v5, 16  ;;  %v2566_v11 = vshll.u32 %v10119_v62, 16  ;;  %v2524_v44 = vrot.slane %v2522_v46, 4 }
 0x1b3   : > { %8151 = vmatpush3.bf16.msra.mxu1 %v10013_v4  ;;  %v8820_v4 = vld [vmem:[%s11374_s4 + $0x78] sm:$0xff]   ;;  %v10115_v40 = vrot.slane %v2494_v38, 5  ;;  %v2557_v35 = vshrl.u32 %v2427_v52, 16  ;;  %v10169_v45 = vrot.slane %v2542_v27, 5  ;;  %v2548_v38 = vrot.slane %v2546_v54, 4  ;;  %v10190_v54 = vld [vmem:[%s11374_s4 + $0xa0] sm:$0xff]  }
 0x1b4   : > { %8152 = vmatprep.subr.bf16.mxu1 %v8825_v29  ;;  %v10150_v17 = vrot.slane %v2491_v16, 4  ;;  %v2483_v43 = vsel %vm9108_vm7, %v10137_v53, %v10113_v15  ;;  %v10177_v16 = vrot.slane %v2566_v11, 5  ;;  %v2525_v15 = vor.u32 %v2524_v44, %v10165_v47 }
 0x1b5   : > { %8345 = vmatpush3.bf16.msra.mxu0 %v8814_v25  ;;  %v10139_v25 = vrot.slane %v2498_v63, 4  ;;  %v10175_v63 = vld [vmem:[#allocation2 + $0x38] sm:$0x1]  ;;  %v2559_v53 = vrot.slane %v2557_v35, 4 }
 0x1b6   : > { %8346 = vmatprep.subr.bf16.mxu0 %v8817_v55 }
 0x1b7   : > { %8153 = vmatpush3.bf16.msra.mxu1 %v8825_v29  ;;  %v2570_v29 = vshrl.u32 %v10119_v62, 16  ;;  %v2501_v46 = vor.u32 %v10139_v25, %v10115_v40  ;;  %v2528_v25 = vshll.u32 %v10175_v63, 16 }
 0x1b8   : > { %8331 = vmatmul.mubr.msk.bf16.gmra.mrb[20].mxu0 %vm1602_vm8, %v7484_v10  ;;  %8139 = vmatmul.mubr.msk.bf16.gmra.mrb[20].mxu1 %vm1602_vm8, %v8818_v28  ;;  %v2512_v10 = vshll.u32 %v10097_v5, 16  ;;  %v2581_v5 = vshrl.u32 %v2430_v49, 16  ;;  %v2584_v28 = vshll.u32 %v2430_v49, 16  ;;  %v2549_v49 = vor.u32 %v2548_v38, %v10169_v45 }
 0x1b9   : > { %8334 = vmatprep.mubr.msk.bf16.mxu0 %vm1602_vm8, %v7485_v24  ;;  %8347 = vmatpush3.bf16.msra.mxu0 %v8817_v55  ;;  %v10163_v24 = vrot.slane %v2509_v1, 4  ;;  %v2560_v55 = vshll.u32 %v2427_v52, 16  ;;  %v2572_v41 = vrot.slane %v2570_v29, 4  ;;  %v2538_v1 = vrot.slane %v2536_v8, 5  ;;  %v10185_v52 = vld [vmem:[#allocation2 + $0x44] sm:$0x1] }
 0x1ba   : > { %8142 = vmatprep.mubr.msk.bf16.mxu1 %vm1602_vm8, %v8819_v36  ;;  %8348 = vmatprep.subr.bf16.mxu0 %v8820_v4  ;;  %v2514_v20 = vrot.slane %v2512_v10, 5  ;;  %v2590_v36 = vshll.u32 %v10167_v3, 16  ;;  %v10199_v10 = vld [vmem:[#allocation2 + $0x50] sm:$0x1]  ;;  %v2583_v11 = vrot.slane %v2581_v5, 4  ;;  %v2586_v29 = vrot.slane %v2584_v28, 5 }
 0x1bb   : > { %8154 = vmatprep.subr.bf16.mxu1 %v8828_v50  ;;  %v2562_v27 = vrot.slane %v2560_v55, 5  ;;  %v2573_v12 = vor.u32 %v2572_v41, %v10177_v16  ;;  %v2539_v8 = vor.u32 %v2538_v1, %v2535_v7  ;;  %v2552_v44 = vshll.u32 %v10185_v52, 16  ;;  %v10224_v28 = vld [vmem:[#allocation2 + $0x5c] sm:$0x1]  ;;  %v10226_v7 = vld [vmem:[#allocation2 + $0x70] sm:$0xf] }
 0x1bc   : > { %8155 = vmatpush3.bf16.msra.mxu1 %v8828_v50  ;;  %v5252_v50 = vld [vmem:[#allocation2 + $0x6c] sm:$0xf]  ;;  %v2515_v33 = vor.u32 %v2514_v20, %v10163_v24  ;;  %v10209_v35 = vrot.slane %v2590_v36, 5  ;;  %v2502_v38 = vrot.slane %v2501_v46, 4  ;;  %v2526_v5 = vrot.slane %v2525_v15, 4 }
 0x1bd   : > { %8349 = vmatpush3.bf16.msra.mxu0 %v8820_v4  ;;  %8156 = vmatprep.subr.bf16.mxu1 %v8831_v58  ;;  %v2594_v4 = vshrl.u32 %v10167_v3, 16  ;;  %v5280_v23 = vshll.u32 %v5252_v50, 16  ;;  %v2563_v51 = vor.u32 %v2562_v27, %v2559_v53  ;;  %v2576_v34 = vshll.u32 %v10199_v10, 16 }
 0x1be   : > { %8366 = vmatprep.subr.bf16.mxu0 %v10159_v61  ;;  %v2550_v24 = vrot.slane %v2549_v49, 4  ;;  %v2530_v20 = vrot.slane %v2528_v25, 5  ;;  %v2574_v41 = vrot.slane %v2573_v12, 4  ;;  %v2540_v9 = vrot.slane %v2539_v8, 4 }
 0x1bf   : > { %v2596_v55 = vrot.slane %v2594_v4, 4  ;;  %v5282_v36 = vrot.slane %v5280_v23, 5  ;;  %v8827_v4 = vld [vmem:[#allocation2 + $0x60] sm:$0xff]   ;;  %v2554_v14 = vrot.slane %v2552_v44, 5  ;;  %v2564_v46 = vrot.slane %v2563_v51, 4 }
 0x1c0   : > { %8335 = vmatmul.mubr.msk.bf16.gmra.mrb[24].mxu0 %vm1602_vm8, %v7486_v22  ;;  %8143 = vmatmul.mubr.msk.bf16.gmra.mrb[24].mxu1 %vm1602_vm8, %v8821_v21  ;;  %v5277_v22 = vshrl.u32 %v5252_v50, 16  ;;  %v2587_v21 = vor.u32 %v2586_v29, %v2583_v11  ;;  %v2516_v50 = vrot.slane %v2515_v33, 4  ;;  %v2578_v15 = vrot.slane %v2576_v34, 5 }
 0x1c1   : > { %8338 = vmatprep.mubr.msk.bf16.mxu0 %vm1602_vm8, %v7487_v6  ;;  %8146 = vmatprep.mubr.msk.bf16.mxu1 %vm1602_vm8, %v8823_v42  ;;  %v10218_v6 = vcombine.low %v2473_v19, %v2483_v43  ;;  %v2597_v19 = vor.u32 %v2596_v55, %v10209_v35  ;;  %v2433_v43 = vld [vmem:[#allocation2 + $0x60] sm:$0xf]  ;;  %v8824_v42 = vld [vmem:[#allocation2 + $0x6c] sm:$0xff]   ;;  %v2555_v53 = vsel %vm9108_vm7, %v2550_v24, %v2554_v14  ;;  %v2600_v25 = vshll.u32 %v10224_v28, 16  ;;  %v10264_v55 = vld [vmem:[#allocation2 + $0x64] sm:$0xf] }
 0x1c2   : > { %8157 = vmatpush3.bf16.msra.mxu1 %v8831_v58  ;;  %v2497_v58 = vsel %vm9108_vm7, %v10150_v17, %v10115_v40  ;;  %v5279_v1 = vrot.slane %v5277_v22, 4  ;;  %v2507_v40 = vsel %vm9108_vm7, %v2502_v38, %v10161_v26  ;;  %v2531_v17 = vsel %vm9108_vm7, %v2526_v5, %v2530_v20  ;;  %v5255_v38 = vld [vmem:[#allocation2 + $0x78] sm:$0xf]  ;;  %v10266_v5 = vld [vmem:[#allocation2 + $0x7c] sm:$0xf] }
 0x1c3   : > { %8174 = vmatprep.subr.bf16.mxu1 %v10190_v54  ;;  %v2588_v27 = vrot.slane %v2587_v21, 4  ;;  %v5286_v26 = vshll.u32 %v10226_v7, 16  ;;  %v2579_v37 = vsel %vm9108_vm7, %v2574_v41, %v2578_v15  ;;  %v5290_v49 = vshrl.u32 %v10226_v7, 16  ;;  %v8829_v24 = vld [vmem:[#allocation2 + $0x78] sm:$0xff]  }
 0x1c4   : > { %v2605_v11 = vshrl.u32 %v2433_v43, 16  ;;  %v2521_v29 = vsel %vm9108_vm7, %v2516_v50, %v10165_v47  ;;  %v2545_v33 = vsel %vm9108_vm7, %v2540_v9, %v10169_v45  ;;  %v2598_v12 = vrot.slane %v2597_v19, 4  ;;  %v10285_v50 = vld [vmem:[#allocation2 + $0x68] sm:$0x1] }
 0x1c5   : > { %v2608_v22 = vshll.u32 %v2433_v43, 16  ;;  %v10257_v23 = vcombine.low %v2521_v29, %v2531_v17  ;;  %v10259_v8 = vcombine.low %v2545_v33, %v2555_v53  ;;  %v2569_v44 = vsel %vm9108_vm7, %v2564_v46, %v10177_v16  ;;  %v8830_v19 = vld [vmem:[#allocation2 + $0x84] sm:$0xff]  }
 0x1c6   : > { %v10268_v47 = vcombine.low %v2569_v44, %v2579_v37  ;;  %v2602_v51 = vrot.slane %v2600_v25, 5  ;;  %v10270_v45 = vrot.slane %v5286_v26, 5  ;;  %v5296_v34 = vshll.u32 %v10248_v60, 16  ;;  %v8841_v46 = vld [vmem:[%s11374_s4 + $0xa8] sm:$0xff]   ;;  %v8835_v26 = vld [vmem:[%s11374_s4 + $0x90] sm:$0xff]  }
 0x1c7   : > { %v2593_v21 = vsel %vm9108_vm7, %v2588_v27, %v10209_v35  ;;  %v5292_v16 = vrot.slane %v5290_v49, 4  ;;  %v2607_v41 = vrot.slane %v2605_v11, 4  ;;  %v2610_v9 = vrot.slane %v2608_v22, 5  ;;  %v10317_v22 = vld [vmem:[#allocation2 + $0x94] sm:$0xf] }
 0x1c8   : > { %8339 = vmatmul.mubr.msk.bf16.gmra.mrb[28].mxu0 %vm1602_vm8, %v7488_v31  ;;  %8147 = vmatmul.mubr.msk.bf16.gmra.mrb[28].mxu1 %vm1602_vm8, %v8827_v4  ;;  %v5283_v31 = vor.u32 %v5282_v36, %v5279_v1  ;;  %v10278_v1 = vld [vmem:[#allocation2 + $0x88] sm:$0xf]  ;;  %v2603_v4 = vsel %vm9108_vm7, %v2598_v12, %v2602_v51  ;;  %v2614_v14 = vshll.u32 %v10264_v55, 16  ;;  %v2618_v35 = vshrl.u32 %v10264_v55, 16  ;;  %v5261_v12 = vld [vmem:[#allocation2 + $0x90] sm:$0xf] }
 0x1c9   : > { %8350 = vmatprep.mubr.msk.bf16.mxu0 %vm1602_vm8, %v8824_v42  ;;  %8158 = vmatprep.mubr.msk.bf16.mxu1 %vm1602_vm8, %v10124_v2  ;;  %v7253_v2 = vcombine.low %v2497_v58, %v2507_v40  ;;  %v5258_v58 = vld [vmem:[#allocation2 + $0x84] sm:$0xf]  ;;  %v8832_v36 = vld [vmem:[%s11374_s4 + $0x88] sm:$0xff]   ;;  %v5301_v43 = vshrl.u32 %v5255_v38, 16  ;;  %v5304_v42 = vshll.u32 %v5255_v38, 16  ;;  %v5310_v40 = vshll.u32 %v10266_v5, 16 }
 0x1ca   : > { %v10276_v20 = vrot.slane %v5283_v31, 4  ;;  %v5314_v17 = vshrl.u32 %v10266_v5, 16  ;;  %v5325_v15 = vshrl.u32 %v5258_v58, 16  ;;  %v5328_v53 = vshll.u32 %v5258_v58, 16  ;;  %11402 = vst [vmem:[#allocation5_spill] sm:$0xff] %v10317_v22 }
 0x1cb   : > { %v5334_v27 = vshll.u32 %v10278_v1, 16  ;;  %v5338_v25 = vshrl.u32 %v10278_v1, 16  ;;  %v10304_v37 = vcombine.low %v2593_v21, %v2603_v4  ;;  %v10307_v31 = vrot.slane %v5296_v34, 5 }
 0x1cc   : > { %v2624_v49 = vshll.u32 %v10285_v50, 16  ;;  %v2611_v11 = vor.u32 %v2610_v9, %v2607_v41  ;;  %v10315_v29 = vrot.slane %v2614_v14, 5  ;;  %v2620_v33 = vrot.slane %v2618_v35, 4  ;;  %v10326_v41 = vld [vmem:[#allocation2 + $0x8c] sm:$0x1]  ;;  %v8833_v35 = vld [vmem:[#allocation2 + $0x90] sm:$0xff]  }
 0x1cd   : > { %v5303_v44 = vrot.slane %v5301_v43, 4  ;;  %v5306_v38 = vrot.slane %v5304_v42, 5  ;;  %v10320_v51 = vrot.slane %v5310_v40, 5  ;;  %v5316_v34 = vrot.slane %v5314_v17, 4  ;;  %v8834_v17 = vld [vmem:[#allocation2 + $0x9c] sm:$0xff]  }
 0x1ce   : > { %v5327_v58 = vrot.slane %v5325_v15, 4  ;;  %v10324_v21 = vrot.slane %v5334_v27, 5  ;;  %v5349_v4 = vshrl.u32 %v5261_v12, 16  ;;  %v5352_v9 = vshll.u32 %v5261_v12, 16  ;;  %v8843_v15 = vld [vmem:[%s11374_s4 + $0xb0] sm:$0xff]  }
 0x1cf   : > { %v5362_v14 = vshrl.u32 %v10317_v22, 16  ;;  %v10335_v42 = vrot.slane %v2611_v11, 4  ;;  %v10338_v40 = vrot.slane %v2624_v49, 5  ;;  %v5317_v27 = vor.u32 %v5316_v34, %v10320_v51  ;;  %v2822_v12 = vld [vmem:[#allocation2 + $0xc] sm:$0xe] }
 0x1d0   : > { %8351 = vmatmul.mubr.msk.bf16.vlgmr.msra.gmra.mrb[16].mxu0 %vm1602_vm8, %v8829_v24  ;;  %8159 = vmatmul.mubr.msk.bf16.vlgmr.msra.gmra.mrb[16].mxu1 %vm1602_vm8, %v10218_v6  ;;  %v5293_v6 = vor.u32 %v5292_v16, %v10270_v45  ;;  %v5330_v24 = vrot.slane %v5328_v53, 5  ;;  %v5340_v16 = vrot.slane %v5338_v25, 4  ;;  %v5307_v53 = vor.u32 %v5306_v38, %v5303_v44  ;;  %v8844_v44 = vld [vmem:[%s11374_s4 + $0xb8] sm:$0xff]  }
 0x1d1   : > { %8367 = vmatpush3.bf16.msra.mxu0 %v10159_v61  ;;  %8354 = vmatprep.mubr.msk.bf16.mxu0 %vm1602_vm8, %v8830_v19  ;;  %v8838_v19 = vld [vmem:[%s11374_s4 + $0x98] sm:$0xff]   ;;  %v5344_v11 = vshll.u32 %v10326_v41, 16  ;;  %v5354_v38 = vrot.slane %v5352_v9, 5  ;;  %v5318_v9 = vrot.slane %v5317_v27, 4  ;;  %v8836_v27 = vld [vmem:[#allocation2 + $0xa8] sm:$0xff]  }
 0x1d2   : > { %8368 = vmatprep.subr.bf16.mxu0 %v8832_v36  ;;  %8162 = vmatprep.mubr.msk.bf16.mxu1 %vm1602_vm8, %v7253_v2  ;;  %v10322_v2 = vld [vmem:[#allocation2 + $0x80] sm:$0x1]  ;;  %v10333_v43 = vrot.slane %v5293_v6, 4  ;;  %v2856_v6 = vrot.slane %v10035_v57, 5  ;;  %v5331_v49 = vor.u32 %v5330_v24, %v5327_v58  ;;  %v5351_v57 = vrot.slane %v5349_v4, 4 }
 0x1d3   : > { %8175 = vmatpush3.bf16.msra.mxu1 %v10190_v54  ;;  %v5358_v54 = vshll.u32 %v10317_v22, 16  ;;  %v5320_v25 = vshll.u32 %v10322_v2, 16  ;;  %v2617_v58 = vsel %vm9108_vm7, %v10335_v42, %v10315_v29  ;;  %v10373_v4 = vld [vmem:[#allocation2 + $0x98] sm:$0x1]  ;;  %v5346_v61 = vrot.slane %v5344_v11, 5 }
 0x1d4   : > { %8176 = vmatprep.subr.bf16.mxu1 %v8841_v46  ;;  %v2823_v42 = vld [vmem:[#allocation2 + $0x18] sm:$0xe] }
 0x1d5   : > { %8369 = vmatpush3.bf16.msra.mxu0 %v8832_v36  ;;  %v2621_v36 = vor.u32 %v2620_v33, %v10315_v29  ;;  %v2863_v33 = vrot.slane %v10056_v59, 5  ;;  %v10356_v34 = vrot.slane %v5358_v54, 5  ;;  %v5322_v54 = vrot.slane %v5320_v25, 5 }
 0x1d6   : > { %8370 = vmatprep.subr.bf16.mxu0 %v8835_v26  ;;  %v2859_v29 = vrot.slane %v10058_v30, 5  ;;  %v2866_v25 = vrot.slane %v10067_v48, 5  ;;  %v10399_v48 = vld [vmem:[%s11374_s4 + $0xc0] sm:$0xff]  }
 0x1d7   : > { %8177 = vmatpush3.bf16.msra.mxu1 %v8841_v46  ;;  %v5341_v46 = vor.u32 %v5340_v16, %v10324_v21  ;;  %v2622_v24 = vrot.slane %v2621_v36, 4  ;;  %v7271_v16 = vrot.slane %v2822_v12, 9  ;;  %v2865_v22 = vrot.slane %v2863_v33, 4 }
 0x1d8   : > { %8355 = vmatmul.mubr.msk.bf16.gmra.mrb[20].mxu0 %vm1602_vm8, %v8833_v35  ;;  %8163 = vmatmul.mubr.msk.bf16.gmra.mrb[20].mxu1 %vm1602_vm8, %v10257_v23  ;;  %v5364_v35 = vrot.slane %v5362_v14, 4  ;;  %v5299_v23 = vsel %vm9108_vm7, %v10333_v43, %v10307_v31  ;;  %v2858_v14 = vrot.slane %v2856_v6, 4  ;;  %v5264_v31 = vld [vmem:[#allocation2 + $0x9c] sm:$0xf]  ;;  %v5332_v43 = vrot.slane %v5331_v49, 4 }
 0x1d9   : > { %8358 = vmatprep.mubr.msk.bf16.mxu0 %vm1602_vm8, %v8834_v17  ;;  %8371 = vmatpush3.bf16.msra.mxu0 %v8835_v26  ;;  %v10367_v26 = vld [vmem:[%s11374_s4 + $0xa0] sm:$0xff]   ;;  %v5342_v17 = vrot.slane %v5341_v46, 4  ;;  %v5355_v36 = vor.u32 %v5354_v38, %v5351_v57  ;;  %v5373_v49 = vshrl.u32 %v5264_v31, 16  ;;  %v8837_v46 = vld [vmem:[#allocation2 + $0xb4] sm:$0xff]   ;;  %v5323_v11 = vsel %vm9108_vm7, %v5318_v9, %v5322_v54 }
 0x1da   : > { %8166 = vmatprep.mubr.msk.bf16.mxu1 %vm1602_vm8, %v10259_v8  ;;  %8372 = vmatprep.subr.bf16.mxu0 %v8838_v19  ;;  %v5308_v8 = vrot.slane %v5307_v53, 4  ;;  %v5365_v12 = vor.u32 %v5364_v35, %v10356_v34  ;;  %v5368_v53 = vshll.u32 %v10373_v4, 16  ;;  %v2857_v57 = vsel %vm9781_vm1, %v7271_v16, %v2856_v6  ;;  %v10394_v35 = vld [vmem:[#allocation2 + $0xa0] sm:$0xf]  ;;  %v2824_v9 = vld [vmem:[#allocation2 + $0x24] sm:$0xe] }
 0x1db   : > { %8178 = vmatprep.subr.bf16.mxu1 %v8843_v15  ;;  %v2860_v38 = vsel %vm9781_vm1, %v2858_v14, %v2859_v29  ;;  %v7272_v6 = vrot.slane %v2823_v42, 9  ;;  %v5356_v16 = vrot.slane %v5355_v36, 4  ;;  %v2870_v54 = vrot.slane %v10069_v0, 5 }
 0x1dc   : > { %8179 = vmatpush3.bf16.msra.mxu1 %v8843_v15  ;;  %v2627_v15 = vsel %vm9108_vm7, %v2622_v24, %v10338_v40  ;;  %v5313_v30 = vsel %vm9108_vm7, %v5308_v8, %v10320_v51  ;;  %v5337_v51 = vsel %vm9108_vm7, %v5332_v43, %v10324_v21  ;;  %v5347_v40 = vsel %vm9108_vm7, %v5342_v17, %v5346_v61 }
 0x1dd   : > { %8373 = vmatpush3.bf16.msra.mxu0 %v8838_v19  ;;  %8180 = vmatprep.subr.bf16.mxu1 %v8844_v44  ;;  %v5376_v19 = vshll.u32 %v5264_v31, 16  ;;  %v10411_v24 = vsel %vm9781_vm1, %v2865_v22, %v2866_v25  ;;  %v5366_v8 = vrot.slane %v5365_v12, 4  ;;  %v5375_v21 = vrot.slane %v5373_v49, 4  ;;  %v5270_v12 = vld [vmem:[#allocation2 + $0xb4] sm:$0xf] }
 0x1de   : > { %8390 = vmatprep.subr.bf16.mxu0 %v10367_v26  ;;  %v5382_v61 = vshll.u32 %v10394_v35, 16  ;;  %v5386_v31 = vshrl.u32 %v10394_v35, 16  ;;  %v11403_v22 = vsel %vm9108_vm7, %v10276_v20, %v10270_v45  ;;  %v7287_v17 = vcombine.low %v2857_v57, %v2860_v38  ;;  %v10437_v20 = vld [vmem:[#allocation2 + $0xac] sm:$0xf] }
 0x1df   : > { %v5378_v14 = vrot.slane %v5376_v19, 5  ;;  %v7537_v43 = vcombine.low %v11403_v22, %v5299_v23  ;;  %v10428_v0 = vsel %vm9781_vm1, %v7272_v6, %v2863_v33  ;;  %v10431_v29 = vcombine.low %v5313_v30, %v5323_v11  ;;  %v2825_v30 = vld [vmem:[#allocation2 + $0x30] sm:$0xe] }
 0x1e0   : > { %8359 = vmatmul.mubr.msk.bf16.gmra.mrb[24].mxu0 %vm1602_vm8, %v8836_v27  ;;  %8167 = vmatmul.mubr.msk.bf16.gmra.mrb[24].mxu1 %vm1602_vm8, %v10268_v47  ;;  %v5370_v47 = vrot.slane %v5368_v53, 5  ;;  %v10433_v42 = vcombine.low %v5337_v51, %v5347_v40  ;;  %v7288_v36 = vcombine.low %v10428_v0, %v10411_v24  ;;  %v7273_v45 = vrot.slane %v2824_v9, 9  ;;  %v10445_v53 = vld [vmem:[#allocation2 + $0xb8] sm:$0xf]  ;;  %v8840_v27 = vld [vmem:[#allocation2 + $0xc0] sm:$0xff]  }
 0x1e1   : > { %8362 = vmatprep.mubr.msk.bf16.mxu0 %vm1602_vm8, %v8837_v46  ;;  %8170 = vmatprep.mubr.msk.bf16.mxu1 %vm1602_vm8, %v10304_v37  ;;  %v7258_v37 = vcombine.low %v2617_v58, %v2627_v15  ;;  %v5361_v59 = vsel %vm9108_vm7, %v5356_v16, %v10356_v34  ;;  %v2872_v23 = vrot.slane %v2870_v54, 4  ;;  %v2873_v58 = vrot.slane %v10095_v13, 5  ;;  %v10447_v15 = vld [vmem:[#allocation2 + $0xa4] sm:$0x1] }
 0x1e2   : > { %8181 = vmatpush3.bf16.msra.mxu1 %v8844_v44  ;;  %v5267_v44 = vld [vmem:[#allocation2 + $0xa8] sm:$0xf]  ;;  %v5371_v33 = vsel %vm9108_vm7, %v5366_v8, %v5370_v47  ;;  %v5379_v25 = vor.u32 %v5378_v14, %v5375_v21  ;;  %v10449_v49 = vrot.slane %v5382_v61, 5  ;;  %v5388_v19 = vrot.slane %v5386_v31, 4  ;;  %v10470_v31 = vld [vmem:[#allocation2 + $0xb0] sm:$0x1] }
 0x1e3   : > { %8198 = vmatprep.subr.bf16.mxu1 %v10399_v48  ;;  %v5397_v46 = vshrl.u32 %v5267_v44, 16  ;;  %v2871_v34 = vsel %vm9781_vm1, %v7273_v45, %v2870_v54  ;;  %v5400_v11 = vshll.u32 %v5267_v44, 16  ;;  %v5406_v57 = vshll.u32 %v10437_v20, 16 }
 0x1e4   : > { %v5410_v13 = vshrl.u32 %v10437_v20, 16  ;;  %v5421_v38 = vshrl.u32 %v5270_v12, 16  ;;  %v5424_v51 = vshll.u32 %v5270_v12, 16  ;;  %v5430_v40 = vshll.u32 %v10445_v53, 16 }
 0x1e5   : > { %v5434_v6 = vshrl.u32 %v10445_v53, 16  ;;  %v10461_v16 = vcombine.low %v5361_v59, %v5371_v33  ;;  %v2874_v8 = vsel %vm9781_vm1, %v2872_v23, %v2873_v58  ;;  %v5392_v47 = vshll.u32 %v10447_v15, 16 }
 0x1e6   : > { %v2877_v9 = vrot.slane %v10103_v32, 5  ;;  %v10467_v54 = vrot.slane %v5379_v25, 4  ;;  %v5389_v21 = vor.u32 %v5388_v19, %v10449_v49  ;;  %v7274_v14 = vrot.slane %v2825_v30, 9  ;;  %v5273_v25 = vld [vmem:[#allocation2 + $0xc0] sm:$0xf]  ;;  %v8845_v19 = vld [vmem:[%s11374_s4 + $0xa8] sm:$0xff]  }
 0x1e7   : > { %v5399_v61 = vrot.slane %v5397_v46, 4  ;;  %v5402_v22 = vrot.slane %v5400_v11, 5  ;;  %v5423_v44 = vrot.slane %v5421_v38, 4  ;;  %v5426_v45 = vrot.slane %v5424_v51, 5  ;;  %v2826_v38 = vld [vmem:[#allocation2 + $0x3c] sm:$0xe] }
 0x1e8   : > { %8363 = vmatmul.mubr.msk.bf16.gmra.mrb[28].mxu0 %vm1602_vm8, %v8840_v27  ;;  %8171 = vmatmul.mubr.msk.bf16.gmra.mrb[28].mxu1 %vm1602_vm8, %v7258_v37  ;;  %v5412_v37 = vrot.slane %v5410_v13, 4  ;;  %v10475_v59 = vrot.slane %v5430_v40, 5  ;;  %v5436_v33 = vrot.slane %v5434_v6, 4  ;;  %v7289_v32 = vcombine.low %v2871_v34, %v2874_v8  ;;  %v10482_v27 = vld [vmem:[#allocation2 + $0xbc] sm:$0x1] }
 0x1e9   : > { %8374 = vmatprep.mubr.msk.bf16.mxu0 %vm1602_vm8, %v7537_v43  ;;  %8182 = vmatprep.mubr.msk.bf16.mxu1 %vm1602_vm8, %v7287_v17  ;;  %v10472_v43 = vrot.slane %v5406_v57, 5  ;;  %v2884_v17 = vrot.slane %v10111_v18, 5  ;;  %v5394_v23 = vrot.slane %v5392_v47, 5  ;;  %v10479_v58 = vsel %vm9781_vm1, %v7274_v14, %v2877_v9  ;;  %v10492_v57 = vld [vmem:[#allocation2 + $0xc4] sm:$0xf] }
 0x1ea   : > { %v2880_v12 = vrot.slane %v10175_v63, 5  ;;  %v5385_v46 = vsel %vm9108_vm7, %v10467_v54, %v10449_v49  ;;  %v5390_v34 = vrot.slane %v5389_v21, 4  ;;  %v2879_v30 = vrot.slane %v2877_v9, 4  ;;  %v8849_v9 = vld [vmem:[%s11374_s4 + $0xc8] sm:$0xff]   ;;  %v8846_v54 = vld [vmem:[%s11374_s4 + $0xb0] sm:$0xff]  }
 0x1eb   : > { %v5416_v11 = vshll.u32 %v10470_v31, 16  ;;  %v5403_v13 = vor.u32 %v5402_v22, %v5399_v61  ;;  %v5413_v63 = vor.u32 %v5412_v37, %v10472_v43  ;;  %v2886_v51 = vrot.slane %v2884_v17, 4 }
 0x1ec   : > { %v2887_v40 = vrot.slane %v10185_v52, 5  ;;  %v5427_v49 = vor.u32 %v5426_v45, %v5423_v44  ;;  %v5437_v6 = vor.u32 %v5436_v33, %v10475_v59  ;;  %v5440_v8 = vshll.u32 %v10482_v27, 16 }
 0x1ed   : > { %v2891_v47 = vrot.slane %v10119_v62, 5  ;;  %v5445_v52 = vshrl.u32 %v5273_v25, 16  ;;  %v5448_v24 = vshll.u32 %v5273_v25, 16  ;;  %v5454_v0 = vshll.u32 %v10492_v57, 16 }
 0x1ee   : > { %v7275_v21 = vrot.slane %v2826_v38, 9  ;;  %v5404_v14 = vrot.slane %v5403_v13, 4  ;;  %v5414_v61 = vrot.slane %v5413_v63, 4  ;;  %v2888_v22 = vsel %vm9781_vm1, %v2886_v51, %v2887_v40 }
 0x1ef   : > { %v2898_v37 = vrot.slane %v10167_v3, 5  ;;  %v5428_v44 = vrot.slane %v5427_v49, 4  ;;  %v5438_v45 = vrot.slane %v5437_v6, 4  ;;  %v5442_v33 = vrot.slane %v5440_v8, 5  ;;  %v2828_v6 = vld [vmem:[#allocation2 + $0x54] sm:$0xe] }
 0x1f0   : > { %8375 = vmatmul.mubr.msk.bf16.vlgmr.msra.gmra.mrb[16].mxu0 %vm1602_vm8, %v10431_v29  ;;  %8183 = vmatmul.mubr.msk.bf16.vlgmr.msra.gmra.mrb[16].mxu1 %vm1602_vm8, %v7288_v36  ;;  %v5458_v29 = vshrl.u32 %v10492_v57, 16  ;;  %v5395_v36 = vsel %vm9108_vm7, %v5390_v34, %v5394_v23  ;;  %v2893_v23 = vrot.slane %v2891_v47, 4  ;;  %v5447_v25 = vrot.slane %v5445_v52, 4  ;;  %v10595_v3 = vld [vmem:[%s11374_s4 + $0xe0] sm:$0xff]  }
 0x1f1   : > { %8391 = vmatpush3.bf16.msra.mxu0 %v10367_v26  ;;  %8378 = vmatprep.mubr.msk.bf16.mxu0 %vm1602_vm8, %v10433_v42  ;;  %v2881_v26 = vsel %vm9781_vm1, %v2879_v30, %v2880_v12  ;;  %v5418_v42 = vrot.slane %v5416_v11, 5  ;;  %v10529_v12 = vld [vmem:[#allocation2 + $0xc8] sm:$0x1]  ;;  %v5450_v34 = vrot.slane %v5448_v24, 5  ;;  %v10531_v30 = vrot.slane %v5454_v0, 5 }
 0x1f2   : > { %8392 = vmatprep.subr.bf16.mxu0 %v8845_v19  ;;  %8186 = vmatprep.mubr.msk.bf16.mxu1 %vm1602_vm8, %v7289_v32  ;;  %v2827_v32 = vld [vmem:[#allocation2 + $0x48] sm:$0xe]  ;;  %v5460_v11 = vrot.slane %v5458_v29, 4  ;;  %v7541_v13 = vcombine.low %v5385_v46, %v5395_v36  ;;  %v2885_v63 = vsel %vm9781_vm1, %v7275_v21, %v2884_v17  ;;  %v2894_v38 = vrot.slane %v10199_v10, 5  ;;  %v8851_v17 = vld [vmem:[%s11374_s4 + $0xd0] sm:$0xff]   ;;  %v10574_v36 = vld [vmem:[%s11374_s4 + $0xc0] sm:$0xff]  }
 0x1f3   : > { %8199 = vmatpush3.bf16.msra.mxu1 %v10399_v48  ;;  %v7290_v48 = vcombine.low %v10479_v58, %v2881_v26  ;;  %v5409_v51 = vsel %vm9108_vm7, %v5404_v14, %v10472_v43  ;;  %v5419_v46 = vsel %vm9108_vm7, %v5414_v61, %v5418_v42  ;;  %v7291_v40 = vcombine.low %v2885_v63, %v2888_v22  ;;  %v5661_v0 = vld [vmem:[#allocation2 + $0x6c] sm:$0xe]  ;;  %v5662_v22 = vld [vmem:[#allocation2 + $0x78] sm:$0xe] }
 0x1f4   : > { %8200 = vmatprep.subr.bf16.mxu1 %v8849_v9  ;;  %v2900_v18 = vrot.slane %v2898_v37, 4  ;;  %v5433_v10 = vsel %vm9108_vm7, %v5428_v44, %v10475_v59  ;;  %v7276_v43 = vrot.slane %v2827_v32, 9  ;;  %v2895_v58 = vsel %vm9781_vm1, %v2893_v23, %v2894_v38  ;;  %v8853_v59 = vld [vmem:[%s11374_s4 + $0xd8] sm:$0xff]   ;;  %v5663_v44 = vld [vmem:[#allocation2 + $0x84] sm:$0xe]  ;;  %v11404_v38 = vld [vmem:[#allocation5_spill] sm:$0xff] }
 0x1f5   : > { %8393 = vmatpush3.bf16.msra.mxu0 %v8845_v19  ;;  %v8847_v19 = vld [vmem:[%s11374_s4 + $0xb8] sm:$0xff]   ;;  %v5464_v49 = vshll.u32 %v10529_v12, 16  ;;  %v5443_v8 = vsel %vm9108_vm7, %v5438_v45, %v5442_v33  ;;  %v2901_v52 = vrot.slane %v10224_v28, 5  ;;  %v7542_v24 = vcombine.low %v5409_v51, %v5419_v46 }
 0x1f6   : > { %8394 = vmatprep.subr.bf16.mxu0 %v8846_v54  ;;  %v5695_v29 = vrot.slane %v10226_v7, 5  ;;  %v2892_v28 = vsel %vm9781_vm1, %v7276_v43, %v2891_v47  ;;  %v7277_v26 = vrot.slane %v2828_v6, 9  ;;  %v5702_v21 = vrot.slane %v10266_v5, 5 }
 0x1f7   : > { %8201 = vmatpush3.bf16.msra.mxu1 %v8849_v9  ;;  %v5461_v9 = vor.u32 %v5460_v11, %v10531_v30  ;;  %v2902_v42 = vsel %vm9781_vm1, %v2900_v18, %v2901_v52  ;;  %v7543_v7 = vcombine.low %v5433_v10, %v5443_v8  ;;  %v7292_v14 = vcombine.low %v2892_v28, %v2895_v58 }
 0x1f8   : > { %8379 = vmatmul.mubr.msk.bf16.gmra.mrb[20].mxu0 %vm1602_vm8, %v10461_v16  ;;  %8187 = vmatmul.mubr.msk.bf16.gmra.mrb[20].mxu1 %vm1602_vm8, %v7290_v48  ;;  %v5451_v16 = vor.u32 %v5450_v34, %v5447_v25  ;;  %v5466_v61 = vrot.slane %v5464_v49, 5  ;;  %v2899_v47 = vsel %vm9781_vm1, %v7277_v26, %v2898_v37  ;;  %v7557_v33 = vrot.slane %v5661_v0, 9  ;;  %v2829_v25 = vld [vmem:[#allocation2 + $0x60] sm:$0xe]  ;;  %v10639_v0 = vld [vmem:[#allocation2 + $0x28] sm:$0xf] }
 0x1f9   : > { %8382 = vmatprep.mubr.msk.bf16.mxu0 %vm1602_vm8, %v7541_v13  ;;  %8395 = vmatpush3.bf16.msra.mxu0 %v8846_v54  ;;  %v2905_v54 = vrot.slane %v10264_v55, 5  ;;  %v5709_v55 = vrot.slane %v10278_v1, 5  ;;  %v5462_v62 = vrot.slane %v5461_v9, 4  ;;  %v7293_v32 = vcombine.low %v2899_v47, %v2902_v42  ;;  %v10634_v9 = vld [vmem:[#allocation2 + $0x1c] sm:$0xf] }
 0x1fa   : > { %8190 = vmatprep.mubr.msk.bf16.mxu1 %vm1602_vm8, %v7291_v40  ;;  %8396 = vmatprep.subr.bf16.mxu0 %v8847_v19  ;;  %v5452_v45 = vrot.slane %v5451_v16, 4  ;;  %v5697_v5 = vrot.slane %v5695_v29, 4  ;;  %v5698_v23 = vrot.slane %v10248_v60, 5  ;;  %v7558_v11 = vrot.slane %v5662_v22, 9  ;;  %v5665_v40 = vld [vmem:[#allocation2 + $0x9c] sm:$0xe] }
 0x1fb   : > { %8202 = vmatprep.subr.bf16.mxu1 %v8851_v17  ;;  %v2907_v34 = vrot.slane %v2905_v54, 4  ;;  %v5704_v1 = vrot.slane %v5702_v21, 4  ;;  %v5705_v13 = vrot.slane %v10322_v2, 5  ;;  %v7559_v48 = vrot.slane %v5663_v44, 9  ;;  %v3334_v22 = vld [vmem:[#allocation2 + $0x24] sm:$0xf] }
 0x1fc   : > { %8203 = vmatpush3.bf16.msra.mxu1 %v8851_v17  ;;  %v2908_v60 = vrot.slane %v10285_v50, 5  ;;  %v5711_v37 = vrot.slane %v5709_v55, 4  ;;  %v5712_v63 = vrot.slane %v10326_v41, 5  ;;  %v5716_v51 = vrot.slane %v11404_v38, 5 }
 0x1fd   : > { %8397 = vmatpush3.bf16.msra.mxu0 %v8847_v19  ;;  %8204 = vmatprep.subr.bf16.mxu1 %v8853_v59  ;;  %v5664_v19 = vld [vmem:[#allocation2 + $0x90] sm:$0xe]  ;;  %v5457_v2 = vsel %vm9108_vm7, %v5452_v45, %v10531_v30  ;;  %v5696_v46 = vsel %vm9781_vm1, %v7557_v33, %v5695_v29  ;;  %v5723_v50 = vrot.slane %v10394_v35, 5  ;;  %v5467_v41 = vsel %vm9108_vm7, %v5462_v62, %v5466_v61  ;;  %v10661_v45 = vld [vmem:[#allocation2 + $0xb4] sm:$0xe] }
 0x1fe   : > { %8414 = vmatprep.subr.bf16.mxu0 %v10574_v36  ;;  %v5699_v18 = vsel %vm9781_vm1, %v5697_v5, %v5698_v23  ;;  %v7278_v17 = vrot.slane %v2829_v25, 9  ;;  %v2909_v10 = vsel %vm9781_vm1, %v2907_v34, %v2908_v60  ;;  %v10618_v30 = vsel %vm9781_vm1, %v7558_v11, %v5702_v21  ;;  %v5666_v21 = vld [vmem:[#allocation2 + $0xa8] sm:$0xe] }
 0x1ff   : > { %v10622_v43 = vsel %vm9781_vm1, %v5704_v1, %v5705_v13  ;;  %v10626_v35 = vsel %vm9781_vm1, %v7559_v48, %v5709_v55  ;;  %v7560_v58 = vrot.slane %v5664_v19, 9  ;;  %v10631_v49 = vsel %vm9781_vm1, %v5711_v37, %v5712_v63  ;;  %v3337_v63 = vld [vmem:[#allocation2 + $0x30] sm:$0xf] }
 0x200   : > { %8383 = vmatmul.mubr.msk.bf16.gmra.mrb[24].mxu0 %vm1602_vm8, %v7542_v24  ;;  %8191 = vmatmul.mubr.msk.bf16.gmra.mrb[24].mxu1 %vm1602_vm8, %v7292_v14  ;;  %v5718_v6 = vrot.slane %v5716_v51, 4  ;;  %v5719_v8 = vrot.slane %v10373_v4, 5  ;;  %v7561_v16 = vrot.slane %v5665_v40, 9  ;;  %v2906_v52 = vsel %vm9781_vm1, %v7278_v17, %v2905_v54  ;;  %v8852_v4 = vld [vmem:[#allocation2 + $0x18] sm:$0xff]   ;;  %v5668_v40 = vld [vmem:[#allocation2 + $0xc0] sm:$0xe] }
 0x201   : > { %8386 = vmatprep.mubr.msk.bf16.mxu0 %vm1602_vm8, %v7543_v7  ;;  %8194 = vmatprep.mubr.msk.bf16.mxu1 %vm1602_vm8, %v7293_v32  ;;  %v5726_v24 = vrot.slane %v10447_v15, 5  ;;  %v7544_v29 = vcombine.low %v5457_v2, %v5467_v41  ;;  %v7573_v28 = vcombine.low %v5696_v46, %v5699_v18  ;;  %v7294_v26 = vcombine.low %v2906_v52, %v2909_v10  ;;  %v3331_v7 = vld [vmem:[#allocation2 + $0x18] sm:$0xf]  ;;  %v10685_v2 = vld [vmem:[#allocation2 + $0x34] sm:$0xf]  ;;  %v8855_v17 = vld [vmem:[#allocation2 + $0x24] sm:$0xff]  }
 0x202   : > { %8205 = vmatpush3.bf16.msra.mxu1 %v8853_v59  ;;  %v5725_v59 = vrot.slane %v5723_v50, 4  ;;  %v7574_v42 = vcombine.low %v10618_v30, %v10622_v43  ;;  %v7575_v14 = vcombine.low %v10626_v35, %v10631_v49  ;;  %v10647_v54 = vsel %vm9781_vm1, %v7560_v58, %v5716_v51  ;;  %v10681_v51 = vld [vmem:[#allocation2 + $0x20] sm:$0x1] }
 0x203   : > { %8222 = vmatprep.subr.bf16.mxu1 %v10595_v3  ;;  %v3365_v15 = vshll.u32 %v10634_v9, 16  ;;  %v3369_v61 = vshrl.u32 %v10634_v9, 16  ;;  %v10655_v44 = vsel %vm9781_vm1, %v5718_v6, %v5719_v8  ;;  %v10659_v55 = vsel %vm9781_vm1, %v7561_v16, %v5723_v50  ;;  %v10696_v6 = vld [vmem:[#allocation2 + $0x2c] sm:$0x1]  ;;  %v8856_v16 = vld [vmem:[#allocation2 + $0x30] sm:$0xff]  }
 0x204   : > { %v3389_v62 = vshll.u32 %v10639_v0, 16  ;;  %v3393_v47 = vshrl.u32 %v10639_v0, 16  ;;  %v10669_v33 = vsel %vm9781_vm1, %v5725_v59, %v5726_v24  ;;  %v7562_v32 = vrot.slane %v5666_v21, 9 }
 0x205   : > { %v3356_v5 = vshrl.u32 %v3331_v7, 16  ;;  %v3359_v23 = vshll.u32 %v3331_v7, 16  ;;  %v5730_v25 = vrot.slane %v10437_v20, 5  ;;  %v5733_v34 = vrot.slane %v10470_v31, 5 }
 0x206   : > { %v3380_v11 = vshrl.u32 %v3334_v22, 16  ;;  %v3383_v1 = vshll.u32 %v3334_v22, 16  ;;  %v7576_v13 = vcombine.low %v10647_v54, %v10655_v44  ;;  %v7563_v48 = vrot.slane %v10661_v45, 9  ;;  %v10721_v45 = vld [vmem:[#allocation2 + $0x38] sm:$0x1] }
 0x207   : > { %v10676_v60 = vrot.slane %v3365_v15, 5  ;;  %v3371_v37 = vrot.slane %v3369_v61, 4  ;;  %v7577_v19 = vcombine.low %v10659_v55, %v10669_v33  ;;  %v5737_v38 = vrot.slane %v10445_v53, 5  ;;  %v8854_v53 = vld [vmem:[%s11374_s4 + $0xc8] sm:$0xff]   ;;  %v10784_v33 = vld [vmem:[%s11374_s4 + $0xe0] sm:$0xff]  }
 0x208   : > { %8387 = vmatmul.mubr.msk.bf16.gmra.mrb[28].mxu0 %vm1602_vm8, %v7544_v29  ;;  %8195 = vmatmul.mubr.msk.bf16.gmra.mrb[28].mxu1 %vm1602_vm8, %v7294_v26  ;;  %v10683_v20 = vrot.slane %v3389_v62, 5  ;;  %v3395_v31 = vrot.slane %v3393_v47, 4  ;;  %v10689_v46 = vsel %vm9781_vm1, %v7562_v32, %v5730_v25  ;;  %v5744_v50 = vrot.slane %v10492_v57, 5  ;;  %v8865_v29 = vld [vmem:[%s11374_s4 + $0xe8] sm:$0xff]  }
 0x209   : > { %8398 = vmatprep.mubr.msk.bf16.mxu0 %vm1602_vm8, %v7573_v28  ;;  %8206 = vmatprep.mubr.msk.bf16.mxu1 %vm1602_vm8, %v8852_v4  ;;  %v3358_v41 = vrot.slane %v3356_v5, 4  ;;  %v3361_v18 = vrot.slane %v3359_v23, 5  ;;  %v3382_v10 = vrot.slane %v3380_v11, 4  ;;  %v3385_v30 = vrot.slane %v3383_v1, 5  ;;  %v3340_v4 = vld [vmem:[#allocation2 + $0x3c] sm:$0xf] }
 0x20a   : > { %v3404_v43 = vshrl.u32 %v3337_v63, 16  ;;  %v3407_v35 = vshll.u32 %v3337_v63, 16  ;;  %v5732_v58 = vrot.slane %v5730_v25, 4  ;;  %v3372_v49 = vor.u32 %v3371_v37, %v10676_v60  ;;  %v10729_v23 = vld [vmem:[#allocation2 + $0x40] sm:$0xf]  ;;  %v8860_v63 = vld [vmem:[%s11374_s4 + $0xd8] sm:$0xff]  }
 0x20b   : > { %v3413_v8 = vshll.u32 %v10685_v2, 16  ;;  %v3417_v57 = vshrl.u32 %v10685_v2, 16  ;;  %v5739_v52 = vrot.slane %v5737_v38, 4  ;;  %v5740_v59 = vrot.slane %v10482_v27, 5  ;;  %v8857_v27 = vld [vmem:[%s11374_s4 + $0xd0] sm:$0xff]  }
 0x20c   : > { %v7564_v24 = vrot.slane %v5668_v40, 9  ;;  %v3396_v28 = vor.u32 %v3395_v31, %v10683_v20  ;;  %v5746_v26 = vrot.slane %v5744_v50, 4  ;;  %v3362_v21 = vor.u32 %v3361_v18, %v3358_v41 }
 0x20d   : > { %v3375_v7 = vshll.u32 %v10681_v51, 16  ;;  %v3386_v15 = vor.u32 %v3385_v30, %v3382_v10  ;;  %v3399_v61 = vshll.u32 %v10696_v6, 16  ;;  %v3409_v22 = vrot.slane %v3407_v35, 5  ;;  %v8859_v30 = vld [vmem:[#allocation2 + $0x48] sm:$0xff]  }
 0x20e   : > { %v10723_v62 = vrot.slane %v3413_v8, 5  ;;  %v3419_v47 = vrot.slane %v3417_v57, 4  ;;  %v10727_v32 = vsel %vm9781_vm1, %v5732_v58, %v5733_v34  ;;  %v3397_v5 = vrot.slane %v3396_v28, 4  ;;  %v8858_v34 = vld [vmem:[#allocation2 + $0x3c] sm:$0xff]   ;;  %v3343_v57 = vld [vmem:[#allocation2 + $0x48] sm:$0xf] }
 0x20f   : > { %v3428_v25 = vshrl.u32 %v3340_v4, 16  ;;  %v3431_v11 = vshll.u32 %v3340_v4, 16  ;;  %v10737_v1 = vsel %vm9781_vm1, %v7564_v24, %v5744_v50  ;;  %v3377_v37 = vrot.slane %v3375_v7, 5  ;;  %v8868_v50 = vld [vmem:[%s11374_s4 + $0xf0] sm:$0xff]   ;;  %v8871_v8 = vld [vmem:[%s11374_s4 + $0xf8] sm:$0xff]  }
 0x210   : > { %8399 = vmatmul.mubr.msk.bf16.vlgmr.msra.gmra.mrb[16].mxu0 %vm1602_vm8, %v7574_v42  ;;  %8207 = vmatmul.mubr.msk.bf16.vlgmr.msra.gmra.mrb[16].mxu1 %vm1602_vm8, %v8855_v17  ;;  %v5747_v42 = vrot.slane %v10529_v12, 5  ;;  %v3373_v12 = vrot.slane %v3372_v49, 4  ;;  %v3387_v31 = vrot.slane %v3386_v15, 4  ;;  %v3401_v40 = vrot.slane %v3399_v61, 5  ;;  %v3349_v24 = vld [vmem:[#allocation2 + $0x60] sm:$0xf] }
 0x211   : > { %8415 = vmatpush3.bf16.msra.mxu0 %v10574_v36  ;;  %8402 = vmatprep.mubr.msk.bf16.mxu0 %vm1602_vm8, %v7575_v14  ;;  %v3406_v36 = vrot.slane %v3404_v43, 4  ;;  %v10718_v14 = vsel %vm9781_vm1, %v7563_v48, %v5737_v38  ;;  %v3363_v48 = vrot.slane %v3362_v21, 4  ;;  %v3423_v17 = vshll.u32 %v10721_v45, 16  ;;  %v10803_v21 = vld [vmem:[#allocation2 + $0x58] sm:$0xf] }
 0x212   : > { %8416 = vmatprep.subr.bf16.mxu0 %v8854_v53  ;;  %8210 = vmatprep.mubr.msk.bf16.mxu1 %vm1602_vm8, %v8856_v16  ;;  %v10744_v38 = vsel %vm9781_vm1, %v5746_v26, %v5747_v42  ;;  %v3378_v18 = vsel %vm9108_vm7, %v3373_v12, %v3377_v37  ;;  %v3437_v10 = vshll.u32 %v10729_v23, 16  ;;  %v3402_v43 = vsel %vm9108_vm7, %v3397_v5, %v3401_v40  ;;  %v10776_v16 = vld [vmem:[#allocation2 + $0x4c] sm:$0xf]  ;;  %v10805_v15 = vld [vmem:[#allocation2 + $0x64] sm:$0xf]  ;;  %v8861_v12 = vld [vmem:[#allocation2 + $0x54] sm:$0xff]  }
 0x213   : > { %8223 = vmatpush3.bf16.msra.mxu1 %v10595_v3  ;;  %v10733_v3 = vsel %vm9781_vm1, %v5739_v52, %v5740_v59  ;;  %v3410_v41 = vor.u32 %v3409_v22, %v3406_v36  ;;  %v3430_v35 = vrot.slane %v3428_v25, 4  ;;  %v3433_v58 = vrot.slane %v3431_v11, 5  ;;  %v10793_v52 = vld [vmem:[#allocation2 + $0x44] sm:$0x1]  ;;  %v3346_v59 = vld [vmem:[#allocation2 + $0x54] sm:$0xf] }
 0x214   : > { %8224 = vmatprep.subr.bf16.mxu1 %v8865_v29  ;;  %v3441_v49 = vshrl.u32 %v10729_v23, 16  ;;  %v7578_v54 = vcombine.low %v10689_v46, %v10727_v32  ;;  %v7579_v44 = vcombine.low %v10718_v14, %v10733_v3  ;;  %v7580_v55 = vcombine.low %v10737_v1, %v10744_v38  ;;  %v8863_v11 = vld [vmem:[#allocation2 + $0x60] sm:$0xff]  }
 0x215   : > { %8417 = vmatpush3.bf16.msra.mxu0 %v8854_v53  ;;  %v3420_v53 = vor.u32 %v3419_v47, %v10723_v62  ;;  %v10791_v46 = vrot.slane %v3410_v41, 4  ;;  %v10799_v26 = vrot.slane %v3423_v17, 5  ;;  %v10801_v42 = vrot.slane %v3437_v10, 5  ;;  %v10820_v37 = vld [vmem:[%s11374_s4 + $0x100] sm:$0xff]  }
 0x216   : > { %8418 = vmatprep.subr.bf16.mxu0 %v8857_v27  ;;  %v3434_v7 = vor.u32 %v3433_v58, %v3430_v35  ;;  %v3452_v4 = vshrl.u32 %v3343_v57, 16  ;;  %v3461_v61 = vshll.u32 %v10776_v16, 16  ;;  %v3465_v36 = vshrl.u32 %v10776_v16, 16 }
 0x217   : > { %8225 = vmatpush3.bf16.msra.mxu1 %v8865_v29  ;;  %v10797_v28 = vrot.slane %v3420_v53, 4  ;;  %v3476_v22 = vshrl.u32 %v3346_v59, 16  ;;  %v3479_v14 = vshll.u32 %v3346_v59, 16  ;;  %v3485_v47 = vshll.u32 %v10803_v21, 16  ;;  %v10831_v53 = vld [vmem:[#allocation2 + $0x50] sm:$0x1] }
 0x218   : > { %8403 = vmatmul.mubr.msk.bf16.gmra.mrb[20].mxu0 %vm1602_vm8, %v7576_v13  ;;  %8211 = vmatmul.mubr.msk.bf16.gmra.mrb[20].mxu1 %vm1602_vm8, %v8858_v34  ;;  %v3368_v13 = vsel %vm9108_vm7, %v3363_v48, %v10676_v60  ;;  %v3392_v60 = vsel %vm9108_vm7, %v3387_v31, %v10683_v20  ;;  %v3443_v20 = vrot.slane %v3441_v49, 4  ;;  %v3489_v32 = vshrl.u32 %v10803_v21, 16 }
 0x219   : > { %8406 = vmatprep.mubr.msk.bf16.mxu0 %vm1602_vm8, %v7577_v19  ;;  %8419 = vmatpush3.bf16.msra.mxu0 %v8857_v27  ;;  %v10786_v19 = vcombine.low %v3368_v13, %v3378_v18  ;;  %v10795_v29 = vcombine.low %v3392_v60, %v3402_v43  ;;  %v3455_v27 = vshll.u32 %v3343_v57, 16  ;;  %v3500_v5 = vshrl.u32 %v3349_v24, 16  ;;  %v6168_v18 = vld [vmem:[#allocation2 + $0x78] sm:$0xf]  ;;  %v10837_v13 = vld [vmem:[#allocation2 + $0x7c] sm:$0xf] }
 0x21a   : > { %8214 = vmatprep.mubr.msk.bf16.mxu1 %vm1602_vm8, %v8859_v30  ;;  %8420 = vmatprep.subr.bf16.mxu0 %v8860_v63  ;;  %v3503_v25 = vshll.u32 %v3349_v24, 16  ;;  %v3426_v3 = vsel %vm9108_vm7, %v10797_v28, %v10799_v26  ;;  %v3447_v48 = vshll.u32 %v10793_v52, 16  ;;  %v3509_v34 = vshll.u32 %v10805_v15, 16 }
 0x21b   : > { %8226 = vmatprep.subr.bf16.mxu1 %v8868_v50  ;;  %v10826_v31 = vrot.slane %v3434_v7, 4  ;;  %v3444_v40 = vor.u32 %v3443_v20, %v10801_v42  ;;  %v3454_v41 = vrot.slane %v3452_v4, 4  ;;  %v10833_v17 = vrot.slane %v3461_v61, 5  ;;  %v10848_v4 = vld [vmem:[#allocation2 + $0x5c] sm:$0x1] }
 0x21c   : > { %8227 = vmatpush3.bf16.msra.mxu1 %v8868_v50  ;;  %v3457_v50 = vrot.slane %v3455_v27, 5  ;;  %v3467_v10 = vrot.slane %v3465_v36, 4  ;;  %v3478_v30 = vrot.slane %v3476_v22, 4  ;;  %v3481_v43 = vrot.slane %v3479_v14, 5  ;;  %v8867_v36 = vld [vmem:[#allocation2 + $0x6c] sm:$0xff]  }
 0x21d   : > { %8421 = vmatpush3.bf16.msra.mxu0 %v8860_v63  ;;  %8228 = vmatprep.subr.bf16.mxu1 %v8871_v8  ;;  %v3513_v63 = vshrl.u32 %v10805_v15, 16  ;;  %v10835_v35 = vrot.slane %v3485_v47, 5  ;;  %v3491_v58 = vrot.slane %v3489_v32, 4  ;;  %v3502_v49 = vrot.slane %v3500_v5, 4  ;;  %v8864_v47 = vld [vmem:[#allocation2 + $0x78] sm:$0xff]  }
 0x21e   : > { %8438 = vmatprep.subr.bf16.mxu0 %v10784_v33  ;;  %v6193_v60 = vshrl.u32 %v6168_v18, 16  ;;  %v6196_v59 = vshll.u32 %v6168_v18, 16  ;;  %v3416_v24 = vsel %vm9108_vm7, %v10791_v46, %v10723_v62  ;;  %v3458_v28 = vor.u32 %v3457_v50, %v3454_v41  ;;  %v10855_v62 = vld [vmem:[#allocation2 + $0x68] sm:$0x1]  ;;  %v10882_v41 = vld [vmem:[#allocation2 + $0x70] sm:$0xf] }
 0x21f   : > { %v3515_v57 = vrot.slane %v3513_v63, 4  ;;  %v3471_v26 = vshll.u32 %v10831_v53, 16  ;;  %v3449_v7 = vrot.slane %v3447_v48, 5  ;;  %v3468_v20 = vor.u32 %v3467_v10, %v10833_v17 }
 0x220   : > { %8407 = vmatmul.mubr.msk.bf16.gmra.mrb[24].mxu0 %vm1602_vm8, %v7578_v54  ;;  %8215 = vmatmul.mubr.msk.bf16.gmra.mrb[24].mxu1 %vm1602_vm8, %v8861_v12  ;;  %v3505_v54 = vrot.slane %v3503_v25, 5  ;;  %v6202_v27 = vshll.u32 %v10837_v13, 16  ;;  %v6206_v61 = vshrl.u32 %v10837_v13, 16  ;;  %v10852_v22 = vcombine.low %v3416_v24, %v3426_v3  ;;  %v10862_v25 = vld [vmem:[#allocation2 + $0x80] sm:$0x1]  ;;  %v8869_v24 = vld [vmem:[#allocation2 + $0x84] sm:$0xff]  }
 0x221   : > { %8410 = vmatprep.mubr.msk.bf16.mxu0 %vm1602_vm8, %v7579_v44  ;;  %8218 = vmatprep.mubr.msk.bf16.mxu1 %vm1602_vm8, %v8863_v11  ;;  %v10840_v44 = vrot.slane %v3509_v34, 5  ;;  %v3482_v14 = vor.u32 %v3481_v43, %v3478_v30  ;;  %v3492_v12 = vor.u32 %v3491_v58, %v10835_v35  ;;  %v3440_v32 = vsel %vm9108_vm7, %v10826_v31, %v10801_v42  ;;  %v3352_v31 = vld [vmem:[#allocation2 + $0x6c] sm:$0xf] }
 0x222   : > { %8229 = vmatpush3.bf16.msra.mxu1 %v8871_v8  ;;  %v3445_v8 = vrot.slane %v3444_v40, 4  ;;  %v3506_v46 = vor.u32 %v3505_v54, %v3502_v49  ;;  %v6195_v11 = vrot.slane %v6193_v60, 4  ;;  %v6198_v48 = vrot.slane %v6196_v59, 5 }
 0x223   : > { %8246 = vmatprep.subr.bf16.mxu1 %v10820_v37  ;;  %v3516_v5 = vor.u32 %v3515_v57, %v10840_v44  ;;  %v10871_v34 = vrot.slane %v3458_v28, 4  ;;  %v10873_v63 = vrot.slane %v3471_v26, 5  ;;  %v3495_v42 = vshll.u32 %v10848_v4, 16 }
 0x224   : > { %v3450_v3 = vsel %vm9108_vm7, %v3445_v8, %v3449_v7  ;;  %v3469_v1 = vrot.slane %v3468_v20, 4  ;;  %v3519_v38 = vshll.u32 %v10855_v62, 16  ;;  %v6208_v40 = vrot.slane %v6206_v61, 4  ;;  %v10897_v20 = vld [vmem:[#allocation2 + $0x74] sm:$0x1]  ;;  %v8872_v61 = vld [vmem:[%s11374_s4 + $0xe8] sm:$0xff]  }
 0x225   : > { %v3483_v50 = vrot.slane %v3482_v14, 4  ;;  %v3493_v18 = vrot.slane %v3492_v12, 4  ;;  %v3507_v10 = vrot.slane %v3506_v46, 4  ;;  %v6212_v30 = vshll.u32 %v10862_v25, 16  ;;  %v10912_v46 = vld [vmem:[#allocation2 + $0x88] sm:$0xf] }
 0x226   : > { %v3517_v43 = vrot.slane %v3516_v5, 4  ;;  %v6199_v58 = vor.u32 %v6198_v48, %v6195_v11  ;;  %v3524_v49 = vshrl.u32 %v3352_v31, 16  ;;  %v3527_v54 = vshll.u32 %v3352_v31, 16 }
 0x227   : > { %v10885_v57 = vcombine.low %v3440_v32, %v3450_v3  ;;  %v3533_v60 = vshll.u32 %v10882_v41, 16  ;;  %v3537_v59 = vshrl.u32 %v10882_v41, 16  ;;  %v3464_v8 = vsel %vm9108_vm7, %v10871_v34, %v10833_v17  ;;  %v8870_v32 = vld [vmem:[#allocation2 + $0x90] sm:$0xff]  }
 0x228   : > { %8411 = vmatmul.mubr.msk.bf16.gmra.mrb[28].mxu0 %vm1602_vm8, %v7580_v55  ;;  %8219 = vmatmul.mubr.msk.bf16.gmra.mrb[28].mxu1 %vm1602_vm8, %v8867_v36  ;;  %v10880_v55 = vrot.slane %v6202_v27, 5  ;;  %v3474_v28 = vsel %vm9108_vm7, %v3469_v1, %v10873_v63  ;;  %v3521_v26 = vrot.slane %v3519_v38, 5  ;;  %v6171_v27 = vld [vmem:[#allocation2 + $0x84] sm:$0xf]  ;;  %v3488_v36 = vsel %vm9108_vm7, %v3483_v50, %v10835_v35  ;;  %v10916_v35 = vld [vmem:[#allocation2 + $0x94] sm:$0xf] }
 0x229   : > { %8422 = vmatprep.mubr.msk.bf16.mxu0 %vm1602_vm8, %v8864_v47  ;;  %8230 = vmatprep.mubr.msk.bf16.mxu1 %vm1602_vm8, %v10786_v19  ;;  %v3497_v19 = vrot.slane %v3495_v42, 5  ;;  %v3512_v14 = vsel %vm9108_vm7, %v3507_v10, %v10840_v44  ;;  %v10910_v12 = vrot.slane %v6212_v30, 5  ;;  %v6174_v47 = vld [vmem:[#allocation2 + $0x90] sm:$0xf]  ;;  %v6200_v11 = vrot.slane %v6199_v58, 4  ;;  %v8881_v44 = vld [vmem:[%s11374_s4 + $0x108] sm:$0xff]  }
 0x22a   : > { %v6209_v7 = vor.u32 %v6208_v40, %v10880_v55  ;;  %v3522_v5 = vsel %vm9108_vm7, %v3517_v43, %v3521_v26  ;;  %v3526_v48 = vrot.slane %v3524_v49, 4  ;;  %v3529_v3 = vrot.slane %v3527_v54, 5  ;;  %v8875_v50 = vld [vmem:[%s11374_s4 + $0xf0] sm:$0xff]   ;;  %v8873_v54 = vld [vmem:[#allocation2 + $0x9c] sm:$0xff]   ;;  %v3741_v26 = vld [vmem:[#allocation2 + $0x18] sm:$0xe] }
 0x22b   : > { %v3498_v17 = vsel %vm9108_vm7, %v3493_v18, %v3497_v19  ;;  %v10924_v34 = vrot.slane %v3533_v60, 5  ;;  %v3539_v63 = vrot.slane %v3537_v59, 4  ;;  %v3543_v42 = vshll.u32 %v10897_v20, 16 }
 0x22c   : > { %v6217_v31 = vshrl.u32 %v6171_v27, 16  ;;  %v6210_v1 = vrot.slane %v6209_v7, 4  ;;  %v6220_v38 = vshll.u32 %v6171_v27, 16  ;;  %v6226_v40 = vshll.u32 %v10912_v46, 16  ;;  %v10957_v7 = vld [vmem:[#allocation2 + $0x8c] sm:$0x1] }
 0x22d   : > { %v6241_v18 = vshrl.u32 %v6174_v47, 16  ;;  %v6244_v10 = vshll.u32 %v6174_v47, 16  ;;  %v6254_v30 = vshrl.u32 %v10916_v35, 16  ;;  %v7347_v43 = vcombine.low %v3464_v8, %v3474_v28  ;;  %v6177_v8 = vld [vmem:[#allocation2 + $0x9c] sm:$0xf] }
 0x22e   : > { %v10938_v58 = vcombine.low %v3488_v36, %v3498_v17  ;;  %v10940_v49 = vcombine.low %v3512_v14, %v3522_v5  ;;  %v3530_v19 = vor.u32 %v3529_v3, %v3526_v48  ;;  %v3540_v60 = vor.u32 %v3539_v63, %v10924_v34  ;;  %v10949_v28 = vld [vmem:[#allocation2 + $0xa0] sm:$0xf]  ;;  %v10961_v14 = vld [vmem:[#allocation2 + $0x98] sm:$0x1] }
 0x22f   : > { %v10947_v59 = vrot.slane %v3543_v42, 5  ;;  %v6222_v27 = vrot.slane %v6220_v38, 5  ;;  %v10959_v36 = vrot.slane %v6226_v40, 5  ;;  %v6243_v47 = vrot.slane %v6241_v18, 4 }
 0x230   : > { %8423 = vmatmul.mubr.msk.bf16.vlgmr.msra.gmra.mrb[16].mxu0 %vm1602_vm8, %v8869_v24  ;;  %8231 = vmatmul.mubr.msk.bf16.vlgmr.msra.gmra.mrb[16].mxu1 %vm1602_vm8, %v10795_v29  ;;  %v6230_v29 = vshrl.u32 %v10912_v46, 16  ;;  %v6219_v24 = vrot.slane %v6217_v31, 4  ;;  %v6256_v5 = vrot.slane %v6254_v30, 4  ;;  %v6265_v48 = vshrl.u32 %v6177_v8, 16 }
 0x231   : > { %8439 = vmatpush3.bf16.msra.mxu0 %v10784_v33  ;;  %8426 = vmatprep.mubr.msk.bf16.mxu0 %vm1602_vm8, %v8870_v32  ;;  %v6250_v33 = vshll.u32 %v10916_v35, 16  ;;  %v6246_v32 = vrot.slane %v6244_v10, 5  ;;  %v6268_v3 = vshll.u32 %v6177_v8, 16  ;;  %v6274_v63 = vshll.u32 %v10949_v28, 16 }
 0x232   : > { %8440 = vmatprep.subr.bf16.mxu0 %v8872_v61  ;;  %8234 = vmatprep.mubr.msk.bf16.mxu1 %vm1602_vm8, %v10852_v22  ;;  %v6205_v22 = vsel %vm9108_vm7, %v6200_v11, %v10880_v55  ;;  %v6215_v55 = vsel %vm9108_vm7, %v6210_v1, %v10910_v12  ;;  %v6232_v17 = vrot.slane %v6230_v29, 4  ;;  %v8874_v11 = vld [vmem:[#allocation2 + $0xa8] sm:$0xff]   ;;  %v8883_v12 = vld [vmem:[%s11374_s4 + $0x110] sm:$0xff]   ;;  %v6278_v42 = vshrl.u32 %v10949_v28, 16 }
 0x233   : > { %8247 = vmatpush3.bf16.msra.mxu1 %v10820_v37  ;;  %v8878_v37 = vld [vmem:[%s11374_s4 + $0xf8] sm:$0xff]   ;;  %v10973_v31 = vcombine.low %v6205_v22, %v6215_v55  ;;  %v3531_v1 = vrot.slane %v3530_v19, 4  ;;  %v3541_v38 = vrot.slane %v3540_v60, 4  ;;  %v6223_v40 = vor.u32 %v6222_v27, %v6219_v24  ;;  %v11000_v27 = vld [vmem:[#allocation2 + $0xa4] sm:$0x1] }
 0x234   : > { %8248 = vmatprep.subr.bf16.mxu1 %v8881_v44  ;;  %v6233_v29 = vor.u32 %v6232_v17, %v10959_v36  ;;  %v7363_v18 = vrot.slane %v3741_v26, 9  ;;  %v3775_v10 = vrot.slane %v10634_v9, 5  ;;  %v6247_v30 = vor.u32 %v6246_v32, %v6243_v47 }
 0x235   : > { %8441 = vmatpush3.bf16.msra.mxu0 %v8872_v61  ;;  %v10963_v61 = vrot.slane %v6250_v33, 5  ;;  %v8884_v33 = vld [vmem:[%s11374_s4 + $0x118] sm:$0xff]   ;;  %v6260_v22 = vshll.u32 %v10961_v14, 16  ;;  %v6267_v9 = vrot.slane %v6265_v48, 4  ;;  %v6270_v19 = vrot.slane %v6268_v3, 5  ;;  %v8877_v3 = vld [vmem:[#allocation2 + $0xc0] sm:$0xff]  }
 0x236   : > { %8442 = vmatprep.subr.bf16.mxu0 %v8875_v50  ;;  %v10991_v60 = vrot.slane %v6274_v63, 5  ;;  %v6280_v24 = vrot.slane %v6278_v42, 4  ;;  %v3546_v26 = vsel %vm9108_vm7, %v3541_v38, %v10947_v59  ;;  %v3778_v55 = vrot.slane %v10681_v51, 5  ;;  %v3742_v63 = vld [vmem:[#allocation2 + $0x24] sm:$0xe] }
 0x237   : > { %8249 = vmatpush3.bf16.msra.mxu1 %v8881_v44  ;;  %v6236_v44 = vshll.u32 %v10957_v7, 16  ;;  %v6224_v17 = vrot.slane %v6223_v40, 4  ;;  %v6234_v47 = vrot.slane %v6233_v29, 4  ;;  %v11004_v32 = vsel %vm9781_vm1, %v7363_v18, %v3775_v10 }
 0x238   : > { %8427 = vmatmul.mubr.msk.bf16.gmra.mrb[20].mxu0 %vm1602_vm8, %v8873_v54  ;;  %8235 = vmatmul.mubr.msk.bf16.gmra.mrb[20].mxu1 %vm1602_vm8, %v10885_v57  ;;  %v10986_v57 = vld [vmem:[%s11374_s4 + $0x100] sm:$0xff]   ;;  %v3782_v54 = vrot.slane %v10639_v0, 5  ;;  %v6180_v0 = vld [vmem:[#allocation2 + $0xa8] sm:$0xf]  ;;  %v6248_v59 = vrot.slane %v6247_v30, 4  ;;  %v3785_v48 = vrot.slane %v10696_v6, 5  ;;  %v6271_v42 = vor.u32 %v6270_v19, %v6267_v9 }
 0x239   : > { %8430 = vmatprep.mubr.msk.bf16.mxu0 %vm1602_vm8, %v8874_v11  ;;  %8443 = vmatpush3.bf16.msra.mxu0 %v8875_v50  ;;  %v6257_v50 = vor.u32 %v6256_v5, %v10963_v61  ;;  %v6238_v8 = vrot.slane %v6236_v44, 5  ;;  %v3777_v5 = vrot.slane %v3775_v10, 4  ;;  %v8876_v11 = vld [vmem:[#allocation2 + $0xb4] sm:$0xff]   ;;  %v6284_v38 = vshll.u32 %v11000_v27, 16  ;;  %v3743_v19 = vld [vmem:[#allocation2 + $0x30] sm:$0xe] }
 0x23a   : > { %8238 = vmatprep.mubr.msk.bf16.mxu1 %vm1602_vm8, %v7347_v43  ;;  %8444 = vmatprep.subr.bf16.mxu0 %v8878_v37  ;;  %v3536_v43 = vsel %vm9108_vm7, %v3531_v1, %v10924_v34  ;;  %v11006_v34 = vld [vmem:[#allocation2 + $0xac] sm:$0xf]  ;;  %v3784_v51 = vrot.slane %v3782_v54, 4  ;;  %v6281_v1 = vor.u32 %v6280_v24, %v10991_v60  ;;  %v6289_v44 = vshrl.u32 %v6180_v0, 16 }
 0x23b   : > { %8250 = vmatprep.subr.bf16.mxu1 %v8883_v12  ;;  %v6292_v40 = vshll.u32 %v6180_v0, 16  ;;  %v6298_v29 = vshll.u32 %v11006_v34, 16  ;;  %v6302_v18 = vshrl.u32 %v11006_v34, 16  ;;  %v7350_v6 = vcombine.low %v3536_v43, %v3546_v26 }
 0x23c   : > { %8251 = vmatpush3.bf16.msra.mxu1 %v8883_v12  ;;  %v6262_v12 = vrot.slane %v6260_v22, 5  ;;  %v6229_v10 = vsel %vm9108_vm7, %v6224_v17, %v10959_v36  ;;  %v3779_v30 = vsel %vm9781_vm1, %v3777_v5, %v3778_v55  ;;  %v6253_v22 = vsel %vm9108_vm7, %v6248_v59, %v10963_v61  ;;  %v11035_v36 = vld [vmem:[#allocation2 + $0xb0] sm:$0x1] }
 0x23d   : > { %8445 = vmatpush3.bf16.msra.mxu0 %v8878_v37  ;;  %8252 = vmatprep.subr.bf16.mxu1 %v8884_v33  ;;  %v6258_v37 = vrot.slane %v6257_v50, 4  ;;  %v6239_v50 = vsel %vm9108_vm7, %v6234_v47, %v6238_v8  ;;  %v7364_v9 = vrot.slane %v3742_v63, 9  ;;  %v6282_v43 = vrot.slane %v6281_v1, 4  ;;  %v8880_v8 = vld [vmem:[#allocation2 + $0xcc] sm:$0xff]  }
 0x23e   : > { %8462 = vmatprep.subr.bf16.mxu0 %v10986_v57  ;;  %v6286_v26 = vrot.slane %v6284_v38, 5  ;;  %v6291_v55 = vrot.slane %v6289_v44, 4  ;;  %v6294_v0 = vrot.slane %v6292_v40, 5  ;;  %v11039_v17 = vrot.slane %v6298_v29, 5  ;;  %v11053_v38 = vld [vmem:[#allocation2 + $0xb8] sm:$0xf] }
 0x23f   : > { %v6263_v24 = vsel %vm9108_vm7, %v6258_v37, %v6262_v12  ;;  %v6304_v61 = vrot.slane %v6302_v18, 4  ;;  %v7365_v47 = vrot.slane %v3743_v19, 9  ;;  %v7630_v59 = vcombine.low %v6229_v10, %v6239_v50  ;;  %v6183_v37 = vld [vmem:[#allocation2 + $0xb4] sm:$0xf]  ;;  %v6186_v40 = vld [vmem:[#allocation2 + $0xc0] sm:$0xf] }
 0x240   : > { %8431 = vmatmul.mubr.msk.bf16.gmra.mrb[24].mxu0 %vm1602_vm8, %v8876_v11  ;;  %8239 = vmatmul.mubr.msk.bf16.gmra.mrb[24].mxu1 %vm1602_vm8, %v10938_v58  ;;  %v3789_v58 = vrot.slane %v10685_v2, 5  ;;  %v6272_v2 = vrot.slane %v6271_v42, 4  ;;  %v6308_v11 = vshll.u32 %v11035_v36, 16  ;;  %v7631_v63 = vcombine.low %v6253_v22, %v6263_v24  ;;  %v11060_v29 = vld [vmem:[#allocation2 + $0xc4] sm:$0xf] }
 0x241   : > { %8434 = vmatprep.mubr.msk.bf16.mxu0 %vm1602_vm8, %v8877_v3  ;;  %8242 = vmatprep.mubr.msk.bf16.mxu1 %vm1602_vm8, %v10940_v49  ;;  %v11033_v49 = vsel %vm9781_vm1, %v3784_v51, %v3785_v48  ;;  %v7379_v51 = vcombine.low %v11004_v32, %v3779_v30  ;;  %v3744_v48 = vld [vmem:[#allocation2 + $0x3c] sm:$0xe]  ;;  %v3796_v3 = vrot.slane %v10729_v23, 5  ;;  %v3792_v1 = vrot.slane %v10721_v45, 5 }
 0x242   : > { %8253 = vmatpush3.bf16.msra.mxu1 %v8884_v33  ;;  %v3783_v33 = vsel %vm9781_vm1, %v7364_v9, %v3782_v54  ;;  %v3791_v5 = vrot.slane %v3789_v58, 4  ;;  %v6277_v42 = vsel %vm9108_vm7, %v6272_v2, %v10991_v60  ;;  %v3790_v54 = vsel %vm9781_vm1, %v7365_v47, %v3789_v58  ;;  %v8885_v47 = vld [vmem:[%s11374_s4 + $0x108] sm:$0xff]  }
 0x243   : > { %v7380_v12 = vcombine.low %v3783_v33, %v11033_v49  ;;  %v6287_v23 = vsel %vm9108_vm7, %v6282_v43, %v6286_v26  ;;  %v6295_v32 = vor.u32 %v6294_v0, %v6291_v55  ;;  %v6305_v44 = vor.u32 %v6304_v61, %v11039_v17  ;;  %v11075_v0 = vld [vmem:[#allocation2 + $0xbc] sm:$0x1]  ;;  %v6189_v33 = vld [vmem:[#allocation2 + $0xcc] sm:$0xf] }
 0x244   : > { %v3793_v45 = vsel %vm9781_vm1, %v3791_v5, %v3792_v1  ;;  %v6310_v60 = vrot.slane %v6308_v11, 5  ;;  %v7366_v18 = vrot.slane %v3744_v48, 9  ;;  %v3798_v10 = vrot.slane %v3796_v3, 4 }
 0x245   : > { %v6316_v30 = vshll.u32 %v6183_v37, 16  ;;  %v6322_v58 = vshll.u32 %v11053_v38, 16  ;;  %v6326_v50 = vshrl.u32 %v11053_v38, 16  ;;  %v6337_v22 = vshrl.u32 %v6186_v40, 16 }
 0x246   : > { %v6340_v9 = vshll.u32 %v6186_v40, 16  ;;  %v6346_v49 = vshll.u32 %v11060_v29, 16  ;;  %v6296_v19 = vrot.slane %v6295_v32, 4  ;;  %v6306_v24 = vrot.slane %v6305_v44, 4  ;;  %v11096_v44 = vld [vmem:[#allocation2 + $0xc8] sm:$0x1] }
 0x247   : > { %v3799_v2 = vrot.slane %v10793_v52, 5  ;;  %v3803_v43 = vrot.slane %v10776_v16, 5  ;;  %v7632_v26 = vcombine.low %v6277_v42, %v6287_v23  ;;  %v3797_v55 = vsel %vm9781_vm1, %v7366_v18, %v3796_v3  ;;  %v3745_v40 = vld [vmem:[#allocation2 + $0x48] sm:$0xe] }
 0x248   : > { %8435 = vmatmul.mubr.msk.bf16.gmra.mrb[28].mxu0 %vm1602_vm8, %v8880_v8  ;;  %8243 = vmatmul.mubr.msk.bf16.gmra.mrb[28].mxu1 %vm1602_vm8, %v7350_v6  ;;  %v6313_v6 = vshrl.u32 %v6183_v37, 16  ;;  %v7381_v8 = vcombine.low %v3790_v54, %v3793_v45  ;;  %v6318_v11 = vrot.slane %v6316_v30, 5  ;;  %v11082_v52 = vrot.slane %v6322_v58, 5 }
 0x249   : > { %8446 = vmatprep.mubr.msk.bf16.mxu0 %vm1602_vm8, %v10973_v31  ;;  %8254 = vmatprep.mubr.msk.bf16.mxu1 %vm1602_vm8, %v7379_v51  ;;  %v6350_v31 = vshrl.u32 %v11060_v29, 16  ;;  %v3800_v5 = vsel %vm9781_vm1, %v3798_v10, %v3799_v2  ;;  %v6328_v16 = vrot.slane %v6326_v50, 4  ;;  %v11084_v51 = vld [vmem:[#allocation2 + $0xd0] sm:$0xf]  ;;  %v6339_v48 = vrot.slane %v6337_v22, 4 }
 0x24a   : > { %v6315_v61 = vrot.slane %v6313_v6, 4  ;;  %v6342_v37 = vrot.slane %v6340_v9, 5  ;;  %v11086_v3 = vrot.slane %v6346_v49, 5  ;;  %v6301_v54 = vsel %vm9108_vm7, %v6296_v19, %v11039_v17  ;;  %v8886_v17 = vld [vmem:[%s11374_s4 + $0x110] sm:$0xff]  }
 0x24b   : > { %v6352_v42 = vrot.slane %v6350_v31, 4  ;;  %v6311_v1 = vsel %vm9108_vm7, %v6306_v24, %v6310_v60  ;;  %v6332_v23 = vshll.u32 %v11075_v0, 16  ;;  %v3805_v32 = vrot.slane %v3803_v43, 4 }
 0x24c   : > { %v6364_v45 = vshll.u32 %v6189_v33, 16  ;;  %v6374_v18 = vshrl.u32 %v11084_v51, 16  ;;  %v7382_v60 = vcombine.low %v3797_v55, %v3800_v5  ;;  %v6319_v6 = vor.u32 %v6318_v11, %v6315_v61  ;;  %v11121_v5 = vld [vmem:[#allocation2 + $0xd4] sm:$0x1] }
 0x24d   : > { %v6343_v10 = vor.u32 %v6342_v37, %v6339_v48  ;;  %v6353_v30 = vor.u32 %v6352_v42, %v11086_v3  ;;  %v6356_v58 = vshll.u32 %v11096_v44, 16  ;;  %v3810_v50 = vrot.slane %v10803_v21, 5 }
 0x24e   : > { %v7633_v22 = vcombine.low %v6301_v54, %v6311_v1  ;;  %v7367_v9 = vrot.slane %v3745_v40, 9  ;;  %v3817_v31 = vrot.slane %v10805_v15, 5  ;;  %v6366_v24 = vrot.slane %v6364_v45, 5 }
 0x24f   : > { %v6334_v61 = vrot.slane %v6332_v23, 5  ;;  %v6344_v15 = vrot.slane %v6343_v10, 4  ;;  %v6358_v11 = vrot.slane %v6356_v58, 5  ;;  %v3812_v48 = vrot.slane %v3810_v50, 4 }
 0x250   : > { %8447 = vmatmul.mubr.msk.bf16.vlgmr.msra.gmra.mrb[16].mxu0 %vm1602_vm8, %v7630_v59  ;;  %8255 = vmatmul.mubr.msk.bf16.vlgmr.msra.gmra.mrb[16].mxu1 %vm1602_vm8, %v7380_v12  ;;  %v6361_v59 = vshrl.u32 %v6189_v33, 16  ;;  %v6370_v12 = vshll.u32 %v11084_v51, 16  ;;  %v3804_v21 = vsel %vm9781_vm1, %v7367_v9, %v3803_v43  ;;  %v8887_v33 = vld [vmem:[%s11374_s4 + $0x118] sm:$0xff]   ;;  %v3819_v42 = vrot.slane %v3817_v31, 4 }
 0x251   : > { %8463 = vmatpush3.bf16.msra.mxu0 %v10986_v57  ;;  %8450 = vmatprep.mubr.msk.bf16.mxu0 %vm1602_vm8, %v7631_v63  ;;  %v6329_v57 = vor.u32 %v6328_v16, %v11082_v52  ;;  %v3806_v63 = vrot.slane %v10831_v53, 5  ;;  %v6376_v53 = vrot.slane %v6374_v18, 4  ;;  %v3746_v16 = vld [vmem:[#allocation2 + $0x54] sm:$0xe]  ;;  %v3813_v43 = vrot.slane %v10848_v4, 5 }
 0x252   : > { %8464 = vmatprep.subr.bf16.mxu0 %v8885_v47  ;;  %8258 = vmatprep.mubr.msk.bf16.mxu1 %vm1602_vm8, %v7381_v8  ;;  %v6363_v19 = vrot.slane %v6361_v59, 4  ;;  %v11114_v2 = vrot.slane %v6370_v12, 5  ;;  %v6320_v8 = vrot.slane %v6319_v6, 4  ;;  %v6380_v23 = vshll.u32 %v11121_v5, 16 }
 0x253   : > { %v3807_v49 = vsel %vm9781_vm1, %v3805_v32, %v3806_v63  ;;  %v6330_v55 = vrot.slane %v6329_v57, 4  ;;  %v3747_v32 = vld [vmem:[#allocation2 + $0x60] sm:$0xe]  ;;  %v7368_v59 = vrot.slane %v3746_v16, 9  ;;  %v3820_v45 = vrot.slane %v10855_v62, 5 }
 0x254   : > { %v7383_v37 = vcombine.low %v3804_v21, %v3807_v49  ;;  %v6367_v54 = vor.u32 %v6366_v24, %v6363_v19  ;;  %v6377_v1 = vor.u32 %v6376_v53, %v11114_v2  ;;  %v6325_v40 = vsel %vm9108_vm7, %v6320_v8, %v11082_v52  ;;  %v3748_v57 = vld [vmem:[#allocation2 + $0x6c] sm:$0xe] }
 0x255   : > { %8465 = vmatpush3.bf16.msra.mxu0 %v8885_v47  ;;  %v6354_v47 = vrot.slane %v6353_v30, 4  ;;  %v6349_v4 = vsel %vm9108_vm7, %v6344_v15, %v11086_v3  ;;  %v3814_v18 = vsel %vm9781_vm1, %v3812_v48, %v3813_v43  ;;  %v3824_v52 = vrot.slane %v10882_v41, 5  ;;  %v6577_v30 = vld [vmem:[#allocation2 + $0x78] sm:$0xe]  ;;  %v6578_v15 = vld [vmem:[#allocation2 + $0x84] sm:$0xe] }
 0x256   : > { %8466 = vmatprep.subr.bf16.mxu0 %v8886_v17  ;;  %v6611_v6 = vrot.slane %v10837_v13, 5  ;;  %v3811_v62 = vsel %vm9781_vm1, %v7368_v59, %v3810_v50  ;;  %v6368_v63 = vrot.slane %v6367_v54, 4  ;;  %v6378_v3 = vrot.slane %v6377_v1, 4 }
 0x257   : > { %v6359_v12 = vsel %vm9108_vm7, %v6354_v47, %v6358_v11  ;;  %v6382_v10 = vrot.slane %v6380_v23, 5  ;;  %v7384_v9 = vcombine.low %v3811_v62, %v3814_v18  ;;  %v7370_v19 = vrot.slane %v3748_v57, 9  ;;  %v6579_v47 = vld [vmem:[#allocation2 + $0x90] sm:$0xe]  ;;  %v6582_v62 = vld [vmem:[#allocation2 + $0xb4] sm:$0xe] }
 0x258   : > { %8451 = vmatmul.mubr.msk.bf16.gmra.mrb[20].mxu0 %vm1602_vm8, %v7632_v26  ;;  %8259 = vmatmul.mubr.msk.bf16.gmra.mrb[20].mxu1 %vm1602_vm8, %v7382_v60  ;;  %v6335_v26 = vsel %vm9108_vm7, %v6330_v55, %v6334_v61  ;;  %v3821_v60 = vsel %vm9781_vm1, %v3819_v42, %v3820_v45  ;;  %v3826_v24 = vrot.slane %v3824_v52, 4  ;;  %v3827_v13 = vrot.slane %v10897_v20, 5 }
 0x259   : > { %8454 = vmatprep.mubr.msk.bf16.mxu0 %vm1602_vm8, %v7633_v22  ;;  %8467 = vmatpush3.bf16.msra.mxu0 %v8886_v17  ;;  %v7369_v17 = vrot.slane %v3747_v32, 9  ;;  %v7634_v58 = vcombine.low %v6325_v40, %v6335_v26  ;;  %v7635_v22 = vcombine.low %v6349_v4, %v6359_v12  ;;  %v7649_v50 = vrot.slane %v6577_v30, 9  ;;  %v6580_v40 = vld [vmem:[#allocation2 + $0x9c] sm:$0xe] }
 0x25a   : > { %8262 = vmatprep.mubr.msk.bf16.mxu1 %vm1602_vm8, %v7383_v37  ;;  %8468 = vmatprep.subr.bf16.mxu0 %v8887_v33  ;;  %v6613_v53 = vrot.slane %v6611_v6, 4  ;;  %v6614_v8 = vrot.slane %v10862_v25, 5  ;;  %v6373_v55 = vsel %vm9108_vm7, %v6368_v63, %v11114_v2  ;;  %v3825_v20 = vsel %vm9781_vm1, %v7370_v19, %v3824_v52  ;;  %v6584_v19 = vld [vmem:[#allocation2 + $0xcc] sm:$0xe] }
 0x25b   : > { %v3818_v41 = vsel %vm9781_vm1, %v7369_v17, %v3817_v31  ;;  %v6383_v31 = vsel %vm9108_vm7, %v6378_v3, %v6382_v10  ;;  %v3828_v61 = vsel %vm9781_vm1, %v3826_v24, %v3827_v13  ;;  %v6618_v21 = vrot.slane %v10912_v46, 5 }
 0x25c   : > { %v7385_v49 = vcombine.low %v3818_v41, %v3821_v60  ;;  %v7636_v25 = vcombine.low %v6373_v55, %v6383_v31  ;;  %v6615_v2 = vsel %vm9781_vm1, %v6613_v53, %v6614_v8  ;;  %v6625_v39 = vrot.slane %v10916_v35, 5 }
 0x25d   : > { %8469 = vmatpush3.bf16.msra.mxu0 %v8887_v33  ;;  %v6612_v33 = vsel %vm9781_vm1, %v7649_v50, %v6611_v6  ;;  %v7386_v11 = vcombine.low %v3825_v20, %v3828_v61  ;;  %v7650_v48 = vrot.slane %v6578_v15, 9  ;;  %v6620_v37 = vrot.slane %v6618_v21, 4 }
 0x25e   : > { %v7665_v16 = vcombine.low %v6612_v33, %v6615_v2  ;;  %v6621_v42 = vrot.slane %v10957_v7, 5  ;;  %v7651_v46 = vrot.slane %v6579_v47, 9  ;;  %v6627_v43 = vrot.slane %v6625_v39, 4 }
 0x25f   : > { %v6628_v54 = vrot.slane %v10961_v14, 5  ;;  %v6619_v35 = vsel %vm9781_vm1, %v7650_v48, %v6618_v21  ;;  %v6632_v23 = vrot.slane %v10949_v28, 5  ;;  %v6639_v26 = vrot.slane %v11006_v34, 5  ;;  %v6581_v14 = vld [vmem:[#allocation2 + $0xa8] sm:$0xe] }
 0x260   : > { %8455 = vmatmul.mubr.msk.bf16.gmra.mrb[24].mxu0 %vm1602_vm8, %v7634_v58  ;;  %8263 = vmatmul.mubr.msk.bf16.gmra.mrb[24].mxu1 %vm1602_vm8, %v7384_v9  ;;  %v6622_v1 = vsel %vm9781_vm1, %v6620_v37, %v6621_v42  ;;  %v6626_v7 = vsel %vm9781_vm1, %v7651_v46, %v6625_v39  ;;  %v7652_v4 = vrot.slane %v6580_v40, 9  ;;  %v6635_v18 = vrot.slane %v11000_v27, 5  ;;  %v11230_v21 = vld [vmem:[%s11376_s6] ss:$0 sm:$0xff] }
 0x261   : > { %8458 = vmatprep.mubr.msk.bf16.mxu0 %vm1602_vm8, %v7635_v22  ;;  %8266 = vmatprep.mubr.msk.bf16.mxu1 %vm1602_vm8, %v7385_v49  ;;  %v6629_v32 = vsel %vm9781_vm1, %v6627_v43, %v6628_v54  ;;  %v7666_v59 = vcombine.low %v6619_v35, %v6622_v1  ;;  %v6634_v12 = vrot.slane %v6632_v23, 4  ;;  %v7653_v52 = vrot.slane %v6581_v14, 9 }
 0x262   : > { %v7667_v45 = vcombine.low %v6626_v7, %v6629_v32  ;;  %v6641_v28 = vrot.slane %v6639_v26, 4  ;;  %v6642_v17 = vrot.slane %v11035_v36, 5  ;;  %v6633_v60 = vsel %vm9781_vm1, %v7652_v4, %v6632_v23  ;;  %v6583_v36 = vld [vmem:[#allocation2 + $0xc0] sm:$0xe] }
 0x263   : > { %v6636_v34 = vsel %vm9781_vm1, %v6634_v12, %v6635_v18  ;;  %v6646_v6 = vrot.slane %v11053_v38, 5  ;;  %v6640_v57 = vsel %vm9781_vm1, %v7653_v52, %v6639_v26  ;;  %v6653_v63 = vrot.slane %v11060_v29, 5 }
 0x264   : > { %v6643_v27 = vsel %vm9781_vm1, %v6641_v28, %v6642_v17  ;;  %v7668_v3 = vcombine.low %v6633_v60, %v6636_v34  ;;  %v7654_v30 = vrot.slane %v6582_v62, 9  ;;  %v6649_v22 = vrot.slane %v11075_v0, 5 }
 0x265   : > { %v7669_v10 = vcombine.low %v6640_v57, %v6643_v27  ;;  %v6648_v58 = vrot.slane %v6646_v6, 4  ;;  %v7655_v9 = vrot.slane %v6583_v36, 9  ;;  %v6655_v38 = vrot.slane %v6653_v63, 4 }
 0x266   : > { %v6656_v41 = vrot.slane %v11096_v44, 5  ;;  %v6660_v49 = vrot.slane %v11084_v51, 5  ;;  %v6647_v29 = vsel %vm9781_vm1, %v7654_v30, %v6646_v6  ;;  %v7656_v50 = vrot.slane %v6584_v19, 9 }
 0x267   : > { %v6650_v24 = vsel %vm9781_vm1, %v6648_v58, %v6649_v22  ;;  %v6654_v0 = vsel %vm9781_vm1, %v7655_v9, %v6653_v63  ;;  %v6663_v44 = vrot.slane %v11121_v5, 5  ;;  %v11225_v5 = vld [vmem:[%s11375_s5] ss:$0 sm:$0xff] }
 0x268   : > { %8459 = vmatmul.mubr.msk.bf16.gmra.mrb[28].mxu0 %vm1602_vm8, %v7636_v25  ;;  %8267 = vmatmul.mubr.msk.bf16.gmra.mrb[28].mxu1 %vm1602_vm8, %v7386_v11  ;;  %v6657_v13 = vsel %vm9781_vm1, %v6655_v38, %v6656_v41  ;;  %v6662_v53 = vrot.slane %v6660_v49, 4  ;;  %v7670_v8 = vcombine.low %v6647_v29, %v6650_v24  ;;  %v6661_v51 = vsel %vm9781_vm1, %v7656_v50, %v6660_v49 }
 0x269   : > { %8470 = vmatprep.mubr.msk.bf16.mxu0 %vm1602_vm8, %v7665_v16  ;;  %v7671_v55 = vcombine.low %v6654_v0, %v6657_v13 }
 0x26a   : > { %v6664_v31 = vsel %vm9781_vm1, %v6662_v53, %v6663_v44 }
 0x26b   : > { %v7672_v20 = vcombine.low %v6661_v51, %v6664_v31 }
 0x270   : > { %8471 = vmatmul.mubr.msk.bf16.vlgmr.msra.gmra.mrb[16].mxu0 %vm1602_vm8, %v7666_v59 }
 0x271   : > { %8474 = vmatprep.mubr.msk.bf16.mxu0 %vm1602_vm8, %v7667_v45 }
 0x278   : > { %8475 = vmatmul.mubr.msk.bf16.gmra.mrb[20].mxu0 %vm1602_vm8, %v7668_v3 }
 0x279   : > { %8478 = vmatprep.mubr.msk.bf16.mxu0 %vm1602_vm8, %v7669_v10 }
 0x280   : > { %8479 = vmatmul.mubr.msk.bf16.gmra.mrb[24].mxu0 %vm1602_vm8, %v7670_v8 }
 0x281   : > { %8482 = vmatprep.mubr.msk.bf16.mxu0 %vm1602_vm8, %v7671_v55 }
 0x288   : > { %8483 = vmatmul.mubr.msk.bf16.gmra.mrb[28].mxu0 %vm1602_vm8, %v7672_v20 }
 0x323   : > { %v8256_v61 = vpop.f32.mrb[16].mxu1 }
 0x324   : > { %v4032_v25 = vmul.f32 %v8256_v61, %v11225_v5  ;;  %v3944_v33 = vpop.f32.mrb[17].mxu1 }
 0x325   : > { %v4030_v56 = vmul.f32 %v11225_v5, %v3944_v33  ;;  %v8257_v2 = vpop.f32.mrb[18].mxu1 }
 0x326   : > { %v4055_v15 = vadd.f32 %v11230_v21, %v4032_v25  ;;  %v4033_v39 = vmul.f32 %v8257_v2, %v11225_v5  ;;  %v3947_v47 = vpop.f32.mrb[19].mxu1 }
 0x327   : > { %v4053_v11 = vadd.f32 %v11230_v21, %v4030_v56  ;;  %v4031_v16 = vmul.f32 %v11225_v5, %v3947_v47 }
 0x328   : > { %v4071_v48 = vmax.f32 %v4055_v15, 0.0  ;;  %v4056_v37 = vadd.f32 %v11230_v21, %v4033_v39 }
 0x329   : > { %v4069_v42 = vmax.f32 %v4053_v11, 0.0  ;;  %v4054_v46 = vadd.f32 %v11230_v21, %v4031_v16 }
 0x32a   : > { %v7757_v43 = vpack.c.bf16 %v4071_v48, %v4071_v48  ;;  %v4072_v54 = vmax.f32 %v4056_v37, 0.0 }
 0x32b   : > { %v7755_v35 = vpack.c.bf16 %v4069_v42, %v4069_v42  ;;  %v4070_v1 = vmax.f32 %v4054_v46, 0.0  ;;  %v8260_v23 = vpop.f32.mrb[20].mxu1 }
 0x32c   : > { %4152 = vst.msk [vmem:[%s11244_s27 + $0x8] sm:$0xf] %vm4149_vm2, %v7757_v43  ;;  %v7758_v7 = vpack.c.bf16 %v4072_v54, %v4072_v54  ;;  %v4036_v32 = vmul.f32 %v8260_v23, %v11225_v5  ;;  %v3960_v40 = vpop.f32.mrb[21].mxu1 }
 0x32d   : > { %4150 = vst.msk [vmem:[%s11244_s27] sm:$0xf] %vm4149_vm2, %v7755_v35  ;;  %v7756_v26 = vpack.c.bf16 %v4070_v1, %v4070_v1  ;;  %v4034_v14 = vmul.f32 %v11225_v5, %v3960_v40  ;;  %v8261_v59 = vpop.f32.mrb[22].mxu1 }
 0x32e   : > { %4153 = vst.msk [vmem:[%s11244_s27 + $0xc] sm:$0xf] %vm4149_vm2, %v7758_v7  ;;  %v4059_v45 = vadd.f32 %v11230_v21, %v4036_v32  ;;  %v4037_v4 = vmul.f32 %v8261_v59, %v11225_v5  ;;  %v3963_v12 = vpop.f32.mrb[23].mxu1 }
 0x32f   : > { %4151 = vst.msk [vmem:[%s11244_s27 + $0x4] sm:$0xf] %vm4149_vm2, %v7756_v26  ;;  %v4057_v18 = vadd.f32 %v11230_v21, %v4034_v14  ;;  %v4035_v52 = vmul.f32 %v11225_v5, %v3963_v12 }
 0x330   : > { %v4075_v28 = vmax.f32 %v4059_v45, 0.0  ;;  %v4060_v17 = vadd.f32 %v11230_v21, %v4037_v4 }
 0x331   : > { %v4073_v60 = vmax.f32 %v4057_v18, 0.0  ;;  %v4058_v34 = vadd.f32 %v11230_v21, %v4035_v52 }
 0x332   : > { %v7761_v6 = vpack.c.bf16 %v4075_v28, %v4075_v28  ;;  %v4076_v57 = vmax.f32 %v4060_v17, 0.0 }
 0x333   : > { %v7759_v27 = vpack.c.bf16 %v4073_v60, %v4073_v60  ;;  %v4074_v62 = vmax.f32 %v4058_v34, 0.0  ;;  %v8264_v63 = vpop.f32.mrb[24].mxu1 }
 0x334   : > { %4156 = vst.msk [vmem:[%s11244_s27 + $0x18] sm:$0xf] %vm4149_vm2, %v7761_v6  ;;  %v7762_v36 = vpack.c.bf16 %v4076_v57, %v4076_v57  ;;  %v4040_v3 = vmul.f32 %v8264_v63, %v11225_v5  ;;  %v3976_v10 = vpop.f32.mrb[25].mxu1 }
 0x335   : > { %4154 = vst.msk [vmem:[%s11244_s27 + $0x10] sm:$0xf] %vm4149_vm2, %v7759_v27  ;;  %v7760_v30 = vpack.c.bf16 %v4074_v62, %v4074_v62  ;;  %v4038_v58 = vmul.f32 %v11225_v5, %v3976_v10  ;;  %v8265_v22 = vpop.f32.mrb[26].mxu1 }
 0x336   : > { %4157 = vst.msk [vmem:[%s11244_s27 + $0x1c] sm:$0xf] %vm4149_vm2, %v7762_v36  ;;  %v4063_v9 = vadd.f32 %v11230_v21, %v4040_v3  ;;  %v4041_v38 = vmul.f32 %v8265_v22, %v11225_v5  ;;  %v3979_v41 = vpop.f32.mrb[27].mxu1 }
 0x337   : > { %4155 = vst.msk [vmem:[%s11244_s27 + $0x14] sm:$0xf] %vm4149_vm2, %v7760_v30  ;;  %v4061_v49 = vadd.f32 %v11230_v21, %v4038_v58  ;;  %v4039_v19 = vmul.f32 %v11225_v5, %v3979_v41 }
 0x338   : > { %v4079_v29 = vmax.f32 %v4063_v9, 0.0  ;;  %v4064_v24 = vadd.f32 %v11230_v21, %v4041_v38 }
 0x339   : > { %v4077_v0 = vmax.f32 %v4061_v49, 0.0  ;;  %v4062_v13 = vadd.f32 %v11230_v21, %v4039_v19 }
 0x33a   : > { %v7765_v50 = vpack.c.bf16 %v4079_v29, %v4079_v29  ;;  %v4080_v53 = vmax.f32 %v4064_v24, 0.0 }
 0x33b   : > { %v7763_v44 = vpack.c.bf16 %v4077_v0, %v4077_v0  ;;  %v4078_v8 = vmax.f32 %v4062_v13, 0.0  ;;  %v8268_v55 = vpop.f32.mrb[28].mxu1 }
 0x33c   : > { %4160 = vst.msk [vmem:[%s11244_s27 + $0x28] sm:$0xf] %vm4149_vm2, %v7765_v50  ;;  %v7766_v51 = vpack.c.bf16 %v4080_v53, %v4080_v53  ;;  %v4044_v31 = vmul.f32 %v8268_v55, %v11225_v5  ;;  %v3992_v20 = vpop.f32.mrb[29].mxu1 }
 0x33d   : > { %4158 = vst.msk [vmem:[%s11244_s27 + $0x20] sm:$0xf] %vm4149_vm2, %v7763_v44  ;;  %v7764_v61 = vpack.c.bf16 %v4078_v8, %v4078_v8  ;;  %v4042_v25 = vmul.f32 %v11225_v5, %v3992_v20  ;;  %v8269_v33 = vpop.f32.mrb[30].mxu1 }
 0x33e   : > { %4161 = vst.msk [vmem:[%s11244_s27 + $0x2c] sm:$0xf] %vm4149_vm2, %v7766_v51  ;;  %v4067_v56 = vadd.f32 %v11230_v21, %v4044_v31  ;;  %v4045_v2 = vmul.f32 %v8269_v33, %v11225_v5  ;;  %v3995_v15 = vpop.f32.mrb[31].mxu1 }
 0x33f   : > { %4159 = vst.msk [vmem:[%s11244_s27 + $0x24] sm:$0xf] %vm4149_vm2, %v7764_v61  ;;  %v4065_v39 = vadd.f32 %v11230_v21, %v4042_v25  ;;  %v4043_v47 = vmul.f32 %v11225_v5, %v3995_v15 }
 0x340   : > { %v4083_v11 = vmax.f32 %v4067_v56, 0.0  ;;  %v4068_v16 = vadd.f32 %v11230_v21, %v4045_v2 }
 0x341   : > { %v4081_v48 = vmax.f32 %v4065_v39, 0.0  ;;  %v4066_v37 = vadd.f32 %v11230_v21, %v4043_v47 }
 0x342   : > { %v7769_v42 = vpack.c.bf16 %v4083_v11, %v4083_v11  ;;  %v4084_v46 = vmax.f32 %v4068_v16, 0.0 }
 0x343   : > { %v8472_v43 = vpop.f32.mrb[16].mxu0  ;;  %v7767_v54 = vpack.c.bf16 %v4081_v48, %v4081_v48  ;;  %v4082_v35 = vmax.f32 %v4066_v37, 0.0 }
 0x344   : > { %4164 = vst.msk [vmem:[%s11244_s27 + $0x38] sm:$0xf] %vm4149_vm2, %v7769_v42  ;;  %v6867_v1 = vmul.f32 %v8472_v43, %v11225_v5  ;;  %v6779_v23 = vpop.f32.mrb[17].mxu0  ;;  %v7770_v7 = vpack.c.bf16 %v4084_v46, %v4084_v46 }
 0x345   : > { %4162 = vst.msk [vmem:[%s11244_s27 + $0x30] sm:$0xf] %vm4149_vm2, %v7767_v54  ;;  %v6865_v32 = vmul.f32 %v11225_v5, %v6779_v23  ;;  %v8473_v40 = vpop.f32.mrb[18].mxu0  ;;  %v7768_v26 = vpack.c.bf16 %v4082_v35, %v4082_v35 }
 0x346   : > { %v6890_v14 = vadd.f32 %v11230_v21, %v6867_v1  ;;  %4165 = vst.msk [vmem:[%s11244_s27 + $0x3c] sm:$0xf] %vm4149_vm2, %v7770_v7  ;;  %v6868_v59 = vmul.f32 %v8473_v40, %v11225_v5  ;;  %v6782_v45 = vpop.f32.mrb[19].mxu0 }
 0x347   : > { %v6888_v4 = vadd.f32 %v11230_v21, %v6865_v32  ;;  %4163 = vst.msk [vmem:[%s11244_s27 + $0x34] sm:$0xf] %vm4149_vm2, %v7768_v26  ;;  %v6866_v12 = vmul.f32 %v11225_v5, %v6782_v45 }
 0x348   : > { %v6906_v18 = vmax.f32 %v6890_v14, 0.0  ;;  %v6891_v52 = vadd.f32 %v11230_v21, %v6868_v59 }
 0x349   : > { %v6904_v28 = vmax.f32 %v6888_v4, 0.0  ;;  %v6889_v17 = vadd.f32 %v11230_v21, %v6866_v12 }
 0x34a   : > { %v7773_v60 = vpack.c.bf16 %v6906_v18, %v6906_v18  ;;  %v6907_v34 = vmax.f32 %v6891_v52, 0.0 }
 0x34b   : > { %v7771_v6 = vpack.c.bf16 %v6904_v28, %v6904_v28  ;;  %v6905_v57 = vmax.f32 %v6889_v17, 0.0  ;;  %v8476_v27 = vpop.f32.mrb[20].mxu0 }
 0x34c   : > { %7705 = vst.msk [vmem:[%s11244_s27 + $0x48] sm:$0xf] %vm4149_vm2, %v7773_v60  ;;  %v7774_v62 = vpack.c.bf16 %v6907_v34, %v6907_v34  ;;  %v6871_v63 = vmul.f32 %v8476_v27, %v11225_v5  ;;  %v6795_v36 = vpop.f32.mrb[21].mxu0 }
 0x34d   : > { %7703 = vst.msk [vmem:[%s11244_s27 + $0x40] sm:$0xf] %vm4149_vm2, %v7771_v6  ;;  %v7772_v3 = vpack.c.bf16 %v6905_v57, %v6905_v57  ;;  %v6869_v10 = vmul.f32 %v11225_v5, %v6795_v36  ;;  %v8477_v30 = vpop.f32.mrb[22].mxu0 }
 0x34e   : > { %7706 = vst.msk [vmem:[%s11244_s27 + $0x4c] sm:$0xf] %vm4149_vm2, %v7774_v62  ;;  %v6894_v58 = vadd.f32 %v11230_v21, %v6871_v63  ;;  %v6872_v22 = vmul.f32 %v8477_v30, %v11225_v5  ;;  %v6798_v9 = vpop.f32.mrb[23].mxu0 }
 0x34f   : > { %7704 = vst.msk [vmem:[%s11244_s27 + $0x44] sm:$0xf] %vm4149_vm2, %v7772_v3  ;;  %v6892_v38 = vadd.f32 %v11230_v21, %v6869_v10  ;;  %v6870_v41 = vmul.f32 %v11225_v5, %v6798_v9 }
 0x350   : > { %v6910_v49 = vmax.f32 %v6894_v58, 0.0  ;;  %v6895_v19 = vadd.f32 %v11230_v21, %v6872_v22 }
 0x351   : > { %v6908_v29 = vmax.f32 %v6892_v38, 0.0  ;;  %v6893_v24 = vadd.f32 %v11230_v21, %v6870_v41 }
 0x352   : > { %v7777_v0 = vpack.c.bf16 %v6910_v49, %v6910_v49  ;;  %v6911_v13 = vmax.f32 %v6895_v19, 0.0 }
 0x353   : > { %v7775_v50 = vpack.c.bf16 %v6908_v29, %v6908_v29  ;;  %v6909_v53 = vmax.f32 %v6893_v24, 0.0  ;;  %v8480_v44 = vpop.f32.mrb[24].mxu0 }
 0x354   : > { %7709 = vst.msk [vmem:[%s11244_s27 + $0x58] sm:$0xf] %vm4149_vm2, %v7777_v0  ;;  %v7778_v8 = vpack.c.bf16 %v6911_v13, %v6911_v13  ;;  %v6875_v55 = vmul.f32 %v8480_v44, %v11225_v5  ;;  %v6811_v51 = vpop.f32.mrb[25].mxu0 }
 0x355   : > { %7707 = vst.msk [vmem:[%s11244_s27 + $0x50] sm:$0xf] %vm4149_vm2, %v7775_v50  ;;  %v7776_v31 = vpack.c.bf16 %v6909_v53, %v6909_v53  ;;  %v6873_v20 = vmul.f32 %v11225_v5, %v6811_v51  ;;  %v8481_v61 = vpop.f32.mrb[26].mxu0 }
 0x356   : > { %7710 = vst.msk [vmem:[%s11244_s27 + $0x5c] sm:$0xf] %vm4149_vm2, %v7778_v8  ;;  %v6898_v25 = vadd.f32 %v11230_v21, %v6875_v55  ;;  %v6876_v33 = vmul.f32 %v8481_v61, %v11225_v5  ;;  %v6814_v56 = vpop.f32.mrb[27].mxu0 }
 0x357   : > { %7708 = vst.msk [vmem:[%s11244_s27 + $0x54] sm:$0xf] %vm4149_vm2, %v7776_v31  ;;  %v6896_v2 = vadd.f32 %v11230_v21, %v6873_v20  ;;  %v6874_v15 = vmul.f32 %v11225_v5, %v6814_v56 }
 0x358   : > { %v6914_v39 = vmax.f32 %v6898_v25, 0.0  ;;  %v6899_v47 = vadd.f32 %v11230_v21, %v6876_v33 }
 0x359   : > { %v6912_v11 = vmax.f32 %v6896_v2, 0.0  ;;  %v6897_v16 = vadd.f32 %v11230_v21, %v6874_v15 }
 0x35a   : > { %v7781_v48 = vpack.c.bf16 %v6914_v39, %v6914_v39  ;;  %v6915_v37 = vmax.f32 %v6899_v47, 0.0 }
 0x35b   : > { %v7779_v42 = vpack.c.bf16 %v6912_v11, %v6912_v11  ;;  %v6913_v46 = vmax.f32 %v6897_v16, 0.0  ;;  %v8484_v43 = vpop.f32.mrb[28].mxu0 }
 0x35c   : > { %7713 = vst.msk [vmem:[%s11244_s27 + $0x68] sm:$0xf] %vm4149_vm2, %v7781_v48  ;;  %v7782_v54 = vpack.c.bf16 %v6915_v37, %v6915_v37  ;;  %v6879_v35 = vmul.f32 %v8484_v43, %v11225_v5  ;;  %v6827_v1 = vpop.f32.mrb[29].mxu0 }
 0x35d   : > { %7711 = vst.msk [vmem:[%s11244_s27 + $0x60] sm:$0xf] %vm4149_vm2, %v7779_v42  ;;  %v7780_v23 = vpack.c.bf16 %v6913_v46, %v6913_v46  ;;  %v6877_v7 = vmul.f32 %v11225_v5, %v6827_v1  ;;  %v8485_v32 = vpop.f32.mrb[30].mxu0 }
 0x35e   : > { %7714 = vst.msk [vmem:[%s11244_s27 + $0x6c] sm:$0xf] %vm4149_vm2, %v7782_v54  ;;  %v6902_v40 = vadd.f32 %v11230_v21, %v6879_v35  ;;  %v6880_v26 = vmul.f32 %v8485_v32, %v11225_v5  ;;  %v6830_v14 = vpop.f32.mrb[31].mxu0 }
 0x35f   : > { %7712 = vst.msk [vmem:[%s11244_s27 + $0x64] sm:$0xf] %vm4149_vm2, %v7780_v23  ;;  %v6900_v59 = vadd.f32 %v11230_v21, %v6877_v7  ;;  %v6878_v45 = vmul.f32 %v11225_v5, %v6830_v14 }
 0x360   : > { %v6918_v4 = vmax.f32 %v6902_v40, 0.0  ;;  %v6903_v12 = vadd.f32 %v11230_v21, %v6880_v26 }
 0x361   : > { %v6916_v18 = vmax.f32 %v6900_v59, 0.0  ;;  %v6901_v52 = vadd.f32 %v11230_v21, %v6878_v45 }
 0x362   : > { %v7785_v28 = vpack.c.bf16 %v6918_v4, %v6918_v4  ;;  %v6919_v17 = vmax.f32 %v6903_v12, 0.0 }
 0x363   : > { %v7783_v60 = vpack.c.bf16 %v6916_v18, %v6916_v18  ;;  %v6917_v34 = vmax.f32 %v6901_v52, 0.0 }
 0x364   : > { %7717 = vst.msk [vmem:[%s11244_s27 + $0x78] sm:$0xf] %vm4149_vm2, %v7785_v28  ;;  %v7786_v6 = vpack.c.bf16 %v6919_v17, %v6919_v17 }
 0x365   : > { %7715 = vst.msk [vmem:[%s11244_s27 + $0x70] sm:$0xf] %vm4149_vm2, %v7783_v60  ;;  %v7784_v57 = vpack.c.bf16 %v6917_v34, %v6917_v34 }
 0x366   : > { %7718 = vst.msk [vmem:[%s11244_s27 + $0x7c] sm:$0xf] %vm4149_vm2, %v7786_v6 }
 0x367   : > { %7716 = vst.msk [vmem:[%s11244_s27 + $0x74] sm:$0xf] %vm4149_vm2, %v7784_v57 }
 0x368 PF: > { %s17_s24 = sadd.s32 1, %s8898_s24  }
 0x369   : > { %p14_p4 = scmp.ge.s32.totalorder %s17_s24, 4  }
 0x36b   :  { %16 = sbr.rel (!%p14_p4) target bundleno = 1 (0x1), region = 93 }

</bundles_post_ra>
